<compile_context>
chip_gen: v6e
topology: v6e:2x2x1
jax: 0.10.0
libtpu: 0.0.40
codegen_flags: <defaults>
</compile_context>

<pallas_src>
import functools

import jax
import jax.numpy as jnp
from jax.experimental import pallas as pl
from jax.experimental.pallas import tpu as pltpu

EPS = 1e-5

# (kernel, stride, pad) per conv block -- static Python config (never traced).
LAYER_CFG = ((7, 1, 3), (4, 2, 1), (4, 2, 1), (4, 2, 1), (4, 2, 1))
LAYER_CHANNELS = (64, 128, 256, 256, 256)


def _round_up(x, m):
    return ((x + m - 1) // m) * m


def _pick_vmem_limit():
    """~75% of physical VMEM (v7x TC has only 64 MiB), capped for sanity."""
    cap = 64 * 1024 * 1024                      # conservative fallback (v7x)
    try:
        cap = int(pltpu.get_tpu_info().vmem_capacity_bytes)
    except Exception:
        pass
    return max(32 * 1024 * 1024, min(cap * 3 // 4, 112 * 1024 * 1024))


VMEM_LIMIT = _pick_vmem_limit()


# ----------------------------------------------------------------------------
# Pallas kernels
# ----------------------------------------------------------------------------
def _conv_bias_stats_kernel(p_ref, w_ref, b_ref, raw_ref, stats_ref,
                            sum_ref, sq_ref, *, hw_real, hw_tile, tail):
    """conv-as-matmul + bias for one (sample, HW tile) + fused IN statistics.

    grid = (N, T): batch n ("parallel") x HW tile t ("arbitrary").
      p_ref    : (1, hw_tile, K)    bf16  im2col patch tile
      w_ref    : (K, Cout)          bf16  flattened conv weight (kh,kw,Cin)->K
      b_ref    : (1, Cout)          f32   conv bias
      raw_ref  : (1, hw_tile, Cout) bf16  raw conv+bias tile (pipelined writeback)
      stats_ref: (1, 2, Cout)       f32   [mean; rstd], written on the last tile
      sum_ref, sq_ref: (1, Cout)    f32   scratch accumulators
    InstanceNorm + ReLU are applied by the NEXT layer's patch prep
    (stats-deferred normalization), so each activation is stored exactly once.
    """
    t = pl.program_id(1)
    nt = pl.num_programs(1)

    @pl.when(t == 0)
    def _init():
        sum_ref[...] = jnp.zeros_like(sum_ref)
        sq_ref[...] = jnp.zeros_like(sq_ref)

    # bf16 MXU matmul with f32 accumulation.
    y = jnp.dot(p_ref[0], w_ref[...], preferred_element_type=jnp.float32)
    y = y + b_ref[...]                                   # (hw_tile, Cout) f32

    if tail:   # mask HW-padding rows out of the statistics (static flag)
        row = t * hw_tile + jax.lax.broadcasted_iota(jnp.int32, (hw_tile, 1), 0)
        ym = jnp.where(row < hw_real, y, 0.0)
    else:
        ym = y
    sum_ref[...] += jnp.sum(ym, axis=0, keepdims=True)
    sq_ref[...] += jnp.sum(ym * ym, axis=0, keepdims=True)

    raw_ref[0] = y.astype(raw_ref.dtype)                 # bf16 tile writeback

    @pl.when(t == nt - 1)
    def _finalize():
        inv_n = 1.0 / hw_real
        mean = sum_ref[...] * inv_n                      # (1, Cout)
        # One-pass variance in f32, clamped.  TODO(synk): Welford update if
        # bit-level parity with torch InstanceNorm is required at huge HW.
        var = jnp.maximum(sq_ref[...] * inv_n - mean * mean, 0.0)
        rstd = jax.lax.rsqrt(var + EPS)
        stats_ref[0, pl.ds(0, 1), :] = mean
        stats_ref[0, pl.ds(1, 1), :] = rstd


def _conv_in_relu_pool_fc_kernel(p_ref, w_ref, b_ref, wf_ref, bf_ref, o_ref,
                                 y_ref, sum_ref, sq_ref,
                                 *, hw_real, hw_tile, tail):
    """Last conv block fused with IN + ReLU + AdaptiveAvgPool2d(1) + 1x1 conv.

      p_ref : (1, hw_tile, K) bf16 ; w_ref: (K, C) bf16 ; b_ref: (1, C) f32
      wf_ref: (C, O) f32 ; bf_ref: (1, O) f32 ; o_ref: (1, 1, O) f32
      y_ref : (HWpad, C) f32 scratch (pre-norm activations, HW here is tiny)
      sum_ref, sq_ref: (1, C) f32 scratch accumulators
    """
    t = pl.program_id(1)
    nt = pl.num_programs(1)

    @pl.when(t == 0)
    def _init():
        sum_ref[...] = jnp.zeros_like(sum_ref)
        sq_ref[...] = jnp.zeros_like(sq_ref)

    y = jnp.dot(p_ref[0], w_ref[...], preferred_element_type=jnp.float32)
    y = y + b_ref[...]
    if tail:
        row = t * hw_tile + jax.lax.broadcasted_iota(jnp.int32, (hw_tile, 1), 0)
        ym = jnp.where(row < hw_real, y, 0.0)
    else:
        ym = y
    sum_ref[...] += jnp.sum(ym, axis=0, keepdims=True)
    sq_ref[...] += jnp.sum(ym * ym, axis=0, keepdims=True)

    start = pl.multiple_of(t * hw_tile, hw_tile)
    y_ref[pl.ds(start, hw_tile), :] = y

    @pl.when(t == nt - 1)
    def _finalize():
        inv_n = 1.0 / hw_real
        mean = sum_ref[...] * inv_n
        var = jnp.maximum(sq_ref[...] * inv_n - mean * mean, 0.0)
        rstd = jax.lax.rsqrt(var + EPS)
        act = jnp.maximum((y_ref[...] - mean) * rstd, 0.0)       # IN + ReLU
        if tail:
            rows = jax.lax.broadcasted_iota(jnp.int32, (y_ref.shape[0], 1), 0)
            act = jnp.where(rows < hw_real, act, 0.0)
        pooled = jnp.sum(act, axis=0, keepdims=True) * inv_n     # AvgPool(1)
        o_ref[0] = (jnp.dot(pooled, wf_ref[...],
                            preferred_element_type=jnp.float32) + bf_ref[...])


# ----------------------------------------------------------------------------
# Plain-JAX glue: deferred IN + ReLU + reflect pad + im2col (fused by XLA)
# ----------------------------------------------------------------------------
def _im2col(x, k, stride):
    """x: (N, H, W, C) already padded -> (N, Ho*Wo, k*k*C), Ho, Wo."""
    n, h, w, c = x.shape
    ho = (h - k) // stride + 1
    wo = (w - k) // stride + 1
    cols = []
    for i in range(k):
        for j in range(k):
            cols.append(x[:, i:i + (ho - 1) * stride + 1:stride,
                             j:j + (wo - 1) * stride + 1:stride, :])
    patches = jnp.stack(cols, axis=3)            # (N, Ho, Wo, k*k, C)
    return patches.reshape(n, ho * wo, k * k * c), ho, wo


def _prep_patches(raw_flat, stats, h, w, cin, k, stride, pad):
    """Apply the previous block's deferred InstanceNorm + ReLU, then reflect
    pad + im2col + bf16 cast, all in one XLA-fused elementwise/gather pass.

    raw_flat: (N, H*W, C) bf16 raw conv+bias output of the previous block.
    stats   : (N, 2, C)   f32  [mean; rstd] of the previous block.
    # TODO(synk): build patches in-kernel from an NHWC halo tile
    # (memory_space=pl.ANY + make_async_copy) to also remove the k*k read
    # amplification of the stride-2 layers.
    """
    n = raw_flat.shape[0]
    mean = stats[:, 0:1, :]
    rstd = stats[:, 1:2, :]
    x = jnp.maximum((raw_flat.astype(jnp.float32) - mean) * rstd, 0.0)
    x = x.astype(jnp.bfloat16).reshape(n, h, w, cin)
    xp = jnp.pad(x, ((0, 0), (pad, pad), (pad, pad), (0, 0)), mode="reflect")
    return _im2col(xp, k, stride)


def _tile_plan(hw, kk):
    """Per-layer spatial tile (multiple of 16 for bf16 sublane packing):
    bigger tiles for smaller K so the MXU M-dim and pipeline depth stay large."""
    if kk <= 1024:
        max_tile = 2048
    elif kk <= 2048:
        max_tile = 1024
    else:
        max_tile = 512
    if hw <= max_tile:
        t = _round_up(hw, 16)
        return t, t
    return max_tile, _round_up(hw, max_tile)


def _pad_hw(patches, hw_pad):
    n, hw, kk = patches.shape
    if hw_pad != hw:
        patches = jnp.pad(patches, ((0, 0), (0, hw_pad - hw), (0, 0)))
    return patches


# ----------------------------------------------------------------------------
# Per-block wrappers
# ----------------------------------------------------------------------------
def _conv7_block_stats(x_nhwc, w_mat, b):
    """Block 1 (k7 s1 p3).  Runs through lax.conv (no 49x im2col HBM
    amplification -- as recommended by the perf review); emits bf16 raw output
    + IN stats.  IN + ReLU are applied by the next block's patch prep."""
    n, h, w, cin = x_nhwc.shape
    k, s, p = LAYER_CFG[0]
    cout = LAYER_CHANNELS[0]
    xp = jnp.pad(x_nhwc, ((0, 0), (p, p), (p, p), (0, 0)), mode="reflect")
    w4 = w_mat.reshape(k, k, cin, cout).astype(jnp.bfloat16)
    y = jax.lax.conv_general_dilated(
        xp.astype(jnp.bfloat16), w4, window_strides=(s, s), padding="VALID",
        dimension_numbers=("NHWC", "HWIO", "NHWC"),
        preferred_element_type=jnp.float32)
    y = y + b.astype(jnp.float32)
    mean = jnp.mean(y, axis=(1, 2))                                  # (N, C)
    var = jnp.maximum(jnp.mean(y * y, axis=(1, 2)) - mean * mean, 0.0)
    rstd = jax.lax.rsqrt(var + EPS)
    stats = jnp.stack([mean, rstd], axis=1)                          # (N, 2, C)
    return y.astype(jnp.bfloat16).reshape(n, h * w, cout), stats, h, w


def _conv_block_stats(raw, stats, h, w, cin, w_mat, b, k, stride, pad):
    """One k4 s2 Conv2dBlock as a fused Pallas kernel (matmul + bias + IN stats).
    Returns (raw bf16 (N, Ho*Wo, Cout), stats f32 (N, 2, Cout), Ho, Wo)."""
    cout = w_mat.shape[-1]
    patches, ho, wo = _prep_patches(raw, stats, h, w, cin, k, stride, pad)
    n, hw, kk = patches.shape
    hw_tile, hw_pad = _tile_plan(hw, kk)
    patches = _pad_hw(patches, hw_pad)
    nt = hw_pad // hw_tile
    tail = hw_pad != hw

    bytes_accessed = (n * hw_pad * kk * 2 + kk * cout * 2 + cout * 4
                      + n * hw_pad * cout * 2 + n * 2 * cout * 4)
    raw_out, stats_out = pl.pallas_call(
        functools.partial(_conv_bias_stats_kernel,
                          hw_real=hw, hw_tile=hw_tile, tail=tail),
        out_shape=(jax.ShapeDtypeStruct((n, hw_pad, cout), jnp.bfloat16),
                   jax.ShapeDtypeStruct((n, 2, cout), jnp.float32)),
        grid=(n, nt),
        in_specs=[
            pl.BlockSpec((1, hw_tile, kk), lambda i, t: (i, t, 0)),
            # TODO(synk): pipeline_mode=pl.Buffered(1) on the constant-index
            # weight/bias blocks to reclaim VMEM on v7x's 64 MiB budget.
            pl.BlockSpec((kk, cout), lambda i, t: (0, 0)),
            pl.BlockSpec((1, cout), lambda i, t: (0, 0)),
        ],
        out_specs=(
            pl.BlockSpec((1, hw_tile, cout), lambda i, t: (i, t, 0)),
            pl.BlockSpec((1, 2, cout), lambda i, t: (i, 0, 0)),
        ),
        scratch_shapes=[
            pltpu.VMEM((1, cout), jnp.float32),
            pltpu.VMEM((1, cout), jnp.float32),
        ],
        compiler_params=pltpu.CompilerParams(
            dimension_semantics=("parallel", "arbitrary"),
            vmem_limit_bytes=VMEM_LIMIT),
        cost_estimate=pl.CostEstimate(
            flops=2 * n * hw_pad * kk * cout,
            transcendentals=0,
            bytes_accessed=bytes_accessed),
    )(patches, w_mat.astype(jnp.bfloat16),
      b.reshape(1, cout).astype(jnp.float32))
    if tail:
        raw_out = raw_out[:, :hw, :]
    return raw_out, stats_out, ho, wo


def _conv_block_pool_fc(raw, stats, h, w, cin, w_mat, b, fc_w, fc_b,
                        k, stride, pad):
    """Last conv block + InstanceNorm + ReLU + AdaptiveAvgPool(1) + 1x1 conv."""
    cout = w_mat.shape[-1]
    o = fc_w.shape[-1]
    patches, _, _ = _prep_patches(raw, stats, h, w, cin, k, stride, pad)
    n, hw, kk = patches.shape
    hw_tile, hw_pad = _tile_plan(hw, kk)
    patches = _pad_hw(patches, hw_pad)
    nt = hw_pad // hw_tile
    tail = hw_pad != hw

    bytes_accessed = (n * hw_pad * kk * 2 + kk * cout * 2 + cout * 4
                      + cout * o * 4 + o * 4 + n * o * 4)
    out = pl.pallas_call(
        functools.partial(_conv_in_relu_pool_fc_kernel,
                          hw_real=hw, hw_tile=hw_tile, tail=tail),
        out_shape=jax.ShapeDtypeStruct((n, 1, o), jnp.float32),
        grid=(n, nt),
        in_specs=[
            pl.BlockSpec((1, hw_tile, kk), lambda i, t: (i, t, 0)),
            pl.BlockSpec((kk, cout), lambda i, t: (0, 0)),
            pl.BlockSpec((1, cout), lambda i, t: (0, 0)),
            pl.BlockSpec((cout, o), lambda i, t: (0, 0)),
            pl.BlockSpec((1, o), lambda i, t: (0, 0)),
        ],
        out_specs=pl.BlockSpec((1, 1, o), lambda i, t: (i, 0, 0)),
        scratch_shapes=[
            pltpu.VMEM((hw_pad, cout), jnp.float32),
            pltpu.VMEM((1, cout), jnp.float32),
            pltpu.VMEM((1, cout), jnp.float32),
        ],
        compiler_params=pltpu.CompilerParams(
            dimension_semantics=("parallel", "arbitrary"),
            vmem_limit_bytes=VMEM_LIMIT),
        cost_estimate=pl.CostEstimate(
            flops=2 * n * hw_pad * kk * cout + 2 * n * cout * o,
            transcendentals=0,
            bytes_accessed=bytes_accessed),
    )(patches, w_mat.astype(jnp.bfloat16),
      b.reshape(1, cout).astype(jnp.float32),
      fc_w.astype(jnp.float32), fc_b.reshape(1, o).astype(jnp.float32))
    return out.reshape(n, o)


# ----------------------------------------------------------------------------
# Parameters (deterministic, synthetic) and forward pass
# ----------------------------------------------------------------------------
def init_style_encoder_params(key, input_dim, output_nc):
    cins = (input_dim,) + LAYER_CHANNELS[:-1]
    conv_ws, conv_bs = [], []
    for (k, _, _), cin, cout in zip(LAYER_CFG, cins, LAYER_CHANNELS):
        key, wkey, bkey = jax.random.split(key, 3)
        fan_in = k * k * cin
        wm = jax.random.normal(wkey, (fan_in, cout), jnp.float32) / jnp.sqrt(
            jnp.float32(fan_in))
        bv = jax.random.normal(bkey, (cout,), jnp.float32) * 0.01
        conv_ws.append(wm)
        conv_bs.append(bv)
    key, wkey, bkey = jax.random.split(key, 3)
    fc_w = jax.random.normal(wkey, (LAYER_CHANNELS[-1], output_nc),
                             jnp.float32) / 16.0
    fc_b = jax.random.normal(bkey, (output_nc,), jnp.float32) * 0.01
    return (tuple(conv_ws), tuple(conv_bs), fc_w, fc_b)


@jax.jit
def style_encoder_forward(params, x_nchw):
    """x_nchw: (N, C, H, W) float32 -> (N, output_nc, 1, 1) (PyTorch layout)."""
    conv_ws, conv_bs, fc_w, fc_b = params
    x = jnp.transpose(x_nchw, (0, 2, 3, 1)).astype(jnp.float32)   # NCHW -> NHWC

    # Block 1 (k7 s1): lax.conv (kills the 49x im2col HBM amplification).
    raw, stats, h, w = _conv7_block_stats(x, conv_ws[0], conv_bs[0])
    cin = LAYER_CHANNELS[0]

    # Blocks 2..4 (k4 s2): Pallas fused matmul + bias + IN stats (bf16 out);
    # IN + ReLU are applied in the next block's XLA-fused patch prep.
    for li in range(1, len(LAYER_CFG) - 1):
        k, s, p = LAYER_CFG[li]
        raw, stats, h, w = _conv_block_stats(raw, stats, h, w, cin,
                                             conv_ws[li], conv_bs[li], k, s, p)
        cin = LAYER_CHANNELS[li]

    # Block 5 + AdaptiveAvgPool(1) + 1x1 conv fused into one Pallas kernel.
    k, s, p = LAYER_CFG[-1]
    out = _conv_block_pool_fc(raw, stats, h, w, cin, conv_ws[-1], conv_bs[-1],
                              fc_w, fc_b, k, s, p)
    # TODO(synk): for N=1 inference on v7x, split the HW grid axis across the
    # two TensorCores; with only the batch-"parallel" axis one core idles.
    return out[:, :, None, None]


if __name__ == "__main__":
    key = jax.random.PRNGKey(0)
    key, pkey, xkey = jax.random.split(key, 3)

    batch, input_dim, spatial, output_nc = 2, 4, 32, 8
    params = init_style_encoder_params(pkey, input_dim, output_nc)
    x = jax.random.normal(xkey, (batch, input_dim, spatial, spatial),
                          jnp.float32)

    out = style_encoder_forward(params, x)
    out = jax.block_until_ready(out)
    assert out.shape == (batch, output_nc, 1, 1), out.shape
    assert bool(jnp.all(jnp.isfinite(out)))
    print("KERNEL_OK")
</pallas_src>

<mosaic_0001>
module attributes {stable_mosaic.version = 11 : i64} {
  func.func @_conv_bias_stats_kernel(%arg0: i32, %arg1: i32, %arg2: memref<1x256x1024xbf16, #tpu.memory_space<vmem>>, %arg3: memref<1024x128xbf16, #tpu.memory_space<vmem>>, %arg4: memref<1x128xf32, #tpu.memory_space<vmem>>, %arg5: memref<1x256x128xbf16, #tpu.memory_space<vmem>>, %arg6: memref<1x2x128xf32, #tpu.memory_space<vmem>>, %arg7: memref<1x128xf32, #tpu.memory_space<vmem>>, %arg8: memref<1x128xf32, #tpu.memory_space<vmem>>) attributes {dimension_semantics = [#tpu.dimension_semantics<parallel>, #tpu.dimension_semantics<arbitrary>], iteration_bounds = array<i64: 2, 1>, scalar_prefetch = 0 : i64, scratch_operands = 2 : i64, tpu.core_type = #tpu.core_type<tc>, window_params = [{transform_indices = @transform_0, window_bounds = array<i64: 1, 256, 1024>}, {pipeline_mode = #tpu.pipeline_mode<synchronous>, transform_indices = @transform_1, window_bounds = array<i64: 1024, 128>}, {pipeline_mode = #tpu.pipeline_mode<synchronous>, transform_indices = @transform_2, window_bounds = array<i64: 1, 128>}, {transform_indices = @transform_3, window_bounds = array<i64: 1, 256, 128>}, {transform_indices = @transform_4, window_bounds = array<i64: 1, 2, 128>}]} {
    %c0_i32 = arith.constant 0 : i32
    %0 = arith.cmpi eq, %arg1, %c0_i32 : i32
    %1 = arith.extui %0 : i1 to i32
    %c0_i32_0 = arith.constant 0 : i32
    %2 = arith.cmpi ne, %1, %c0_i32_0 : i32
    scf.if %2 {
      %cst_22 = arith.constant 0.000000e+00 : f32
      %28 = vector.broadcast %cst_22 : f32 to vector<1x128xf32>
      %c0_23 = arith.constant 0 : index
      %c0_24 = arith.constant 0 : index
      %29 = vector.load %arg7[%c0_23, %c0_24] : memref<1x128xf32, #tpu.memory_space<vmem>>, vector<1x128xf32>
      tpu.vector_store %arg7[%c0_23, %c0_24], %28 {strides = array<i32>} : memref<1x128xf32, #tpu.memory_space<vmem>>, vector<1x128xf32>,
      %cst_25 = arith.constant 0.000000e+00 : f32
      %30 = vector.broadcast %cst_25 : f32 to vector<1x128xf32>
      %c0_26 = arith.constant 0 : index
      %c0_27 = arith.constant 0 : index
      %31 = vector.load %arg8[%c0_26, %c0_27] : memref<1x128xf32, #tpu.memory_space<vmem>>, vector<1x128xf32>
      tpu.vector_store %arg8[%c0_26, %c0_27], %30 {strides = array<i32>} : memref<1x128xf32, #tpu.memory_space<vmem>>, vector<1x128xf32>,
    } else {
    }
    %c0 = arith.constant 0 : index
    %c0_1 = arith.constant 0 : index
    %c0_2 = arith.constant 0 : index
    %3 = vector.load %arg2[%c0, %c0_1, %c0_2] : memref<1x256x1024xbf16, #tpu.memory_space<vmem>>, vector<1x256x1024xbf16>
    %4 = vector.shape_cast %3 : vector<1x256x1024xbf16> to vector<256x1024xbf16>
    %c0_3 = arith.constant 0 : index
    %c0_4 = arith.constant 0 : index
    %5 = vector.load %arg3[%c0_3, %c0_4] : memref<1024x128xbf16, #tpu.memory_space<vmem>>, vector<1024x128xbf16>
    %cst = arith.constant dense<0.000000e+00> : vector<256x128xf32>
    %6 = tpu.matmul %4, %5, %cst {dimension_numbers = #tpu.dot_dimension_numbers<[1], [0], [0], [1], [0, 0, 1, 1], [], []>} : vector<256x1024xbf16>, vector<1024x128xbf16>, vector<256x128xf32> -> vector<256x128xf32>
    %c0_5 = arith.constant 0 : index
    %c0_6 = arith.constant 0 : index
    %7 = vector.load %arg4[%c0_5, %c0_6] : memref<1x128xf32, #tpu.memory_space<vmem>>, vector<1x128xf32>
    %8 = vector.broadcast %7 : vector<1x128xf32> to vector<256x128xf32>
    %9 = arith.addf %6, %8 : vector<256x128xf32>
    %c0_7 = arith.constant 0 : index
    %c0_8 = arith.constant 0 : index
    %10 = vector.load %arg7[%c0_7, %c0_8] : memref<1x128xf32, #tpu.memory_space<vmem>>, vector<1x128xf32>
    %cst_9 = arith.constant dense<0.000000e+00> : vector<128xf32>
    %11 = vector.multi_reduction <add>, %9, %cst_9 [0] : vector<256x128xf32> to vector<128xf32>
    %12 = vector.shape_cast %11 : vector<128xf32> to vector<1x128xf32>
    %13 = arith.addf %10, %12 : vector<1x128xf32>
    %c0_10 = arith.constant 0 : index
    %c0_11 = arith.constant 0 : index
    %14 = vector.load %arg7[%c0_10, %c0_11] : memref<1x128xf32, #tpu.memory_space<vmem>>, vector<1x128xf32>
    tpu.vector_store %arg7[%c0_10, %c0_11], %13 {strides = array<i32>} : memref<1x128xf32, #tpu.memory_space<vmem>>, vector<1x128xf32>,
    %c0_12 = arith.constant 0 : index
    %c0_13 = arith.constant 0 : index
    %15 = vector.load %arg8[%c0_12, %c0_13] : memref<1x128xf32, #tpu.memory_space<vmem>>, vector<1x128xf32>
    %16 = arith.mulf %9, %9 : vector<256x128xf32>
    %cst_14 = arith.constant dense<0.000000e+00> : vector<128xf32>
    %17 = vector.multi_reduction <add>, %16, %cst_14 [0] : vector<256x128xf32> to vector<128xf32>
    %18 = vector.shape_cast %17 : vector<128xf32> to vector<1x128xf32>
    %19 = arith.addf %15, %18 : vector<1x128xf32>
    %c0_15 = arith.constant 0 : index
    %c0_16 = arith.constant 0 : index
    %20 = vector.load %arg8[%c0_15, %c0_16] : memref<1x128xf32, #tpu.memory_space<vmem>>, vector<1x128xf32>
    tpu.vector_store %arg8[%c0_15, %c0_16], %19 {strides = array<i32>} : memref<1x128xf32, #tpu.memory_space<vmem>>, vector<1x128xf32>,
    %21 = arith.truncf %9 : vector<256x128xf32> to vector<256x128xbf16>
    %c0_17 = arith.constant 0 : index
    %c0_18 = arith.constant 0 : index
    %c0_19 = arith.constant 0 : index
    %22 = vector.load %arg5[%c0_17, %c0_18, %c0_19] : memref<1x256x128xbf16, #tpu.memory_space<vmem>>, vector<1x256x128xbf16>
    %23 = vector.shape_cast %22 : vector<1x256x128xbf16> to vector<256x128xbf16>
    %24 = vector.shape_cast %21 : vector<256x128xbf16> to vector<1x256x128xbf16>
    tpu.vector_store %arg5[%c0_17, %c0_18, %c0_19], %24 {strides = array<i32>} : memref<1x256x128xbf16, #tpu.memory_space<vmem>>, vector<1x256x128xbf16>,
    %c0_i32_20 = arith.constant 0 : i32
    %25 = arith.cmpi eq, %arg1, %c0_i32_20 : i32
    %26 = arith.extui %25 : i1 to i32
    %c0_i32_21 = arith.constant 0 : i32
    %27 = arith.cmpi ne, %26, %c0_i32_21 : i32
    scf.if %27 {
      %c0_22 = arith.constant 0 : index
      %c0_23 = arith.constant 0 : index
      %28 = vector.load %arg7[%c0_22, %c0_23] : memref<1x128xf32, #tpu.memory_space<vmem>>, vector<1x128xf32>
      %cst_24 = arith.constant 3.906250e-03 : f32
      %29 = vector.broadcast %cst_24 : f32 to vector<1x128xf32>
      %30 = arith.mulf %28, %29 : vector<1x128xf32>
      %c0_25 = arith.constant 0 : index
      %c0_26 = arith.constant 0 : index
      %31 = vector.load %arg8[%c0_25, %c0_26] : memref<1x128xf32, #tpu.memory_space<vmem>>, vector<1x128xf32>
      %cst_27 = arith.constant 3.906250e-03 : f32
      %32 = vector.broadcast %cst_27 : f32 to vector<1x128xf32>
      %33 = arith.mulf %31, %32 : vector<1x128xf32>
      %34 = arith.mulf %30, %30 : vector<1x128xf32>
      %35 = arith.subf %33, %34 : vector<1x128xf32>
      %cst_28 = arith.constant 0.000000e+00 : f32
      %36 = vector.broadcast %cst_28 : f32 to vector<1x128xf32>
      %37 = arith.maximumf %35, %36 : vector<1x128xf32>
      %cst_29 = arith.constant 9.99999974E-6 : f32
      %38 = vector.broadcast %cst_29 : f32 to vector<1x128xf32>
      %39 = arith.addf %37, %38 : vector<1x128xf32>
      %40 = math.rsqrt %39 : vector<1x128xf32>
      %c0_30 = arith.constant 0 : index
      %c0_31 = arith.constant 0 : index
      %c0_32 = arith.constant 0 : index
      %41 = vector.load %arg6[%c0_30, %c0_31, %c0_32] : memref<1x2x128xf32, #tpu.memory_space<vmem>>, vector<1x1x128xf32>
      %42 = vector.shape_cast %41 : vector<1x1x128xf32> to vector<1x128xf32>
      %43 = vector.shape_cast %30 : vector<1x128xf32> to vector<1x1x128xf32>
      tpu.vector_store %arg6[%c0_30, %c0_31, %c0_32], %43 {strides = array<i32>} : memref<1x2x128xf32, #tpu.memory_space<vmem>>, vector<1x1x128xf32>,
      %c0_33 = arith.constant 0 : index
      %c1 = arith.constant 1 : index
      %c0_34 = arith.constant 0 : index
      %44 = vector.load %arg6[%c0_33, %c1, %c0_34] : memref<1x2x128xf32, #tpu.memory_space<vmem>>, vector<1x1x128xf32>
      %45 = vector.shape_cast %44 : vector<1x1x128xf32> to vector<1x128xf32>
      %46 = vector.shape_cast %40 : vector<1x128xf32> to vector<1x1x128xf32>
      tpu.vector_store %arg6[%c0_33, %c1, %c0_34], %46 {strides = array<i32>} : memref<1x2x128xf32, #tpu.memory_space<vmem>>, vector<1x1x128xf32>,
    } else {
    }
    return
  }
  func.func @transform_0(%arg0: i32, %arg1: i32) -> (i32, i32, i32) {
    %c0_i32 = arith.constant 0 : i32
    %c0_i32_0 = arith.constant 0 : i32
    return %arg0, %arg1, %c0_i32 : i32, i32, i32
  }
  func.func @transform_1(%arg0: i32, %arg1: i32) -> (i32, i32) {
    %c0_i32 = arith.constant 0 : i32
    %c0_i32_0 = arith.constant 0 : i32
    %c0_i32_1 = arith.constant 0 : i32
    return %c0_i32, %c0_i32_0 : i32, i32
  }
  func.func @transform_2(%arg0: i32, %arg1: i32) -> (i32, i32) {
    %c0_i32 = arith.constant 0 : i32
    %c0_i32_0 = arith.constant 0 : i32
    %c0_i32_1 = arith.constant 0 : i32
    return %c0_i32, %c0_i32_0 : i32, i32
  }
  func.func @transform_3(%arg0: i32, %arg1: i32) -> (i32, i32, i32) {
    %c0_i32 = arith.constant 0 : i32
    %c0_i32_0 = arith.constant 0 : i32
    return %arg0, %arg1, %c0_i32 : i32, i32, i32
  }
  func.func @transform_4(%arg0: i32, %arg1: i32) -> (i32, i32, i32) {
    %c0_i32 = arith.constant 0 : i32
    %c0_i32_0 = arith.constant 0 : i32
    %c0_i32_1 = arith.constant 0 : i32
    return %arg0, %c0_i32, %c0_i32_0 : i32, i32, i32
  }
}

module attributes {stable_mosaic.version = 11 : i64} {
  func.func @_conv_bias_stats_kernel(%arg0: i32, %arg1: i32, %arg2: memref<1x64x2048xbf16, #tpu.memory_space<vmem>>, %arg3: memref<2048x256xbf16, #tpu.memory_space<vmem>>, %arg4: memref<1x256xf32, #tpu.memory_space<vmem>>, %arg5: memref<1x64x256xbf16, #tpu.memory_space<vmem>>, %arg6: memref<1x2x256xf32, #tpu.memory_space<vmem>>, %arg7: memref<1x256xf32, #tpu.memory_space<vmem>>, %arg8: memref<1x256xf32, #tpu.memory_space<vmem>>) attributes {dimension_semantics = [#tpu.dimension_semantics<parallel>, #tpu.dimension_semantics<arbitrary>], iteration_bounds = array<i64: 2, 1>, scalar_prefetch = 0 : i64, scratch_operands = 2 : i64, tpu.core_type = #tpu.core_type<tc>, window_params = [{transform_indices = @transform_0, window_bounds = array<i64: 1, 64, 2048>}, {pipeline_mode = #tpu.pipeline_mode<synchronous>, transform_indices = @transform_1, window_bounds = array<i64: 2048, 256>}, {pipeline_mode = #tpu.pipeline_mode<synchronous>, transform_indices = @transform_2, window_bounds = array<i64: 1, 256>}, {transform_indices = @transform_3, window_bounds = array<i64: 1, 64, 256>}, {transform_indices = @transform_4, window_bounds = array<i64: 1, 2, 256>}]} {
    %c0_i32 = arith.constant 0 : i32
    %0 = arith.cmpi eq, %arg1, %c0_i32 : i32
    %1 = arith.extui %0 : i1 to i32
    %c0_i32_0 = arith.constant 0 : i32
    %2 = arith.cmpi ne, %1, %c0_i32_0 : i32
    scf.if %2 {
      %cst_22 = arith.constant 0.000000e+00 : f32
      %28 = vector.broadcast %cst_22 : f32 to vector<1x256xf32>
      %c0_23 = arith.constant 0 : index
      %c0_24 = arith.constant 0 : index
      %29 = vector.load %arg7[%c0_23, %c0_24] : memref<1x256xf32, #tpu.memory_space<vmem>>, vector<1x256xf32>
      tpu.vector_store %arg7[%c0_23, %c0_24], %28 {strides = array<i32>} : memref<1x256xf32, #tpu.memory_space<vmem>>, vector<1x256xf32>,
      %cst_25 = arith.constant 0.000000e+00 : f32
      %30 = vector.broadcast %cst_25 : f32 to vector<1x256xf32>
      %c0_26 = arith.constant 0 : index
      %c0_27 = arith.constant 0 : index
      %31 = vector.load %arg8[%c0_26, %c0_27] : memref<1x256xf32, #tpu.memory_space<vmem>>, vector<1x256xf32>
      tpu.vector_store %arg8[%c0_26, %c0_27], %30 {strides = array<i32>} : memref<1x256xf32, #tpu.memory_space<vmem>>, vector<1x256xf32>,
    } else {
    }
    %c0 = arith.constant 0 : index
    %c0_1 = arith.constant 0 : index
    %c0_2 = arith.constant 0 : index
    %3 = vector.load %arg2[%c0, %c0_1, %c0_2] : memref<1x64x2048xbf16, #tpu.memory_space<vmem>>, vector<1x64x2048xbf16>
    %4 = vector.shape_cast %3 : vector<1x64x2048xbf16> to vector<64x2048xbf16>
    %c0_3 = arith.constant 0 : index
    %c0_4 = arith.constant 0 : index
    %5 = vector.load %arg3[%c0_3, %c0_4] : memref<2048x256xbf16, #tpu.memory_space<vmem>>, vector<2048x256xbf16>
    %cst = arith.constant dense<0.000000e+00> : vector<64x256xf32>
    %6 = tpu.matmul %4, %5, %cst {dimension_numbers = #tpu.dot_dimension_numbers<[1], [0], [0], [1], [0, 0, 1, 1], [], []>} : vector<64x2048xbf16>, vector<2048x256xbf16>, vector<64x256xf32> -> vector<64x256xf32>
    %c0_5 = arith.constant 0 : index
    %c0_6 = arith.constant 0 : index
    %7 = vector.load %arg4[%c0_5, %c0_6] : memref<1x256xf32, #tpu.memory_space<vmem>>, vector<1x256xf32>
    %8 = vector.broadcast %7 : vector<1x256xf32> to vector<64x256xf32>
    %9 = arith.addf %6, %8 : vector<64x256xf32>
    %c0_7 = arith.constant 0 : index
    %c0_8 = arith.constant 0 : index
    %10 = vector.load %arg7[%c0_7, %c0_8] : memref<1x256xf32, #tpu.memory_space<vmem>>, vector<1x256xf32>
    %cst_9 = arith.constant dense<0.000000e+00> : vector<256xf32>
    %11 = vector.multi_reduction <add>, %9, %cst_9 [0] : vector<64x256xf32> to vector<256xf32>
    %12 = vector.shape_cast %11 : vector<256xf32> to vector<1x256xf32>
    %13 = arith.addf %10, %12 : vector<1x256xf32>
    %c0_10 = arith.constant 0 : index
    %c0_11 = arith.constant 0 : index
    %14 = vector.load %arg7[%c0_10, %c0_11] : memref<1x256xf32, #tpu.memory_space<vmem>>, vector<1x256xf32>
    tpu.vector_store %arg7[%c0_10, %c0_11], %13 {strides = array<i32>} : memref<1x256xf32, #tpu.memory_space<vmem>>, vector<1x256xf32>,
    %c0_12 = arith.constant 0 : index
    %c0_13 = arith.constant 0 : index
    %15 = vector.load %arg8[%c0_12, %c0_13] : memref<1x256xf32, #tpu.memory_space<vmem>>, vector<1x256xf32>
    %16 = arith.mulf %9, %9 : vector<64x256xf32>
    %cst_14 = arith.constant dense<0.000000e+00> : vector<256xf32>
    %17 = vector.multi_reduction <add>, %16, %cst_14 [0] : vector<64x256xf32> to vector<256xf32>
    %18 = vector.shape_cast %17 : vector<256xf32> to vector<1x256xf32>
    %19 = arith.addf %15, %18 : vector<1x256xf32>
    %c0_15 = arith.constant 0 : index
    %c0_16 = arith.constant 0 : index
    %20 = vector.load %arg8[%c0_15, %c0_16] : memref<1x256xf32, #tpu.memory_space<vmem>>, vector<1x256xf32>
    tpu.vector_store %arg8[%c0_15, %c0_16], %19 {strides = array<i32>} : memref<1x256xf32, #tpu.memory_space<vmem>>, vector<1x256xf32>,
    %21 = arith.truncf %9 : vector<64x256xf32> to vector<64x256xbf16>
    %c0_17 = arith.constant 0 : index
    %c0_18 = arith.constant 0 : index
    %c0_19 = arith.constant 0 : index
    %22 = vector.load %arg5[%c0_17, %c0_18, %c0_19] : memref<1x64x256xbf16, #tpu.memory_space<vmem>>, vector<1x64x256xbf16>
    %23 = vector.shape_cast %22 : vector<1x64x256xbf16> to vector<64x256xbf16>
    %24 = vector.shape_cast %21 : vector<64x256xbf16> to vector<1x64x256xbf16>
    tpu.vector_store %arg5[%c0_17, %c0_18, %c0_19], %24 {strides = array<i32>} : memref<1x64x256xbf16, #tpu.memory_space<vmem>>, vector<1x64x256xbf16>,
    %c0_i32_20 = arith.constant 0 : i32
    %25 = arith.cmpi eq, %arg1, %c0_i32_20 : i32
    %26 = arith.extui %25 : i1 to i32
    %c0_i32_21 = arith.constant 0 : i32
    %27 = arith.cmpi ne, %26, %c0_i32_21 : i32
    scf.if %27 {
      %c0_22 = arith.constant 0 : index
      %c0_23 = arith.constant 0 : index
      %28 = vector.load %arg7[%c0_22, %c0_23] : memref<1x256xf32, #tpu.memory_space<vmem>>, vector<1x256xf32>
      %cst_24 = arith.constant 1.562500e-02 : f32
      %29 = vector.broadcast %cst_24 : f32 to vector<1x256xf32>
      %30 = arith.mulf %28, %29 : vector<1x256xf32>
      %c0_25 = arith.constant 0 : index
      %c0_26 = arith.constant 0 : index
      %31 = vector.load %arg8[%c0_25, %c0_26] : memref<1x256xf32, #tpu.memory_space<vmem>>, vector<1x256xf32>
      %cst_27 = arith.constant 1.562500e-02 : f32
      %32 = vector.broadcast %cst_27 : f32 to vector<1x256xf32>
      %33 = arith.mulf %31, %32 : vector<1x256xf32>
      %34 = arith.mulf %30, %30 : vector<1x256xf32>
      %35 = arith.subf %33, %34 : vector<1x256xf32>
      %cst_28 = arith.constant 0.000000e+00 : f32
      %36 = vector.broadcast %cst_28 : f32 to vector<1x256xf32>
      %37 = arith.maximumf %35, %36 : vector<1x256xf32>
      %cst_29 = arith.constant 9.99999974E-6 : f32
      %38 = vector.broadcast %cst_29 : f32 to vector<1x256xf32>
      %39 = arith.addf %37, %38 : vector<1x256xf32>
      %40 = math.rsqrt %39 : vector<1x256xf32>
      %c0_30 = arith.constant 0 : index
      %c0_31 = arith.constant 0 : index
      %c0_32 = arith.constant 0 : index
      %41 = vector.load %arg6[%c0_30, %c0_31, %c0_32] : memref<1x2x256xf32, #tpu.memory_space<vmem>>, vector<1x1x256xf32>
      %42 = vector.shape_cast %41 : vector<1x1x256xf32> to vector<1x256xf32>
      %43 = vector.shape_cast %30 : vector<1x256xf32> to vector<1x1x256xf32>
      tpu.vector_store %arg6[%c0_30, %c0_31, %c0_32], %43 {strides = array<i32>} : memref<1x2x256xf32, #tpu.memory_space<vmem>>, vector<1x1x256xf32>,
      %c0_33 = arith.constant 0 : index
      %c1 = arith.constant 1 : index
      %c0_34 = arith.constant 0 : index
      %44 = vector.load %arg6[%c0_33, %c1, %c0_34] : memref<1x2x256xf32, #tpu.memory_space<vmem>>, vector<1x1x256xf32>
      %45 = vector.shape_cast %44 : vector<1x1x256xf32> to vector<1x256xf32>
      %46 = vector.shape_cast %40 : vector<1x256xf32> to vector<1x1x256xf32>
      tpu.vector_store %arg6[%c0_33, %c1, %c0_34], %46 {strides = array<i32>} : memref<1x2x256xf32, #tpu.memory_space<vmem>>, vector<1x1x256xf32>,
    } else {
    }
    return
  }
  func.func @transform_0(%arg0: i32, %arg1: i32) -> (i32, i32, i32) {
    %c0_i32 = arith.constant 0 : i32
    %c0_i32_0 = arith.constant 0 : i32
    return %arg0, %arg1, %c0_i32 : i32, i32, i32
  }
  func.func @transform_1(%arg0: i32, %arg1: i32) -> (i32, i32) {
    %c0_i32 = arith.constant 0 : i32
    %c0_i32_0 = arith.constant 0 : i32
    %c0_i32_1 = arith.constant 0 : i32
    return %c0_i32, %c0_i32_0 : i32, i32
  }
  func.func @transform_2(%arg0: i32, %arg1: i32) -> (i32, i32) {
    %c0_i32 = arith.constant 0 : i32
    %c0_i32_0 = arith.constant 0 : i32
    %c0_i32_1 = arith.constant 0 : i32
    return %c0_i32, %c0_i32_0 : i32, i32
  }
  func.func @transform_3(%arg0: i32, %arg1: i32) -> (i32, i32, i32) {
    %c0_i32 = arith.constant 0 : i32
    %c0_i32_0 = arith.constant 0 : i32
    return %arg0, %arg1, %c0_i32 : i32, i32, i32
  }
  func.func @transform_4(%arg0: i32, %arg1: i32) -> (i32, i32, i32) {
    %c0_i32 = arith.constant 0 : i32
    %c0_i32_0 = arith.constant 0 : i32
    %c0_i32_1 = arith.constant 0 : i32
    return %arg0, %c0_i32, %c0_i32_0 : i32, i32, i32
  }
}

module attributes {stable_mosaic.version = 11 : i64} {
  func.func @_conv_bias_stats_kernel(%arg0: i32, %arg1: i32, %arg2: memref<1x16x4096xbf16, #tpu.memory_space<vmem>>, %arg3: memref<4096x256xbf16, #tpu.memory_space<vmem>>, %arg4: memref<1x256xf32, #tpu.memory_space<vmem>>, %arg5: memref<1x16x256xbf16, #tpu.memory_space<vmem>>, %arg6: memref<1x2x256xf32, #tpu.memory_space<vmem>>, %arg7: memref<1x256xf32, #tpu.memory_space<vmem>>, %arg8: memref<1x256xf32, #tpu.memory_space<vmem>>) attributes {dimension_semantics = [#tpu.dimension_semantics<parallel>, #tpu.dimension_semantics<arbitrary>], iteration_bounds = array<i64: 2, 1>, scalar_prefetch = 0 : i64, scratch_operands = 2 : i64, tpu.core_type = #tpu.core_type<tc>, window_params = [{transform_indices = @transform_0, window_bounds = array<i64: 1, 16, 4096>}, {pipeline_mode = #tpu.pipeline_mode<synchronous>, transform_indices = @transform_1, window_bounds = array<i64: 4096, 256>}, {pipeline_mode = #tpu.pipeline_mode<synchronous>, transform_indices = @transform_2, window_bounds = array<i64: 1, 256>}, {transform_indices = @transform_3, window_bounds = array<i64: 1, 16, 256>}, {transform_indices = @transform_4, window_bounds = array<i64: 1, 2, 256>}]} {
    %c0_i32 = arith.constant 0 : i32
    %0 = arith.cmpi eq, %arg1, %c0_i32 : i32
    %1 = arith.extui %0 : i1 to i32
    %c0_i32_0 = arith.constant 0 : i32
    %2 = arith.cmpi ne, %1, %c0_i32_0 : i32
    scf.if %2 {
      %cst_22 = arith.constant 0.000000e+00 : f32
      %28 = vector.broadcast %cst_22 : f32 to vector<1x256xf32>
      %c0_23 = arith.constant 0 : index
      %c0_24 = arith.constant 0 : index
      %29 = vector.load %arg7[%c0_23, %c0_24] : memref<1x256xf32, #tpu.memory_space<vmem>>, vector<1x256xf32>
      tpu.vector_store %arg7[%c0_23, %c0_24], %28 {strides = array<i32>} : memref<1x256xf32, #tpu.memory_space<vmem>>, vector<1x256xf32>,
      %cst_25 = arith.constant 0.000000e+00 : f32
      %30 = vector.broadcast %cst_25 : f32 to vector<1x256xf32>
      %c0_26 = arith.constant 0 : index
      %c0_27 = arith.constant 0 : index
      %31 = vector.load %arg8[%c0_26, %c0_27] : memref<1x256xf32, #tpu.memory_space<vmem>>, vector<1x256xf32>
      tpu.vector_store %arg8[%c0_26, %c0_27], %30 {strides = array<i32>} : memref<1x256xf32, #tpu.memory_space<vmem>>, vector<1x256xf32>,
    } else {
    }
    %c0 = arith.constant 0 : index
    %c0_1 = arith.constant 0 : index
    %c0_2 = arith.constant 0 : index
    %3 = vector.load %arg2[%c0, %c0_1, %c0_2] : memref<1x16x4096xbf16, #tpu.memory_space<vmem>>, vector<1x16x4096xbf16>
    %4 = vector.shape_cast %3 : vector<1x16x4096xbf16> to vector<16x4096xbf16>
    %c0_3 = arith.constant 0 : index
    %c0_4 = arith.constant 0 : index
    %5 = vector.load %arg3[%c0_3, %c0_4] : memref<4096x256xbf16, #tpu.memory_space<vmem>>, vector<4096x256xbf16>
    %cst = arith.constant dense<0.000000e+00> : vector<16x256xf32>
    %6 = tpu.matmul %4, %5, %cst {dimension_numbers = #tpu.dot_dimension_numbers<[1], [0], [0], [1], [0, 0, 1, 1], [], []>} : vector<16x4096xbf16>, vector<4096x256xbf16>, vector<16x256xf32> -> vector<16x256xf32>
    %c0_5 = arith.constant 0 : index
    %c0_6 = arith.constant 0 : index
    %7 = vector.load %arg4[%c0_5, %c0_6] : memref<1x256xf32, #tpu.memory_space<vmem>>, vector<1x256xf32>
    %8 = vector.broadcast %7 : vector<1x256xf32> to vector<16x256xf32>
    %9 = arith.addf %6, %8 : vector<16x256xf32>
    %c0_7 = arith.constant 0 : index
    %c0_8 = arith.constant 0 : index
    %10 = vector.load %arg7[%c0_7, %c0_8] : memref<1x256xf32, #tpu.memory_space<vmem>>, vector<1x256xf32>
    %cst_9 = arith.constant dense<0.000000e+00> : vector<256xf32>
    %11 = vector.multi_reduction <add>, %9, %cst_9 [0] : vector<16x256xf32> to vector<256xf32>
    %12 = vector.shape_cast %11 : vector<256xf32> to vector<1x256xf32>
    %13 = arith.addf %10, %12 : vector<1x256xf32>
    %c0_10 = arith.constant 0 : index
    %c0_11 = arith.constant 0 : index
    %14 = vector.load %arg7[%c0_10, %c0_11] : memref<1x256xf32, #tpu.memory_space<vmem>>, vector<1x256xf32>
    tpu.vector_store %arg7[%c0_10, %c0_11], %13 {strides = array<i32>} : memref<1x256xf32, #tpu.memory_space<vmem>>, vector<1x256xf32>,
    %c0_12 = arith.constant 0 : index
    %c0_13 = arith.constant 0 : index
    %15 = vector.load %arg8[%c0_12, %c0_13] : memref<1x256xf32, #tpu.memory_space<vmem>>, vector<1x256xf32>
    %16 = arith.mulf %9, %9 : vector<16x256xf32>
    %cst_14 = arith.constant dense<0.000000e+00> : vector<256xf32>
    %17 = vector.multi_reduction <add>, %16, %cst_14 [0] : vector<16x256xf32> to vector<256xf32>
    %18 = vector.shape_cast %17 : vector<256xf32> to vector<1x256xf32>
    %19 = arith.addf %15, %18 : vector<1x256xf32>
    %c0_15 = arith.constant 0 : index
    %c0_16 = arith.constant 0 : index
    %20 = vector.load %arg8[%c0_15, %c0_16] : memref<1x256xf32, #tpu.memory_space<vmem>>, vector<1x256xf32>
    tpu.vector_store %arg8[%c0_15, %c0_16], %19 {strides = array<i32>} : memref<1x256xf32, #tpu.memory_space<vmem>>, vector<1x256xf32>,
    %21 = arith.truncf %9 : vector<16x256xf32> to vector<16x256xbf16>
    %c0_17 = arith.constant 0 : index
    %c0_18 = arith.constant 0 : index
    %c0_19 = arith.constant 0 : index
    %22 = vector.load %arg5[%c0_17, %c0_18, %c0_19] : memref<1x16x256xbf16, #tpu.memory_space<vmem>>, vector<1x16x256xbf16>
    %23 = vector.shape_cast %22 : vector<1x16x256xbf16> to vector<16x256xbf16>
    %24 = vector.shape_cast %21 : vector<16x256xbf16> to vector<1x16x256xbf16>
    tpu.vector_store %arg5[%c0_17, %c0_18, %c0_19], %24 {strides = array<i32>} : memref<1x16x256xbf16, #tpu.memory_space<vmem>>, vector<1x16x256xbf16>,
    %c0_i32_20 = arith.constant 0 : i32
    %25 = arith.cmpi eq, %arg1, %c0_i32_20 : i32
    %26 = arith.extui %25 : i1 to i32
    %c0_i32_21 = arith.constant 0 : i32
    %27 = arith.cmpi ne, %26, %c0_i32_21 : i32
    scf.if %27 {
      %c0_22 = arith.constant 0 : index
      %c0_23 = arith.constant 0 : index
      %28 = vector.load %arg7[%c0_22, %c0_23] : memref<1x256xf32, #tpu.memory_space<vmem>>, vector<1x256xf32>
      %cst_24 = arith.constant 6.250000e-02 : f32
      %29 = vector.broadcast %cst_24 : f32 to vector<1x256xf32>
      %30 = arith.mulf %28, %29 : vector<1x256xf32>
      %c0_25 = arith.constant 0 : index
      %c0_26 = arith.constant 0 : index
      %31 = vector.load %arg8[%c0_25, %c0_26] : memref<1x256xf32, #tpu.memory_space<vmem>>, vector<1x256xf32>
      %cst_27 = arith.constant 6.250000e-02 : f32
      %32 = vector.broadcast %cst_27 : f32 to vector<1x256xf32>
      %33 = arith.mulf %31, %32 : vector<1x256xf32>
      %34 = arith.mulf %30, %30 : vector<1x256xf32>
      %35 = arith.subf %33, %34 : vector<1x256xf32>
      %cst_28 = arith.constant 0.000000e+00 : f32
      %36 = vector.broadcast %cst_28 : f32 to vector<1x256xf32>
      %37 = arith.maximumf %35, %36 : vector<1x256xf32>
      %cst_29 = arith.constant 9.99999974E-6 : f32
      %38 = vector.broadcast %cst_29 : f32 to vector<1x256xf32>
      %39 = arith.addf %37, %38 : vector<1x256xf32>
      %40 = math.rsqrt %39 : vector<1x256xf32>
      %c0_30 = arith.constant 0 : index
      %c0_31 = arith.constant 0 : index
      %c0_32 = arith.constant 0 : index
      %41 = vector.load %arg6[%c0_30, %c0_31, %c0_32] : memref<1x2x256xf32, #tpu.memory_space<vmem>>, vector<1x1x256xf32>
      %42 = vector.shape_cast %41 : vector<1x1x256xf32> to vector<1x256xf32>
      %43 = vector.shape_cast %30 : vector<1x256xf32> to vector<1x1x256xf32>
      tpu.vector_store %arg6[%c0_30, %c0_31, %c0_32], %43 {strides = array<i32>} : memref<1x2x256xf32, #tpu.memory_space<vmem>>, vector<1x1x256xf32>,
      %c0_33 = arith.constant 0 : index
      %c1 = arith.constant 1 : index
      %c0_34 = arith.constant 0 : index
      %44 = vector.load %arg6[%c0_33, %c1, %c0_34] : memref<1x2x256xf32, #tpu.memory_space<vmem>>, vector<1x1x256xf32>
      %45 = vector.shape_cast %44 : vector<1x1x256xf32> to vector<1x256xf32>
      %46 = vector.shape_cast %40 : vector<1x256xf32> to vector<1x1x256xf32>
      tpu.vector_store %arg6[%c0_33, %c1, %c0_34], %46 {strides = array<i32>} : memref<1x2x256xf32, #tpu.memory_space<vmem>>, vector<1x1x256xf32>,
    } else {
    }
    return
  }
  func.func @transform_0(%arg0: i32, %arg1: i32) -> (i32, i32, i32) {
    %c0_i32 = arith.constant 0 : i32
    %c0_i32_0 = arith.constant 0 : i32
    return %arg0, %arg1, %c0_i32 : i32, i32, i32
  }
  func.func @transform_1(%arg0: i32, %arg1: i32) -> (i32, i32) {
    %c0_i32 = arith.constant 0 : i32
    %c0_i32_0 = arith.constant 0 : i32
    %c0_i32_1 = arith.constant 0 : i32
    return %c0_i32, %c0_i32_0 : i32, i32
  }
  func.func @transform_2(%arg0: i32, %arg1: i32) -> (i32, i32) {
    %c0_i32 = arith.constant 0 : i32
    %c0_i32_0 = arith.constant 0 : i32
    %c0_i32_1 = arith.constant 0 : i32
    return %c0_i32, %c0_i32_0 : i32, i32
  }
  func.func @transform_3(%arg0: i32, %arg1: i32) -> (i32, i32, i32) {
    %c0_i32 = arith.constant 0 : i32
    %c0_i32_0 = arith.constant 0 : i32
    return %arg0, %arg1, %c0_i32 : i32, i32, i32
  }
  func.func @transform_4(%arg0: i32, %arg1: i32) -> (i32, i32, i32) {
    %c0_i32 = arith.constant 0 : i32
    %c0_i32_0 = arith.constant 0 : i32
    %c0_i32_1 = arith.constant 0 : i32
    return %arg0, %c0_i32, %c0_i32_0 : i32, i32, i32
  }
}

module attributes {stable_mosaic.version = 11 : i64} {
  func.func @_conv_in_relu_pool_fc_kernel(%arg0: i32, %arg1: i32, %arg2: memref<1x16x4096xbf16, #tpu.memory_space<vmem>>, %arg3: memref<4096x256xbf16, #tpu.memory_space<vmem>>, %arg4: memref<1x256xf32, #tpu.memory_space<vmem>>, %arg5: memref<256x8xf32, #tpu.memory_space<vmem>>, %arg6: memref<1x8xf32, #tpu.memory_space<vmem>>, %arg7: memref<1x1x8xf32, #tpu.memory_space<vmem>>, %arg8: memref<16x256xf32, #tpu.memory_space<vmem>>, %arg9: memref<1x256xf32, #tpu.memory_space<vmem>>, %arg10: memref<1x256xf32, #tpu.memory_space<vmem>>) attributes {dimension_semantics = [#tpu.dimension_semantics<parallel>, #tpu.dimension_semantics<arbitrary>], iteration_bounds = array<i64: 2, 1>, scalar_prefetch = 0 : i64, scratch_operands = 3 : i64, tpu.core_type = #tpu.core_type<tc>, window_params = [{transform_indices = @transform_0, window_bounds = array<i64: 1, 16, 4096>}, {pipeline_mode = #tpu.pipeline_mode<synchronous>, transform_indices = @transform_1, window_bounds = array<i64: 4096, 256>}, {pipeline_mode = #tpu.pipeline_mode<synchronous>, transform_indices = @transform_2, window_bounds = array<i64: 1, 256>}, {pipeline_mode = #tpu.pipeline_mode<synchronous>, transform_indices = @transform_3, window_bounds = array<i64: 256, 8>}, {pipeline_mode = #tpu.pipeline_mode<synchronous>, transform_indices = @transform_4, window_bounds = array<i64: 1, 8>}, {transform_indices = @transform_5, window_bounds = array<i64: 1, 1, 8>}]} {
    %c0_i32 = arith.constant 0 : i32
    %0 = arith.cmpi eq, %arg1, %c0_i32 : i32
    %1 = arith.extui %0 : i1 to i32
    %c0_i32_0 = arith.constant 0 : i32
    %2 = arith.cmpi ne, %1, %c0_i32_0 : i32
    scf.if %2 {
      %cst_22 = arith.constant 0.000000e+00 : f32
      %38 = vector.broadcast %cst_22 : f32 to vector<1x256xf32>
      %c0_23 = arith.constant 0 : index
      %c0_24 = arith.constant 0 : index
      %39 = vector.load %arg9[%c0_23, %c0_24] : memref<1x256xf32, #tpu.memory_space<vmem>>, vector<1x256xf32>
      tpu.vector_store %arg9[%c0_23, %c0_24], %38 {strides = array<i32>} : memref<1x256xf32, #tpu.memory_space<vmem>>, vector<1x256xf32>,
      %cst_25 = arith.constant 0.000000e+00 : f32
      %40 = vector.broadcast %cst_25 : f32 to vector<1x256xf32>
      %c0_26 = arith.constant 0 : index
      %c0_27 = arith.constant 0 : index
      %41 = vector.load %arg10[%c0_26, %c0_27] : memref<1x256xf32, #tpu.memory_space<vmem>>, vector<1x256xf32>
      tpu.vector_store %arg10[%c0_26, %c0_27], %40 {strides = array<i32>} : memref<1x256xf32, #tpu.memory_space<vmem>>, vector<1x256xf32>,
    } else {
    }
    %c0 = arith.constant 0 : index
    %c0_1 = arith.constant 0 : index
    %c0_2 = arith.constant 0 : index
    %3 = vector.load %arg2[%c0, %c0_1, %c0_2] : memref<1x16x4096xbf16, #tpu.memory_space<vmem>>, vector<1x16x4096xbf16>
    %4 = vector.shape_cast %3 : vector<1x16x4096xbf16> to vector<16x4096xbf16>
    %c0_3 = arith.constant 0 : index
    %c0_4 = arith.constant 0 : index
    %5 = vector.load %arg3[%c0_3, %c0_4] : memref<4096x256xbf16, #tpu.memory_space<vmem>>, vector<4096x256xbf16>
    %cst = arith.constant dense<0.000000e+00> : vector<16x256xf32>
    %6 = tpu.matmul %4, %5, %cst {dimension_numbers = #tpu.dot_dimension_numbers<[1], [0], [0], [1], [0, 0, 1, 1], [], []>} : vector<16x4096xbf16>, vector<4096x256xbf16>, vector<16x256xf32> -> vector<16x256xf32>
    %c0_5 = arith.constant 0 : index
    %c0_6 = arith.constant 0 : index
    %7 = vector.load %arg4[%c0_5, %c0_6] : memref<1x256xf32, #tpu.memory_space<vmem>>, vector<1x256xf32>
    %8 = vector.broadcast %7 : vector<1x256xf32> to vector<16x256xf32>
    %9 = arith.addf %6, %8 : vector<16x256xf32>
    %c16_i32 = arith.constant 16 : i32
    %10 = arith.muli %arg1, %c16_i32 : i32
    %11 = tpu.iota {dimensions = array<i32: 0>} : vector<16x1xi32>
    %12 = vector.broadcast %10 : i32 to vector<16x1xi32>
    %13 = arith.addi %12, %11 : vector<16x1xi32>
    %c4_i32 = arith.constant 4 : i32
    %14 = vector.broadcast %c4_i32 : i32 to vector<16x1xi32>
    %15 = arith.cmpi slt, %13, %14 : vector<16x1xi32>
    %cst_7 = arith.constant 0.000000e+00 : f32
    %16 = vector.shape_cast %15 : vector<16x1xi1> to vector<16x1xi1>
    %17 = vector.broadcast %16 : vector<16x1xi1> to vector<16x256xi1>
    %18 = vector.broadcast %cst_7 : f32 to vector<16x256xf32>
    %19 = arith.select %17, %9, %18 : vector<16x256xi1>, vector<16x256xf32>
    %c0_8 = arith.constant 0 : index
    %c0_9 = arith.constant 0 : index
    %20 = vector.load %arg9[%c0_8, %c0_9] : memref<1x256xf32, #tpu.memory_space<vmem>>, vector<1x256xf32>
    %cst_10 = arith.constant dense<0.000000e+00> : vector<256xf32>
    %21 = vector.multi_reduction <add>, %19, %cst_10 [0] : vector<16x256xf32> to vector<256xf32>
    %22 = vector.shape_cast %21 : vector<256xf32> to vector<1x256xf32>
    %23 = arith.addf %20, %22 : vector<1x256xf32>
    %c0_11 = arith.constant 0 : index
    %c0_12 = arith.constant 0 : index
    %24 = vector.load %arg9[%c0_11, %c0_12] : memref<1x256xf32, #tpu.memory_space<vmem>>, vector<1x256xf32>
    tpu.vector_store %arg9[%c0_11, %c0_12], %23 {strides = array<i32>} : memref<1x256xf32, #tpu.memory_space<vmem>>, vector<1x256xf32>,
    %c0_13 = arith.constant 0 : index
    %c0_14 = arith.constant 0 : index
    %25 = vector.load %arg10[%c0_13, %c0_14] : memref<1x256xf32, #tpu.memory_space<vmem>>, vector<1x256xf32>
    %26 = arith.mulf %19, %19 : vector<16x256xf32>
    %cst_15 = arith.constant dense<0.000000e+00> : vector<256xf32>
    %27 = vector.multi_reduction <add>, %26, %cst_15 [0] : vector<16x256xf32> to vector<256xf32>
    %28 = vector.shape_cast %27 : vector<256xf32> to vector<1x256xf32>
    %29 = arith.addf %25, %28 : vector<1x256xf32>
    %c0_16 = arith.constant 0 : index
    %c0_17 = arith.constant 0 : index
    %30 = vector.load %arg10[%c0_16, %c0_17] : memref<1x256xf32, #tpu.memory_space<vmem>>, vector<1x256xf32>
    tpu.vector_store %arg10[%c0_16, %c0_17], %29 {strides = array<i32>} : memref<1x256xf32, #tpu.memory_space<vmem>>, vector<1x256xf32>,
    %c16_i32_18 = arith.constant 16 : i32
    %31 = arith.muli %arg1, %c16_i32_18 : i32
    %32 = tpu.assume_multiple %31, 16 : i32
    %33 = arith.index_cast %32 : i32 to index
    %c0_19 = arith.constant 0 : index
    %34 = vector.load %arg8[%33, %c0_19] : memref<16x256xf32, #tpu.memory_space<vmem>>, vector<16x256xf32>
    tpu.vector_store %arg8[%33, %c0_19], %9 {strides = array<i32>} : memref<16x256xf32, #tpu.memory_space<vmem>>, vector<16x256xf32>,
    %c0_i32_20 = arith.constant 0 : i32
    %35 = arith.cmpi eq, %arg1, %c0_i32_20 : i32
    %36 = arith.extui %35 : i1 to i32
    %c0_i32_21 = arith.constant 0 : i32
    %37 = arith.cmpi ne, %36, %c0_i32_21 : i32
    scf.if %37 {
      %c0_22 = arith.constant 0 : index
      %c0_23 = arith.constant 0 : index
      %38 = vector.load %arg9[%c0_22, %c0_23] : memref<1x256xf32, #tpu.memory_space<vmem>>, vector<1x256xf32>
      %cst_24 = arith.constant 2.500000e-01 : f32
      %39 = vector.broadcast %cst_24 : f32 to vector<1x256xf32>
      %40 = arith.mulf %38, %39 : vector<1x256xf32>
      %c0_25 = arith.constant 0 : index
      %c0_26 = arith.constant 0 : index
      %41 = vector.load %arg10[%c0_25, %c0_26] : memref<1x256xf32, #tpu.memory_space<vmem>>, vector<1x256xf32>
      %cst_27 = arith.constant 2.500000e-01 : f32
      %42 = vector.broadcast %cst_27 : f32 to vector<1x256xf32>
      %43 = arith.mulf %41, %42 : vector<1x256xf32>
      %44 = arith.mulf %40, %40 : vector<1x256xf32>
      %45 = arith.subf %43, %44 : vector<1x256xf32>
      %cst_28 = arith.constant 0.000000e+00 : f32
      %46 = vector.broadcast %cst_28 : f32 to vector<1x256xf32>
      %47 = arith.maximumf %45, %46 : vector<1x256xf32>
      %cst_29 = arith.constant 9.99999974E-6 : f32
      %48 = vector.broadcast %cst_29 : f32 to vector<1x256xf32>
      %49 = arith.addf %47, %48 : vector<1x256xf32>
      %50 = math.rsqrt %49 : vector<1x256xf32>
      %c0_30 = arith.constant 0 : index
      %c0_31 = arith.constant 0 : index
      %51 = vector.load %arg8[%c0_30, %c0_31] : memref<16x256xf32, #tpu.memory_space<vmem>>, vector<16x256xf32>
      %52 = vector.broadcast %40 : vector<1x256xf32> to vector<16x256xf32>
      %53 = arith.subf %51, %52 : vector<16x256xf32>
      %54 = vector.broadcast %50 : vector<1x256xf32> to vector<16x256xf32>
      %55 = arith.mulf %53, %54 : vector<16x256xf32>
      %cst_32 = arith.constant 0.000000e+00 : f32
      %56 = vector.broadcast %cst_32 : f32 to vector<16x256xf32>
      %57 = arith.maximumf %55, %56 : vector<16x256xf32>
      %58 = tpu.iota {dimensions = array<i32: 0>} : vector<16x1xi32>
      %c4_i32_33 = arith.constant 4 : i32
      %59 = vector.broadcast %c4_i32_33 : i32 to vector<16x1xi32>
      %60 = arith.cmpi slt, %58, %59 : vector<16x1xi32>
      %cst_34 = arith.constant 0.000000e+00 : f32
      %61 = vector.shape_cast %60 : vector<16x1xi1> to vector<16x1xi1>
      %62 = vector.broadcast %61 : vector<16x1xi1> to vector<16x256xi1>
      %63 = vector.broadcast %cst_34 : f32 to vector<16x256xf32>
      %64 = arith.select %62, %57, %63 : vector<16x256xi1>, vector<16x256xf32>
      %cst_35 = arith.constant dense<0.000000e+00> : vector<256xf32>
      %65 = vector.multi_reduction <add>, %64, %cst_35 [0] : vector<16x256xf32> to vector<256xf32>
      %66 = vector.shape_cast %65 : vector<256xf32> to vector<1x256xf32>
      %cst_36 = arith.constant 2.500000e-01 : f32
      %67 = vector.broadcast %cst_36 : f32 to vector<1x256xf32>
      %68 = arith.mulf %66, %67 : vector<1x256xf32>
      %c0_37 = arith.constant 0 : index
      %c0_38 = arith.constant 0 : index
      %69 = vector.load %arg5[%c0_37, %c0_38] : memref<256x8xf32, #tpu.memory_space<vmem>>, vector<256x8xf32>
      %cst_39 = arith.constant dense<0.000000e+00> : vector<1x8xf32>
      %70 = tpu.matmul %68, %69, %cst_39 {dimension_numbers = #tpu.dot_dimension_numbers<[1], [0], [0], [1], [0, 0, 1, 1], [], []>} : vector<1x256xf32>, vector<256x8xf32>, vector<1x8xf32> -> vector<1x8xf32>
      %c0_40 = arith.constant 0 : index
      %c0_41 = arith.constant 0 : index
      %71 = vector.load %arg6[%c0_40, %c0_41] : memref<1x8xf32, #tpu.memory_space<vmem>>, vector<1x8xf32>
      %72 = arith.addf %70, %71 : vector<1x8xf32>
      %c0_42 = arith.constant 0 : index
      %c0_43 = arith.constant 0 : index
      %c0_44 = arith.constant 0 : index
      %73 = vector.load %arg7[%c0_42, %c0_43, %c0_44] : memref<1x1x8xf32, #tpu.memory_space<vmem>>, vector<1x1x8xf32>
      %74 = vector.shape_cast %73 : vector<1x1x8xf32> to vector<1x8xf32>
      %75 = vector.shape_cast %72 : vector<1x8xf32> to vector<1x1x8xf32>
      tpu.vector_store %arg7[%c0_42, %c0_43, %c0_44], %75 {strides = array<i32>} : memref<1x1x8xf32, #tpu.memory_space<vmem>>, vector<1x1x8xf32>,
    } else {
    }
    return
  }
  func.func @transform_0(%arg0: i32, %arg1: i32) -> (i32, i32, i32) {
    %c0_i32 = arith.constant 0 : i32
    %c0_i32_0 = arith.constant 0 : i32
    return %arg0, %arg1, %c0_i32 : i32, i32, i32
  }
  func.func @transform_1(%arg0: i32, %arg1: i32) -> (i32, i32) {
    %c0_i32 = arith.constant 0 : i32
    %c0_i32_0 = arith.constant 0 : i32
    %c0_i32_1 = arith.constant 0 : i32
    return %c0_i32, %c0_i32_0 : i32, i32
  }
  func.func @transform_2(%arg0: i32, %arg1: i32) -> (i32, i32) {
    %c0_i32 = arith.constant 0 : i32
    %c0_i32_0 = arith.constant 0 : i32
    %c0_i32_1 = arith.constant 0 : i32
    return %c0_i32, %c0_i32_0 : i32, i32
  }
  func.func @transform_3(%arg0: i32, %arg1: i32) -> (i32, i32) {
    %c0_i32 = arith.constant 0 : i32
    %c0_i32_0 = arith.constant 0 : i32
    %c0_i32_1 = arith.constant 0 : i32
    return %c0_i32, %c0_i32_0 : i32, i32
  }
  func.func @transform_4(%arg0: i32, %arg1: i32) -> (i32, i32) {
    %c0_i32 = arith.constant 0 : i32
    %c0_i32_0 = arith.constant 0 : i32
    %c0_i32_1 = arith.constant 0 : i32
    return %c0_i32, %c0_i32_0 : i32, i32
  }
  func.func @transform_5(%arg0: i32, %arg1: i32) -> (i32, i32, i32) {
    %c0_i32 = arith.constant 0 : i32
    %c0_i32_0 = arith.constant 0 : i32
    %c0_i32_1 = arith.constant 0 : i32
    return %arg0, %c0_i32, %c0_i32_0 : i32, i32, i32
  }
}

</mosaic_0001>

<bundles_post_ra>
// kernel: style_encoder_forward.4
= control target key start
LH: loop header
LB: loop body
LE: loop exit
PB: predicated region body
PF: predicated region fallthrough
CT: control target
= control target key end

     0   :  { %s3551_s15 = smov 0   ;;  %s3553_s16 = smov 0   ;;  %s4069_s0 = inlined_call_operand.vmem [shape: bf16[2,256,1024], index: 0, kind: input, shape index: {}]   ;;  %s4070_s1 = inlined_call_operand.vmem [shape: bf16[1024,128], index: 1, kind: input, shape index: {}]   ;;  %s4071_s2 = inlined_call_operand.vmem [shape: f32[1,128], index: 2, kind: input, shape index: {}]   ;;  %s4072_s3 = inlined_call_operand.vmem [shape: bf16[2,256,128], index: 3, kind: output, shape index: {0}]   ;;  %s4073_s4 = inlined_call_operand.vmem [shape: f32[2,2,128], index: 4, kind: output, shape index: {1}]  }
   0x1   :  { %s3555_s17 = smov 0  }
   0x2 LB: > { %s27_s18 = sadd.s32 1, %s3519_s16  ;;  %p2600_p0 = scmp.ge.s32.totalorder %s3523_s17, 1  ;;  %s3523_s17 = sphi %s3555_s17, %s15_s17   ;;  %s3519_s16 = sphi %s3553_s16, %s4075_s16   ;;  %s3515_s15 = sphi %s3551_s15, %s4074_s15  }
   0x3   : > { %p29_p1 = scmp.ge.s32.totalorder %s27_s18, 2  ;;  %p187_p2 = scmp.lt.s32.totalorder %s3523_s17, 3 }
   0x5   : > { %s4077_s18 = smov (%p29_p1, %s27_s18), 0  ;;  %p188_p3 = pnand %p2600_p0, %p187_p2 }
   0x6   : > { %p227_p4 = scmp.lt.s32.totalorder (!%p188_p3), %s3515_s15, 1 }
   0x7   : > { %191 = sbr.rel (%p188_p3) target bundleno = 548 (0x224), region = 32 }
   0xc   : > { %v3435_v0 = vld [vmem:[%s4070_s1 + $0x78] sm:$0xff]   ;;  %v3439_v4 = vld [vmem:[%s4070_s1 + $0x70] sm:$0xff]   ;;  %v3443_v8 = vld [vmem:[%s4070_s1 + $0x68] sm:$0xff]   ;;  %s4079_s15 = smov (!%p227_p4, %s3515_s15), 1 }
   0xd   : > { %v3436_v1 = vld [vmem:[%s4070_s1 + $0xf8] sm:$0xff]   ;;  %2962 = vmatprep.subr.bf16.mxu0 %v3435_v0  ;;  %v3440_v5 = vld [vmem:[%s4070_s1 + $0xf0] sm:$0xff]   ;;  %v3444_v9 = vld [vmem:[%s4070_s1 + $0xe8] sm:$0xff]   ;;  %s2833_s29 = sshll.u32 %s4079_s15, 10  ;;  %s2605_s27 = sshll.u32 %s4079_s15, 1 }
   0xe   : > { %v3437_v2 = vld [vmem:[%s4070_s1 + $0x38] sm:$0xff]   ;;  %3074 = vmatprep.subr.bf16.mxu1 %v3436_v1  ;;  %v3441_v6 = vld [vmem:[%s4070_s1 + $0x30] sm:$0xff]   ;;  %v3445_v10 = vld [vmem:[%s4070_s1 + $0x28] sm:$0xff]   ;;  %s3669_s12 = scalar_lea.vmem %s4069_s0, %s2833_s29  ;;  %s250_s30 = scalar_lea.vmem %s4073_s4, %s2605_s27 }
   0xf   : > { %v3438_v3 = vld [vmem:[%s4070_s1 + $0xb8] sm:$0xff]   ;;  %2963 = vmatpush3.bf16.msra.mxu0 %v3437_v2  ;;  %v3442_v7 = vld [vmem:[%s4070_s1 + $0xb0] sm:$0xff]   ;;  %v3446_v11 = vld [vmem:[%s4070_s1 + $0xa8] sm:$0xff]  }
  0x10   : > { %3075 = vmatpush3.bf16.msra.mxu1 %v3438_v3  ;;  %2964 = vmatprep.subr.bf16.mxu0 %v3439_v4  ;;  %v3447_v12 = vld [vmem:[%s4070_s1 + $0x60] sm:$0xff]   ;;  %v3451_v16 = vld [vmem:[%s4070_s1 + $0x58] sm:$0xff]   ;;  %v3455_v20 = vld [vmem:[%s4070_s1 + $0x50] sm:$0xff]  }
  0x11   : > { %3076 = vmatprep.subr.bf16.mxu1 %v3440_v5  ;;  %v3448_v13 = vld [vmem:[%s4070_s1 + $0xe0] sm:$0xff]   ;;  %v3452_v17 = vld [vmem:[%s4070_s1 + $0xd8] sm:$0xff]   ;;  %v3456_v21 = vld [vmem:[%s4070_s1 + $0xd0] sm:$0xff]  }
  0x12   : > { %v3449_v14 = vld [vmem:[%s4070_s1 + $0x20] sm:$0xff]   ;;  %v3453_v18 = vld [vmem:[%s4070_s1 + $0x18] sm:$0xff]   ;;  %v3457_v22 = vld [vmem:[%s4070_s1 + $0x10] sm:$0xff]  }
  0x13   : > { %2965 = vmatpush3.bf16.msra.mxu0 %v3441_v6  ;;  %v3450_v15 = vld [vmem:[%s4070_s1 + $0xa0] sm:$0xff]   ;;  %v3454_v19 = vld [vmem:[%s4070_s1 + $0x98] sm:$0xff]   ;;  %v3458_v23 = vld [vmem:[%s4070_s1 + $0x90] sm:$0xff]  }
  0x14   : > { %3077 = vmatpush3.bf16.msra.mxu1 %v3442_v7  ;;  %2966 = vmatprep.subr.bf16.mxu0 %v3443_v8  ;;  %v3459_v24 = vld [vmem:[%s4070_s1 + $0x48] sm:$0xff]   ;;  %v3463_v28 = vld [vmem:[%s4070_s1 + $0x40] sm:$0xff]   ;;  %v3467_v40 = vld [vmem:[%s4070_s1 + $0x178] sm:$0xff]  }
  0x15   : > { %3078 = vmatprep.subr.bf16.mxu1 %v3444_v9  ;;  %v3460_v25 = vld [vmem:[%s4070_s1 + $0xc8] sm:$0xff]   ;;  %v3464_v29 = vld [vmem:[%s4070_s1 + $0xc0] sm:$0xff]   ;;  %v3468_v41 = vld [vmem:[%s4070_s1 + $0x138] sm:$0xff]  }
  0x16   : > { %v3461_v26 = vld [vmem:[%s4070_s1 + $0x8] sm:$0xff]   ;;  %v3465_v30 = vld [vmem:[%s4070_s1] sm:$0xff]   ;;  %v3469_v42 = vld [vmem:[%s4070_s1 + $0x1f8] sm:$0xff]  }
  0x17   : > { %2967 = vmatpush3.bf16.msra.mxu0 %v3445_v10  ;;  %v3462_v27 = vld [vmem:[%s4070_s1 + $0x88] sm:$0xff]   ;;  %v3466_v31 = vld [vmem:[%s4070_s1 + $0x80] sm:$0xff]   ;;  %v3470_v43 = vld [vmem:[%s4070_s1 + $0x1b8] sm:$0xff]  }
  0x18   : > { %3079 = vmatpush3.bf16.msra.mxu1 %v3446_v11  ;;  %2968 = vmatprep.subr.bf16.mxu0 %v3447_v12  ;;  %v258_v32 = vld [vmem:[%s3669_s12] sm:$0xff]  ;;  %v259_v34 = vld [vmem:[%s3669_s12 + $0x8] sm:$0xff]  ;;  %v3471_v55 = vld [vmem:[%s4070_s1 + $0x170] sm:$0xff]  }
  0x19   : > { %3080 = vmatprep.subr.bf16.mxu1 %v3448_v13  ;;  %v262_v33 = vld [vmem:[%s3669_s12 + $0x20] sm:$0xff]  ;;  %v263_v37 = vld [vmem:[%s3669_s12 + $0x28] sm:$0xff]  ;;  %v3472_v58 = vld [vmem:[%s4070_s1 + $0x130] sm:$0xff]  }
  0x1a   : > { %v2607_v35 = vcombine.low %v258_v32, %v262_v33  ;;  %v2608_v36 = vcombine.high %v258_v32, %v262_v33  ;;  %v2609_v38 = vcombine.low %v259_v34, %v263_v37  ;;  %v2610_v39 = vcombine.high %v259_v34, %v263_v37  ;;  %v266_v44 = vld [vmem:[%s3669_s12 + $0x40] sm:$0xff]  ;;  %v267_v47 = vld [vmem:[%s3669_s12 + $0x48] sm:$0xff]  ;;  %v3473_v60 = vld [vmem:[%s4070_s1 + $0x1f0] sm:$0xff]  }
  0x1b   : > { %2969 = vmatpush3.bf16.msra.mxu0 %v3449_v14  ;;  %v270_v45 = vld [vmem:[%s3669_s12 + $0x60] sm:$0xff]  ;;  %v271_v48 = vld [vmem:[%s3669_s12 + $0x68] sm:$0xff]  ;;  %v3474_v61 = vld [vmem:[%s4070_s1 + $0x1b0] sm:$0xff]  }
  0x1c   : > { %3081 = vmatpush3.bf16.msra.mxu1 %v3450_v15  ;;  %2970 = vmatprep.subr.bf16.mxu0 %v3451_v16  ;;  %v2616_v46 = vcombine.high %v266_v44, %v270_v45  ;;  %v274_v49 = vld [vmem:[%s3669_s12 + $0x80] sm:$0xff]  ;;  %v2618_v50 = vcombine.high %v267_v47, %v271_v48  ;;  %v275_v52 = vld [vmem:[%s3669_s12 + $0x88] sm:$0xff]  ;;  %v2615_v54 = vcombine.low %v266_v44, %v270_v45  ;;  %v3487_v34 = vld [vmem:[%s4070_s1 + $0x150] sm:$0xff]  }
  0x1d   : > { %3082 = vmatprep.subr.bf16.mxu1 %v3452_v17  ;;  %1577 = vmatprep.mubr.bf16.mxu0 %v2608_v36  ;;  %v278_v51 = vld [vmem:[%s3669_s12 + $0xa0] sm:$0xff]  ;;  %v279_v53 = vld [vmem:[%s3669_s12 + $0xa8] sm:$0xff]  ;;  %v2617_v56 = vcombine.low %v267_v47, %v271_v48  ;;  %v3488_v36 = vld [vmem:[%s4070_s1 + $0x110] sm:$0xff]  }
  0x1e   : > { %1738 = vmatprep.mubr.bf16.mxu1 %v2610_v39  ;;  %v2624_v57 = vcombine.high %v274_v49, %v278_v51  ;;  %v2626_v59 = vcombine.high %v275_v52, %v279_v53  ;;  %v282_v62 = vld [vmem:[%s3669_s12 + $0xc0] sm:$0xff]  ;;  %v283_v0 = vld [vmem:[%s3669_s12 + $0xc8] sm:$0xff]  ;;  %v2623_v3 = vcombine.low %v274_v49, %v278_v51  ;;  %v2625_v5 = vcombine.low %v275_v52, %v279_v53  ;;  %v3489_v37 = vld [vmem:[%s4070_s1 + $0x1d0] sm:$0xff]  }
  0x1f   : > { %2971 = vmatpush3.bf16.msra.mxu0 %v3453_v18  ;;  %v286_v63 = vld [vmem:[%s3669_s12 + $0xe0] sm:$0xff]  ;;  %v287_v1 = vld [vmem:[%s3669_s12 + $0xe8] sm:$0xff]  ;;  %v3490_v39 = vld [vmem:[%s4070_s1 + $0x190] sm:$0xff]  }
  0x20   : > { %3083 = vmatpush3.bf16.msra.mxu1 %v3454_v19  ;;  %2972 = vmatprep.subr.bf16.mxu0 %v3455_v20  ;;  %v3475_v2 = vld [vmem:[%s4070_s1 + $0x168] sm:$0xff]   ;;  %v2632_v6 = vcombine.high %v282_v62, %v286_v63  ;;  %v2634_v8 = vcombine.high %v283_v0, %v287_v1  ;;  %v290_v10 = vld [vmem:[%s3669_s12 + $0x100] sm:$0xff]  ;;  %v2631_v16 = vcombine.low %v282_v62, %v286_v63 }
  0x21   : > { %3084 = vmatprep.subr.bf16.mxu1 %v3456_v21  ;;  %v3476_v4 = vld [vmem:[%s4070_s1 + $0x128] sm:$0xff]   ;;  %v294_v11 = vld [vmem:[%s3669_s12 + $0x120] sm:$0xff]  ;;  %v2633_v18 = vcombine.low %v283_v0, %v287_v1 }
  0x22   : > { %v3477_v7 = vld [vmem:[%s4070_s1 + $0x1e8] sm:$0xff]   ;;  %v3479_v14 = vld [vmem:[%s4070_s1 + $0x160] sm:$0xff]   ;;  %v2640_v19 = vcombine.high %v290_v10, %v294_v11 }
  0x23   : > { %2973 = vmatpush3.bf16.msra.mxu0 %v3457_v22  ;;  %v3478_v9 = vld [vmem:[%s4070_s1 + $0x1a8] sm:$0xff]   ;;  %v3480_v15 = vld [vmem:[%s4070_s1 + $0x120] sm:$0xff]  }
  0x24   : > { %3085 = vmatpush3.bf16.msra.mxu1 %v3458_v23  ;;  %2974 = vmatprep.subr.bf16.mxu0 %v3459_v24  ;;  %v291_v12 = vld [vmem:[%s3669_s12 + $0x108] sm:$0xff]  ;;  %v3481_v17 = vld [vmem:[%s4070_s1 + $0x1e0] sm:$0xff]   ;;  %v3483_v24 = vld [vmem:[%s4070_s1 + $0x158] sm:$0xff]  }
  0x25   : > { %3086 = vmatprep.subr.bf16.mxu1 %v3460_v25  ;;  %v295_v13 = vld [vmem:[%s3669_s12 + $0x128] sm:$0xff]  ;;  %v3482_v20 = vld [vmem:[%s4070_s1 + $0x1a0] sm:$0xff]  }
  0x26   : > { %v2642_v21 = vcombine.high %v291_v12, %v295_v13  ;;  %v298_v22 = vld [vmem:[%s3669_s12 + $0x140] sm:$0xff]  ;;  %v299_v25 = vld [vmem:[%s3669_s12 + $0x148] sm:$0xff] }
  0x27   : > { %2975 = vmatpush3.bf16.msra.mxu0 %v3461_v26  ;;  %v302_v23 = vld [vmem:[%s3669_s12 + $0x160] sm:$0xff]  ;;  %v303_v26 = vld [vmem:[%s3669_s12 + $0x168] sm:$0xff] }
  0x28   : > { %3087 = vmatpush3.bf16.msra.mxu1 %v3462_v27  ;;  %2976 = vmatprep.subr.bf16.mxu0 %v3463_v28  ;;  %v3484_v27 = vld [vmem:[%s4070_s1 + $0x118] sm:$0xff]   ;;  %v2648_v32 = vcombine.high %v298_v22, %v302_v23  ;;  %v2650_v33 = vcombine.high %v299_v25, %v303_v26  ;;  %v3492_v47 = vld [vmem:[%s4070_s1 + $0x108] sm:$0xff]   ;;  %v318_v51 = vld [vmem:[%s3669_s12 + $0x1e0] sm:$0xff] }
  0x29   : > { %3088 = vmatprep.subr.bf16.mxu1 %v3464_v29  ;;  %v3485_v28 = vld [vmem:[%s4070_s1 + $0x1d8] sm:$0xff]   ;;  %v3493_v48 = vld [vmem:[%s4070_s1 + $0x1c8] sm:$0xff]   ;;  %v322_v62 = vld [vmem:[%s3669_s12 + $0x200] sm:$0xff] }
  0x2a   : > { %v3486_v29 = vld [vmem:[%s4070_s1 + $0x198] sm:$0xff]   ;;  %v3494_v49 = vld [vmem:[%s4070_s1 + $0x188] sm:$0xff]   ;;  %v326_v63 = vld [vmem:[%s3669_s12 + $0x220] sm:$0xff] }
  0x2b   : > { %2977 = vmatpush3.bf16.msra.mxu0 %v3465_v30  ;;  %v2639_v30 = vcombine.low %v290_v10, %v294_v11  ;;  %v315_v52 = vld [vmem:[%s3669_s12 + $0x1c8] sm:$0xff]  ;;  %v2671_v10 = vcombine.low %v322_v62, %v326_v63 }
  0x2c   : > { %3089 = vmatpush3.bf16.msra.mxu1 %v3466_v31  ;;  %3186 = vmatprep.subr.bf16.mxu0 %v3467_v40  ;;  %v2641_v31 = vcombine.low %v291_v12, %v295_v13  ;;  %v307_v40 = vld [vmem:[%s3669_s12 + $0x188] sm:$0xff] }
  0x2d   : > { %3298 = vmatprep.subr.bf16.mxu1 %v3469_v42  ;;  %v2647_v42 = vcombine.low %v298_v22, %v302_v23  ;;  %v319_v53 = vld [vmem:[%s3669_s12 + $0x1e8] sm:$0xff]  ;;  %v346_v22 = vld [vmem:[%s3669_s12 + $0x2c0] sm:$0xff] }
  0x2e   : > { %1578 = vmatmul.mubr.bf16.vlgmr.msra.gmra.mxu0 %v2607_v35  ;;  %v306_v35 = vld [vmem:[%s3669_s12 + $0x180] sm:$0xff]  ;;  %v323_v0 = vld [vmem:[%s3669_s12 + $0x208] sm:$0xff] }
  0x2f   : > { %1739 = vmatmul.mubr.bf16.vlgmr.msra.gmra.mxu1 %v2609_v38  ;;  %3187 = vmatpush3.bf16.msra.mxu0 %v3468_v41  ;;  %v310_v38 = vld [vmem:[%s3669_s12 + $0x1a0] sm:$0xff]  ;;  %v311_v41 = vld [vmem:[%s3669_s12 + $0x1a8] sm:$0xff] }
  0x30   : > { %3299 = vmatpush3.bf16.msra.mxu1 %v3470_v43  ;;  %1585 = vmatprep.mubr.bf16.mxu0 %v2616_v46  ;;  %v2649_v43 = vcombine.low %v299_v25, %v303_v26  ;;  %v2656_v44 = vcombine.high %v306_v35, %v310_v38  ;;  %v2658_v45 = vcombine.high %v307_v40, %v311_v41  ;;  %v3491_v46 = vld [vmem:[%s4070_s1 + $0x148] sm:$0xff]   ;;  %v350_v23 = vld [vmem:[%s3669_s12 + $0x2e0] sm:$0xff] }
  0x31   : > { %1746 = vmatprep.mubr.bf16.mxu1 %v2618_v50  ;;  %3188 = vmatprep.subr.bf16.mxu0 %v3471_v55  ;;  %v314_v50 = vld [vmem:[%s3669_s12 + $0x1c0] sm:$0xff]  ;;  %v327_v1 = vld [vmem:[%s3669_s12 + $0x228] sm:$0xff] }
  0x32   : > { %3300 = vmatprep.subr.bf16.mxu1 %v3473_v60  ;;  %v3495_v55 = vld [vmem:[%s4070_s1 + $0x140] sm:$0xff]   ;;  %v2673_v11 = vcombine.low %v323_v0, %v327_v1  ;;  %v351_v25 = vld [vmem:[%s3669_s12 + $0x2e8] sm:$0xff] }
  0x33   : > { %3189 = vmatpush3.bf16.msra.mxu0 %v3472_v58  ;;  %v3496_v58 = vld [vmem:[%s4070_s1 + $0x100] sm:$0xff]  }
  0x34   : > { %3301 = vmatpush3.bf16.msra.mxu1 %v3474_v61  ;;  %3190 = vmatprep.subr.bf16.mxu0 %v3475_v2  ;;  %v3497_v60 = vld [vmem:[%s4070_s1 + $0x1c0] sm:$0xff]   ;;  %v2663_v2 = vcombine.low %v314_v50, %v318_v51 }
  0x35   : > { %3302 = vmatprep.subr.bf16.mxu1 %v3477_v7  ;;  %v3498_v61 = vld [vmem:[%s4070_s1 + $0x180] sm:$0xff]  }
  0x36   : > { %1586 = vmatmul.mubr.bf16.gmra.mxu0 %v2615_v54  ;;  %v2655_v54 = vcombine.low %v306_v35, %v310_v38  ;;  %v334_v7 = vld [vmem:[%s3669_s12 + $0x260] sm:$0xff] }
  0x37   : > { %1747 = vmatmul.mubr.bf16.gmra.mxu1 %v2617_v56  ;;  %1593 = vmatprep.mubr.bf16.mxu0 %v2624_v57  ;;  %v2657_v56 = vcombine.low %v307_v40, %v311_v41  ;;  %v2664_v57 = vcombine.high %v314_v50, %v318_v51  ;;  %v362_v38 = vld [vmem:[%s3669_s12 + $0x340] sm:$0xff]  ;;  %v363_v40 = vld [vmem:[%s3669_s12 + $0x348] sm:$0xff] }
  0x38   : > { %1754 = vmatprep.mubr.bf16.mxu1 %v2626_v59  ;;  %3191 = vmatpush3.bf16.msra.mxu0 %v3476_v4  ;;  %v2666_v59 = vcombine.high %v315_v52, %v319_v53  ;;  %v2672_v4 = vcombine.high %v322_v62, %v326_v63  ;;  %v367_v41 = vld [vmem:[%s3669_s12 + $0x368] sm:$0xff]  ;;  %v260_v62 = vld [vmem:[%s3669_s12 + $0x10] sm:$0xff] }
  0x39   : > { %3303 = vmatpush3.bf16.msra.mxu1 %v3478_v9  ;;  %3192 = vmatprep.subr.bf16.mxu0 %v3479_v14  ;;  %v335_v9 = vld [vmem:[%s3669_s12 + $0x268] sm:$0xff]  ;;  %v338_v14 = vld [vmem:[%s3669_s12 + $0x280] sm:$0xff]  ;;  %v2713_v51 = vcombine.low %v363_v40, %v367_v41  ;;  %v264_v63 = vld [vmem:[%s3669_s12 + $0x30] sm:$0xff] }
  0x3a   : > { %3304 = vmatprep.subr.bf16.mxu1 %v3481_v17  ;;  %v343_v17 = vld [vmem:[%s3669_s12 + $0x2a8] sm:$0xff] }
  0x3c   : > { %3193 = vmatpush3.bf16.msra.mxu0 %v3480_v15  ;;  %v342_v15 = vld [vmem:[%s3669_s12 + $0x2a0] sm:$0xff] }
  0x3d   : > { %3305 = vmatpush3.bf16.msra.mxu1 %v3482_v20  ;;  %3194 = vmatprep.subr.bf16.mxu0 %v3483_v24  ;;  %v2688_v20 = vcombine.high %v338_v14, %v342_v15  ;;  %v347_v24 = vld [vmem:[%s3669_s12 + $0x2c8] sm:$0xff]  ;;  %v2687_v26 = vcombine.low %v338_v14, %v342_v15  ;;  %v276_v14 = vld [vmem:[%s3669_s12 + $0x90] sm:$0xff] }
  0x3e   : > { %1594 = vmatmul.mubr.bf16.gmra.mxu0 %v2623_v3  ;;  %3306 = vmatprep.subr.bf16.mxu1 %v3485_v28  ;;  %v2665_v3 = vcombine.low %v315_v52, %v319_v53  ;;  %v2696_v28 = vcombine.high %v346_v22, %v350_v23  ;;  %v2697_v35 = vcombine.low %v347_v24, %v351_v25  ;;  %v280_v15 = vld [vmem:[%s3669_s12 + $0xb0] sm:$0xff] }
  0x3f   : > { %1755 = vmatmul.mubr.bf16.gmra.mxu1 %v2625_v5  ;;  %1601 = vmatprep.mubr.bf16.mxu0 %v2632_v6  ;;  %v2674_v5 = vcombine.high %v323_v0, %v327_v1  ;;  %v330_v6 = vld [vmem:[%s3669_s12 + $0x240] sm:$0xff]  ;;  %v261_v0 = vld [vmem:[%s3669_s12 + $0x18] sm:$0xff] }
  0x40   : > { %1762 = vmatprep.mubr.bf16.mxu1 %v2634_v8  ;;  %3195 = vmatpush3.bf16.msra.mxu0 %v3484_v27  ;;  %v331_v8 = vld [vmem:[%s3669_s12 + $0x248] sm:$0xff]  ;;  %v2680_v12 = vcombine.high %v330_v6, %v334_v7  ;;  %v265_v1 = vld [vmem:[%s3669_s12 + $0x38] sm:$0xff] }
  0x41   : > { %3307 = vmatpush3.bf16.msra.mxu1 %v3486_v29  ;;  %3196 = vmatprep.subr.bf16.mxu0 %v3487_v34  ;;  %v2682_v13 = vcombine.high %v331_v8, %v335_v9  ;;  %v2698_v29 = vcombine.high %v347_v24, %v351_v25  ;;  %v2695_v34 = vcombine.low %v346_v22, %v350_v23  ;;  %v284_v22 = vld [vmem:[%s3669_s12 + $0xd0] sm:$0xff]  ;;  %v285_v24 = vld [vmem:[%s3669_s12 + $0xd8] sm:$0xff] }
  0x42   : > { %3308 = vmatprep.subr.bf16.mxu1 %v3489_v37  ;;  %v288_v23 = vld [vmem:[%s3669_s12 + $0xf0] sm:$0xff]  ;;  %v289_v25 = vld [vmem:[%s3669_s12 + $0xf8] sm:$0xff] }
  0x44   : > { %3197 = vmatpush3.bf16.msra.mxu0 %v3488_v36 }
  0x45   : > { %3309 = vmatpush3.bf16.msra.mxu1 %v3490_v39  ;;  %3198 = vmatprep.subr.bf16.mxu0 %v3491_v46  ;;  %v366_v39 = vld [vmem:[%s3669_s12 + $0x360] sm:$0xff] }
  0x46   : > { %1602 = vmatmul.mubr.bf16.gmra.mxu0 %v2631_v16  ;;  %3310 = vmatprep.subr.bf16.mxu1 %v3493_v48  ;;  %v339_v16 = vld [vmem:[%s3669_s12 + $0x288] sm:$0xff]  ;;  %v370_v46 = vld [vmem:[%s3669_s12 + $0x380] sm:$0xff]  ;;  %v2711_v50 = vcombine.low %v362_v38, %v366_v39 }
  0x47   : > { %1763 = vmatmul.mubr.bf16.gmra.mxu1 %v2633_v18  ;;  %1609 = vmatprep.mubr.bf16.mxu0 %v2640_v19  ;;  %v2679_v18 = vcombine.low %v330_v6, %v334_v7  ;;  %v2681_v19 = vcombine.low %v331_v8, %v335_v9  ;;  %v2689_v27 = vcombine.low %v339_v16, %v343_v17  ;;  %v371_v48 = vld [vmem:[%s3669_s12 + $0x388] sm:$0xff]  ;;  %v268_v6 = vld [vmem:[%s3669_s12 + $0x50] sm:$0xff]  ;;  %v269_v8 = vld [vmem:[%s3669_s12 + $0x58] sm:$0xff] }
  0x48   : > { %1770 = vmatprep.mubr.bf16.mxu1 %v2642_v21  ;;  %3199 = vmatpush3.bf16.msra.mxu0 %v3492_v47  ;;  %v2690_v21 = vcombine.high %v339_v16, %v343_v17  ;;  %v374_v47 = vld [vmem:[%s3669_s12 + $0x3a0] sm:$0xff]  ;;  %v272_v7 = vld [vmem:[%s3669_s12 + $0x70] sm:$0xff]  ;;  %v273_v9 = vld [vmem:[%s3669_s12 + $0x78] sm:$0xff] }
  0x49   : > { %3311 = vmatpush3.bf16.msra.mxu1 %v3494_v49  ;;  %3200 = vmatprep.subr.bf16.mxu0 %v3495_v55  ;;  %v375_v49 = vld [vmem:[%s3669_s12 + $0x3a8] sm:$0xff]  ;;  %v2720_v52 = vcombine.high %v370_v46, %v374_v47  ;;  %v382_v55 = vld [vmem:[%s3669_s12 + $0x3e0] sm:$0xff]  ;;  %v277_v16 = vld [vmem:[%s3669_s12 + $0x98] sm:$0xff] }
  0x4a   : > { %3312 = vmatprep.subr.bf16.mxu1 %v3497_v60  ;;  %v2722_v53 = vcombine.high %v371_v48, %v375_v49  ;;  %v281_v17 = vld [vmem:[%s3669_s12 + $0xb8] sm:$0xff] }
  0x4c   : > { %3201 = vmatpush3.bf16.msra.mxu0 %v3496_v58  ;;  %v2719_v58 = vcombine.low %v370_v46, %v374_v47  ;;  %v308_v46 = vld [vmem:[%s3669_s12 + $0x190] sm:$0xff] }
  0x4d   : > { %3313 = vmatpush3.bf16.msra.mxu1 %v3498_v61  ;;  %v312_v47 = vld [vmem:[%s3669_s12 + $0x1b0] sm:$0xff] }
  0x4e   : > { %1610 = vmatmul.mubr.bf16.gmra.mxu0 %v2639_v30  ;;  %v354_v30 = vld [vmem:[%s3669_s12 + $0x300] sm:$0xff] }
  0x4f   : > { %1771 = vmatmul.mubr.bf16.gmra.mxu1 %v2641_v31  ;;  %1617 = vmatprep.mubr.bf16.mxu0 %v2648_v32  ;;  %v358_v31 = vld [vmem:[%s3669_s12 + $0x320] sm:$0xff]  ;;  %v355_v32 = vld [vmem:[%s3669_s12 + $0x308] sm:$0xff] }
  0x50   : > { %1778 = vmatprep.mubr.bf16.mxu1 %v2650_v33  ;;  %v359_v33 = vld [vmem:[%s3669_s12 + $0x328] sm:$0xff]  ;;  %v2704_v36 = vcombine.high %v354_v30, %v358_v31 }
  0x51   : > { %v2706_v37 = vcombine.high %v355_v32, %v359_v33 }
  0x56   : > { %1618 = vmatmul.mubr.bf16.gmra.mxu0 %v2647_v42  ;;  %v2703_v42 = vcombine.low %v354_v30, %v358_v31  ;;  %v292_v30 = vld [vmem:[%s3669_s12 + $0x110] sm:$0xff] }
  0x57   : > { %1779 = vmatmul.mubr.bf16.gmra.mxu1 %v2649_v43  ;;  %1625 = vmatprep.mubr.bf16.mxu0 %v2656_v44  ;;  %v2705_v43 = vcombine.low %v355_v32, %v359_v33  ;;  %v2712_v44 = vcombine.high %v362_v38, %v366_v39  ;;  %v296_v31 = vld [vmem:[%s3669_s12 + $0x130] sm:$0xff]  ;;  %v293_v32 = vld [vmem:[%s3669_s12 + $0x118] sm:$0xff] }
  0x58   : > { %1786 = vmatprep.mubr.bf16.mxu1 %v2658_v45  ;;  %v2714_v45 = vcombine.high %v363_v40, %v367_v41  ;;  %v297_v33 = vld [vmem:[%s3669_s12 + $0x138] sm:$0xff]  ;;  %v300_v38 = vld [vmem:[%s3669_s12 + $0x150] sm:$0xff] }
  0x59   : > { %v304_v39 = vld [vmem:[%s3669_s12 + $0x170] sm:$0xff]  ;;  %v301_v40 = vld [vmem:[%s3669_s12 + $0x158] sm:$0xff] }
  0x5a   : > { %v305_v41 = vld [vmem:[%s3669_s12 + $0x178] sm:$0xff] }
  0x5e   : > { %1626 = vmatmul.mubr.bf16.gmra.mxu0 %v2655_v54  ;;  %v378_v54 = vld [vmem:[%s3669_s12 + $0x3c0] sm:$0xff] }
  0x5f   : > { %1787 = vmatmul.mubr.bf16.gmra.mxu1 %v2657_v56  ;;  %1633 = vmatprep.mubr.bf16.mxu0 %v2664_v57  ;;  %v379_v56 = vld [vmem:[%s3669_s12 + $0x3c8] sm:$0xff]  ;;  %v2728_v60 = vcombine.high %v378_v54, %v382_v55 }
  0x60   : > { %1794 = vmatprep.mubr.bf16.mxu1 %v2666_v59  ;;  %v383_v57 = vld [vmem:[%s3669_s12 + $0x3e8] sm:$0xff]  ;;  %v2721_v59 = vcombine.low %v371_v48, %v375_v49  ;;  %v309_v48 = vld [vmem:[%s3669_s12 + $0x198] sm:$0xff] }
  0x61   : > { %v2730_v61 = vcombine.high %v379_v56, %v383_v57  ;;  %v313_v49 = vld [vmem:[%s3669_s12 + $0x1b8] sm:$0xff] }
  0x66   : > { %1634 = vmatmul.mubr.bf16.gmra.mxu0 %v2663_v2  ;;  %v2727_v2 = vcombine.low %v378_v54, %v382_v55  ;;  %v316_v54 = vld [vmem:[%s3669_s12 + $0x1d0] sm:$0xff] }
  0x67   : > { %1795 = vmatmul.mubr.bf16.gmra.mxu1 %v2665_v3  ;;  %1641 = vmatprep.mubr.bf16.mxu0 %v2672_v4  ;;  %v2729_v3 = vcombine.low %v379_v56, %v383_v57  ;;  %v2612_v4 = vcombine.high %v260_v62, %v264_v63  ;;  %v320_v55 = vld [vmem:[%s3669_s12 + $0x1f0] sm:$0xff]  ;;  %v317_v56 = vld [vmem:[%s3669_s12 + $0x1d8] sm:$0xff] }
  0x68   : > { %1802 = vmatprep.mubr.bf16.mxu1 %v2674_v5  ;;  %v2614_v5 = vcombine.high %v261_v0, %v265_v1  ;;  %v321_v57 = vld [vmem:[%s3669_s12 + $0x1f8] sm:$0xff] }
  0x6e   : > { %1642 = vmatmul.mubr.bf16.gmra.mxu0 %v2671_v10  ;;  %v2611_v10 = vcombine.low %v260_v62, %v264_v63  ;;  %v324_v62 = vld [vmem:[%s3669_s12 + $0x210] sm:$0xff] }
  0x6f   : > { %1803 = vmatmul.mubr.bf16.gmra.mxu1 %v2673_v11  ;;  %1649 = vmatprep.mubr.bf16.mxu0 %v2680_v12  ;;  %v2613_v11 = vcombine.low %v261_v0, %v265_v1  ;;  %v2620_v12 = vcombine.high %v268_v6, %v272_v7  ;;  %v328_v63 = vld [vmem:[%s3669_s12 + $0x230] sm:$0xff]  ;;  %v325_v0 = vld [vmem:[%s3669_s12 + $0x218] sm:$0xff] }
  0x70   : > { %1810 = vmatprep.mubr.bf16.mxu1 %v2682_v13  ;;  %v2622_v13 = vcombine.high %v269_v8, %v273_v9  ;;  %v329_v1 = vld [vmem:[%s3669_s12 + $0x238] sm:$0xff] }
  0x76   : > { %1650 = vmatmul.mubr.bf16.gmra.mxu0 %v2679_v18  ;;  %v2619_v18 = vcombine.low %v268_v6, %v272_v7  ;;  %v332_v6 = vld [vmem:[%s3669_s12 + $0x250] sm:$0xff] }
  0x77   : > { %1811 = vmatmul.mubr.bf16.gmra.mxu1 %v2681_v19  ;;  %1657 = vmatprep.mubr.bf16.mxu0 %v2688_v20  ;;  %v2621_v19 = vcombine.low %v269_v8, %v273_v9  ;;  %v2628_v20 = vcombine.high %v276_v14, %v280_v15  ;;  %v336_v7 = vld [vmem:[%s3669_s12 + $0x270] sm:$0xff]  ;;  %v333_v8 = vld [vmem:[%s3669_s12 + $0x258] sm:$0xff] }
  0x78   : > { %1818 = vmatprep.mubr.bf16.mxu1 %v2690_v21  ;;  %v2630_v21 = vcombine.high %v277_v16, %v281_v17  ;;  %v337_v9 = vld [vmem:[%s3669_s12 + $0x278] sm:$0xff] }
  0x7e   : > { %1658 = vmatmul.mubr.bf16.gmra.mxu0 %v2687_v26  ;;  %v2627_v26 = vcombine.low %v276_v14, %v280_v15 }
  0x7f   : > { %1819 = vmatmul.mubr.bf16.gmra.mxu1 %v2689_v27  ;;  %1665 = vmatprep.mubr.bf16.mxu0 %v2696_v28  ;;  %v2629_v27 = vcombine.low %v277_v16, %v281_v17  ;;  %v2636_v28 = vcombine.high %v284_v22, %v288_v23  ;;  %v3880_v16 = vld [vmem:[%s4071_s2] ss:$0 sm:$0xff] }
  0x80   : > { %1826 = vmatprep.mubr.bf16.mxu1 %v2698_v29  ;;  %v2638_v29 = vcombine.high %v285_v24, %v289_v25 }
  0x86   : > { %1666 = vmatmul.mubr.bf16.gmra.mxu0 %v2695_v34  ;;  %v2635_v34 = vcombine.low %v284_v22, %v288_v23  ;;  %v341_v22 = vld [vmem:[%s3669_s12 + $0x298] sm:$0xff] }
  0x87   : > { %1827 = vmatmul.mubr.bf16.gmra.mxu1 %v2697_v35  ;;  %1673 = vmatprep.mubr.bf16.mxu0 %v2704_v36  ;;  %v2637_v35 = vcombine.low %v285_v24, %v289_v25  ;;  %v2644_v36 = vcombine.high %v292_v30, %v296_v31  ;;  %v345_v23 = vld [vmem:[%s3669_s12 + $0x2b8] sm:$0xff] }
  0x88   : > { %1834 = vmatprep.mubr.bf16.mxu1 %v2706_v37  ;;  %v2646_v37 = vcombine.high %v293_v32, %v297_v33 }
  0x8e   : > { %1674 = vmatmul.mubr.bf16.gmra.mxu0 %v2703_v42  ;;  %v2643_v42 = vcombine.low %v292_v30, %v296_v31 }
  0x8f   : > { %1835 = vmatmul.mubr.bf16.gmra.mxu1 %v2705_v43  ;;  %1681 = vmatprep.mubr.bf16.mxu0 %v2712_v44  ;;  %v2645_v43 = vcombine.low %v293_v32, %v297_v33  ;;  %v2652_v44 = vcombine.high %v300_v38, %v304_v39  ;;  %v2694_v32 = vcombine.high %v341_v22, %v345_v23 }
  0x90   : > { %1842 = vmatprep.mubr.bf16.mxu1 %v2714_v45  ;;  %v2654_v45 = vcombine.high %v301_v40, %v305_v41 }
  0x96   : > { %1682 = vmatmul.mubr.bf16.gmra.mxu0 %v2711_v50  ;;  %v2651_v50 = vcombine.low %v300_v38, %v304_v39 }
  0x97   : > { %1843 = vmatmul.mubr.bf16.gmra.mxu1 %v2713_v51  ;;  %1689 = vmatprep.mubr.bf16.mxu0 %v2720_v52  ;;  %v2653_v51 = vcombine.low %v301_v40, %v305_v41  ;;  %v2660_v52 = vcombine.high %v308_v46, %v312_v47  ;;  %v348_v41 = vld [vmem:[%s3669_s12 + $0x2d0] sm:$0xff] }
  0x98   : > { %1850 = vmatprep.mubr.bf16.mxu1 %v2722_v53  ;;  %v2662_v53 = vcombine.high %v309_v48, %v313_v49 }
  0x9e   : > { %1690 = vmatmul.mubr.bf16.gmra.mxu0 %v2719_v58  ;;  %v2659_v58 = vcombine.low %v308_v46, %v312_v47  ;;  %v349_v46 = vld [vmem:[%s3669_s12 + $0x2d8] sm:$0xff] }
  0x9f   : > { %1851 = vmatmul.mubr.bf16.gmra.mxu1 %v2721_v59  ;;  %1697 = vmatprep.mubr.bf16.mxu0 %v2728_v60  ;;  %v2661_v59 = vcombine.low %v309_v48, %v313_v49  ;;  %v2668_v60 = vcombine.high %v316_v54, %v320_v55  ;;  %v353_v47 = vld [vmem:[%s3669_s12 + $0x2f8] sm:$0xff] }
  0xa0   : > { %1858 = vmatprep.mubr.bf16.mxu1 %v2730_v61  ;;  %v2670_v61 = vcombine.high %v317_v56, %v321_v57 }
  0xa6   : > { %1698 = vmatmul.mubr.bf16.gmra.mxu0 %v2727_v2  ;;  %v2667_v2 = vcombine.low %v316_v54, %v320_v55 }
  0xa7   : > { %1859 = vmatmul.mubr.bf16.gmra.mxu1 %v2729_v3  ;;  %1899 = vmatprep.mubr.bf16.mxu0 %v2612_v4  ;;  %v2669_v3 = vcombine.low %v317_v56, %v321_v57  ;;  %v2676_v4 = vcombine.high %v324_v62, %v328_v63  ;;  %v2702_v56 = vcombine.high %v349_v46, %v353_v47 }
  0xa8   : > { %2060 = vmatprep.mubr.bf16.mxu1 %v2614_v5  ;;  %v2678_v5 = vcombine.high %v325_v0, %v329_v1 }
  0xae   : > { %1900 = vmatmul.mubr.bf16.vlgmr.msra.gmra.mxu0 %v2611_v10  ;;  %v2675_v10 = vcombine.low %v324_v62, %v328_v63 }
  0xaf   : > { %2061 = vmatmul.mubr.bf16.vlgmr.msra.gmra.mxu1 %v2613_v11  ;;  %1907 = vmatprep.mubr.bf16.mxu0 %v2620_v12  ;;  %v2677_v11 = vcombine.low %v325_v0, %v329_v1  ;;  %v2684_v12 = vcombine.high %v332_v6, %v336_v7  ;;  %v356_v1 = vld [vmem:[%s3669_s12 + $0x310] sm:$0xff] }
  0xb0   : > { %2068 = vmatprep.mubr.bf16.mxu1 %v2622_v13  ;;  %v2686_v13 = vcombine.high %v333_v8, %v337_v9 }
  0xb6   : > { %1908 = vmatmul.mubr.bf16.gmra.mxu0 %v2619_v18  ;;  %v340_v18 = vld [vmem:[%s3669_s12 + $0x290] sm:$0xff] }
  0xb7   : > { %2069 = vmatmul.mubr.bf16.gmra.mxu1 %v2621_v19  ;;  %1915 = vmatprep.mubr.bf16.mxu0 %v2628_v20  ;;  %v344_v19 = vld [vmem:[%s3669_s12 + $0x2b0] sm:$0xff] }
  0xb8   : > { %2076 = vmatprep.mubr.bf16.mxu1 %v2630_v21  ;;  %v2692_v30 = vcombine.high %v340_v18, %v344_v19 }
  0xbe   : > { %1916 = vmatmul.mubr.bf16.gmra.mxu0 %v2627_v26  ;;  %v2683_v26 = vcombine.low %v332_v6, %v336_v7  ;;  %v357_v6 = vld [vmem:[%s3669_s12 + $0x318] sm:$0xff] }
  0xbf   : > { %2077 = vmatmul.mubr.bf16.gmra.mxu1 %v2629_v27  ;;  %1923 = vmatprep.mubr.bf16.mxu0 %v2636_v28  ;;  %v361_v7 = vld [vmem:[%s3669_s12 + $0x338] sm:$0xff] }
  0xc0   : > { %2084 = vmatprep.mubr.bf16.mxu1 %v2638_v29  ;;  %v2685_v29 = vcombine.low %v333_v8, %v337_v9 }
  0xc6   : > { %1924 = vmatmul.mubr.bf16.gmra.mxu0 %v2635_v34 }
  0xc7   : > { %2085 = vmatmul.mubr.bf16.gmra.mxu1 %v2637_v35  ;;  %1931 = vmatprep.mubr.bf16.mxu0 %v2644_v36 }
  0xc8   : > { %2092 = vmatprep.mubr.bf16.mxu1 %v2646_v37 }
  0xce   : > { %1932 = vmatmul.mubr.bf16.gmra.mxu0 %v2643_v42  ;;  %v352_v42 = vld [vmem:[%s3669_s12 + $0x2f0] sm:$0xff] }
  0xcf   : > { %2093 = vmatmul.mubr.bf16.gmra.mxu1 %v2645_v43  ;;  %1939 = vmatprep.mubr.bf16.mxu0 %v2652_v44  ;;  %v2700_v54 = vcombine.high %v348_v41, %v352_v42 }
  0xd0   : > { %2100 = vmatprep.mubr.bf16.mxu1 %v2654_v45 }
  0xd6   : > { %1940 = vmatmul.mubr.bf16.gmra.mxu0 %v2651_v50  ;;  %v2691_v50 = vcombine.low %v340_v18, %v344_v19 }
  0xd7   : > { %2101 = vmatmul.mubr.bf16.gmra.mxu1 %v2653_v51  ;;  %1947 = vmatprep.mubr.bf16.mxu0 %v2660_v52 }
  0xd8   : > { %2108 = vmatprep.mubr.bf16.mxu1 %v2662_v53  ;;  %v2693_v53 = vcombine.low %v341_v22, %v345_v23 }
  0xde   : > { %1948 = vmatmul.mubr.bf16.gmra.mxu0 %v2659_v58 }
  0xdf   : > { %2109 = vmatmul.mubr.bf16.gmra.mxu1 %v2661_v59  ;;  %1955 = vmatprep.mubr.bf16.mxu0 %v2668_v60 }
  0xe0   : > { %2116 = vmatprep.mubr.bf16.mxu1 %v2670_v61 }
  0xe6   : > { %1956 = vmatmul.mubr.bf16.gmra.mxu0 %v2667_v2  ;;  %v360_v2 = vld [vmem:[%s3669_s12 + $0x330] sm:$0xff] }
  0xe7   : > { %2117 = vmatmul.mubr.bf16.gmra.mxu1 %v2669_v3  ;;  %1963 = vmatprep.mubr.bf16.mxu0 %v2676_v4 }
  0xe8   : > { %2124 = vmatprep.mubr.bf16.mxu1 %v2678_v5 }
  0xee   : > { %v2978_v14 = vpop.f32.mrf.mxu0  ;;  %1964 = vmatmul.mubr.bf16.gmra.mxu0 %v2675_v10  ;;  %v2699_v10 = vcombine.low %v348_v41, %v352_v42 }
  0xef   : > { %v3090_v15 = vpop.f32.mrf.mxu1  ;;  %2125 = vmatmul.mubr.bf16.gmra.mxu1 %v2677_v11  ;;  %1971 = vmatprep.mubr.bf16.mxu0 %v2684_v12 }
  0xf0   : > { %v2979_v17 = vpop.f32.mrf.mxu0  ;;  %2132 = vmatprep.mubr.bf16.mxu1 %v2686_v13  ;;  %v2701_v13 = vcombine.low %v349_v46, %v353_v47 }
  0xf1   : > { %v2980_v20 = vadd.f32 %v2979_v17, %v2978_v14  ;;  %v3091_v21 = vpop.f32.mrf.mxu1  ;;  %v2708_v14 = vcombine.high %v356_v1, %v360_v2  ;;  %v2710_v17 = vcombine.high %v357_v6, %v361_v7 }
  0xf2   : > { %v3092_v24 = vadd.f32 %v3091_v21, %v3090_v15  ;;  %v2981_v25 = vpop.f32.mrf.mxu0 }
  0xf3   : > { %v1580_v27 = vadd.f32 %v2980_v20, %v3880_v16  ;;  %v3093_v28 = vpop.f32.mrf.mxu1 }
  0xf4   : > { %v2982_v31 = vpop.f32.mrf.mxu0 }
  0xf5   : > { %v3887_v33 = vadd.f32 %v3092_v24, %v1580_v27  ;;  %v2983_v34 = vadd.f32 %v2982_v31, %v2981_v25  ;;  %v3094_v35 = vpop.f32.mrf.mxu1  ;;  %v368_v27 = vld [vmem:[%s3669_s12 + $0x370] sm:$0xff]  ;;  %v365_v31 = vld [vmem:[%s3669_s12 + $0x358] sm:$0xff] }
  0xf6   : > { %v3095_v36 = vadd.f32 %v3094_v35, %v3093_v28  ;;  %v2984_v37 = vpop.f32.mrf.mxu0  ;;  %1972 = vmatmul.mubr.bf16.gmra.mxu0 %v2683_v26  ;;  %v364_v26 = vld [vmem:[%s3669_s12 + $0x350] sm:$0xff] }
  0xf7   : > { %v1583_v38 = vadd.f32 %v2983_v34, %v3880_v16  ;;  %v3096_v39 = vpop.f32.mrf.mxu1  ;;  %2133 = vmatmul.mubr.bf16.gmra.mxu1 %v2685_v29  ;;  %1979 = vmatprep.mubr.bf16.mxu0 %v2692_v30 }
  0xf8   : > { %v2985_v40 = vpop.f32.mrf.mxu0  ;;  %2140 = vmatprep.mubr.bf16.mxu1 %v2694_v32  ;;  %v369_v32 = vld [vmem:[%s3669_s12 + $0x378] sm:$0xff] }
  0xf9   : > { %v3892_v43 = vadd.f32 %v3095_v36, %v1583_v38  ;;  %v2986_v44 = vadd.f32 %v2985_v40, %v2984_v37  ;;  %v3097_v45 = vpop.f32.mrf.mxu1  ;;  %v2707_v36 = vcombine.low %v356_v1, %v360_v2  ;;  %v2716_v40 = vcombine.high %v364_v26, %v368_v27 }
  0xfa   : > { %v3098_v48 = vadd.f32 %v3097_v45, %v3096_v39  ;;  %v2987_v49 = vpop.f32.mrf.mxu0  ;;  %v2709_v39 = vcombine.low %v357_v6, %v361_v7  ;;  %v2718_v42 = vcombine.high %v365_v31, %v369_v32  ;;  %v2717_v1 = vcombine.low %v365_v31, %v369_v32 }
  0xfb   : > { %v1588_v51 = vadd.f32 %v2986_v44, %v3880_v16  ;;  %v3099_v52 = vpop.f32.mrf.mxu1 }
  0xfc   : > { %v2988_v55 = vpop.f32.mrf.mxu0 }
  0xfd   : > { %v3897_v57 = vadd.f32 %v3098_v48, %v1588_v51  ;;  %v2989_v58 = vadd.f32 %v2988_v55, %v2987_v49  ;;  %v3100_v59 = vpop.f32.mrf.mxu1 }
  0xfe   : > { %v3101_v60 = vadd.f32 %v3100_v59, %v3099_v52  ;;  %v2990_v61 = vpop.f32.mrf.mxu0  ;;  %1980 = vmatmul.mubr.bf16.gmra.mxu0 %v2691_v50  ;;  %v372_v52 = vld [vmem:[%s3669_s12 + $0x390] sm:$0xff]  ;;  %v377_v59 = vld [vmem:[%s3669_s12 + $0x3b8] sm:$0xff] }
  0xff   : > { %v1591_v62 = vadd.f32 %v2989_v58, %v3880_v16  ;;  %v3102_v63 = vpop.f32.mrf.mxu1  ;;  %2141 = vmatmul.mubr.bf16.gmra.mxu1 %v2693_v53  ;;  %1987 = vmatprep.mubr.bf16.mxu0 %v2700_v54  ;;  %v376_v53 = vld [vmem:[%s3669_s12 + $0x3b0] sm:$0xff]  ;;  %v373_v58 = vld [vmem:[%s3669_s12 + $0x398] sm:$0xff] }
 0x100   : > { %v2991_v0 = vpop.f32.mrf.mxu0  ;;  %2148 = vmatprep.mubr.bf16.mxu1 %v2702_v56  ;;  %v2724_v2 = vcombine.high %v372_v52, %v376_v53 }
 0x101   : > { %v3902_v3 = vadd.f32 %v3101_v60, %v1591_v62  ;;  %v2992_v4 = vadd.f32 %v2991_v0, %v2990_v61  ;;  %v3103_v5 = vpop.f32.mrf.mxu1  ;;  %v2715_v62 = vcombine.low %v364_v26, %v368_v27 }
 0x102   : > { %v3104_v8 = vadd.f32 %v3103_v5, %v3102_v63  ;;  %v2993_v9 = vpop.f32.mrf.mxu0  ;;  %v2726_v5 = vcombine.high %v373_v58, %v377_v59 }
 0x103   : > { %v1596_v11 = vadd.f32 %v2992_v4, %v3880_v16  ;;  %v3105_v12 = vpop.f32.mrf.mxu1 }
 0x104   : > { %v2994_v15 = vpop.f32.mrf.mxu0 }
 0x105   : > { %v3907_v18 = vadd.f32 %v3104_v8, %v1596_v11  ;;  %v2995_v19 = vadd.f32 %v2994_v15, %v2993_v9  ;;  %v3106_v20 = vpop.f32.mrf.mxu1  ;;  %v384_v15 = vld [vmem:[%s3669_s12 + $0x3f0] sm:$0xff] }
 0x106   : > { %v3107_v21 = vadd.f32 %v3106_v20, %v3105_v12  ;;  %v2996_v22 = vpop.f32.mrf.mxu0  ;;  %1988 = vmatmul.mubr.bf16.gmra.mxu0 %v2699_v10 }
 0x107   : > { %v1599_v23 = vadd.f32 %v2995_v19, %v3880_v16  ;;  %v3108_v24 = vpop.f32.mrf.mxu1  ;;  %2149 = vmatmul.mubr.bf16.gmra.mxu1 %v2701_v13  ;;  %1995 = vmatprep.mubr.bf16.mxu0 %v2708_v14  ;;  %v380_v14 = vld [vmem:[%s3669_s12 + $0x3d0] sm:$0xff] }
 0x108   : > { %v2997_v25 = vpop.f32.mrf.mxu0  ;;  %2156 = vmatprep.mubr.bf16.mxu1 %v2710_v17 }
 0x109   : > { %v3912_v28 = vadd.f32 %v3107_v21, %v1599_v23  ;;  %v2998_v29 = vadd.f32 %v2997_v25, %v2996_v22  ;;  %v3109_v30 = vpop.f32.mrf.mxu1  ;;  %v381_v21 = vld [vmem:[%s3669_s12 + $0x3d8] sm:$0xff]  ;;  %v2723_v25 = vcombine.low %v372_v52, %v376_v53 }
 0x10a   : > { %v3110_v34 = vadd.f32 %v3109_v30, %v3108_v24  ;;  %v2999_v35 = vpop.f32.mrf.mxu0  ;;  %v385_v22 = vld [vmem:[%s3669_s12 + $0x3f8] sm:$0xff]  ;;  %v2732_v30 = vcombine.high %v380_v14, %v384_v15  ;;  %s2834_s12 = sshll.u32 %s4079_s15, 7 }
 0x10b   : > { %v1604_v37 = vadd.f32 %v2998_v29, %v3880_v16  ;;  %v3111_v38 = vpop.f32.mrf.mxu1  ;;  %v2725_v29 = vcombine.low %v373_v58, %v377_v59  ;;  %v2734_v32 = vcombine.high %v381_v21, %v385_v22  ;;  %v2733_v52 = vcombine.low %v381_v21, %v385_v22  ;;  %s4008_s26 = scalar_lea.vmem %s4072_s3, %s2834_s12 }
 0x10c   : > { %v3000_v41 = vpop.f32.mrf.mxu0 }
 0x10d   : > { %v3917_v44 = vadd.f32 %v3110_v34, %v1604_v37  ;;  %v3001_v45 = vadd.f32 %v3000_v41, %v2999_v35  ;;  %v3112_v46 = vpop.f32.mrf.mxu1 }
 0x10e   : > { %v3113_v47 = vadd.f32 %v3112_v46, %v3111_v38  ;;  %v3002_v48 = vpop.f32.mrf.mxu0  ;;  %1996 = vmatmul.mubr.bf16.gmra.mxu0 %v2707_v36 }
 0x10f   : > { %v1607_v49 = vadd.f32 %v3001_v45, %v3880_v16  ;;  %v3114_v50 = vpop.f32.mrf.mxu1  ;;  %2157 = vmatmul.mubr.bf16.gmra.mxu1 %v2709_v39  ;;  %2003 = vmatprep.mubr.bf16.mxu0 %v2716_v40 }
 0x110   : > { %v3003_v51 = vpop.f32.mrf.mxu0  ;;  %2164 = vmatprep.mubr.bf16.mxu1 %v2718_v42 }
 0x111   : > { %v3922_v54 = vadd.f32 %v3113_v47, %v1607_v49  ;;  %v3004_v55 = vadd.f32 %v3003_v51, %v3002_v48  ;;  %v3115_v56 = vpop.f32.mrf.mxu1  ;;  %v2731_v49 = vcombine.low %v380_v14, %v384_v15 }
 0x112   : > { %v3116_v60 = vadd.f32 %v3115_v56, %v3114_v50  ;;  %v3005_v61 = vpop.f32.mrf.mxu0 }
 0x113   : > { %v1612_v63 = vadd.f32 %v3004_v55, %v3880_v16  ;;  %v3117_v0 = vpop.f32.mrf.mxu1 }
 0x114   : > { %v3006_v4 = vpop.f32.mrf.mxu0 }
 0x115   : > { %v3927_v6 = vadd.f32 %v3116_v60, %v1612_v63  ;;  %v3007_v7 = vadd.f32 %v3006_v4, %v3005_v61  ;;  %v3118_v8 = vpop.f32.mrf.mxu1 }
 0x116   : > { %v3119_v9 = vadd.f32 %v3118_v8, %v3117_v0  ;;  %v3008_v10 = vpop.f32.mrf.mxu0  ;;  %2004 = vmatmul.mubr.bf16.gmra.mxu0 %v2715_v62 }
 0x117   : > { %v1615_v11 = vadd.f32 %v3007_v7, %v3880_v16  ;;  %v3120_v12 = vpop.f32.mrf.mxu1  ;;  %2165 = vmatmul.mubr.bf16.gmra.mxu1 %v2717_v1  ;;  %2011 = vmatprep.mubr.bf16.mxu0 %v2724_v2 }
 0x118   : > { %v3009_v13 = vpop.f32.mrf.mxu0  ;;  %2172 = vmatprep.mubr.bf16.mxu1 %v2726_v5 }
 0x119   : > { %v3932_v17 = vadd.f32 %v3119_v9, %v1615_v11  ;;  %v3010_v19 = vadd.f32 %v3009_v13, %v3008_v10  ;;  %v3121_v20 = vpop.f32.mrf.mxu1 }
 0x11a   : > { %v3122_v23 = vadd.f32 %v3121_v20, %v3120_v12  ;;  %v3011_v24 = vpop.f32.mrf.mxu0 }
 0x11b   : > { %v1620_v26 = vadd.f32 %v3010_v19, %v3880_v16  ;;  %v3123_v27 = vpop.f32.mrf.mxu1 }
 0x11c   : > { %v3012_v31 = vpop.f32.mrf.mxu0 }
 0x11d   : > { %v3937_v34 = vadd.f32 %v3122_v23, %v1620_v26  ;;  %v3013_v35 = vadd.f32 %v3012_v31, %v3011_v24  ;;  %v3124_v36 = vpop.f32.mrf.mxu1 }
 0x11e   : > { %v3125_v37 = vadd.f32 %v3124_v36, %v3123_v27  ;;  %v3014_v38 = vpop.f32.mrf.mxu0  ;;  %2012 = vmatmul.mubr.bf16.gmra.mxu0 %v2723_v25 }
 0x11f   : > { %v1623_v39 = vadd.f32 %v3013_v35, %v3880_v16  ;;  %v3126_v40 = vpop.f32.mrf.mxu1  ;;  %2173 = vmatmul.mubr.bf16.gmra.mxu1 %v2725_v29  ;;  %2019 = vmatprep.mubr.bf16.mxu0 %v2732_v30 }
 0x120   : > { %v3015_v41 = vpop.f32.mrf.mxu0  ;;  %2180 = vmatprep.mubr.bf16.mxu1 %v2734_v32 }
 0x121   : > { %v3940_v42 = vadd.f32 %v3125_v37, %v1623_v39  ;;  %v3016_v45 = vadd.f32 %v3015_v41, %v3014_v38  ;;  %v3127_v46 = vpop.f32.mrf.mxu1 }
 0x122   : > { %v3128_v47 = vadd.f32 %v3127_v46, %v3126_v40  ;;  %v3017_v48 = vpop.f32.mrf.mxu0 }
 0x123   : > { %v1628_v50 = vadd.f32 %v3016_v45, %v3880_v16  ;;  %v3129_v51 = vpop.f32.mrf.mxu1 }
 0x124   : > { %v3018_v53 = vpop.f32.mrf.mxu0 }
 0x125   : > { %v3943_v55 = vadd.f32 %v3128_v47, %v1628_v50  ;;  %v3019_v56 = vadd.f32 %v3018_v53, %v3017_v48  ;;  %v3130_v58 = vpop.f32.mrf.mxu1 }
 0x126   : > { %v3131_v59 = vadd.f32 %v3130_v58, %v3129_v51  ;;  %v3020_v60 = vpop.f32.mrf.mxu0  ;;  %2020 = vmatmul.mubr.bf16.gmra.mxu0 %v2731_v49 }
 0x127   : > { %v1631_v61 = vadd.f32 %v3019_v56, %v3880_v16  ;;  %v3132_v62 = vpop.f32.mrf.mxu1  ;;  %2181 = vmatmul.mubr.bf16.gmra.mxu1 %v2733_v52 }
 0x128   : > { %v3021_v63 = vpop.f32.mrf.mxu0 }
 0x129   : > { %v3946_v0 = vadd.f32 %v3131_v59, %v1631_v61  ;;  %v3022_v1 = vadd.f32 %v3021_v63, %v3020_v60  ;;  %v3133_v2 = vpop.f32.mrf.mxu1 }
 0x12a   : > { %v3134_v4 = vadd.f32 %v3133_v2, %v3132_v62  ;;  %v3023_v5 = vpop.f32.mrf.mxu0 }
 0x12b   : > { %v1636_v7 = vadd.f32 %v3022_v1, %v3880_v16  ;;  %v3135_v8 = vpop.f32.mrf.mxu1 }
 0x12c   : > { %v3024_v9 = vpop.f32.mrf.mxu0 }
 0x12d   : > { %v3949_v10 = vadd.f32 %v3134_v4, %v1636_v7  ;;  %v3025_v11 = vadd.f32 %v3024_v9, %v3023_v5  ;;  %v3136_v12 = vpop.f32.mrf.mxu1 }
 0x12e   : > { %v3137_v13 = vadd.f32 %v3136_v12, %v3135_v8  ;;  %v3026_v14 = vpop.f32.mrf.mxu0 }
 0x12f   : > { %v1639_v15 = vadd.f32 %v3025_v11, %v3880_v16  ;;  %v3138_v19 = vpop.f32.mrf.mxu1 }
 0x130   : > { %v3027_v20 = vpop.f32.mrf.mxu0 }
 0x131   : > { %v3952_v21 = vadd.f32 %v3137_v13, %v1639_v15  ;;  %v3028_v22 = vadd.f32 %v3027_v20, %v3026_v14  ;;  %v3139_v23 = vpop.f32.mrf.mxu1 }
 0x132   : > { %v3140_v24 = vadd.f32 %v3139_v23, %v3138_v19  ;;  %v3029_v25 = vpop.f32.mrf.mxu0 }
 0x133   : > { %v1644_v26 = vadd.f32 %v3028_v22, %v3880_v16  ;;  %v3141_v27 = vpop.f32.mrf.mxu1 }
 0x134   : > { %v3030_v29 = vpop.f32.mrf.mxu0 }
 0x135   : > { %v3955_v30 = vadd.f32 %v3140_v24, %v1644_v26  ;;  %v3031_v31 = vadd.f32 %v3030_v29, %v3029_v25  ;;  %v3142_v32 = vpop.f32.mrf.mxu1 }
 0x136   : > { %v3143_v35 = vadd.f32 %v3142_v32, %v3141_v27  ;;  %v3032_v36 = vpop.f32.mrf.mxu0 }
 0x137   : > { %v1647_v37 = vadd.f32 %v3031_v31, %v3880_v16  ;;  %v3144_v38 = vpop.f32.mrf.mxu1 }
 0x138   : > { %v3033_v39 = vpop.f32.mrf.mxu0 }
 0x139   : > { %v3958_v40 = vadd.f32 %v3143_v35, %v1647_v37  ;;  %v3034_v41 = vadd.f32 %v3033_v39, %v3032_v36  ;;  %v3145_v45 = vpop.f32.mrf.mxu1 }
 0x13a   : > { %v3146_v46 = vadd.f32 %v3145_v45, %v3144_v38  ;;  %v3035_v47 = vpop.f32.mrf.mxu0 }
 0x13b   : > { %v1652_v48 = vadd.f32 %v3034_v41, %v3880_v16  ;;  %v3147_v49 = vpop.f32.mrf.mxu1 }
 0x13c   : > { %v3036_v50 = vpop.f32.mrf.mxu0 }
 0x13d   : > { %v3961_v51 = vadd.f32 %v3146_v46, %v1652_v48  ;;  %v3037_v52 = vadd.f32 %v3036_v50, %v3035_v47  ;;  %v3148_v53 = vpop.f32.mrf.mxu1 }
 0x13e   : > { %v3149_v56 = vadd.f32 %v3148_v53, %v3147_v49  ;;  %v3038_v58 = vpop.f32.mrf.mxu0 }
 0x13f   : > { %v1655_v59 = vadd.f32 %v3037_v52, %v3880_v16  ;;  %v3150_v60 = vpop.f32.mrf.mxu1 }
 0x140   : > { %v3039_v61 = vpop.f32.mrf.mxu0 }
 0x141   : > { %v3964_v62 = vadd.f32 %v3149_v56, %v1655_v59  ;;  %v3040_v63 = vadd.f32 %v3039_v61, %v3038_v58  ;;  %v3151_v1 = vpop.f32.mrf.mxu1 }
 0x142   : > { %v3152_v2 = vadd.f32 %v3151_v1, %v3150_v60  ;;  %v3041_v4 = vpop.f32.mrf.mxu0 }
 0x143   : > { %v1660_v5 = vadd.f32 %v3040_v63, %v3880_v16  ;;  %v3153_v7 = vpop.f32.mrf.mxu1 }
 0x144   : > { %v3042_v8 = vpop.f32.mrf.mxu0 }
 0x145   : > { %v3967_v9 = vadd.f32 %v3152_v2, %v1660_v5  ;;  %v3043_v11 = vadd.f32 %v3042_v8, %v3041_v4  ;;  %v3154_v12 = vpop.f32.mrf.mxu1 }
 0x146   : > { %v3155_v13 = vadd.f32 %v3154_v12, %v3153_v7  ;;  %v3044_v14 = vpop.f32.mrf.mxu0 }
 0x147   : > { %v1663_v15 = vadd.f32 %v3043_v11, %v3880_v16  ;;  %v3156_v19 = vpop.f32.mrf.mxu1 }
 0x148   : > { %v3045_v20 = vpop.f32.mrf.mxu0 }
 0x149   : > { %v3970_v22 = vadd.f32 %v3155_v13, %v1663_v15  ;;  %v3046_v23 = vadd.f32 %v3045_v20, %v3044_v14  ;;  %v3157_v24 = vpop.f32.mrf.mxu1 }
 0x14a   : > { %v3158_v25 = vadd.f32 %v3157_v24, %v3156_v19  ;;  %v3047_v26 = vpop.f32.mrf.mxu0 }
 0x14b   : > { %v1668_v27 = vadd.f32 %v3046_v23, %v3880_v16  ;;  %v3159_v29 = vpop.f32.mrf.mxu1 }
 0x14c   : > { %v3048_v31 = vpop.f32.mrf.mxu0 }
 0x14d   : > { %v3973_v32 = vadd.f32 %v3158_v25, %v1668_v27  ;;  %v3049_v35 = vadd.f32 %v3048_v31, %v3047_v26  ;;  %v3160_v36 = vpop.f32.mrf.mxu1 }
 0x14e   : > { %v3161_v37 = vadd.f32 %v3160_v36, %v3159_v29  ;;  %v3050_v38 = vpop.f32.mrf.mxu0 }
 0x14f   : > { %v1671_v39 = vadd.f32 %v3049_v35, %v3880_v16  ;;  %v3162_v41 = vpop.f32.mrf.mxu1 }
 0x150   : > { %v3051_v45 = vpop.f32.mrf.mxu0 }
 0x151   : > { %v3976_v46 = vadd.f32 %v3161_v37, %v1671_v39  ;;  %v3052_v47 = vadd.f32 %v3051_v45, %v3050_v38  ;;  %v3163_v48 = vpop.f32.mrf.mxu1 }
 0x152   : > { %v3164_v49 = vadd.f32 %v3163_v48, %v3162_v41  ;;  %v3053_v50 = vpop.f32.mrf.mxu0 }
 0x153   : > { %v1676_v52 = vadd.f32 %v3052_v47, %v3880_v16  ;;  %v3165_v53 = vpop.f32.mrf.mxu1 }
 0x154   : > { %v3054_v56 = vpop.f32.mrf.mxu0 }
 0x155   : > { %v3979_v58 = vadd.f32 %v3164_v49, %v1676_v52  ;;  %v3055_v59 = vadd.f32 %v3054_v56, %v3053_v50  ;;  %v3166_v60 = vpop.f32.mrf.mxu1 }
 0x156   : > { %v3167_v61 = vadd.f32 %v3166_v60, %v3165_v53  ;;  %v3056_v63 = vpop.f32.mrf.mxu0 }
 0x157   : > { %v1679_v1 = vadd.f32 %v3055_v59, %v3880_v16  ;;  %v3168_v2 = vpop.f32.mrf.mxu1 }
 0x158   : > { %v3057_v4 = vpop.f32.mrf.mxu0 }
 0x159   : > { %v3982_v5 = vadd.f32 %v3167_v61, %v1679_v1  ;;  %v3058_v7 = vadd.f32 %v3057_v4, %v3056_v63  ;;  %v3169_v8 = vpop.f32.mrf.mxu1 }
 0x15a   : > { %v3170_v11 = vadd.f32 %v3169_v8, %v3168_v2  ;;  %v3059_v12 = vpop.f32.mrf.mxu0 }
 0x15b   : > { %v1684_v13 = vadd.f32 %v3058_v7, %v3880_v16  ;;  %v3171_v14 = vpop.f32.mrf.mxu1 }
 0x15c   : > { %v3060_v15 = vpop.f32.mrf.mxu0 }
 0x15d   : > { %v3985_v19 = vadd.f32 %v3170_v11, %v1684_v13  ;;  %v3061_v20 = vadd.f32 %v3060_v15, %v3059_v12  ;;  %v3172_v23 = vpop.f32.mrf.mxu1 }
 0x15e   : > { %v3173_v24 = vadd.f32 %v3172_v23, %v3171_v14  ;;  %v3062_v25 = vpop.f32.mrf.mxu0 }
 0x15f   : > { %v1687_v26 = vadd.f32 %v3061_v20, %v3880_v16  ;;  %v3174_v27 = vpop.f32.mrf.mxu1 }
 0x160   : > { %v3063_v29 = vpop.f32.mrf.mxu0 }
 0x161   : > { %v3988_v31 = vadd.f32 %v3173_v24, %v1687_v26  ;;  %v3064_v35 = vadd.f32 %v3063_v29, %v3062_v25  ;;  %v3175_v36 = vpop.f32.mrf.mxu1 }
 0x162   : > { %v3176_v37 = vadd.f32 %v3175_v36, %v3174_v27  ;;  %v3065_v38 = vpop.f32.mrf.mxu0 }
 0x163   : > { %v1692_v39 = vadd.f32 %v3064_v35, %v3880_v16  ;;  %v3177_v41 = vpop.f32.mrf.mxu1  ;;  %v3525_v35 = vmov 0.0  }
 0x164   : > { %v3066_v45 = vpop.f32.mrf.mxu0  ;;  %256 = vst [vmem:[#allocation2] sm:$0x1] %v3525_v35  ;;  %257 = vst [vmem:[#allocation3] sm:$0x1] %v3525_v35 }
 0x165   : > { %v3991_v47 = vadd.f32 %v3176_v37, %v1692_v39  ;;  %v3067_v48 = vadd.f32 %v3066_v45, %v3065_v38  ;;  %v3178_v49 = vpop.f32.mrf.mxu1 }
 0x166   : > { %v3179_v50 = vadd.f32 %v3178_v49, %v3177_v41  ;;  %v3068_v52 = vpop.f32.mrf.mxu0 }
 0x167   : > { %v1695_v53 = vadd.f32 %v3067_v48, %v3880_v16  ;;  %v3180_v56 = vpop.f32.mrf.mxu1 }
 0x168   : > { %v3069_v59 = vpop.f32.mrf.mxu0 }
 0x169   : > { %v3994_v60 = vadd.f32 %v3179_v50, %v1695_v53  ;;  %v3070_v61 = vadd.f32 %v3069_v59, %v3068_v52  ;;  %v3181_v63 = vpop.f32.mrf.mxu1 }
 0x16a   : > { %v3182_v1 = vadd.f32 %v3181_v63, %v3180_v56  ;;  %v3071_v2 = vpop.f32.mrf.mxu0 }
 0x16b   : > { %v1700_v4 = vadd.f32 %v3070_v61, %v3880_v16  ;;  %v3183_v7 = vpop.f32.mrf.mxu1 }
 0x16c   : > { %v3072_v8 = vpop.f32.mrf.mxu0 }
 0x16d   : > { %v3997_v11 = vadd.f32 %v3182_v1, %v1700_v4  ;;  %v3073_v12 = vadd.f32 %v3072_v8, %v3071_v2  ;;  %v3184_v13 = vpop.f32.mrf.mxu1 }
 0x16e   : > { %v3185_v14 = vadd.f32 %v3184_v13, %v3183_v7  ;;  %v3202_v15 = vpop.f32.mrf.mxu0 }
 0x16f   : > { %v1703_v20 = vadd.f32 %v3073_v12, %v3880_v16  ;;  %v3314_v23 = vpop.f32.mrf.mxu1 }
 0x170   : > { %v3203_v24 = vpop.f32.mrf.mxu0 }
 0x171   : > { %v4000_v25 = vadd.f32 %v3185_v14, %v1703_v20  ;;  %v3204_v26 = vadd.f32 %v3203_v24, %v3202_v15  ;;  %v3315_v27 = vpop.f32.mrf.mxu1 }
 0x172   : > { %v3205_v29 = vpop.f32.mrf.mxu0  ;;  %v3316_v38 = vadd.f32 %v3315_v27, %v3314_v23 }
 0x173   : > { %v1902_v36 = vadd.f32 %v3204_v26, %v3887_v33  ;;  %v3317_v37 = vpop.f32.mrf.mxu1 }
 0x174   : > { %v3206_v39 = vpop.f32.mrf.mxu0 }
 0x175   : > { %v3207_v41 = vadd.f32 %v3206_v39, %v3205_v29  ;;  %v3318_v45 = vpop.f32.mrf.mxu1  ;;  %v2063_v48 = vadd.f32 %v3316_v38, %v1902_v36 }
 0x176   : > { %v3208_v16 = vpop.f32.mrf.mxu0  ;;  %v3319_v50 = vadd.f32 %v3318_v45, %v3317_v37 }
 0x177   : > { %v1905_v49 = vadd.f32 %v3207_v41, %v3892_v43  ;;  %v3320_v52 = vpop.f32.mrf.mxu1  ;;  %v2230_v63 = vmul.f32 %v2063_v48, %v2063_v48 }
 0x178   : > { %v3209_v53 = vpop.f32.mrf.mxu0 }
 0x179   : > { %v2066_v56 = vadd.f32 %v3319_v50, %v1905_v49  ;;  %v3210_v59 = vadd.f32 %v3209_v53, %v3208_v16  ;;  %v3321_v61 = vpop.f32.mrf.mxu1 }
 0x17a   : > { %v3322_v33 = vadd.f32 %v3321_v61, %v3320_v52  ;;  %v3211_v1 = vpop.f32.mrf.mxu0 }
 0x17b   : > { %v2190_v2 = vadd.f32 %v2066_v56, %v2063_v48  ;;  %v2231_v4 = vmul.f32 %v2066_v56, %v2066_v56  ;;  %v2870_v7 = vpack.c.bf16 %v2066_v56, %v2063_v48  ;;  %v1910_v43 = vadd.f32 %v3210_v59, %v3897_v57  ;;  %v3323_v8 = vpop.f32.mrf.mxu1 }
 0x17c   : > { %v3212_v12 = vpop.f32.mrf.mxu0 }
 0x17d   : > { %v2262_v13 = vadd.f32 %v2231_v4, %v2230_v63  ;;  %2871 = vst [vmem:[%s4008_s26] sm:$0xff] %v2870_v7   ;;  %v2071_v14 = vadd.f32 %v3322_v33, %v1910_v43  ;;  %v3213_v15 = vadd.f32 %v3212_v12, %v3211_v1  ;;  %v3324_v20 = vpop.f32.mrf.mxu1 }
 0x17e   : > { %v3214_v23 = vpop.f32.mrf.mxu0  ;;  %v3325_v29 = vadd.f32 %v3324_v20, %v3323_v8 }
 0x17f   : > { %v2191_v24 = vadd.f32 %v2190_v2, %v2071_v14  ;;  %v2232_v26 = vmul.f32 %v2071_v14, %v2071_v14  ;;  %v1913_v27 = vadd.f32 %v3213_v15, %v3902_v3  ;;  %v3326_v35 = vpop.f32.mrf.mxu1 }
 0x180   : > { %v3215_v36 = vpop.f32.mrf.mxu0 }
 0x181   : > { %v2263_v37 = vadd.f32 %v2262_v13, %v2232_v26  ;;  %v2074_v38 = vadd.f32 %v3325_v29, %v1913_v27  ;;  %v3216_v39 = vadd.f32 %v3215_v36, %v3214_v23  ;;  %v3327_v57 = vpop.f32.mrf.mxu1 }
 0x182   : > { %v3328_v41 = vadd.f32 %v3327_v57, %v3326_v35  ;;  %v3217_v45 = vpop.f32.mrf.mxu0 }
 0x183   : > { %v2192_v48 = vadd.f32 %v2191_v24, %v2074_v38  ;;  %v2233_v16 = vmul.f32 %v2074_v38, %v2074_v38  ;;  %v2875_v49 = vpack.c.bf16 %v2074_v38, %v2071_v14  ;;  %v1918_v50 = vadd.f32 %v3216_v39, %v3907_v18  ;;  %v3329_v52 = vpop.f32.mrf.mxu1 }
 0x184   : > { %v3218_v53 = vpop.f32.mrf.mxu0 }
 0x185   : > { %v2264_v56 = vadd.f32 %v2263_v37, %v2233_v16  ;;  %2947 = vst [vmem:[%s4008_s26 + $0x8] sm:$0xff] %v2875_v49   ;;  %v2079_v3 = vadd.f32 %v3328_v41, %v1918_v50  ;;  %v3219_v59 = vadd.f32 %v3218_v53, %v3217_v45  ;;  %v3330_v61 = vpop.f32.mrf.mxu1 }
 0x186   : > { %v3220_v63 = vpop.f32.mrf.mxu0  ;;  %v3331_v4 = vadd.f32 %v3330_v61, %v3329_v52 }
 0x187   : > { %v2193_v33 = vadd.f32 %v2192_v48, %v2079_v3  ;;  %v2234_v1 = vmul.f32 %v2079_v3, %v2079_v3  ;;  %v1921_v2 = vadd.f32 %v3219_v59, %v3912_v28  ;;  %v3332_v7 = vpop.f32.mrf.mxu1 }
 0x188   : > { %v3221_v43 = vpop.f32.mrf.mxu0 }
 0x189   : > { %v2265_v8 = vadd.f32 %v2264_v56, %v2234_v1  ;;  %v2082_v12 = vadd.f32 %v3331_v4, %v1921_v2  ;;  %v3222_v13 = vadd.f32 %v3221_v43, %v3220_v63  ;;  %v3333_v18 = vpop.f32.mrf.mxu1 }
 0x18a   : > { %v3334_v14 = vadd.f32 %v3333_v18, %v3332_v7  ;;  %v3223_v15 = vpop.f32.mrf.mxu0 }
 0x18b   : > { %v2194_v20 = vadd.f32 %v2193_v33, %v2082_v12  ;;  %v2235_v23 = vmul.f32 %v2082_v12, %v2082_v12  ;;  %v2880_v24 = vpack.c.bf16 %v2082_v12, %v2079_v3  ;;  %v1926_v26 = vadd.f32 %v3222_v13, %v3917_v44  ;;  %v3335_v27 = vpop.f32.mrf.mxu1 }
 0x18c   : > { %v3224_v29 = vpop.f32.mrf.mxu0 }
 0x18d   : > { %v2266_v35 = vadd.f32 %v2265_v8, %v2235_v23  ;;  %2948 = vst [vmem:[%s4008_s26 + $0x10] sm:$0xff] %v2880_v24   ;;  %v2087_v28 = vadd.f32 %v3334_v14, %v1926_v26  ;;  %v3225_v36 = vadd.f32 %v3224_v29, %v3223_v15  ;;  %v3336_v37 = vpop.f32.mrf.mxu1 }
 0x18e   : > { %v3226_v38 = vpop.f32.mrf.mxu0  ;;  %v3337_v45 = vadd.f32 %v3336_v37, %v3335_v27 }
 0x18f   : > { %v2195_v39 = vadd.f32 %v2194_v20, %v2087_v28  ;;  %v2236_v57 = vmul.f32 %v2087_v28, %v2087_v28  ;;  %v1929_v41 = vadd.f32 %v3225_v36, %v3922_v54  ;;  %v3338_v48 = vpop.f32.mrf.mxu1 }
 0x190   : > { %v3227_v16 = vpop.f32.mrf.mxu0 }
 0x191   : > { %v2267_v49 = vadd.f32 %v2266_v35, %v2236_v57  ;;  %v2090_v50 = vadd.f32 %v3337_v45, %v1929_v41  ;;  %v3228_v52 = vadd.f32 %v3227_v16, %v3226_v38  ;;  %v3339_v44 = vpop.f32.mrf.mxu1 }
 0x192   : > { %v3340_v53 = vadd.f32 %v3339_v44, %v3338_v48  ;;  %v3229_v56 = vpop.f32.mrf.mxu0 }
 0x193   : > { %v2196_v3 = vadd.f32 %v2195_v39, %v2090_v50  ;;  %v2237_v59 = vmul.f32 %v2090_v50, %v2090_v50  ;;  %v2885_v61 = vpack.c.bf16 %v2090_v50, %v2087_v28  ;;  %v1934_v63 = vadd.f32 %v3228_v52, %v3927_v6  ;;  %v3341_v33 = vpop.f32.mrf.mxu1 }
 0x194   : > { %v3230_v1 = vpop.f32.mrf.mxu0 }
 0x195   : > { %v2268_v2 = vadd.f32 %v2267_v49, %v2237_v59  ;;  %2949 = vst [vmem:[%s4008_s26 + $0x18] sm:$0xff] %v2885_v61   ;;  %v2095_v54 = vadd.f32 %v3340_v53, %v1934_v63  ;;  %v3231_v4 = vadd.f32 %v3230_v1, %v3229_v56  ;;  %v3342_v7 = vpop.f32.mrf.mxu1 }
 0x196   : > { %v3232_v43 = vpop.f32.mrf.mxu0  ;;  %v3343_v18 = vadd.f32 %v3342_v7, %v3341_v33 }
 0x197   : > { %v2197_v8 = vadd.f32 %v2196_v3, %v2095_v54  ;;  %v2238_v12 = vmul.f32 %v2095_v54, %v2095_v54  ;;  %v1937_v13 = vadd.f32 %v3231_v4, %v3932_v17  ;;  %v3344_v14 = vpop.f32.mrf.mxu1 }
 0x198   : > { %v3233_v15 = vpop.f32.mrf.mxu0 }
 0x199   : > { %v2269_v20 = vadd.f32 %v2268_v2, %v2238_v12  ;;  %v2098_v23 = vadd.f32 %v3343_v18, %v1937_v13  ;;  %v3234_v24 = vadd.f32 %v3233_v15, %v3232_v43  ;;  %v3345_v6 = vpop.f32.mrf.mxu1 }
 0x19a   : > { %v3346_v26 = vadd.f32 %v3345_v6, %v3344_v14  ;;  %v3235_v27 = vpop.f32.mrf.mxu0 }
 0x19b   : > { %v2198_v29 = vadd.f32 %v2197_v8, %v2098_v23  ;;  %v2239_v35 = vmul.f32 %v2098_v23, %v2098_v23  ;;  %v2890_v28 = vpack.c.bf16 %v2098_v23, %v2095_v54  ;;  %v1942_v36 = vadd.f32 %v3234_v24, %v3937_v34  ;;  %v3347_v37 = vpop.f32.mrf.mxu1 }
 0x19c   : > { %v3236_v38 = vpop.f32.mrf.mxu0 }
 0x19d   : > { %v2270_v39 = vadd.f32 %v2269_v20, %v2239_v35  ;;  %2950 = vst [vmem:[%s4008_s26 + $0x20] sm:$0xff] %v2890_v28   ;;  %v2103_v17 = vadd.f32 %v3346_v26, %v1942_v36  ;;  %v3237_v57 = vadd.f32 %v3236_v38, %v3235_v27  ;;  %v3348_v41 = vpop.f32.mrf.mxu1 }
 0x19e   : > { %v3238_v45 = vpop.f32.mrf.mxu0  ;;  %v3349_v50 = vadd.f32 %v3348_v41, %v3347_v37 }
 0x19f   : > { %v2199_v48 = vadd.f32 %v2198_v29, %v2103_v17  ;;  %v2240_v16 = vmul.f32 %v2103_v17, %v2103_v17  ;;  %v1945_v49 = vadd.f32 %v3237_v57, %v3940_v42  ;;  %v3350_v52 = vpop.f32.mrf.mxu1 }
 0x1a0   : > { %v3239_v44 = vpop.f32.mrf.mxu0 }
 0x1a1   : > { %v2271_v53 = vadd.f32 %v2270_v39, %v2240_v16  ;;  %v2106_v56 = vadd.f32 %v3349_v50, %v1945_v49  ;;  %v3240_v3 = vadd.f32 %v3239_v44, %v3238_v45  ;;  %v3351_v34 = vpop.f32.mrf.mxu1 }
 0x1a2   : > { %v3352_v59 = vadd.f32 %v3351_v34, %v3350_v52  ;;  %v3241_v61 = vpop.f32.mrf.mxu0 }
 0x1a3   : > { %v2200_v63 = vadd.f32 %v2199_v48, %v2106_v56  ;;  %v2241_v33 = vmul.f32 %v2106_v56, %v2106_v56  ;;  %v2895_v1 = vpack.c.bf16 %v2106_v56, %v2103_v17  ;;  %v1950_v2 = vadd.f32 %v3240_v3, %v3943_v55  ;;  %v3353_v54 = vpop.f32.mrf.mxu1 }
 0x1a4   : > { %v3242_v4 = vpop.f32.mrf.mxu0 }
 0x1a5   : > { %v2272_v7 = vadd.f32 %v2271_v53, %v2241_v33  ;;  %2951 = vst [vmem:[%s4008_s26 + $0x28] sm:$0xff] %v2895_v1   ;;  %v2111_v42 = vadd.f32 %v3352_v59, %v1950_v2  ;;  %v3243_v43 = vadd.f32 %v3242_v4, %v3241_v61  ;;  %v3354_v8 = vpop.f32.mrf.mxu1 }
 0x1a6   : > { %v3244_v12 = vpop.f32.mrf.mxu0  ;;  %v3355_v15 = vadd.f32 %v3354_v8, %v3353_v54 }
 0x1a7   : > { %v2201_v13 = vadd.f32 %v2200_v63, %v2111_v42  ;;  %v2242_v18 = vmul.f32 %v2111_v42, %v2111_v42  ;;  %v1953_v14 = vadd.f32 %v3243_v43, %v3946_v0  ;;  %v3356_v20 = vpop.f32.mrf.mxu1 }
 0x1a8   : > { %v3245_v23 = vpop.f32.mrf.mxu0 }
 0x1a9   : > { %v2273_v24 = vadd.f32 %v2272_v7, %v2242_v18  ;;  %v2114_v6 = vadd.f32 %v3355_v15, %v1953_v14  ;;  %v3246_v26 = vadd.f32 %v3245_v23, %v3244_v12  ;;  %v3357_v55 = vpop.f32.mrf.mxu1 }
 0x1aa   : > { %v3358_v27 = vadd.f32 %v3357_v55, %v3356_v20  ;;  %v3247_v29 = vpop.f32.mrf.mxu0 }
 0x1ab   : > { %v2202_v35 = vadd.f32 %v2201_v13, %v2114_v6  ;;  %v2243_v28 = vmul.f32 %v2114_v6, %v2114_v6  ;;  %v2900_v36 = vpack.c.bf16 %v2114_v6, %v2111_v42  ;;  %v1958_v37 = vadd.f32 %v3246_v26, %v3949_v10  ;;  %v3359_v38 = vpop.f32.mrf.mxu1 }
 0x1ac   : > { %v3248_v39 = vpop.f32.mrf.mxu0 }
 0x1ad   : > { %v2274_v17 = vadd.f32 %v2273_v24, %v2243_v28  ;;  %2952 = vst [vmem:[%s4008_s26 + $0x30] sm:$0xff] %v2900_v36   ;;  %v2119_v0 = vadd.f32 %v3358_v27, %v1958_v37  ;;  %v3249_v57 = vadd.f32 %v3248_v39, %v3247_v29  ;;  %v3360_v41 = vpop.f32.mrf.mxu1 }
 0x1ae   : > { %v3250_v45 = vpop.f32.mrf.mxu0  ;;  %v3361_v50 = vadd.f32 %v3360_v41, %v3359_v38 }
 0x1af   : > { %v2203_v48 = vadd.f32 %v2202_v35, %v2119_v0  ;;  %v2244_v16 = vmul.f32 %v2119_v0, %v2119_v0  ;;  %v1961_v49 = vadd.f32 %v3249_v57, %v3952_v21  ;;  %v3362_v52 = vpop.f32.mrf.mxu1 }
 0x1b0   : > { %v3251_v44 = vpop.f32.mrf.mxu0 }
 0x1b1   : > { %v2275_v53 = vadd.f32 %v2274_v17, %v2244_v16  ;;  %v2122_v56 = vadd.f32 %v3361_v50, %v1961_v49  ;;  %v3252_v3 = vadd.f32 %v3251_v44, %v3250_v45  ;;  %v3363_v10 = vpop.f32.mrf.mxu1 }
 0x1b2   : > { %v3364_v34 = vadd.f32 %v3363_v10, %v3362_v52  ;;  %v3253_v59 = vpop.f32.mrf.mxu0 }
 0x1b3   : > { %v2204_v61 = vadd.f32 %v2203_v48, %v2122_v56  ;;  %v2245_v63 = vmul.f32 %v2122_v56, %v2122_v56  ;;  %v2905_v33 = vpack.c.bf16 %v2122_v56, %v2119_v0  ;;  %v1966_v1 = vadd.f32 %v3252_v3, %v3955_v30  ;;  %v3365_v2 = vpop.f32.mrf.mxu1 }
 0x1b4   : > { %v3254_v54 = vpop.f32.mrf.mxu0 }
 0x1b5   : > { %v2276_v4 = vadd.f32 %v2275_v53, %v2245_v63  ;;  %2953 = vst [vmem:[%s4008_s26 + $0x38] sm:$0xff] %v2905_v33   ;;  %v2127_v21 = vadd.f32 %v3364_v34, %v1966_v1  ;;  %v3255_v7 = vadd.f32 %v3254_v54, %v3253_v59  ;;  %v3366_v42 = vpop.f32.mrf.mxu1 }
 0x1b6   : > { %v3256_v43 = vpop.f32.mrf.mxu0  ;;  %v3367_v18 = vadd.f32 %v3366_v42, %v3365_v2 }
 0x1b7   : > { %v2205_v8 = vadd.f32 %v2204_v61, %v2127_v21  ;;  %v2246_v12 = vmul.f32 %v2127_v21, %v2127_v21  ;;  %v1969_v13 = vadd.f32 %v3255_v7, %v3958_v40  ;;  %v3368_v14 = vpop.f32.mrf.mxu1 }
 0x1b8   : > { %v3257_v15 = vpop.f32.mrf.mxu0 }
 0x1b9   : > { %v2277_v20 = vadd.f32 %v2276_v4, %v2246_v12  ;;  %v2130_v23 = vadd.f32 %v3367_v18, %v1969_v13  ;;  %v3258_v24 = vadd.f32 %v3257_v15, %v3256_v43  ;;  %v3369_v30 = vpop.f32.mrf.mxu1 }
 0x1ba   : > { %v3370_v6 = vadd.f32 %v3369_v30, %v3368_v14  ;;  %v3259_v26 = vpop.f32.mrf.mxu0 }
 0x1bb   : > { %v2206_v55 = vadd.f32 %v2205_v8, %v2130_v23  ;;  %v2247_v27 = vmul.f32 %v2130_v23, %v2130_v23  ;;  %v2910_v29 = vpack.c.bf16 %v2130_v23, %v2127_v21  ;;  %v1974_v35 = vadd.f32 %v3258_v24, %v3961_v51  ;;  %v3371_v28 = vpop.f32.mrf.mxu1 }
 0x1bc   : > { %v3260_v36 = vpop.f32.mrf.mxu0 }
 0x1bd   : > { %v2278_v37 = vadd.f32 %v2277_v20, %v2247_v27  ;;  %2954 = vst [vmem:[%s4008_s26 + $0x40] sm:$0xff] %v2910_v29   ;;  %v2135_v40 = vadd.f32 %v3370_v6, %v1974_v35  ;;  %v3261_v38 = vadd.f32 %v3260_v36, %v3259_v26  ;;  %v3372_v39 = vpop.f32.mrf.mxu1 }
 0x1be   : > { %v3262_v17 = vpop.f32.mrf.mxu0  ;;  %v3373_v45 = vadd.f32 %v3372_v39, %v3371_v28 }
 0x1bf   : > { %v2207_v0 = vadd.f32 %v2206_v55, %v2135_v40  ;;  %v2248_v57 = vmul.f32 %v2135_v40, %v2135_v40  ;;  %v1977_v41 = vadd.f32 %v3261_v38, %v3964_v62  ;;  %v3374_v48 = vpop.f32.mrf.mxu1 }
 0x1c0   : > { %v3263_v16 = vpop.f32.mrf.mxu0 }
 0x1c1   : > { %v2279_v49 = vadd.f32 %v2278_v37, %v2248_v57  ;;  %v2138_v50 = vadd.f32 %v3373_v45, %v1977_v41  ;;  %v3264_v52 = vadd.f32 %v3263_v16, %v3262_v17  ;;  %v3375_v51 = vpop.f32.mrf.mxu1 }
 0x1c2   : > { %v3376_v44 = vadd.f32 %v3375_v51, %v3374_v48  ;;  %v3265_v53 = vpop.f32.mrf.mxu0 }
 0x1c3   : > { %v2208_v56 = vadd.f32 %v2207_v0, %v2138_v50  ;;  %v2249_v3 = vmul.f32 %v2138_v50, %v2138_v50  ;;  %v2915_v10 = vpack.c.bf16 %v2138_v50, %v2135_v40  ;;  %v1982_v34 = vadd.f32 %v3264_v52, %v3967_v9  ;;  %v3377_v59 = vpop.f32.mrf.mxu1 }
 0x1c4   : > { %v3266_v61 = vpop.f32.mrf.mxu0 }
 0x1c5   : > { %v2280_v63 = vadd.f32 %v2279_v49, %v2249_v3  ;;  %2955 = vst [vmem:[%s4008_s26 + $0x48] sm:$0xff] %v2915_v10   ;;  %v2143_v62 = vadd.f32 %v3376_v44, %v1982_v34  ;;  %v3267_v33 = vadd.f32 %v3266_v61, %v3265_v53  ;;  %v3378_v1 = vpop.f32.mrf.mxu1 }
 0x1c6   : > { %v3268_v2 = vpop.f32.mrf.mxu0  ;;  %v3379_v7 = vadd.f32 %v3378_v1, %v3377_v59 }
 0x1c7   : > { %v2209_v54 = vadd.f32 %v2208_v56, %v2143_v62  ;;  %v2250_v4 = vmul.f32 %v2143_v62, %v2143_v62  ;;  %v1985_v21 = vadd.f32 %v3267_v33, %v3970_v22  ;;  %v3380_v42 = vpop.f32.mrf.mxu1 }
 0x1c8   : > { %v3269_v43 = vpop.f32.mrf.mxu0 }
 0x1c9   : > { %v2281_v8 = vadd.f32 %v2280_v63, %v2250_v4  ;;  %v2146_v12 = vadd.f32 %v3379_v7, %v1985_v21  ;;  %v3270_v13 = vadd.f32 %v3269_v43, %v3268_v2  ;;  %v3381_v9 = vpop.f32.mrf.mxu1 }
 0x1ca   : > { %v3382_v18 = vadd.f32 %v3381_v9, %v3380_v42  ;;  %v3271_v14 = vpop.f32.mrf.mxu0 }
 0x1cb   : > { %v2210_v15 = vadd.f32 %v2209_v54, %v2146_v12  ;;  %v2251_v20 = vmul.f32 %v2146_v12, %v2146_v12  ;;  %v2920_v23 = vpack.c.bf16 %v2146_v12, %v2143_v62  ;;  %v1990_v24 = vadd.f32 %v3270_v13, %v3973_v32  ;;  %v3383_v30 = vpop.f32.mrf.mxu1 }
 0x1cc   : > { %v3272_v6 = vpop.f32.mrf.mxu0 }
 0x1cd   : > { %v2282_v26 = vadd.f32 %v2281_v8, %v2251_v20  ;;  %2956 = vst [vmem:[%s4008_s26 + $0x50] sm:$0xff] %v2920_v23   ;;  %v2151_v22 = vadd.f32 %v3382_v18, %v1990_v24  ;;  %v3273_v55 = vadd.f32 %v3272_v6, %v3271_v14  ;;  %v3384_v27 = vpop.f32.mrf.mxu1 }
 0x1ce   : > { %v3274_v29 = vpop.f32.mrf.mxu0  ;;  %v3385_v37 = vadd.f32 %v3384_v27, %v3383_v30 }
 0x1cf   : > { %v2211_v35 = vadd.f32 %v2210_v15, %v2151_v22  ;;  %v2252_v28 = vmul.f32 %v2151_v22, %v2151_v22  ;;  %v1993_v36 = vadd.f32 %v3273_v55, %v3976_v46  ;;  %v3386_v40 = vpop.f32.mrf.mxu1 }
 0x1d0   : > { %v3275_v38 = vpop.f32.mrf.mxu0 }
 0x1d1   : > { %v2283_v39 = vadd.f32 %v2282_v26, %v2252_v28  ;;  %v2154_v17 = vadd.f32 %v3385_v37, %v1993_v36  ;;  %v3276_v0 = vadd.f32 %v3275_v38, %v3274_v29  ;;  %v3387_v32 = vpop.f32.mrf.mxu1 }
 0x1d2   : > { %v3388_v57 = vadd.f32 %v3387_v32, %v3386_v40  ;;  %v3277_v41 = vpop.f32.mrf.mxu0 }
 0x1d3   : > { %v2212_v45 = vadd.f32 %v2211_v35, %v2154_v17  ;;  %v2253_v48 = vmul.f32 %v2154_v17, %v2154_v17  ;;  %v2925_v16 = vpack.c.bf16 %v2154_v17, %v2151_v22  ;;  %v1998_v49 = vadd.f32 %v3276_v0, %v3979_v58  ;;  %v3389_v50 = vpop.f32.mrf.mxu1 }
 0x1d4   : > { %v3278_v52 = vpop.f32.mrf.mxu0 }
 0x1d5   : > { %v2284_v51 = vadd.f32 %v2283_v39, %v2253_v48  ;;  %2957 = vst [vmem:[%s4008_s26 + $0x58] sm:$0xff] %v2925_v16   ;;  %v2159_v46 = vadd.f32 %v3388_v57, %v1998_v49  ;;  %v3279_v44 = vadd.f32 %v3278_v52, %v3277_v41  ;;  %v3390_v53 = vpop.f32.mrf.mxu1 }
 0x1d6   : > { %v3280_v56 = vpop.f32.mrf.mxu0  ;;  %v3391_v59 = vadd.f32 %v3390_v53, %v3389_v50 }
 0x1d7   : > { %v2213_v3 = vadd.f32 %v2212_v45, %v2159_v46  ;;  %v2254_v10 = vmul.f32 %v2159_v46, %v2159_v46  ;;  %v2001_v34 = vadd.f32 %v3279_v44, %v3982_v5  ;;  %v3392_v61 = vpop.f32.mrf.mxu1 }
 0x1d8   : > { %v3281_v63 = vpop.f32.mrf.mxu0 }
 0x1d9   : > { %v2285_v62 = vadd.f32 %v2284_v51, %v2254_v10  ;;  %v2162_v33 = vadd.f32 %v3391_v59, %v2001_v34  ;;  %v3282_v1 = vadd.f32 %v3281_v63, %v3280_v56  ;;  %v3393_v58 = vpop.f32.mrf.mxu1 }
 0x1da   : > { %v3394_v2 = vadd.f32 %v3393_v58, %v3392_v61  ;;  %v3283_v54 = vpop.f32.mrf.mxu0 }
 0x1db   : > { %v2214_v4 = vadd.f32 %v2213_v3, %v2162_v33  ;;  %v2255_v21 = vmul.f32 %v2162_v33, %v2162_v33  ;;  %v2930_v7 = vpack.c.bf16 %v2162_v33, %v2159_v46  ;;  %v2006_v42 = vadd.f32 %v3282_v1, %v3985_v19  ;;  %v3395_v43 = vpop.f32.mrf.mxu1 }
 0x1dc   : > { %v3284_v8 = vpop.f32.mrf.mxu0 }
 0x1dd   : > { %v2286_v12 = vadd.f32 %v2285_v62, %v2255_v21  ;;  %2958 = vst [vmem:[%s4008_s26 + $0x60] sm:$0xff] %v2930_v7   ;;  %v2167_v5 = vadd.f32 %v3394_v2, %v2006_v42  ;;  %v3285_v13 = vadd.f32 %v3284_v8, %v3283_v54  ;;  %v3396_v9 = vpop.f32.mrf.mxu1 }
 0x1de   : > { %v3286_v18 = vpop.f32.mrf.mxu0  ;;  %v3397_v23 = vadd.f32 %v3396_v9, %v3395_v43 }
 0x1df   : > { %v2215_v14 = vadd.f32 %v2214_v4, %v2167_v5  ;;  %v2256_v15 = vmul.f32 %v2167_v5, %v2167_v5  ;;  %v2009_v20 = vadd.f32 %v3285_v13, %v3988_v31  ;;  %v3398_v24 = vpop.f32.mrf.mxu1 }
 0x1e0   : > { %v3287_v30 = vpop.f32.mrf.mxu0 }
 0x1e1   : > { %v2287_v6 = vadd.f32 %v2286_v12, %v2256_v15  ;;  %v2170_v26 = vadd.f32 %v3397_v23, %v2009_v20  ;;  %v3288_v22 = vadd.f32 %v3287_v30, %v3286_v18  ;;  %v3399_v19 = vpop.f32.mrf.mxu1  ;;  %v2189_v15 = vld [vmem:[#allocation2] sm:$0x1]  ;;  %v2229_v23 = vld [vmem:[#allocation3] sm:$0x1] }
 0x1e2   : > { %v3400_v55 = vadd.f32 %v3399_v19, %v3398_v24  ;;  %v3289_v27 = vpop.f32.mrf.mxu0 }
 0x1e3   : > { %v2216_v29 = vadd.f32 %v2215_v14, %v2170_v26  ;;  %v2257_v35 = vmul.f32 %v2170_v26, %v2170_v26  ;;  %v2935_v28 = vpack.c.bf16 %v2170_v26, %v2167_v5  ;;  %v2014_v36 = vadd.f32 %v3288_v22, %v3991_v47  ;;  %v3401_v37 = vpop.f32.mrf.mxu1 }
 0x1e4   : > { %v3290_v40 = vpop.f32.mrf.mxu0 }
 0x1e5   : > { %v2288_v38 = vadd.f32 %v2287_v6, %v2257_v35  ;;  %2959 = vst [vmem:[%s4008_s26 + $0x68] sm:$0xff] %v2935_v28   ;;  %v2175_v31 = vadd.f32 %v3400_v55, %v2014_v36  ;;  %v3291_v39 = vadd.f32 %v3290_v40, %v3289_v27  ;;  %v3402_v17 = vpop.f32.mrf.mxu1 }
 0x1e6   : > { %v3292_v0 = vpop.f32.mrf.mxu0  ;;  %v3403_v45 = vadd.f32 %v3402_v17, %v3401_v37 }
 0x1e7   : > { %v2217_v32 = vadd.f32 %v2216_v29, %v2175_v31  ;;  %v2258_v57 = vmul.f32 %v2175_v31, %v2175_v31  ;;  %v2017_v41 = vadd.f32 %v3291_v39, %v3994_v60  ;;  %v3404_v48 = vpop.f32.mrf.mxu1 }
 0x1e8   : > { %v3293_v16 = vpop.f32.mrf.mxu0 }
 0x1e9   : > { %v2289_v49 = vadd.f32 %v2288_v38, %v2258_v57  ;;  %v2178_v50 = vadd.f32 %v3403_v45, %v2017_v41  ;;  %v3294_v52 = vadd.f32 %v3293_v16, %v3292_v0  ;;  %v3405_v47 = vpop.f32.mrf.mxu1 }
 0x1ea   : > { %v3406_v51 = vadd.f32 %v3405_v47, %v3404_v48  ;;  %v3295_v46 = vpop.f32.mrf.mxu0 }
 0x1eb   : > { %v2218_v44 = vadd.f32 %v2217_v32, %v2178_v50  ;;  %v2259_v53 = vmul.f32 %v2178_v50, %v2178_v50  ;;  %v2940_v56 = vpack.c.bf16 %v2178_v50, %v2175_v31  ;;  %v2022_v3 = vadd.f32 %v3294_v52, %v3997_v11  ;;  %v3407_v10 = vpop.f32.mrf.mxu1 }
 0x1ec   : > { %v3296_v34 = vpop.f32.mrf.mxu0 }
 0x1ed   : > { %v2290_v59 = vadd.f32 %v2289_v49, %v2259_v53  ;;  %2960 = vst [vmem:[%s4008_s26 + $0x70] sm:$0xff] %v2940_v56   ;;  %v2183_v60 = vadd.f32 %v3406_v51, %v2022_v3  ;;  %v3297_v61 = vadd.f32 %v3296_v34, %v3295_v46  ;;  %v3408_v63 = vpop.f32.mrf.mxu1 }
 0x1ee   : > { %v3409_v58 = vadd.f32 %v3408_v63, %v3407_v10 }
 0x1ef   : > { %v2219_v62 = vadd.f32 %v2218_v44, %v2183_v60  ;;  %v2260_v33 = vmul.f32 %v2183_v60, %v2183_v60  ;;  %v2025_v1 = vadd.f32 %v3297_v61, %v4000_v25 }
 0x1f1   : > { %v2291_v2 = vadd.f32 %v2290_v59, %v2260_v33  ;;  %v2186_v54 = vadd.f32 %v3409_v58, %v2025_v1 }
 0x1f3   : > { %v2220_v4 = vadd.f32 %v2219_v62, %v2186_v54  ;;  %v2261_v21 = vmul.f32 %v2186_v54, %v2186_v54  ;;  %v2945_v7 = vpack.c.bf16 %v2186_v54, %v2183_v60 }
 0x1f5   : > { %v2221_v42 = vrot.slane %v2220_v4, 4  ;;  %v2292_v11 = vadd.f32 %v2291_v2, %v2261_v21  ;;  %2961 = vst [vmem:[%s4008_s26 + $0x78] sm:$0xff] %v2945_v7  }
 0x1f7   : > { %v2222_v43 = vadd.f32 %v2221_v42, %v2220_v4  ;;  %v2293_v8 = vrot.slane %v2292_v11, 4 }
 0x1f9   : > { %v2223_v12 = vrot.slane %v2222_v43, 2  ;;  %v2294_v5 = vadd.f32 %v2293_v8, %v2292_v11 }
 0x1fb   : > { %v2224_v13 = vadd.f32 %v2223_v12, %v2222_v43  ;;  %v2295_v9 = vrot.slane %v2294_v5, 2 }
 0x1fd   : > { %v2225_v18 = vrot.slane %v2224_v13, 1  ;;  %v2296_v14 = vadd.f32 %v2295_v9, %v2294_v5 }
 0x1ff   : > { %v2226_v25 = vadd.f32 %v2225_v18, %v2224_v13  ;;  %v2297_v20 = vrot.slane %v2296_v14, 1 }
 0x201   : > { %v2227_v24 = vadd.f32 %v2226_v25, %v2189_v15  ;;  %v2298_v30 = vadd.f32 %v2297_v20, %v2296_v14 }
 0x203   : > { %2228 = vst [vmem:[#allocation2] sm:$0x1] %v2227_v24  ;;  %v2299_v6 = vadd.f32 %v2298_v30, %v2229_v23 }
 0x205   : > { %2300 = vst [vmem:[#allocation3] sm:$0x1] %v2299_v6 }
 0x20a   : > { %v2464_v26 = vld [vmem:[#allocation2] sm:$0x1] }
 0x20b   : > { %v2465_v22 = vmul.f32 0.00390625, %v2464_v26 }
 0x20c   : > { %v2466_v19 = vld [vmem:[#allocation3] sm:$0x1] }
 0x20d   : > { %v2467_v55 = vmul.f32 0.00390625, %v2466_v19  ;;  %v2468_v27 = vmul.f32 %v2465_v22, %v2465_v22  ;;  %2473 = vst [vmem:[%s250_s30] sm:$0x1] %v2465_v22 }
 0x20f   : > { %v2469_v29 = vsub.f32 %v2467_v55, %v2468_v27 }
 0x211   : > { %v2470_v35 = vmax.f32 %v2469_v29, 0.0 }
 0x213   : > { %v2471_v28 = vadd.f32 1e-05, %v2470_v35 }
 0x215   : > { %3499 = vrsqrt.f32 %v2471_v28 }
 0x222   : > { %v3500_v36 = vpop.eup %3499 }
 0x223   : > { %2474 = vst [vmem:[%s250_s30 + $0x1] sm:$0x1] %v3500_v36 }
 0x224 PF: > { %s15_s17 = sadd.s32 1, %s3523_s17   ;;  %s4074_s15 = smov %s3519_s16 }
 0x225   : > { %p12_p5 = scmp.ge.s32.totalorder %s15_s17, 4   ;;  %s4075_s16 = smov %s4077_s18 }
 0x227   :  { %14 = sbr.rel (!%p12_p5) target bundleno = 2 (0x2), region = 82 }

// kernel: style_encoder_forward.5
= control target key start
LH: loop header
LB: loop body
LE: loop exit
PB: predicated region body
PF: predicated region fallthrough
CT: control target
= control target key end

     0   :  { %s3911_s15 = smov 0   ;;  %s3913_s16 = smov 0   ;;  %s5107_s0 = inlined_call_operand.vmem [shape: bf16[2,64,2048], index: 0, kind: input, shape index: {}]   ;;  %s5108_s1 = inlined_call_operand.vmem [shape: bf16[2048,256], index: 1, kind: input, shape index: {}]   ;;  %s5109_s2 = inlined_call_operand.vmem [shape: f32[1,256], index: 2, kind: input, shape index: {}]   ;;  %s5110_s3 = inlined_call_operand.vmem [shape: bf16[2,64,256], index: 3, kind: output, shape index: {0}]   ;;  %s5111_s4 = inlined_call_operand.vmem [shape: f32[2,2,256], index: 4, kind: output, shape index: {1}]  }
   0x1   :  { %s3915_s17 = smov 0  }
   0x2 LB: > { %s27_s18 = sadd.s32 1, %s3878_s16  ;;  %p3099_p0 = scmp.ge.s32.totalorder %s3882_s17, 1  ;;  %s3882_s17 = sphi %s3915_s17, %s15_s17   ;;  %s3878_s16 = sphi %s3913_s16, %s5162_s16   ;;  %s3874_s15 = sphi %s3911_s15, %s5161_s15  }
   0x3   : > { %p29_p1 = scmp.ge.s32.totalorder %s27_s18, 2  ;;  %p187_p2 = scmp.lt.s32.totalorder %s3882_s17, 3 }
   0x5   : > { %s5164_s18 = smov (%p29_p1, %s27_s18), 0  ;;  %p188_p3 = pnand %p3099_p0, %p187_p2 }
   0x7   : > { %191 = sbr.rel (%p188_p3) target bundleno = 551 (0x227), region = 32 }
   0xc   : > { %v3474_v0 = vld [vmem:[%s5108_s1 + $0x74] ss:$8 sps:$4 sm:$0xff]   ;;  %v3478_v2 = vld [vmem:[%s5108_s1 + $0x70] ss:$8 sps:$4 sm:$0xff]   ;;  %v3480_v4 = vld [vmem:[%s5108_s1 + $0x64] ss:$8 sps:$4 sm:$0xff]  }
   0xd   : > { %v3476_v1 = vld [vmem:[%s5108_s1 + $0x174] ss:$8 sps:$4 sm:$0xff]   ;;  %2197 = vmatprep.subr.bf16.mxu0 %v3474_v0  ;;  %v3479_v3 = vld [vmem:[%s5108_s1 + $0x170] ss:$8 sps:$4 sm:$0xff]   ;;  %v3482_v5 = vld [vmem:[%s5108_s1 + $0x164] ss:$8 sps:$4 sm:$0xff]  }
   0xe   : > { %2270 = vmatprep.subr.bf16.mxu1 %v3476_v1  ;;  %2198 = vmatpush1.bf16.msra.mxu0 %v3478_v2  ;;  %v3484_v6 = vld [vmem:[%s5108_s1 + $0x60] ss:$8 sps:$4 sm:$0xff]   ;;  %v3486_v8 = vld [vmem:[%s5108_s1 + $0x54] ss:$8 sps:$4 sm:$0xff]   ;;  %v3490_v10 = vld [vmem:[%s5108_s1 + $0x50] ss:$8 sps:$4 sm:$0xff]  }
   0xf   : > { %2271 = vmatpush1.bf16.msra.mxu1 %v3479_v3  ;;  %2199 = vmatprep.subr.bf16.mxu0 %v3480_v4  ;;  %v3485_v7 = vld [vmem:[%s5108_s1 + $0x160] ss:$8 sps:$4 sm:$0xff]   ;;  %v3488_v9 = vld [vmem:[%s5108_s1 + $0x154] ss:$8 sps:$4 sm:$0xff]   ;;  %v3491_v11 = vld [vmem:[%s5108_s1 + $0x150] ss:$8 sps:$4 sm:$0xff]  }
  0x10   : > { %2272 = vmatprep.subr.bf16.mxu1 %v3482_v5  ;;  %v3492_v12 = vld [vmem:[%s5108_s1 + $0x44] ss:$8 sps:$4 sm:$0xff]   ;;  %v3496_v14 = vld [vmem:[%s5108_s1 + $0x40] ss:$8 sps:$4 sm:$0xff]   ;;  %v3498_v16 = vld [vmem:[%s5108_s1 + $0x34] ss:$8 sps:$4 sm:$0xff]  }
  0x11   : > { %v3494_v13 = vld [vmem:[%s5108_s1 + $0x144] ss:$8 sps:$4 sm:$0xff]   ;;  %v3497_v15 = vld [vmem:[%s5108_s1 + $0x140] ss:$8 sps:$4 sm:$0xff]   ;;  %v3500_v17 = vld [vmem:[%s5108_s1 + $0x134] ss:$8 sps:$4 sm:$0xff]  }
  0x12   : > { %2200 = vmatpush1.bf16.msra.mxu0 %v3484_v6  ;;  %v3502_v18 = vld [vmem:[%s5108_s1 + $0x30] ss:$8 sps:$4 sm:$0xff]   ;;  %v3504_v20 = vld [vmem:[%s5108_s1 + $0x24] ss:$8 sps:$4 sm:$0xff]   ;;  %v3508_v22 = vld [vmem:[%s5108_s1 + $0x20] ss:$8 sps:$4 sm:$0xff]  }
  0x13   : > { %2273 = vmatpush1.bf16.msra.mxu1 %v3485_v7  ;;  %2201 = vmatprep.subr.bf16.mxu0 %v3486_v8  ;;  %v3503_v19 = vld [vmem:[%s5108_s1 + $0x130] ss:$8 sps:$4 sm:$0xff]   ;;  %v3506_v21 = vld [vmem:[%s5108_s1 + $0x124] ss:$8 sps:$4 sm:$0xff]   ;;  %v3509_v23 = vld [vmem:[%s5108_s1 + $0x120] ss:$8 sps:$4 sm:$0xff]  }
  0x14   : > { %2274 = vmatprep.subr.bf16.mxu1 %v3488_v9  ;;  %v3510_v24 = vld [vmem:[%s5108_s1 + $0x14] ss:$8 sps:$4 sm:$0xff]   ;;  %v3514_v26 = vld [vmem:[%s5108_s1 + $0x10] ss:$8 sps:$4 sm:$0xff]   ;;  %v3516_v28 = vld [vmem:[%s5108_s1 + $0x4] ss:$8 sps:$4 sm:$0xff]  }
  0x15   : > { %v3512_v25 = vld [vmem:[%s5108_s1 + $0x114] ss:$8 sps:$4 sm:$0xff]   ;;  %v3515_v27 = vld [vmem:[%s5108_s1 + $0x110] ss:$8 sps:$4 sm:$0xff]   ;;  %v3518_v29 = vld [vmem:[%s5108_s1 + $0x104] ss:$8 sps:$4 sm:$0xff]  }
  0x16   : > { %2202 = vmatpush1.bf16.msra.mxu0 %v3490_v10  ;;  %v3520_v30 = vld [vmem:[%s5108_s1] ss:$8 sps:$4 sm:$0xff]   ;;  %v3522_v32 = vld [vmem:[%s5108_s1 + $0xf4] ss:$8 sps:$4 sm:$0xff]   ;;  %p229_p4 = scmp.lt.s32.totalorder %s3874_s15, 1 }
  0x17   : > { %2275 = vmatpush1.bf16.msra.mxu1 %v3491_v11  ;;  %2203 = vmatprep.subr.bf16.mxu0 %v3492_v12  ;;  %v3521_v31 = vld [vmem:[%s5108_s1 + $0x100] ss:$8 sps:$4 sm:$0xff]   ;;  %v3524_v33 = vld [vmem:[%s5108_s1 + $0x1f4] ss:$8 sps:$4 sm:$0xff]   ;;  %v3526_v34 = vld [vmem:[%s5108_s1 + $0xf0] ss:$8 sps:$4 sm:$0xff]  }
  0x18   : > { %2276 = vmatprep.subr.bf16.mxu1 %v3494_v13  ;;  %v3527_v35 = vld [vmem:[%s5108_s1 + $0x1f0] ss:$8 sps:$4 sm:$0xff]   ;;  %v3528_v36 = vld [vmem:[%s5108_s1 + $0xe4] ss:$8 sps:$4 sm:$0xff]   ;;  %s5166_s15 = smov (!%p229_p4, %s3874_s15), 1 }
  0x19   : > { %v3530_v37 = vld [vmem:[%s5108_s1 + $0x1e4] ss:$8 sps:$4 sm:$0xff]   ;;  %v3532_v38 = vld [vmem:[%s5108_s1 + $0xe0] ss:$8 sps:$4 sm:$0xff]   ;;  %v3534_v40 = vld [vmem:[%s5108_s1 + $0xd4] ss:$8 sps:$4 sm:$0xff]  }
  0x1a   : > { %2204 = vmatpush1.bf16.msra.mxu0 %v3496_v14  ;;  %v3533_v39 = vld [vmem:[%s5108_s1 + $0x1e0] ss:$8 sps:$4 sm:$0xff]   ;;  %s3437_s9 = sshll.u32 %s5166_s15, 9  ;;  %v3536_v41 = vld [vmem:[%s5108_s1 + $0x1d4] ss:$8 sps:$4 sm:$0xff]   ;;  %s3439_s6 = sshll.u32 %s5166_s15, 2 }
  0x1b   : > { %2277 = vmatpush1.bf16.msra.mxu1 %v3497_v15  ;;  %2205 = vmatprep.subr.bf16.mxu0 %v3498_v16  ;;  %v3538_v42 = vld [vmem:[%s5108_s1 + $0xd0] ss:$8 sps:$4 sm:$0xff]   ;;  %s4071_s22 = scalar_lea.vmem %s5107_s0, %s3437_s9  ;;  %v3540_v44 = vld [vmem:[%s5108_s1 + $0xc4] ss:$8 sps:$4 sm:$0xff]   ;;  %v3544_v46 = vld [vmem:[%s5108_s1 + $0xc0] ss:$8 sps:$4 sm:$0xff]   ;;  %s254_s9 = scalar_lea.vmem %s5111_s4, %s3439_s6 }
  0x1c   : > { %2278 = vmatprep.subr.bf16.mxu1 %v3500_v17  ;;  %v3539_v43 = vld [vmem:[%s5108_s1 + $0x1d0] ss:$8 sps:$4 sm:$0xff]   ;;  %v3542_v45 = vld [vmem:[%s5108_s1 + $0x1c4] ss:$8 sps:$4 sm:$0xff]   ;;  %v3545_v47 = vld [vmem:[%s5108_s1 + $0x1c0] ss:$8 sps:$4 sm:$0xff]  }
  0x1d   : > { %v265_v48 = vld [vmem:[%s4071_s22] sm:$0xff]  ;;  %v266_v50 = vld [vmem:[%s4071_s22 + $0x8] sm:$0xff]  ;;  %v3546_v52 = vld [vmem:[%s5108_s1 + $0xb4] ss:$8 sps:$4 sm:$0xff]  }
  0x1e   : > { %2206 = vmatpush1.bf16.msra.mxu0 %v3502_v18  ;;  %v273_v49 = vld [vmem:[%s4071_s22 + $0x40] sm:$0xff]  ;;  %v274_v51 = vld [vmem:[%s4071_s22 + $0x48] sm:$0xff]  ;;  %v3548_v54 = vld [vmem:[%s5108_s1 + $0x1b4] ss:$8 sps:$4 sm:$0xff]  }
  0x1f   : > { %2279 = vmatpush1.bf16.msra.mxu1 %v3503_v19  ;;  %2207 = vmatprep.subr.bf16.mxu0 %v3504_v20  ;;  %v3107_v53 = vcombine.high %v265_v48, %v273_v49  ;;  %v3109_v55 = vcombine.high %v266_v50, %v274_v51  ;;  %v3550_v56 = vld [vmem:[%s5108_s1 + $0xb0] ss:$8 sps:$4 sm:$0xff]   ;;  %v3552_v58 = vld [vmem:[%s5108_s1 + $0xa4] ss:$8 sps:$4 sm:$0xff]   ;;  %v3556_v60 = vld [vmem:[%s5108_s1 + $0xa0] ss:$8 sps:$4 sm:$0xff]   ;;  %v3106_v8 = vcombine.low %v265_v48, %v273_v49 }
  0x20   : > { %2280 = vmatprep.subr.bf16.mxu1 %v3506_v21  ;;  %v3551_v57 = vld [vmem:[%s5108_s1 + $0x1b0] ss:$8 sps:$4 sm:$0xff]   ;;  %v3554_v59 = vld [vmem:[%s5108_s1 + $0x1a4] ss:$8 sps:$4 sm:$0xff]   ;;  %v3557_v61 = vld [vmem:[%s5108_s1 + $0x1a0] ss:$8 sps:$4 sm:$0xff]   ;;  %v3108_v9 = vcombine.low %v266_v50, %v274_v51 }
  0x21   : > { %2229 = vmatprep.mubr.bf16.mxu0 %v3107_v53  ;;  %2302 = vmatprep.mubr.bf16.mxu1 %v3109_v55  ;;  %v3558_v62 = vld [vmem:[%s5108_s1 + $0x94] ss:$8 sps:$4 sm:$0xff]   ;;  %v3562_v0 = vld [vmem:[%s5108_s1 + $0x90] ss:$8 sps:$4 sm:$0xff]   ;;  %v3564_v2 = vld [vmem:[%s5108_s1 + $0x84] ss:$8 sps:$4 sm:$0xff]  }
  0x22   : > { %2208 = vmatpush1.bf16.msra.mxu0 %v3508_v22  ;;  %v3560_v63 = vld [vmem:[%s5108_s1 + $0x194] ss:$8 sps:$4 sm:$0xff]   ;;  %v3563_v1 = vld [vmem:[%s5108_s1 + $0x190] ss:$8 sps:$4 sm:$0xff]   ;;  %v3566_v3 = vld [vmem:[%s5108_s1 + $0x184] ss:$8 sps:$4 sm:$0xff]  }
  0x23   : > { %2281 = vmatpush1.bf16.msra.mxu1 %v3509_v23  ;;  %2209 = vmatprep.subr.bf16.mxu0 %v3510_v24  ;;  %v3568_v4 = vld [vmem:[%s5108_s1 + $0x80] ss:$8 sps:$4 sm:$0xff]   ;;  %v3572_v6 = vld [vmem:[%s5108_s1 + $0x274] ss:$8 sps:$4 sm:$0xff]   ;;  %v3570_v10 = vld [vmem:[%s5108_s1 + $0x270] ss:$8 sps:$4 sm:$0xff]  }
  0x24   : > { %2282 = vmatprep.subr.bf16.mxu1 %v3512_v25  ;;  %v3569_v5 = vld [vmem:[%s5108_s1 + $0x180] ss:$8 sps:$4 sm:$0xff]   ;;  %v3575_v7 = vld [vmem:[%s5108_s1 + $0x374] ss:$8 sps:$4 sm:$0xff]   ;;  %v3573_v11 = vld [vmem:[%s5108_s1 + $0x370] ss:$8 sps:$4 sm:$0xff]  }
  0x25   : > { %v3578_v12 = vld [vmem:[%s5108_s1 + $0x264] ss:$8 sps:$4 sm:$0xff]   ;;  %v3576_v14 = vld [vmem:[%s5108_s1 + $0x260] ss:$8 sps:$4 sm:$0xff]   ;;  %v3584_v16 = vld [vmem:[%s5108_s1 + $0x254] ss:$8 sps:$4 sm:$0xff]  }
  0x26   : > { %2210 = vmatpush1.bf16.msra.mxu0 %v3514_v26  ;;  %v3581_v13 = vld [vmem:[%s5108_s1 + $0x364] ss:$8 sps:$4 sm:$0xff]   ;;  %v3579_v15 = vld [vmem:[%s5108_s1 + $0x360] ss:$8 sps:$4 sm:$0xff]   ;;  %v3587_v17 = vld [vmem:[%s5108_s1 + $0x354] ss:$8 sps:$4 sm:$0xff]  }
  0x27   : > { %2283 = vmatpush1.bf16.msra.mxu1 %v3515_v27  ;;  %2211 = vmatprep.subr.bf16.mxu0 %v3516_v28  ;;  %v281_v18 = vld [vmem:[%s4071_s22 + $0x80] sm:$0xff]  ;;  %v282_v20 = vld [vmem:[%s4071_s22 + $0x88] sm:$0xff]  ;;  %v3582_v24 = vld [vmem:[%s5108_s1 + $0x250] ss:$8 sps:$4 sm:$0xff]  }
  0x28   : > { %2284 = vmatprep.subr.bf16.mxu1 %v3518_v29  ;;  %v289_v19 = vld [vmem:[%s4071_s22 + $0xc0] sm:$0xff]  ;;  %v290_v22 = vld [vmem:[%s4071_s22 + $0xc8] sm:$0xff]  ;;  %v3585_v25 = vld [vmem:[%s5108_s1 + $0x350] ss:$8 sps:$4 sm:$0xff]  }
  0x29   : > { %v3123_v21 = vcombine.high %v281_v18, %v289_v19  ;;  %v3125_v23 = vcombine.high %v282_v20, %v290_v22  ;;  %v3122_v26 = vcombine.low %v281_v18, %v289_v19  ;;  %v3124_v27 = vcombine.low %v282_v20, %v290_v22  ;;  %v3590_v28 = vld [vmem:[%s5108_s1 + $0x244] ss:$8 sps:$4 sm:$0xff]   ;;  %v3600_v51 = vld [vmem:[%s5108_s1 + $0x220] ss:$8 sps:$4 sm:$0xff]   ;;  %v3611_v55 = vld [vmem:[%s5108_s1 + $0x314] ss:$8 sps:$4 sm:$0xff]  }
  0x2a   : > { %2212 = vmatpush1.bf16.msra.mxu0 %v3520_v30  ;;  %v3593_v29 = vld [vmem:[%s5108_s1 + $0x344] ss:$8 sps:$4 sm:$0xff]   ;;  %v3588_v30 = vld [vmem:[%s5108_s1 + $0x240] ss:$8 sps:$4 sm:$0xff]   ;;  %v3644_v22 = vld [vmem:[%s5108_s1 + $0x2b4] ss:$8 sps:$4 sm:$0xff]  }
  0x2b   : > { %2285 = vmatpush1.bf16.msra.mxu1 %v3521_v31  ;;  %2213 = vmatprep.subr.bf16.mxu0 %v3522_v32  ;;  %v3591_v31 = vld [vmem:[%s5108_s1 + $0x340] ss:$8 sps:$4 sm:$0xff]   ;;  %v3638_v18 = vld [vmem:[%s5108_s1 + $0x2c4] ss:$8 sps:$4 sm:$0xff]  }
  0x2c   : > { %2286 = vmatprep.subr.bf16.mxu1 %v3524_v33  ;;  %v297_v32 = vld [vmem:[%s4071_s22 + $0x100] sm:$0xff]  ;;  %v314_v49 = vld [vmem:[%s4071_s22 + $0x188] sm:$0xff] }
  0x2d   : > { %v305_v33 = vld [vmem:[%s4071_s22 + $0x140] sm:$0xff]  ;;  %v322_v50 = vld [vmem:[%s4071_s22 + $0x1c8] sm:$0xff] }
  0x2e   : > { %2214 = vmatpush2.bf16.msra.mxu0 %v3526_v34  ;;  %v298_v34 = vld [vmem:[%s4071_s22 + $0x108] sm:$0xff]  ;;  %v3157_v53 = vcombine.high %v314_v49, %v322_v50 }
  0x2f   : > { %2287 = vmatpush2.bf16.msra.mxu1 %v3527_v35  ;;  %2215 = vmatprep.subr.bf16.mxu0 %v3528_v36  ;;  %v306_v35 = vld [vmem:[%s4071_s22 + $0x148] sm:$0xff]  ;;  %v3596_v36 = vld [vmem:[%s5108_s1 + $0x234] ss:$8 sps:$4 sm:$0xff]  }
  0x30   : > { %2288 = vmatprep.subr.bf16.mxu1 %v3530_v37  ;;  %v3139_v37 = vcombine.high %v297_v32, %v305_v33  ;;  %v3641_v19 = vld [vmem:[%s5108_s1 + $0x3c4] ss:$8 sps:$4 sm:$0xff]   ;;  %v3636_v20 = vld [vmem:[%s5108_s1 + $0x2c0] ss:$8 sps:$4 sm:$0xff]  }
  0x32   : > { %2216 = vmatpush2.bf16.msra.mxu0 %v3532_v38  ;;  %v3141_v38 = vcombine.high %v298_v34, %v306_v35 }
  0x33   : > { %2289 = vmatpush2.bf16.msra.mxu1 %v3533_v39  ;;  %2217 = vmatprep.subr.bf16.mxu0 %v3534_v40  ;;  %v3599_v39 = vld [vmem:[%s5108_s1 + $0x334] ss:$8 sps:$4 sm:$0xff]   ;;  %v3594_v40 = vld [vmem:[%s5108_s1 + $0x230] ss:$8 sps:$4 sm:$0xff]  }
  0x34   : > { %2290 = vmatprep.subr.bf16.mxu1 %v3536_v41  ;;  %v3597_v41 = vld [vmem:[%s5108_s1 + $0x330] ss:$8 sps:$4 sm:$0xff]  }
  0x36   : > { %2218 = vmatpush2.bf16.msra.mxu0 %v3538_v42  ;;  %v3138_v42 = vcombine.low %v297_v32, %v305_v33  ;;  %v3654_v32 = vld [vmem:[%s5108_s1 + $0x290] ss:$8 sps:$4 sm:$0xff]  }
  0x37   : > { %2291 = vmatpush2.bf16.msra.mxu1 %v3539_v43  ;;  %2219 = vmatprep.subr.bf16.mxu0 %v3540_v44  ;;  %v3140_v43 = vcombine.low %v298_v34, %v306_v35  ;;  %v3602_v44 = vld [vmem:[%s5108_s1 + $0x224] ss:$8 sps:$4 sm:$0xff]   ;;  %v3657_v33 = vld [vmem:[%s5108_s1 + $0x390] ss:$8 sps:$4 sm:$0xff]  }
  0x38   : > { %2292 = vmatprep.subr.bf16.mxu1 %v3542_v45  ;;  %v3605_v45 = vld [vmem:[%s5108_s1 + $0x324] ss:$8 sps:$4 sm:$0xff]  }
  0x39   : > { %v3662_v34 = vld [vmem:[%s5108_s1 + $0x284] ss:$8 sps:$4 sm:$0xff]  }
  0x3a   : > { %2220 = vmatpush2.bf16.msra.mxu0 %v3544_v46  ;;  %v313_v46 = vld [vmem:[%s4071_s22 + $0x180] sm:$0xff] }
  0x3b   : > { %2293 = vmatpush2.bf16.msra.mxu1 %v3545_v47  ;;  %2221 = vmatprep.subr.bf16.mxu0 %v3546_v52  ;;  %v321_v47 = vld [vmem:[%s4071_s22 + $0x1c0] sm:$0xff] }
  0x3c   : > { %2294 = vmatprep.subr.bf16.mxu1 %v3548_v54  ;;  %v3155_v48 = vcombine.high %v313_v46, %v321_v47  ;;  %v3603_v52 = vld [vmem:[%s5108_s1 + $0x320] ss:$8 sps:$4 sm:$0xff]   ;;  %v3608_v54 = vld [vmem:[%s5108_s1 + $0x214] ss:$8 sps:$4 sm:$0xff]   ;;  %v3665_v35 = vld [vmem:[%s5108_s1 + $0x384] ss:$8 sps:$4 sm:$0xff]  }
  0x3e   : > { %2222 = vmatpush2.bf16.msra.mxu0 %v3550_v56  ;;  %v3606_v56 = vld [vmem:[%s5108_s1 + $0x210] ss:$8 sps:$4 sm:$0xff]  }
  0x3f   : > { %2295 = vmatpush2.bf16.msra.mxu1 %v3551_v57  ;;  %2223 = vmatprep.subr.bf16.mxu0 %v3552_v58  ;;  %v3609_v57 = vld [vmem:[%s5108_s1 + $0x310] ss:$8 sps:$4 sm:$0xff]   ;;  %v3154_v58 = vcombine.low %v313_v46, %v321_v47 }
  0x40   : > { %2296 = vmatprep.subr.bf16.mxu1 %v3554_v59  ;;  %v3156_v59 = vcombine.low %v314_v49, %v322_v50  ;;  %v284_v46 = vld [vmem:[%s4071_s22 + $0x98] sm:$0xff]  ;;  %v3677_v49 = vld [vmem:[%s5108_s1 + $0x564] ss:$8 sps:$4 sm:$0xff]  }
  0x41   : > { %v292_v47 = vld [vmem:[%s4071_s22 + $0xd8] sm:$0xff] }
  0x42   : > { %2224 = vmatpush2.bf16.msra.mxu0 %v3556_v60  ;;  %v3614_v60 = vld [vmem:[%s5108_s1 + $0x204] ss:$8 sps:$4 sm:$0xff]  }
  0x43   : > { %2297 = vmatpush2.bf16.msra.mxu1 %v3557_v61  ;;  %2225 = vmatprep.subr.bf16.mxu0 %v3558_v62  ;;  %v3617_v61 = vld [vmem:[%s5108_s1 + $0x304] ss:$8 sps:$4 sm:$0xff]   ;;  %v3612_v62 = vld [vmem:[%s5108_s1 + $0x200] ss:$8 sps:$4 sm:$0xff]  }
  0x44   : > { %2298 = vmatprep.subr.bf16.mxu1 %v3560_v63  ;;  %v3615_v63 = vld [vmem:[%s5108_s1 + $0x300] ss:$8 sps:$4 sm:$0xff]  }
  0x46   : > { %2226 = vmatpush2.bf16.msra.mxu0 %v3562_v0  ;;  %v4246_v0 = vld [vmem:[%s4071_s22 + $0x10] sm:$0xff] }
  0x47   : > { %2299 = vmatpush2.bf16.msra.mxu1 %v3563_v1  ;;  %2227 = vmatprep.subr.bf16.mxu0 %v3564_v2  ;;  %v4249_v1 = vld [vmem:[%s4071_s22 + $0x50] sm:$0xff]  ;;  %v4252_v2 = vld [vmem:[%s4071_s22 + $0x18] sm:$0xff] }
  0x48   : > { %2300 = vmatprep.subr.bf16.mxu1 %v3566_v3  ;;  %v4255_v3 = vld [vmem:[%s4071_s22 + $0x58] sm:$0xff] }
  0x4a   : > { %2228 = vmatpush2.bf16.msra.mxu0 %v3568_v4  ;;  %v3620_v4 = vld [vmem:[%s5108_s1 + $0x2f4] ss:$8 sps:$4 sm:$0xff]  }
  0x4b   : > { %2301 = vmatpush2.bf16.msra.mxu1 %v3569_v5  ;;  %2343 = vmatprep.subr.bf16.mxu0 %v3572_v6  ;;  %v3111_v5 = vcombine.high %v4246_v0, %v4249_v1  ;;  %v3623_v6 = vld [vmem:[%s5108_s1 + $0x3f4] ss:$8 sps:$4 sm:$0xff]  }
  0x4c   : > { %2416 = vmatprep.subr.bf16.mxu1 %v3575_v7  ;;  %v3113_v7 = vcombine.high %v4252_v2, %v4255_v3 }
  0x4d   : > { %2230 = vmatmul.mubr.bf16.vlgmr.msra.gmra.mxu0 %v3106_v8  ;;  %v3618_v8 = vld [vmem:[%s5108_s1 + $0x2f0] ss:$8 sps:$4 sm:$0xff]  }
  0x4e   : > { %2303 = vmatmul.mubr.bf16.vlgmr.msra.gmra.mxu1 %v3108_v9  ;;  %2344 = vmatpush1.bf16.msra.mxu0 %v3570_v10  ;;  %v3621_v9 = vld [vmem:[%s5108_s1 + $0x3f0] ss:$8 sps:$4 sm:$0xff]   ;;  %v3626_v10 = vld [vmem:[%s5108_s1 + $0x2e4] ss:$8 sps:$4 sm:$0xff]  }
  0x4f   : > { %2417 = vmatpush1.bf16.msra.mxu1 %v3573_v11  ;;  %2345 = vmatprep.subr.bf16.mxu0 %v3578_v12  ;;  %v3629_v11 = vld [vmem:[%s5108_s1 + $0x3e4] ss:$8 sps:$4 sm:$0xff]   ;;  %v3624_v12 = vld [vmem:[%s5108_s1 + $0x2e0] ss:$8 sps:$4 sm:$0xff]  }
  0x50   : > { %2418 = vmatprep.subr.bf16.mxu1 %v3581_v13  ;;  %2239 = vmatprep.mubr.bf16.mxu0 %v3123_v21  ;;  %v3627_v13 = vld [vmem:[%s5108_s1 + $0x3e0] ss:$8 sps:$4 sm:$0xff]  }
  0x51   : > { %2312 = vmatprep.mubr.bf16.mxu1 %v3125_v23  ;;  %v3639_v21 = vld [vmem:[%s5108_s1 + $0x3c0] ss:$8 sps:$4 sm:$0xff]   ;;  %v3647_v23 = vld [vmem:[%s5108_s1 + $0x3b4] ss:$8 sps:$4 sm:$0xff]  }
  0x52   : > { %2346 = vmatpush1.bf16.msra.mxu0 %v3576_v14  ;;  %v3632_v14 = vld [vmem:[%s5108_s1 + $0x2d4] ss:$8 sps:$4 sm:$0xff]  }
  0x53   : > { %2419 = vmatpush1.bf16.msra.mxu1 %v3579_v15  ;;  %2347 = vmatprep.subr.bf16.mxu0 %v3584_v16  ;;  %v3635_v15 = vld [vmem:[%s5108_s1 + $0x3d4] ss:$8 sps:$4 sm:$0xff]   ;;  %v3630_v16 = vld [vmem:[%s5108_s1 + $0x2d0] ss:$8 sps:$4 sm:$0xff]  }
  0x54   : > { %2420 = vmatprep.subr.bf16.mxu1 %v3587_v17  ;;  %v3633_v17 = vld [vmem:[%s5108_s1 + $0x3d0] ss:$8 sps:$4 sm:$0xff]  }
  0x55   : > { %2240 = vmatmul.mubr.bf16.gmra.mxu0 %v3122_v26  ;;  %v3650_v26 = vld [vmem:[%s5108_s1 + $0x2a4] ss:$8 sps:$4 sm:$0xff]  }
  0x56   : > { %2313 = vmatmul.mubr.bf16.gmra.mxu1 %v3124_v27  ;;  %2348 = vmatpush1.bf16.msra.mxu0 %v3582_v24  ;;  %v3642_v24 = vld [vmem:[%s5108_s1 + $0x2b0] ss:$8 sps:$4 sm:$0xff]   ;;  %v3653_v27 = vld [vmem:[%s5108_s1 + $0x3a4] ss:$8 sps:$4 sm:$0xff]  }
  0x57   : > { %2421 = vmatpush1.bf16.msra.mxu1 %v3585_v25  ;;  %2349 = vmatprep.subr.bf16.mxu0 %v3590_v28  ;;  %v3645_v25 = vld [vmem:[%s5108_s1 + $0x3b0] ss:$8 sps:$4 sm:$0xff]   ;;  %v3648_v28 = vld [vmem:[%s5108_s1 + $0x2a0] ss:$8 sps:$4 sm:$0xff]  }
  0x58   : > { %2422 = vmatprep.subr.bf16.mxu1 %v3593_v29  ;;  %2249 = vmatprep.mubr.bf16.mxu0 %v3139_v37  ;;  %v3651_v29 = vld [vmem:[%s5108_s1 + $0x3a0] ss:$8 sps:$4 sm:$0xff]  }
  0x59   : > { %2322 = vmatprep.mubr.bf16.mxu1 %v3141_v38  ;;  %v3663_v37 = vld [vmem:[%s5108_s1 + $0x380] ss:$8 sps:$4 sm:$0xff]   ;;  %v3668_v38 = vld [vmem:[%s5108_s1 + $0x474] ss:$8 sps:$4 sm:$0xff]  }
  0x5a   : > { %2350 = vmatpush1.bf16.msra.mxu0 %v3588_v30  ;;  %v3656_v30 = vld [vmem:[%s5108_s1 + $0x294] ss:$8 sps:$4 sm:$0xff]  }
  0x5b   : > { %2423 = vmatpush1.bf16.msra.mxu1 %v3591_v31  ;;  %2351 = vmatprep.subr.bf16.mxu0 %v3596_v36  ;;  %v3659_v31 = vld [vmem:[%s5108_s1 + $0x394] ss:$8 sps:$4 sm:$0xff]   ;;  %v3660_v36 = vld [vmem:[%s5108_s1 + $0x280] ss:$8 sps:$4 sm:$0xff]  }
  0x5c   : > { %2424 = vmatprep.subr.bf16.mxu1 %v3599_v39  ;;  %v3671_v39 = vld [vmem:[%s5108_s1 + $0x574] ss:$8 sps:$4 sm:$0xff]  }
  0x5d   : > { %2250 = vmatmul.mubr.bf16.gmra.mxu0 %v3138_v42  ;;  %v283_v42 = vld [vmem:[%s4071_s22 + $0x90] sm:$0xff] }
  0x5e   : > { %2323 = vmatmul.mubr.bf16.gmra.mxu1 %v3140_v43  ;;  %2352 = vmatpush1.bf16.msra.mxu0 %v3594_v40  ;;  %v3666_v40 = vld [vmem:[%s5108_s1 + $0x470] ss:$8 sps:$4 sm:$0xff]  }
  0x5f   : > { %2425 = vmatpush1.bf16.msra.mxu1 %v3597_v41  ;;  %2353 = vmatprep.subr.bf16.mxu0 %v3602_v44  ;;  %v3669_v41 = vld [vmem:[%s5108_s1 + $0x570] ss:$8 sps:$4 sm:$0xff]   ;;  %v3110_v44 = vcombine.low %v4246_v0, %v4249_v1  ;;  %v3686_v0 = vld [vmem:[%s5108_s1 + $0x444] ss:$8 sps:$4 sm:$0xff]  }
  0x60   : > { %2426 = vmatprep.subr.bf16.mxu1 %v3605_v45  ;;  %2259 = vmatprep.mubr.bf16.mxu0 %v3155_v48  ;;  %v291_v43 = vld [vmem:[%s4071_s22 + $0xd0] sm:$0xff]  ;;  %v3112_v45 = vcombine.low %v4252_v2, %v4255_v3  ;;  %v3674_v48 = vld [vmem:[%s5108_s1 + $0x464] ss:$8 sps:$4 sm:$0xff]  }
  0x61   : > { %2332 = vmatprep.mubr.bf16.mxu1 %v3157_v53  ;;  %v3127_v50 = vcombine.high %v283_v42, %v291_v43  ;;  %v3675_v53 = vld [vmem:[%s5108_s1 + $0x560] ss:$8 sps:$4 sm:$0xff]   ;;  %v3689_v1 = vld [vmem:[%s5108_s1 + $0x544] ss:$8 sps:$4 sm:$0xff]  }
  0x62   : > { %2354 = vmatpush1.bf16.msra.mxu0 %v3600_v51  ;;  %v3129_v51 = vcombine.high %v284_v46, %v292_v47 }
  0x63   : > { %2427 = vmatpush1.bf16.msra.mxu1 %v3603_v52  ;;  %2355 = vmatprep.subr.bf16.mxu0 %v3608_v54  ;;  %v3672_v52 = vld [vmem:[%s5108_s1 + $0x460] ss:$8 sps:$4 sm:$0xff]   ;;  %v3680_v54 = vld [vmem:[%s5108_s1 + $0x454] ss:$8 sps:$4 sm:$0xff]  }
  0x64   : > { %2428 = vmatprep.subr.bf16.mxu1 %v3611_v55  ;;  %v3683_v55 = vld [vmem:[%s5108_s1 + $0x554] ss:$8 sps:$4 sm:$0xff]  }
  0x65   : > { %2260 = vmatmul.mubr.bf16.gmra.mxu0 %v3154_v58  ;;  %v299_v58 = vld [vmem:[%s4071_s22 + $0x110] sm:$0xff] }
  0x66   : > { %2333 = vmatmul.mubr.bf16.gmra.mxu1 %v3156_v59  ;;  %2356 = vmatpush1.bf16.msra.mxu0 %v3606_v56  ;;  %v3678_v56 = vld [vmem:[%s5108_s1 + $0x450] ss:$8 sps:$4 sm:$0xff]  }
  0x67   : > { %2429 = vmatpush1.bf16.msra.mxu1 %v3609_v57  ;;  %2357 = vmatprep.subr.bf16.mxu0 %v3614_v60  ;;  %v3681_v57 = vld [vmem:[%s5108_s1 + $0x550] ss:$8 sps:$4 sm:$0xff]   ;;  %v3126_v60 = vcombine.low %v283_v42, %v291_v43  ;;  %v3722_v42 = vld [vmem:[%s5108_s1 + $0x4e4] ss:$8 sps:$4 sm:$0xff]  }
  0x68   : > { %2430 = vmatprep.subr.bf16.mxu1 %v3617_v61  ;;  %2375 = vmatprep.mubr.bf16.mxu0 %v3111_v5  ;;  %v307_v59 = vld [vmem:[%s4071_s22 + $0x150] sm:$0xff]  ;;  %v3128_v61 = vcombine.low %v284_v46, %v292_v47  ;;  %v3687_v5 = vld [vmem:[%s5108_s1 + $0x540] ss:$8 sps:$4 sm:$0xff]   ;;  %v3725_v43 = vld [vmem:[%s5108_s1 + $0x5e4] ss:$8 sps:$4 sm:$0xff]  }
  0x69   : > { %2448 = vmatprep.mubr.bf16.mxu1 %v3113_v7  ;;  %v3143_v2 = vcombine.high %v299_v58, %v307_v59  ;;  %v3695_v7 = vld [vmem:[%s5108_s1 + $0x534] ss:$8 sps:$4 sm:$0xff]  }
  0x6a   : > { %2358 = vmatpush1.bf16.msra.mxu0 %v3612_v62  ;;  %v300_v62 = vld [vmem:[%s4071_s22 + $0x118] sm:$0xff] }
  0x6b   : > { %2431 = vmatpush1.bf16.msra.mxu1 %v3615_v63  ;;  %2359 = vmatprep.subr.bf16.mxu0 %v3620_v4  ;;  %v308_v63 = vld [vmem:[%s4071_s22 + $0x158] sm:$0xff]  ;;  %v3684_v4 = vld [vmem:[%s5108_s1 + $0x440] ss:$8 sps:$4 sm:$0xff]  }
  0x6c   : > { %2432 = vmatprep.subr.bf16.mxu1 %v3623_v6  ;;  %v3145_v3 = vcombine.high %v300_v62, %v308_v63  ;;  %v3692_v6 = vld [vmem:[%s5108_s1 + $0x434] ss:$8 sps:$4 sm:$0xff]  }
  0x6d   : > { %v3728_v46 = vld [vmem:[%s5108_s1 + $0x4d4] ss:$8 sps:$4 sm:$0xff]  }
  0x6e   : > { %2360 = vmatpush2.bf16.msra.mxu0 %v3618_v8  ;;  %v3690_v8 = vld [vmem:[%s5108_s1 + $0x430] ss:$8 sps:$4 sm:$0xff]   ;;  %v3731_v47 = vld [vmem:[%s5108_s1 + $0x5d4] ss:$8 sps:$4 sm:$0xff]  }
  0x6f   : > { %2433 = vmatpush2.bf16.msra.mxu1 %v3621_v9  ;;  %2361 = vmatprep.subr.bf16.mxu0 %v3626_v10  ;;  %v315_v9 = vld [vmem:[%s4071_s22 + $0x190] sm:$0xff] }
  0x70   : > { %2434 = vmatprep.subr.bf16.mxu1 %v3629_v11  ;;  %v323_v10 = vld [vmem:[%s4071_s22 + $0x1d0] sm:$0xff]  ;;  %v3142_v11 = vcombine.low %v299_v58, %v307_v59  ;;  %v3746_v58 = vld [vmem:[%s5108_s1 + $0x4a4] ss:$8 sps:$4 sm:$0xff]  }
  0x71   : > { %v3749_v59 = vld [vmem:[%s5108_s1 + $0x5a4] ss:$8 sps:$4 sm:$0xff]  }
  0x72   : > { %2362 = vmatpush2.bf16.msra.mxu0 %v3624_v12  ;;  %v3144_v12 = vcombine.low %v300_v62, %v308_v63  ;;  %v3752_v62 = vld [vmem:[%s5108_s1 + $0x494] ss:$8 sps:$4 sm:$0xff]  }
  0x73   : > { %2435 = vmatpush2.bf16.msra.mxu1 %v3627_v13  ;;  %2363 = vmatprep.subr.bf16.mxu0 %v3632_v14  ;;  %v316_v13 = vld [vmem:[%s4071_s22 + $0x198] sm:$0xff] }
  0x74   : > { %2436 = vmatprep.subr.bf16.mxu1 %v3635_v15  ;;  %v324_v14 = vld [vmem:[%s4071_s22 + $0x1d8] sm:$0xff] }
  0x75   : > { %v3693_v15 = vld [vmem:[%s5108_s1 + $0x530] ss:$8 sps:$4 sm:$0xff]   ;;  %v3755_v63 = vld [vmem:[%s5108_s1 + $0x594] ss:$8 sps:$4 sm:$0xff]  }
  0x76   : > { %2364 = vmatpush2.bf16.msra.mxu0 %v3630_v16  ;;  %v3698_v16 = vld [vmem:[%s5108_s1 + $0x424] ss:$8 sps:$4 sm:$0xff]  }
  0x77   : > { %2437 = vmatpush2.bf16.msra.mxu1 %v3633_v17  ;;  %2365 = vmatprep.subr.bf16.mxu0 %v3638_v18  ;;  %v3701_v17 = vld [vmem:[%s5108_s1 + $0x524] ss:$8 sps:$4 sm:$0xff]   ;;  %v3159_v18 = vcombine.high %v315_v9, %v323_v10 }
  0x78   : > { %2438 = vmatprep.subr.bf16.mxu1 %v3641_v19  ;;  %v3161_v19 = vcombine.high %v316_v13, %v324_v14 }
  0x7a   : > { %2366 = vmatpush2.bf16.msra.mxu0 %v3636_v20  ;;  %v3696_v20 = vld [vmem:[%s5108_s1 + $0x420] ss:$8 sps:$4 sm:$0xff]  }
  0x7b   : > { %2439 = vmatpush2.bf16.msra.mxu1 %v3639_v21  ;;  %2367 = vmatprep.subr.bf16.mxu0 %v3644_v22  ;;  %v3699_v21 = vld [vmem:[%s5108_s1 + $0x520] ss:$8 sps:$4 sm:$0xff]   ;;  %v3704_v22 = vld [vmem:[%s5108_s1 + $0x414] ss:$8 sps:$4 sm:$0xff]  }
  0x7c   : > { %2440 = vmatprep.subr.bf16.mxu1 %v3647_v23  ;;  %v3707_v23 = vld [vmem:[%s5108_s1 + $0x514] ss:$8 sps:$4 sm:$0xff]  }
  0x7e   : > { %2368 = vmatpush2.bf16.msra.mxu0 %v3642_v24  ;;  %v4452_v24 = vld [vmem:[%s4071_s22 + $0x20] sm:$0xff] }
  0x7f   : > { %2441 = vmatpush2.bf16.msra.mxu1 %v3645_v25  ;;  %2369 = vmatprep.subr.bf16.mxu0 %v3650_v26  ;;  %v4455_v25 = vld [vmem:[%s4071_s22 + $0x60] sm:$0xff]  ;;  %v3158_v26 = vcombine.low %v315_v9, %v323_v10 }
  0x80   : > { %2442 = vmatprep.subr.bf16.mxu1 %v3653_v27  ;;  %v3160_v27 = vcombine.low %v316_v13, %v324_v14  ;;  %v3114_v9 = vcombine.low %v4452_v24, %v4455_v25  ;;  %v294_v13 = vld [vmem:[%s4071_s22 + $0xe8] sm:$0xff]  ;;  %v3762_v14 = vld [vmem:[%s5108_s1 + $0x670] ss:$8 sps:$4 sm:$0xff]  }
  0x82   : > { %2370 = vmatpush2.bf16.msra.mxu0 %v3648_v28  ;;  %v4458_v28 = vld [vmem:[%s4071_s22 + $0x28] sm:$0xff] }
  0x83   : > { %2443 = vmatpush2.bf16.msra.mxu1 %v3651_v29  ;;  %2371 = vmatprep.subr.bf16.mxu0 %v3656_v30  ;;  %v4461_v29 = vld [vmem:[%s4071_s22 + $0x68] sm:$0xff]  ;;  %v3702_v30 = vld [vmem:[%s5108_s1 + $0x410] ss:$8 sps:$4 sm:$0xff]  }
  0x84   : > { %2444 = vmatprep.subr.bf16.mxu1 %v3659_v31  ;;  %v3705_v31 = vld [vmem:[%s5108_s1 + $0x510] ss:$8 sps:$4 sm:$0xff]   ;;  %v3116_v10 = vcombine.low %v4458_v28, %v4461_v29 }
  0x86   : > { %2372 = vmatpush2.bf16.msra.mxu0 %v3654_v32  ;;  %v3710_v32 = vld [vmem:[%s5108_s1 + $0x404] ss:$8 sps:$4 sm:$0xff]  }
  0x87   : > { %2445 = vmatpush2.bf16.msra.mxu1 %v3657_v33  ;;  %2373 = vmatprep.subr.bf16.mxu0 %v3662_v34  ;;  %v3713_v33 = vld [vmem:[%s5108_s1 + $0x504] ss:$8 sps:$4 sm:$0xff]   ;;  %v3115_v34 = vcombine.high %v4452_v24, %v4455_v25 }
  0x88   : > { %2446 = vmatprep.subr.bf16.mxu1 %v3665_v35  ;;  %v3117_v35 = vcombine.high %v4458_v28, %v4461_v29  ;;  %v301_v24 = vld [vmem:[%s4071_s22 + $0x120] sm:$0xff]  ;;  %v302_v28 = vld [vmem:[%s4071_s22 + $0x128] sm:$0xff] }
  0x89   : > { %v310_v29 = vld [vmem:[%s4071_s22 + $0x168] sm:$0xff] }
  0x8a   : > { %2374 = vmatpush2.bf16.msra.mxu0 %v3660_v36  ;;  %v3708_v36 = vld [vmem:[%s5108_s1 + $0x400] ss:$8 sps:$4 sm:$0xff]  }
  0x8b   : > { %2447 = vmatpush2.bf16.msra.mxu1 %v3663_v37  ;;  %2489 = vmatprep.subr.bf16.mxu0 %v3668_v38  ;;  %v3711_v37 = vld [vmem:[%s5108_s1 + $0x500] ss:$8 sps:$4 sm:$0xff]   ;;  %v3716_v38 = vld [vmem:[%s5108_s1 + $0x4f4] ss:$8 sps:$4 sm:$0xff]  }
  0x8c   : > { %2562 = vmatprep.subr.bf16.mxu1 %v3671_v39  ;;  %v3719_v39 = vld [vmem:[%s5108_s1 + $0x5f4] ss:$8 sps:$4 sm:$0xff]  }
  0x8d   : > { %2376 = vmatmul.mubr.bf16.vlgmr.msra.gmra.mxu0 %v3110_v44  ;;  %v3720_v44 = vld [vmem:[%s5108_s1 + $0x4e0] ss:$8 sps:$4 sm:$0xff]  }
  0x8e   : > { %2449 = vmatmul.mubr.bf16.vlgmr.msra.gmra.mxu1 %v3112_v45  ;;  %2490 = vmatpush1.bf16.msra.mxu0 %v3666_v40  ;;  %v3714_v40 = vld [vmem:[%s5108_s1 + $0x4f0] ss:$8 sps:$4 sm:$0xff]   ;;  %v3723_v45 = vld [vmem:[%s5108_s1 + $0x5e0] ss:$8 sps:$4 sm:$0xff]  }
  0x8f   : > { %2563 = vmatpush1.bf16.msra.mxu1 %v3669_v41  ;;  %2491 = vmatprep.subr.bf16.mxu0 %v3674_v48  ;;  %v3717_v41 = vld [vmem:[%s5108_s1 + $0x5f0] ss:$8 sps:$4 sm:$0xff]  }
  0x90   : > { %2564 = vmatprep.subr.bf16.mxu1 %v3677_v49  ;;  %2385 = vmatprep.mubr.bf16.mxu0 %v3127_v50  ;;  %v3726_v48 = vld [vmem:[%s5108_s1 + $0x4d0] ss:$8 sps:$4 sm:$0xff]   ;;  %v3734_v50 = vld [vmem:[%s5108_s1 + $0x4c4] ss:$8 sps:$4 sm:$0xff]  }
  0x91   : > { %2458 = vmatprep.mubr.bf16.mxu1 %v3129_v51  ;;  %v3729_v49 = vld [vmem:[%s5108_s1 + $0x5d0] ss:$8 sps:$4 sm:$0xff]   ;;  %v3737_v51 = vld [vmem:[%s5108_s1 + $0x5c4] ss:$8 sps:$4 sm:$0xff]  }
  0x92   : > { %2492 = vmatpush1.bf16.msra.mxu0 %v3672_v52  ;;  %v3732_v52 = vld [vmem:[%s5108_s1 + $0x4c0] ss:$8 sps:$4 sm:$0xff]  }
  0x93   : > { %2565 = vmatpush1.bf16.msra.mxu1 %v3675_v53  ;;  %2493 = vmatprep.subr.bf16.mxu0 %v3680_v54  ;;  %v3735_v53 = vld [vmem:[%s5108_s1 + $0x5c0] ss:$8 sps:$4 sm:$0xff]   ;;  %v3740_v54 = vld [vmem:[%s5108_s1 + $0x4b4] ss:$8 sps:$4 sm:$0xff]  }
  0x94   : > { %2566 = vmatprep.subr.bf16.mxu1 %v3683_v55  ;;  %v3743_v55 = vld [vmem:[%s5108_s1 + $0x5b4] ss:$8 sps:$4 sm:$0xff]  }
  0x95   : > { %2386 = vmatmul.mubr.bf16.gmra.mxu0 %v3126_v60  ;;  %v3744_v60 = vld [vmem:[%s5108_s1 + $0x4a0] ss:$8 sps:$4 sm:$0xff]  }
  0x96   : > { %2459 = vmatmul.mubr.bf16.gmra.mxu1 %v3128_v61  ;;  %2494 = vmatpush1.bf16.msra.mxu0 %v3678_v56  ;;  %v3738_v56 = vld [vmem:[%s5108_s1 + $0x4b0] ss:$8 sps:$4 sm:$0xff]   ;;  %v3747_v61 = vld [vmem:[%s5108_s1 + $0x5a0] ss:$8 sps:$4 sm:$0xff]  }
  0x97   : > { %2567 = vmatpush1.bf16.msra.mxu1 %v3681_v57  ;;  %2495 = vmatprep.subr.bf16.mxu0 %v3686_v0  ;;  %v3741_v57 = vld [vmem:[%s5108_s1 + $0x5b0] ss:$8 sps:$4 sm:$0xff]  }
  0x98   : > { %2568 = vmatprep.subr.bf16.mxu1 %v3689_v1  ;;  %2395 = vmatprep.mubr.bf16.mxu0 %v3143_v2  ;;  %v3750_v0 = vld [vmem:[%s5108_s1 + $0x490] ss:$8 sps:$4 sm:$0xff]   ;;  %v3758_v2 = vld [vmem:[%s5108_s1 + $0x484] ss:$8 sps:$4 sm:$0xff]  }
  0x99   : > { %2468 = vmatprep.mubr.bf16.mxu1 %v3145_v3  ;;  %v3753_v1 = vld [vmem:[%s5108_s1 + $0x590] ss:$8 sps:$4 sm:$0xff]   ;;  %v3761_v3 = vld [vmem:[%s5108_s1 + $0x584] ss:$8 sps:$4 sm:$0xff]  }
  0x9a   : > { %2496 = vmatpush1.bf16.msra.mxu0 %v3684_v4  ;;  %v3756_v4 = vld [vmem:[%s5108_s1 + $0x480] ss:$8 sps:$4 sm:$0xff]  }
  0x9b   : > { %2569 = vmatpush1.bf16.msra.mxu1 %v3687_v5  ;;  %2497 = vmatprep.subr.bf16.mxu0 %v3692_v6  ;;  %v3759_v5 = vld [vmem:[%s5108_s1 + $0x580] ss:$8 sps:$4 sm:$0xff]   ;;  %v3764_v6 = vld [vmem:[%s5108_s1 + $0x674] ss:$8 sps:$4 sm:$0xff]  }
  0x9c   : > { %2570 = vmatprep.subr.bf16.mxu1 %v3695_v7  ;;  %v3767_v7 = vld [vmem:[%s5108_s1 + $0x774] ss:$8 sps:$4 sm:$0xff]  }
  0x9d   : > { %2396 = vmatmul.mubr.bf16.gmra.mxu0 %v3142_v11  ;;  %v293_v11 = vld [vmem:[%s4071_s22 + $0xe0] sm:$0xff] }
  0x9e   : > { %2469 = vmatmul.mubr.bf16.gmra.mxu1 %v3144_v12  ;;  %2498 = vmatpush1.bf16.msra.mxu0 %v3690_v8  ;;  %v285_v8 = vld [vmem:[%s4071_s22 + $0xa0] sm:$0xff]  ;;  %v286_v12 = vld [vmem:[%s4071_s22 + $0xa8] sm:$0xff] }
  0x9f   : > { %2571 = vmatpush1.bf16.msra.mxu1 %v3693_v15  ;;  %2499 = vmatprep.subr.bf16.mxu0 %v3698_v16  ;;  %v3765_v15 = vld [vmem:[%s5108_s1 + $0x770] ss:$8 sps:$4 sm:$0xff]   ;;  %v3770_v16 = vld [vmem:[%s5108_s1 + $0x664] ss:$8 sps:$4 sm:$0xff]   ;;  %v3130_v25 = vcombine.low %v285_v8, %v293_v11 }
  0xa0   : > { %2572 = vmatprep.subr.bf16.mxu1 %v3701_v17  ;;  %2405 = vmatprep.mubr.bf16.mxu0 %v3159_v18  ;;  %v3773_v17 = vld [vmem:[%s5108_s1 + $0x764] ss:$8 sps:$4 sm:$0xff]   ;;  %v3131_v18 = vcombine.high %v285_v8, %v293_v11  ;;  %v3810_v8 = vld [vmem:[%s5108_s1 + $0x6f0] ss:$8 sps:$4 sm:$0xff]  }
  0xa1   : > { %2478 = vmatprep.mubr.bf16.mxu1 %v3161_v19  ;;  %v3133_v19 = vcombine.high %v286_v12, %v294_v13  ;;  %v3821_v11 = vld [vmem:[%s5108_s1 + $0x7e4] ss:$8 sps:$4 sm:$0xff]  }
  0xa2   : > { %2500 = vmatpush1.bf16.msra.mxu0 %v3696_v20  ;;  %v3768_v20 = vld [vmem:[%s5108_s1 + $0x660] ss:$8 sps:$4 sm:$0xff]  }
  0xa3   : > { %2573 = vmatpush1.bf16.msra.mxu1 %v3699_v21  ;;  %2501 = vmatprep.subr.bf16.mxu0 %v3704_v22  ;;  %v3771_v21 = vld [vmem:[%s5108_s1 + $0x760] ss:$8 sps:$4 sm:$0xff]   ;;  %v3776_v22 = vld [vmem:[%s5108_s1 + $0x654] ss:$8 sps:$4 sm:$0xff]  }
  0xa4   : > { %2574 = vmatprep.subr.bf16.mxu1 %v3707_v23  ;;  %v3779_v23 = vld [vmem:[%s5108_s1 + $0x754] ss:$8 sps:$4 sm:$0xff]  }
  0xa5   : > { %2406 = vmatmul.mubr.bf16.gmra.mxu0 %v3158_v26  ;;  %v3132_v26 = vcombine.low %v286_v12, %v294_v13  ;;  %v3816_v12 = vld [vmem:[%s5108_s1 + $0x6e0] ss:$8 sps:$4 sm:$0xff]  }
  0xa6   : > { %2479 = vmatmul.mubr.bf16.gmra.mxu1 %v3160_v27  ;;  %2502 = vmatpush1.bf16.msra.mxu0 %v3702_v30  ;;  %v309_v27 = vld [vmem:[%s4071_s22 + $0x160] sm:$0xff]  ;;  %v3774_v30 = vld [vmem:[%s5108_s1 + $0x650] ss:$8 sps:$4 sm:$0xff]  }
  0xa7   : > { %2575 = vmatpush1.bf16.msra.mxu1 %v3705_v31  ;;  %2503 = vmatprep.subr.bf16.mxu0 %v3710_v32  ;;  %v3777_v31 = vld [vmem:[%s5108_s1 + $0x750] ss:$8 sps:$4 sm:$0xff]   ;;  %v3782_v32 = vld [vmem:[%s5108_s1 + $0x644] ss:$8 sps:$4 sm:$0xff]   ;;  %v3819_v13 = vld [vmem:[%s5108_s1 + $0x7e0] ss:$8 sps:$4 sm:$0xff]  }
  0xa8   : > { %2576 = vmatprep.subr.bf16.mxu1 %v3713_v33  ;;  %2521 = vmatprep.mubr.bf16.mxu0 %v3115_v34  ;;  %v3785_v33 = vld [vmem:[%s5108_s1 + $0x744] ss:$8 sps:$4 sm:$0xff]   ;;  %v3147_v34 = vcombine.high %v301_v24, %v309_v27 }
  0xa9   : > { %2594 = vmatprep.mubr.bf16.mxu1 %v3117_v35  ;;  %v3149_v35 = vcombine.high %v302_v28, %v310_v29 }
  0xaa   : > { %2504 = vmatpush1.bf16.msra.mxu0 %v3708_v36  ;;  %v3780_v36 = vld [vmem:[%s5108_s1 + $0x640] ss:$8 sps:$4 sm:$0xff]  }
  0xab   : > { %2577 = vmatpush1.bf16.msra.mxu1 %v3711_v37  ;;  %2505 = vmatprep.subr.bf16.mxu0 %v3716_v38  ;;  %v3783_v37 = vld [vmem:[%s5108_s1 + $0x740] ss:$8 sps:$4 sm:$0xff]   ;;  %v3788_v38 = vld [vmem:[%s5108_s1 + $0x634] ss:$8 sps:$4 sm:$0xff]  }
  0xac   : > { %2578 = vmatprep.subr.bf16.mxu1 %v3719_v39  ;;  %v3791_v39 = vld [vmem:[%s5108_s1 + $0x734] ss:$8 sps:$4 sm:$0xff]  }
  0xae   : > { %2506 = vmatpush2.bf16.msra.mxu0 %v3714_v40  ;;  %v317_v40 = vld [vmem:[%s4071_s22 + $0x1a0] sm:$0xff] }
  0xaf   : > { %2579 = vmatpush2.bf16.msra.mxu1 %v3717_v41  ;;  %2507 = vmatprep.subr.bf16.mxu0 %v3722_v42  ;;  %v3146_v41 = vcombine.low %v301_v24, %v309_v27  ;;  %v3148_v42 = vcombine.low %v302_v28, %v310_v29  ;;  %v3834_v24 = vld [vmem:[%s5108_s1 + $0x6b0] ss:$8 sps:$4 sm:$0xff]   ;;  %v3845_v27 = vld [vmem:[%s5108_s1 + $0x7a4] ss:$8 sps:$4 sm:$0xff]   ;;  %v3840_v28 = vld [vmem:[%s5108_s1 + $0x6a0] ss:$8 sps:$4 sm:$0xff]  }
  0xb0   : > { %2580 = vmatprep.subr.bf16.mxu1 %v3725_v43  ;;  %v325_v43 = vld [vmem:[%s4071_s22 + $0x1e0] sm:$0xff] }
  0xb1   : > { %v3843_v29 = vld [vmem:[%s5108_s1 + $0x7a0] ss:$8 sps:$4 sm:$0xff]  }
  0xb2   : > { %2508 = vmatpush2.bf16.msra.mxu0 %v3720_v44  ;;  %v318_v44 = vld [vmem:[%s4071_s22 + $0x1a8] sm:$0xff] }
  0xb3   : > { %2581 = vmatpush2.bf16.msra.mxu1 %v3723_v45  ;;  %2509 = vmatprep.subr.bf16.mxu0 %v3728_v46  ;;  %v326_v45 = vld [vmem:[%s4071_s22 + $0x1e8] sm:$0xff]  ;;  %v3786_v46 = vld [vmem:[%s5108_s1 + $0x630] ss:$8 sps:$4 sm:$0xff]  }
  0xb4   : > { %2582 = vmatprep.subr.bf16.mxu1 %v3731_v47  ;;  %v3789_v47 = vld [vmem:[%s5108_s1 + $0x730] ss:$8 sps:$4 sm:$0xff]  }
  0xb6   : > { %2510 = vmatpush2.bf16.msra.mxu0 %v3726_v48  ;;  %v3794_v48 = vld [vmem:[%s5108_s1 + $0x624] ss:$8 sps:$4 sm:$0xff]  }
  0xb7   : > { %2583 = vmatpush2.bf16.msra.mxu1 %v3729_v49  ;;  %2511 = vmatprep.subr.bf16.mxu0 %v3734_v50  ;;  %v3797_v49 = vld [vmem:[%s5108_s1 + $0x724] ss:$8 sps:$4 sm:$0xff]   ;;  %v3163_v50 = vcombine.high %v317_v40, %v325_v43 }
  0xb8   : > { %2584 = vmatprep.subr.bf16.mxu1 %v3737_v51  ;;  %v3165_v51 = vcombine.high %v318_v44, %v326_v45 }
  0xba   : > { %2512 = vmatpush2.bf16.msra.mxu0 %v3732_v52  ;;  %v3792_v52 = vld [vmem:[%s5108_s1 + $0x620] ss:$8 sps:$4 sm:$0xff]  }
  0xbb   : > { %2585 = vmatpush2.bf16.msra.mxu1 %v3735_v53  ;;  %2513 = vmatprep.subr.bf16.mxu0 %v3740_v54  ;;  %v3795_v53 = vld [vmem:[%s5108_s1 + $0x720] ss:$8 sps:$4 sm:$0xff]   ;;  %v3800_v54 = vld [vmem:[%s5108_s1 + $0x614] ss:$8 sps:$4 sm:$0xff]  }
  0xbc   : > { %2586 = vmatprep.subr.bf16.mxu1 %v3743_v55  ;;  %v3803_v55 = vld [vmem:[%s5108_s1 + $0x714] ss:$8 sps:$4 sm:$0xff]  }
  0xbe   : > { %2514 = vmatpush2.bf16.msra.mxu0 %v3738_v56  ;;  %v4676_v56 = vld [vmem:[%s4071_s22 + $0x30] sm:$0xff] }
  0xbf   : > { %2587 = vmatpush2.bf16.msra.mxu1 %v3741_v57  ;;  %2515 = vmatprep.subr.bf16.mxu0 %v3746_v58  ;;  %v3162_v57 = vcombine.low %v317_v40, %v325_v43  ;;  %v3164_v58 = vcombine.low %v318_v44, %v326_v45  ;;  %v585_v40 = vld [vmem:[%s5109_s2] sm:$0x3]  ;;  %v295_v43 = vld [vmem:[%s4071_s22 + $0xf0] sm:$0xff]  ;;  %v288_v44 = vld [vmem:[%s4071_s22 + $0xb8] sm:$0xff] }
  0xc0   : > { %2588 = vmatprep.subr.bf16.mxu1 %v3749_v59  ;;  %v4679_v59 = vld [vmem:[%s4071_s22 + $0x70] sm:$0xff]  ;;  %v296_v45 = vld [vmem:[%s4071_s22 + $0xf8] sm:$0xff] }
  0xc2   : > { %2516 = vmatpush2.bf16.msra.mxu0 %v3744_v60  ;;  %v4682_v60 = vld [vmem:[%s4071_s22 + $0x38] sm:$0xff] }
  0xc3   : > { %2589 = vmatpush2.bf16.msra.mxu1 %v3747_v61  ;;  %2517 = vmatprep.subr.bf16.mxu0 %v3752_v62  ;;  %v4685_v61 = vld [vmem:[%s4071_s22 + $0x78] sm:$0xff] }
  0xc4   : > { %2590 = vmatprep.subr.bf16.mxu1 %v3755_v63  ;;  %v3798_v62 = vld [vmem:[%s5108_s1 + $0x610] ss:$8 sps:$4 sm:$0xff]  }
  0xc5   : > { %v3801_v63 = vld [vmem:[%s5108_s1 + $0x710] ss:$8 sps:$4 sm:$0xff]  }
  0xc6   : > { %2518 = vmatpush2.bf16.msra.mxu0 %v3750_v0  ;;  %v3806_v0 = vld [vmem:[%s5108_s1 + $0x604] ss:$8 sps:$4 sm:$0xff]  }
  0xc7   : > { %2591 = vmatpush2.bf16.msra.mxu1 %v3753_v1  ;;  %2519 = vmatprep.subr.bf16.mxu0 %v3758_v2  ;;  %v3809_v1 = vld [vmem:[%s5108_s1 + $0x704] ss:$8 sps:$4 sm:$0xff]   ;;  %v3119_v2 = vcombine.high %v4676_v56, %v4679_v59 }
  0xc8   : > { %2592 = vmatprep.subr.bf16.mxu1 %v3761_v3  ;;  %v3121_v3 = vcombine.high %v4682_v60, %v4685_v61 }
  0xca   : > { %2520 = vmatpush2.bf16.msra.mxu0 %v3756_v4  ;;  %v3804_v4 = vld [vmem:[%s5108_s1 + $0x600] ss:$8 sps:$4 sm:$0xff]  }
  0xcb   : > { %2593 = vmatpush2.bf16.msra.mxu1 %v3759_v5  ;;  %2635 = vmatprep.subr.bf16.mxu0 %v3764_v6  ;;  %v3807_v5 = vld [vmem:[%s5108_s1 + $0x700] ss:$8 sps:$4 sm:$0xff]   ;;  %v3812_v6 = vld [vmem:[%s5108_s1 + $0x6f4] ss:$8 sps:$4 sm:$0xff]  }
  0xcc   : > { %2708 = vmatprep.subr.bf16.mxu1 %v3767_v7  ;;  %v3815_v7 = vld [vmem:[%s5108_s1 + $0x7f4] ss:$8 sps:$4 sm:$0xff]  }
  0xcd   : > { %2522 = vmatmul.mubr.bf16.vlgmr.msra.gmra.mxu0 %v3114_v9  ;;  %v3813_v9 = vld [vmem:[%s5108_s1 + $0x7f0] ss:$8 sps:$4 sm:$0xff]  }
  0xce   : > { %2595 = vmatmul.mubr.bf16.vlgmr.msra.gmra.mxu1 %v3116_v10  ;;  %2636 = vmatpush1.bf16.msra.mxu0 %v3762_v14  ;;  %v3818_v10 = vld [vmem:[%s5108_s1 + $0x6e4] ss:$8 sps:$4 sm:$0xff]   ;;  %v3824_v14 = vld [vmem:[%s5108_s1 + $0x6d4] ss:$8 sps:$4 sm:$0xff]  }
  0xcf   : > { %2709 = vmatpush1.bf16.msra.mxu1 %v3765_v15  ;;  %2637 = vmatprep.subr.bf16.mxu0 %v3770_v16  ;;  %v3827_v15 = vld [vmem:[%s5108_s1 + $0x7d4] ss:$8 sps:$4 sm:$0xff]   ;;  %v3822_v16 = vld [vmem:[%s5108_s1 + $0x6d0] ss:$8 sps:$4 sm:$0xff]  }
  0xd0   : > { %2710 = vmatprep.subr.bf16.mxu1 %v3773_v17  ;;  %2531 = vmatprep.mubr.bf16.mxu0 %v3131_v18  ;;  %v3825_v17 = vld [vmem:[%s5108_s1 + $0x7d0] ss:$8 sps:$4 sm:$0xff]   ;;  %v3830_v18 = vld [vmem:[%s5108_s1 + $0x6c4] ss:$8 sps:$4 sm:$0xff]  }
  0xd1   : > { %2604 = vmatprep.mubr.bf16.mxu1 %v3133_v19  ;;  %v3833_v19 = vld [vmem:[%s5108_s1 + $0x7c4] ss:$8 sps:$4 sm:$0xff]  }
  0xd2   : > { %2638 = vmatpush1.bf16.msra.mxu0 %v3768_v20  ;;  %v3828_v20 = vld [vmem:[%s5108_s1 + $0x6c0] ss:$8 sps:$4 sm:$0xff]  }
  0xd3   : > { %2711 = vmatpush1.bf16.msra.mxu1 %v3771_v21  ;;  %2639 = vmatprep.subr.bf16.mxu0 %v3776_v22  ;;  %v3831_v21 = vld [vmem:[%s5108_s1 + $0x7c0] ss:$8 sps:$4 sm:$0xff]   ;;  %v3836_v22 = vld [vmem:[%s5108_s1 + $0x6b4] ss:$8 sps:$4 sm:$0xff]  }
  0xd4   : > { %2712 = vmatprep.subr.bf16.mxu1 %v3779_v23  ;;  %v3839_v23 = vld [vmem:[%s5108_s1 + $0x7b4] ss:$8 sps:$4 sm:$0xff]  }
  0xd5   : > { %2532 = vmatmul.mubr.bf16.gmra.mxu0 %v3130_v25  ;;  %v3837_v25 = vld [vmem:[%s5108_s1 + $0x7b0] ss:$8 sps:$4 sm:$0xff]  }
  0xd6   : > { %2605 = vmatmul.mubr.bf16.gmra.mxu1 %v3132_v26  ;;  %2640 = vmatpush1.bf16.msra.mxu0 %v3774_v30  ;;  %v3842_v26 = vld [vmem:[%s5108_s1 + $0x6a4] ss:$8 sps:$4 sm:$0xff]   ;;  %v259_v30 = vlaneseq }
  0xd7   : > { %2713 = vmatpush1.bf16.msra.mxu1 %v3777_v31  ;;  %2641 = vmatprep.subr.bf16.mxu0 %v3782_v32  ;;  %v3848_v31 = vld [vmem:[%s5108_s1 + $0x694] ss:$8 sps:$4 sm:$0xff]  }
  0xd8   : > { %2714 = vmatprep.subr.bf16.mxu1 %v3785_v33  ;;  %2541 = vmatprep.mubr.bf16.mxu0 %v3147_v34  ;;  %v3851_v32 = vld [vmem:[%s5108_s1 + $0x794] ss:$8 sps:$4 sm:$0xff]   ;;  %v3846_v33 = vld [vmem:[%s5108_s1 + $0x690] ss:$8 sps:$4 sm:$0xff]   ;;  %vm4924_vm0 = vcmp.lt.s32.totalorder %v259_v30, 256 }
  0xd9   : > { %2614 = vmatprep.mubr.bf16.mxu1 %v3149_v35  ;;  %v3849_v34 = vld [vmem:[%s5108_s1 + $0x790] ss:$8 sps:$4 sm:$0xff]   ;;  %v4794_v35 = vshrl.u32 %v259_v30, 7 }
  0xda   : > { %2642 = vmatpush1.bf16.msra.mxu0 %v3780_v36  ;;  %v3854_v36 = vld [vmem:[%s5108_s1 + $0x684] ss:$8 sps:$4 sm:$0xff]  }
  0xdb   : > { %2715 = vmatpush1.bf16.msra.mxu1 %v3783_v37  ;;  %2643 = vmatprep.subr.bf16.mxu0 %v3788_v38  ;;  %5115 = vst [vmem:[#allocation4_spill] sm:$0xff] %v4794_v35  ;;  %v3857_v37 = vld [vmem:[%s5108_s1 + $0x784] ss:$8 sps:$4 sm:$0xff]   ;;  %v3852_v38 = vld [vmem:[%s5108_s1 + $0x680] ss:$8 sps:$4 sm:$0xff]  }
  0xdc   : > { %2716 = vmatprep.subr.bf16.mxu1 %v3791_v39  ;;  %v3855_v39 = vld [vmem:[%s5108_s1 + $0x780] ss:$8 sps:$4 sm:$0xff]  }
  0xdd   : > { %2542 = vmatmul.mubr.bf16.gmra.mxu0 %v3146_v41  ;;  %v589_v41 = vsub.s32 0, %v4794_v35 }
  0xde   : > { %2615 = vmatmul.mubr.bf16.gmra.mxu1 %v3148_v42  ;;  %2644 = vmatpush1.bf16.msra.mxu0 %v3786_v46  ;;  %v287_v42 = vld [vmem:[%s4071_s22 + $0xb0] sm:$0xff]  ;;  %v593_v46 = vsub.s32 1, %v4794_v35 }
  0xdf   : > { %2717 = vmatpush1.bf16.msra.mxu1 %v3789_v47  ;;  %2645 = vmatprep.subr.bf16.mxu0 %v3794_v48  ;;  %v3118_v47 = vcombine.low %v4676_v56, %v4679_v59  ;;  %v3120_v48 = vcombine.low %v4682_v60, %v4685_v61  ;;  %v303_v56 = vld [vmem:[%s4071_s22 + $0x130] sm:$0xff]  ;;  %v304_v60 = vld [vmem:[%s4071_s22 + $0x138] sm:$0xff] }
  0xe0   : > { %2718 = vmatprep.subr.bf16.mxu1 %v3797_v49  ;;  %2551 = vmatprep.mubr.bf16.mxu0 %v3163_v50  ;;  %v4821_v49 = vrot.slane %v585_v40, %v589_v41  ;;  %v3135_v50 = vcombine.high %v287_v42, %v295_v43  ;;  %v311_v59 = vld [vmem:[%s4071_s22 + $0x170] sm:$0xff]  ;;  %v312_v61 = vld [vmem:[%s4071_s22 + $0x178] sm:$0xff] }
  0xe1   : > { %2624 = vmatprep.mubr.bf16.mxu1 %v3165_v51  ;;  %v3137_v51 = vcombine.high %v288_v44, %v296_v45 }
  0xe2   : > { %2646 = vmatpush1.bf16.msra.mxu0 %v3792_v52  ;;  %v4823_v52 = vrot.slane %v585_v40, %v593_v46 }
  0xe3   : > { %2719 = vmatpush1.bf16.msra.mxu1 %v3795_v53  ;;  %2647 = vmatprep.subr.bf16.mxu0 %v3800_v54 }
  0xe4   : > { %2720 = vmatprep.subr.bf16.mxu1 %v3803_v55 }
  0xe5   : > { %2552 = vmatmul.mubr.bf16.gmra.mxu0 %v3162_v57 }
  0xe6   : > { %2625 = vmatmul.mubr.bf16.gmra.mxu1 %v3164_v58  ;;  %2648 = vmatpush1.bf16.msra.mxu0 %v3798_v62 }
  0xe7   : > { %2721 = vmatpush1.bf16.msra.mxu1 %v3801_v63  ;;  %2649 = vmatprep.subr.bf16.mxu0 %v3806_v0 }
  0xe8   : > { %2722 = vmatprep.subr.bf16.mxu1 %v3809_v1  ;;  %2667 = vmatprep.mubr.bf16.mxu0 %v3119_v2  ;;  %v3134_v2 = vcombine.low %v287_v42, %v295_v43 }
  0xe9   : > { %2740 = vmatprep.mubr.bf16.mxu1 %v3121_v3  ;;  %v3136_v3 = vcombine.low %v288_v44, %v296_v45 }
  0xea   : > { %2650 = vmatpush1.bf16.msra.mxu0 %v3804_v4 }
  0xeb   : > { %2723 = vmatpush1.bf16.msra.mxu1 %v3807_v5  ;;  %2651 = vmatprep.subr.bf16.mxu0 %v3812_v6  ;;  %v3151_v6 = vcombine.high %v303_v56, %v311_v59 }
  0xec   : > { %2724 = vmatprep.subr.bf16.mxu1 %v3815_v7  ;;  %v3153_v7 = vcombine.high %v304_v60, %v312_v61 }
  0xee   : > { %2652 = vmatpush2.bf16.msra.mxu0 %v3810_v8 }
  0xef   : > { %2725 = vmatpush2.bf16.msra.mxu1 %v3813_v9  ;;  %2653 = vmatprep.subr.bf16.mxu0 %v3818_v10 }
  0xf0   : > { %2726 = vmatprep.subr.bf16.mxu1 %v3821_v11 }
  0xf2   : > { %2654 = vmatpush2.bf16.msra.mxu0 %v3816_v12 }
  0xf3   : > { %2727 = vmatpush2.bf16.msra.mxu1 %v3819_v13  ;;  %2655 = vmatprep.subr.bf16.mxu0 %v3824_v14 }
  0xf4   : > { %2728 = vmatprep.subr.bf16.mxu1 %v3827_v15  ;;  %v319_v15 = vld [vmem:[%s4071_s22 + $0x1b0] sm:$0xff] }
  0xf6   : > { %2656 = vmatpush2.bf16.msra.mxu0 %v3822_v16 }
  0xf7   : > { %2729 = vmatpush2.bf16.msra.mxu1 %v3825_v17  ;;  %2657 = vmatprep.subr.bf16.mxu0 %v3830_v18  ;;  %v327_v17 = vld [vmem:[%s4071_s22 + $0x1f0] sm:$0xff]  ;;  %v320_v18 = vld [vmem:[%s4071_s22 + $0x1b8] sm:$0xff] }
  0xf8   : > { %2730 = vmatprep.subr.bf16.mxu1 %v3833_v19  ;;  %v328_v19 = vld [vmem:[%s4071_s22 + $0x1f8] sm:$0xff]  ;;  %v3166_v46 = vcombine.low %v319_v15, %v327_v17  ;;  %s3438_s22 = sshll.u32 %s5166_s15, 6 }
  0xf9   : > { %s5046_s5 = scalar_lea.vmem %s5110_s3, %s3438_s22 }
  0xfa   : > { %2658 = vmatpush2.bf16.msra.mxu0 %v3828_v20 }
  0xfb   : > { %2731 = vmatpush2.bf16.msra.mxu1 %v3831_v21  ;;  %2659 = vmatprep.subr.bf16.mxu0 %v3836_v22 }
  0xfc   : > { %2732 = vmatprep.subr.bf16.mxu1 %v3839_v23 }
  0xfe   : > { %2660 = vmatpush2.bf16.msra.mxu0 %v3834_v24  ;;  %v3150_v24 = vcombine.low %v303_v56, %v311_v59 }
  0xff   : > { %2733 = vmatpush2.bf16.msra.mxu1 %v3837_v25  ;;  %2661 = vmatprep.subr.bf16.mxu0 %v3842_v26  ;;  %v3152_v25 = vcombine.low %v304_v60, %v312_v61 }
 0x100   : > { %2734 = vmatprep.subr.bf16.mxu1 %v3845_v27 }
 0x102   : > { %2662 = vmatpush2.bf16.msra.mxu0 %v3840_v28  ;;  %v3167_v28 = vcombine.high %v319_v15, %v327_v17 }
 0x103   : > { %2735 = vmatpush2.bf16.msra.mxu1 %v3843_v29  ;;  %2663 = vmatprep.subr.bf16.mxu0 %v3848_v31  ;;  %v3169_v29 = vcombine.high %v320_v18, %v328_v19 }
 0x104   : > { %2736 = vmatprep.subr.bf16.mxu1 %v3851_v32 }
 0x106   : > { %2664 = vmatpush2.bf16.msra.mxu0 %v3846_v33 }
 0x107   : > { %2737 = vmatpush2.bf16.msra.mxu1 %v3849_v34  ;;  %2665 = vmatprep.subr.bf16.mxu0 %v3854_v36 }
 0x108   : > { %2738 = vmatprep.subr.bf16.mxu1 %v3857_v37 }
 0x10a   : > { %2666 = vmatpush2.bf16.msra.mxu0 %v3852_v38 }
 0x10b   : > { %2739 = vmatpush2.bf16.msra.mxu1 %v3855_v39 }
 0x10d   : > { %v2231_v53 = vpop.f32.mrf.mxu0  ;;  %2668 = vmatmul.mubr.bf16.vlgmr.msra.gmra.mxu0 %v3118_v47  ;;  %v3168_v47 = vcombine.low %v320_v18, %v328_v19 }
 0x10e   : > { %v2304_v54 = vpop.f32.mrf.mxu1  ;;  %2741 = vmatmul.mubr.bf16.vlgmr.msra.gmra.mxu1 %v3120_v48  ;;  %v2232_v55 = vadd.f32 %v2231_v53, %v4821_v49  ;;  %2677 = vmatprep.mubr.bf16.mxu0 %v3135_v50 }
 0x10f   : > { %2750 = vmatprep.mubr.bf16.mxu1 %v3137_v51  ;;  %v2233_v57 = vpop.f32.mrf.mxu0 }
 0x110   : > { %v2306_v58 = vpop.f32.mrf.mxu1  ;;  %v4830_v62 = vadd.f32 %v2304_v54, %v2232_v55  ;;  %v2234_v63 = vadd.f32 %v2233_v57, %v4823_v52 }
 0x111   : > { %v2235_v0 = vpop.f32.mrf.mxu0 }
 0x112   : > { %v2308_v1 = vpop.f32.mrf.mxu1  ;;  %v4833_v4 = vadd.f32 %v2306_v58, %v2234_v63  ;;  %v2236_v5 = vadd.f32 %v2235_v0, %v4821_v49 }
 0x113   : > { %v2237_v8 = vpop.f32.mrf.mxu0 }
 0x114   : > { %v2310_v9 = vpop.f32.mrf.mxu1  ;;  %v4836_v10 = vadd.f32 %v2308_v1, %v2236_v5  ;;  %v2238_v11 = vadd.f32 %v2237_v8, %v4823_v52 }
 0x115   : > { %2678 = vmatmul.mubr.bf16.gmra.mxu0 %v3134_v2  ;;  %v2241_v12 = vpop.f32.mrf.mxu0 }
 0x116   : > { %2751 = vmatmul.mubr.bf16.gmra.mxu1 %v3136_v3  ;;  %v2314_v13 = vpop.f32.mrf.mxu1  ;;  %v4839_v14 = vadd.f32 %v2310_v9, %v2238_v11  ;;  %2687 = vmatprep.mubr.bf16.mxu0 %v3151_v6  ;;  %v2242_v16 = vadd.f32 %v2241_v12, %v4821_v49 }
 0x117   : > { %2760 = vmatprep.mubr.bf16.mxu1 %v3153_v7  ;;  %v2243_v20 = vpop.f32.mrf.mxu0 }
 0x118   : > { %v2316_v21 = vpop.f32.mrf.mxu1  ;;  %v2244_v22 = vadd.f32 %v2243_v20, %v4823_v52  ;;  %v4847_v23 = vadd.f32 %v2314_v13, %v2242_v16 }
 0x119   : > { %v2245_v26 = vpop.f32.mrf.mxu0 }
 0x11a   : > { %v2318_v27 = vpop.f32.mrf.mxu1  ;;  %v2246_v31 = vadd.f32 %v2245_v26, %v4821_v49  ;;  %v4850_v32 = vadd.f32 %v2316_v21, %v2244_v22 }
 0x11b   : > { %v2247_v33 = vpop.f32.mrf.mxu0 }
 0x11c   : > { %v2320_v34 = vpop.f32.mrf.mxu1  ;;  %v2248_v36 = vadd.f32 %v2247_v33, %v4823_v52  ;;  %v4853_v37 = vadd.f32 %v2318_v27, %v2246_v31 }
 0x11d   : > { %2688 = vmatmul.mubr.bf16.gmra.mxu0 %v3150_v24  ;;  %v2251_v38 = vpop.f32.mrf.mxu0 }
 0x11e   : > { %2761 = vmatmul.mubr.bf16.gmra.mxu1 %v3152_v25  ;;  %v2324_v39 = vpop.f32.mrf.mxu1  ;;  %2697 = vmatprep.mubr.bf16.mxu0 %v3167_v28  ;;  %v2252_v40 = vadd.f32 %v2251_v38, %v4821_v49  ;;  %v4856_v41 = vadd.f32 %v2320_v34, %v2248_v36 }
 0x11f   : > { %2770 = vmatprep.mubr.bf16.mxu1 %v3169_v29  ;;  %v2253_v42 = vpop.f32.mrf.mxu0 }
 0x120   : > { %v2326_v43 = vpop.f32.mrf.mxu1  ;;  %v2254_v44 = vadd.f32 %v2253_v42, %v4823_v52  ;;  %v4859_v45 = vadd.f32 %v2324_v39, %v2252_v40  ;;  %v5118_v40 = vmov 0 }
 0x121   : > { %v2255_v48 = vpop.f32.mrf.mxu0  ;;  %v5119_v40 = vsel %vm4924_vm0, 4294967295, %v5118_v40 }
 0x122   : > { %v2328_v50 = vpop.f32.mrf.mxu1  ;;  %v2256_v51 = vadd.f32 %v2255_v48, %v4821_v49  ;;  %v4862_v53 = vadd.f32 %v2326_v43, %v2254_v44  ;;  %5120 = vst [vmem:[#allocation7_spill] sm:$0xff] %v5119_v40  ;;  %v3884_v43 = vmov 0.0  }
 0x123   : > { %v2257_v54 = vpop.f32.mrf.mxu0  ;;  %263 = vst.msk [vmem:[#allocation2] sm:$0x3] %vm4924_vm0, %v3884_v43  ;;  %264 = vst.msk [vmem:[#allocation3] sm:$0x3] %vm4924_vm0, %v3884_v43 }
 0x124   : > { %v2330_v55 = vpop.f32.mrf.mxu1  ;;  %v2258_v56 = vadd.f32 %v2257_v54, %v4823_v52  ;;  %v4865_v57 = vadd.f32 %v2328_v50, %v2256_v51 }
 0x125   : > { %2698 = vmatmul.mubr.bf16.gmra.mxu0 %v3166_v46  ;;  %v2261_v58 = vpop.f32.mrf.mxu0 }
 0x126   : > { %2771 = vmatmul.mubr.bf16.gmra.mxu1 %v3168_v47  ;;  %v2334_v59 = vpop.f32.mrf.mxu1  ;;  %v2262_v60 = vadd.f32 %v2261_v58, %v4821_v49  ;;  %v4868_v61 = vadd.f32 %v2330_v55, %v2258_v56 }
 0x127   : > { %v2263_v63 = vpop.f32.mrf.mxu0 }
 0x128   : > { %v2336_v0 = vpop.f32.mrf.mxu1  ;;  %v2264_v1 = vadd.f32 %v2263_v63, %v4823_v52  ;;  %v4871_v2 = vadd.f32 %v2334_v59, %v2262_v60 }
 0x129   : > { %v2265_v3 = vpop.f32.mrf.mxu0 }
 0x12a   : > { %v2338_v5 = vpop.f32.mrf.mxu1  ;;  %v2266_v6 = vadd.f32 %v2265_v3, %v4821_v49  ;;  %v4874_v7 = vadd.f32 %v2336_v0, %v2264_v1 }
 0x12b   : > { %v2267_v8 = vpop.f32.mrf.mxu0 }
 0x12c   : > { %v2340_v9 = vpop.f32.mrf.mxu1  ;;  %v2268_v11 = vadd.f32 %v2267_v8, %v4823_v52  ;;  %v4877_v12 = vadd.f32 %v2338_v5, %v2266_v6 }
 0x12e   : > { %5116 = vst [vmem:[#allocation5_spill] sm:$0xff] %v4877_v12  ;;  %v4879_v13 = vadd.f32 %v2340_v9, %v2268_v11 }
 0x130   : > { %5117 = vst [vmem:[#allocation6_spill] sm:$0xff] %v4879_v13 }
 0x14d   : > { %v2377_v15 = vpop.f32.mrf.mxu0 }
 0x14e   : > { %v4881_v16 = vpop.f32.mrf.mxu1 }
 0x14f   : > { %v4883_v17 = vpop.f32.mrf.mxu0 }
 0x150   : > { %v4885_v18 = vpop.f32.mrf.mxu1 }
 0x151   : > { %v4887_v19 = vpop.f32.mrf.mxu0 }
 0x152   : > { %v4889_v49 = vpop.f32.mrf.mxu1 }
 0x153   : > { %v4891_v20 = vpop.f32.mrf.mxu0 }
 0x154   : > { %v4893_v21 = vpop.f32.mrf.mxu1 }
 0x155   : > { %v4895_v52 = vpop.f32.mrf.mxu0 }
 0x156   : > { %v4897_v22 = vpop.f32.mrf.mxu1 }
 0x157   : > { %v4899_v24 = vpop.f32.mrf.mxu0 }
 0x158   : > { %v4901_v25 = vpop.f32.mrf.mxu1 }
 0x159   : > { %v4903_v26 = vpop.f32.mrf.mxu0 }
 0x15a   : > { %v4905_v27 = vpop.f32.mrf.mxu1 }
 0x15b   : > { %v4907_v28 = vpop.f32.mrf.mxu0 }
 0x15c   : > { %v4909_v29 = vpop.f32.mrf.mxu1 }
 0x15d   : > { %v4911_v31 = vpop.f32.mrf.mxu0 }
 0x15e   : > { %v4913_v33 = vpop.f32.mrf.mxu1 }
 0x15f   : > { %v4915_v34 = vpop.f32.mrf.mxu0 }
 0x160   : > { %v4917_v36 = vpop.f32.mrf.mxu1 }
 0x161   : > { %v4919_v38 = vpop.f32.mrf.mxu0 }
 0x162   : > { %v4921_v39 = vpop.f32.mrf.mxu1 }
 0x163   : > { %v4928_v42 = vpop.f32.mrf.mxu0 }
 0x164   : > { %v4934_v44 = vpop.f32.mrf.mxu1 }
 0x165   : > { %v4936_v46 = vpop.f32.mrf.mxu0 }
 0x166   : > { %v4938_v47 = vpop.f32.mrf.mxu1 }
 0x167   : > { %v4940_v48 = vpop.f32.mrf.mxu0 }
 0x168   : > { %v4942_v30 = vpop.f32.mrf.mxu1 }
 0x169   : > { %5121 = vst [vmem:[#allocation8_spill] sm:$0xff] %v4942_v30  ;;  %v4944_v50 = vpop.f32.mrf.mxu0 }
 0x16a   : > { %5122 = vst [vmem:[#allocation9_spill] sm:$0xff] %v4944_v50  ;;  %v4946_v51 = vpop.f32.mrf.mxu1 }
 0x16b   : > { %5123 = vst [vmem:[#allocation10_spill] sm:$0xff] %v4946_v51  ;;  %v4948_v54 = vpop.f32.mrf.mxu0 }
 0x16c   : > { %5124 = vst [vmem:[#allocation11_spill] sm:$0xff] %v4948_v54  ;;  %v4950_v55 = vpop.f32.mrf.mxu1 }
 0x16d   : > { %5125 = vst [vmem:[#allocation12_spill] sm:$0xff] %v4950_v55 }
 0x18d   : > { %v2523_v56 = vpop.f32.mrf.mxu0 }
 0x18e   : > { %v2596_v58 = vpop.f32.mrf.mxu1 }
 0x18f   : > { %v2525_v59 = vpop.f32.mrf.mxu0 }
 0x190   : > { %v2598_v60 = vpop.f32.mrf.mxu1 }
 0x191   : > { %v2527_v63 = vpop.f32.mrf.mxu0 }
 0x192   : > { %v2600_v0 = vpop.f32.mrf.mxu1 }
 0x193   : > { %v2529_v1 = vpop.f32.mrf.mxu0 }
 0x194   : > { %v4952_v3 = vpop.f32.mrf.mxu1 }
 0x195   : > { %v2533_v5 = vpop.f32.mrf.mxu0 }
 0x196   : > { %v4954_v6 = vpop.f32.mrf.mxu1 }
 0x197   : > { %v4956_v8 = vpop.f32.mrf.mxu0 }
 0x198   : > { %v4958_v9 = vpop.f32.mrf.mxu1 }
 0x199   : > { %5126 = vst [vmem:[#allocation13_spill] sm:$0xff] %v4958_v9  ;;  %v4960_v11 = vpop.f32.mrf.mxu0 }
 0x19a   : > { %v4962_v43 = vpop.f32.mrf.mxu1 }
 0x19b   : > { %5127 = vst [vmem:[#allocation14_spill] sm:$0xff] %v4962_v43  ;;  %v4964_v40 = vpop.f32.mrf.mxu0 }
 0x19c   : > { %5128 = vst [vmem:[#allocation15_spill] sm:$0xff] %v4964_v40  ;;  %v4966_v35 = vpop.f32.mrf.mxu1 }
 0x19d   : > { %5129 = vst [vmem:[#allocation16_spill] sm:$0xff] %v4966_v35  ;;  %v4968_v55 = vpop.f32.mrf.mxu0  ;;  %v2378_v35 = vadd.f32 %v2377_v15, %v4830_v62  ;;  %v2384_v62 = vadd.f32 %v4891_v20, %v4839_v14  ;;  %v2394_v14 = vadd.f32 %v4907_v28, %v4856_v41  ;;  %v2398_v20 = vadd.f32 %v4911_v31, %v4859_v45 }
 0x19e   : > { %5130 = vst [vmem:[#allocation17_spill] sm:$0xff] %v4968_v55  ;;  %v4970_v51 = vpop.f32.mrf.mxu1 }
 0x19f   : > { %5131 = vst [vmem:[#allocation18_spill] sm:$0xff] %v4970_v51  ;;  %v4972_v54 = vpop.f32.mrf.mxu0 }
 0x1a0   : > { %v4974_v13 = vpop.f32.mrf.mxu1 }
 0x1a1   : > { %5132 = vst [vmem:[#allocation19_spill] sm:$0xff] %v4974_v13  ;;  %v4976_v30 = vpop.f32.mrf.mxu0  ;;  %v2380_v13 = vadd.f32 %v4883_v17, %v4833_v4 }
 0x1a2   : > { %5133 = vst [vmem:[#allocation20_spill] sm:$0xff] %v4976_v30  ;;  %v4978_v50 = vpop.f32.mrf.mxu1  ;;  %v2451_v30 = vadd.f32 %v4881_v16, %v2378_v35  ;;  %v2390_v35 = vadd.f32 %v4899_v24, %v4850_v32  ;;  %v2400_v32 = vadd.f32 %v4915_v34, %v4862_v53  ;;  %v2402_v24 = vadd.f32 %v4919_v38, %v4865_v57 }
 0x1a3   : > { %5134 = vst [vmem:[#allocation21_spill] sm:$0xff] %v4978_v50  ;;  %v4980_v9 = vpop.f32.mrf.mxu0  ;;  %v2382_v50 = vadd.f32 %v4887_v19, %v4836_v10  ;;  %v2392_v10 = vadd.f32 %v4903_v26, %v4853_v37  ;;  %v2467_v53 = vadd.f32 %v4909_v29, %v2394_v14  ;;  %v2471_v57 = vadd.f32 %v4913_v33, %v2398_v20  ;;  %v5143_v14 = vld [vmem:[#allocation14_spill] sm:$0xff] }
 0x1a4   : > { %5135 = vst [vmem:[#allocation22_spill] sm:$0xff] %v4980_v9  ;;  %v4982_v12 = vpop.f32.mrf.mxu1  ;;  %v2524_v15 = vadd.f32 %v2523_v56, %v2451_v30  ;;  %v2463_v41 = vadd.f32 %v4901_v25, %v2390_v35  ;;  %v2473_v38 = vadd.f32 %v4917_v36, %v2400_v32  ;;  %v2408_v25 = vadd.f32 %v4936_v46, %v4871_v2 }
 0x1a5   : > { %5136 = vst [vmem:[#allocation23_spill] sm:$0xff] %v4982_v12  ;;  %v4984_v43 = vpop.f32.mrf.mxu0  ;;  %v2455_v4 = vadd.f32 %v4889_v49, %v2382_v50  ;;  %v2465_v28 = vadd.f32 %v4905_v27, %v2392_v10 }
 0x1a6   : > { %v4986_v40 = vpop.f32.mrf.mxu1  ;;  %v2536_v33 = vadd.f32 %v4956_v8, %v2463_v41  ;;  %v5146_v41 = vld [vmem:[#allocation6_spill] sm:$0xff] }
 0x1a7   : > { %5137 = vst [vmem:[#allocation24_spill] sm:$0xff] %v4986_v40  ;;  %v4989_v55 = vpop.f32.mrf.mxu0  ;;  %v2453_v40 = vadd.f32 %v4885_v18, %v2380_v13  ;;  %v2457_v13 = vadd.f32 %v4893_v21, %v2384_v62  ;;  %v2597_v18 = vadd.f32 %v2596_v58, %v2524_v15  ;;  %v2538_v36 = vadd.f32 %v4960_v11, %v2465_v28  ;;  %v5147_v28 = vld [vmem:[#allocation11_spill] sm:$0xff] }
 0x1a8   : > { %v4991_v51 = vpop.f32.mrf.mxu1 }
 0x1a9   : > { %5138 = vst [vmem:[#allocation25_spill] sm:$0xff] %v4991_v51  ;;  %v4998_v9 = vpop.f32.mrf.mxu0  ;;  %v2388_v51 = vadd.f32 %v4895_v52, %v4847_v23  ;;  %v2526_v17 = vadd.f32 %v2525_v59, %v2453_v40  ;;  %v2528_v23 = vadd.f32 %v2527_v63, %v2455_v4  ;;  %v2530_v26 = vadd.f32 %v2529_v1, %v2457_v13  ;;  %v5142_v13 = vld [vmem:[#allocation13_spill] sm:$0xff] }
 0x1aa   : > { %v5000_v12 = vpop.f32.mrf.mxu1  ;;  %v2481_v1 = vadd.f32 %v4938_v47, %v2408_v25 }
 0x1ab   : > { %v5012_v16 = vpop.f32.mrf.mxu0  ;;  %v2461_v49 = vadd.f32 %v4897_v22, %v2388_v51  ;;  %v2599_v21 = vadd.f32 %v2598_v60, %v2526_v17  ;;  %v2404_v22 = vadd.f32 %v4928_v42, %v4868_v61  ;;  %v2601_v34 = vadd.f32 %v2600_v0, %v2528_v23  ;;  %v5144_v23 = vld [vmem:[#allocation17_spill] sm:$0xff] }
 0x1ac   : > { %v5014_v19 = vpop.f32.mrf.mxu1  ;;  %v2475_v61 = vadd.f32 %v4921_v39, %v2402_v24  ;;  %v2603_v42 = vadd.f32 %v4952_v3, %v2530_v26  ;;  %v2410_v60 = vadd.f32 %v4940_v48, %v4874_v7  ;;  %v5139_v7 = vld [vmem:[#allocation5_spill] sm:$0xff]  ;;  %v5145_v26 = vld [vmem:[#allocation8_spill] sm:$0xff] }
 0x1ad   : > { %v2534_v30 = vadd.f32 %v2533_v5, %v2461_v49  ;;  %v2477_v59 = vadd.f32 %v4934_v44, %v2404_v22  ;;  %v5140_v48 = vld [vmem:[#allocation9_spill] sm:$0xff]  ;;  %v5141_v5 = vld [vmem:[#allocation15_spill] sm:$0xff]  ;;  %v2544_v49 = vadd.f32 %v5144_v23, %v2471_v57  ;;  %v2414_v22 = vadd.f32 %v5147_v28, %v5146_v41 }
 0x1ae   : > { %v2412_v3 = vadd.f32 %v5140_v48, %v5139_v7  ;;  %v2540_v8 = vadd.f32 %v5141_v5, %v2467_v53  ;;  %v2546_v57 = vadd.f32 %v4972_v54, %v2473_v38  ;;  %v5156_v41 = vld [vmem:[#allocation23_spill] sm:$0xff] }
 0x1af   : > { %v2607_v46 = vadd.f32 %v4954_v6, %v2534_v30  ;;  %v2609_v6 = vadd.f32 %v5142_v13, %v2536_v33  ;;  %v5148_v30 = vld [vmem:[#allocation16_spill] sm:$0xff] }
 0x1cd   : > { %v2669_v37 = vpop.f32.mrf.mxu0 }
 0x1ce   : > { %v2742_v52 = vpop.f32.mrf.mxu1  ;;  %v2670_v40 = vadd.f32 %v2669_v37, %v2597_v18  ;;  %v2611_v18 = vadd.f32 %v5143_v14, %v2538_v36  ;;  %v5150_v36 = vld [vmem:[#allocation18_spill] sm:$0xff] }
 0x1cf   : > { %v2671_v45 = vpop.f32.mrf.mxu0 }
 0x1d0   : > { %v2744_v31 = vpop.f32.mrf.mxu1  ;;  %v2672_v50 = vadd.f32 %v2671_v45, %v2599_v21  ;;  %v2743_v51 = vadd.f32 %v2742_v52, %v2670_v40  ;;  %v2483_v40 = vadd.f32 %v5145_v26, %v2410_v60 }
 0x1d1   : > { %v2673_v27 = vpop.f32.mrf.mxu0 }
 0x1d2   : > { %v2746_v56 = vpop.f32.mrf.mxu1  ;;  %v2745_v58 = vadd.f32 %v2744_v31, %v2672_v50  ;;  %v2674_v29 = vadd.f32 %v2673_v27, %v2601_v34  ;;  %v2833_v11 = vmul.f32 %v2743_v51, %v2743_v51  ;;  %v2613_v50 = vadd.f32 %v5148_v30, %v2540_v8  ;;  %v5149_v27 = vld [vmem:[#allocation20_spill] sm:$0xff] }
 0x1d3   : > { %v2675_v2 = vpop.f32.mrf.mxu0 }
 0x1d4   : > { %v2748_v39 = vpop.f32.mrf.mxu1  ;;  %v3440_v63 = vpack.c.bf16 %v2745_v58, %v2743_v51  ;;  %v2747_v0 = vadd.f32 %v2746_v56, %v2674_v29  ;;  %v2676_v44 = vadd.f32 %v2675_v2, %v2603_v42  ;;  %v2834_v47 = vmul.f32 %v2745_v58, %v2745_v58 }
 0x1d5   : > { %v2679_v62 = vpop.f32.mrf.mxu0  ;;  %v2548_v56 = vadd.f32 %v5149_v27, %v2475_v61  ;;  %v2617_v2 = vadd.f32 %v5150_v36, %v2544_v49 }
 0x1d6   : > { %v2752_v15 = vpop.f32.mrf.mxu1  ;;  %2943 = vst [vmem:[%s5046_s5] sm:$0xff] %v3440_v63  ;;  %v2782_v4 = vadd.f32 %v2747_v0, %v2743_v51  ;;  %v2835_v17 = vmul.f32 %v2747_v0, %v2747_v0  ;;  %v2749_v35 = vadd.f32 %v2748_v39, %v2676_v44  ;;  %v2680_v10 = vadd.f32 %v2679_v62, %v2607_v46  ;;  %v5151_v39 = vld [vmem:[#allocation22_spill] sm:$0xff] }
 0x1d7   : > { %v2681_v20 = vpop.f32.mrf.mxu0  ;;  %v2550_v46 = vadd.f32 %v5151_v39, %v2477_v59 }
 0x1d8   : > { %v2754_v32 = vpop.f32.mrf.mxu1  ;;  %v2849_v37 = vadd.f32 %v2835_v17, %v2833_v11  ;;  %v2795_v52 = vadd.f32 %v2749_v35, %v2745_v58  ;;  %v2836_v24 = vmul.f32 %v2749_v35, %v2749_v35  ;;  %v3441_v21 = vpack.c.bf16 %v2749_v35, %v2747_v0  ;;  %v5153_v17 = vld [vmem:[#allocation21_spill] sm:$0xff] }
 0x1d9   : > { %v2753_v45 = vadd.f32 %v2752_v15, %v2680_v10  ;;  %v2682_v31 = vadd.f32 %v2681_v20, %v2609_v6  ;;  %v2683_v53 = vpop.f32.mrf.mxu0  ;;  %v5152_v15 = vld [vmem:[#allocation19_spill] sm:$0xff]  ;;  %v2621_v35 = vadd.f32 %v5153_v17, %v2548_v56  ;;  %v2554_v10 = vadd.f32 %v4984_v43, %v2481_v1 }
 0x1da   : > { %v2756_v34 = vpop.f32.mrf.mxu1  ;;  %v2862_v25 = vadd.f32 %v2836_v24, %v2834_v47  ;;  %2944 = vst [vmem:[%s5046_s5 + $0x8] sm:$0xff] %v3441_v21  ;;  %v2684_v51 = vadd.f32 %v2683_v53, %v2611_v18  ;;  %v5154_v47 = vld [vmem:[#allocation10_spill] sm:$0xff]  ;;  %v2623_v28 = vadd.f32 %v5156_v41, %v2550_v46  ;;  %v2556_v43 = vadd.f32 %v4989_v55, %v2483_v40 }
 0x1db   : > { %v2783_v42 = vadd.f32 %v2782_v4, %v2753_v45  ;;  %v2837_v58 = vmul.f32 %v2753_v45, %v2753_v45  ;;  %v2755_v29 = vadd.f32 %v2754_v32, %v2682_v31  ;;  %v2685_v60 = vpop.f32.mrf.mxu0  ;;  %v2619_v4 = vadd.f32 %v5152_v15, %v2546_v57  ;;  %v5155_v32 = vld [vmem:[#allocation12_spill] sm:$0xff] }
 0x1dc   : > { %v2758_v33 = vpop.f32.mrf.mxu1  ;;  %v2757_v63 = vadd.f32 %v2756_v34, %v2684_v51  ;;  %v2686_v0 = vadd.f32 %v2685_v60, %v2613_v50  ;;  %v2485_v20 = vadd.f32 %v5154_v47, %v2412_v3  ;;  %v5157_v57 = vld [vmem:[#allocation24_spill] sm:$0xff] }
 0x1dd   : > { %v2850_v44 = vadd.f32 %v2849_v37, %v2837_v58  ;;  %v2796_v7 = vadd.f32 %v2795_v52, %v2755_v29  ;;  %v2838_v54 = vmul.f32 %v2755_v29, %v2755_v29  ;;  %v3442_v38 = vpack.c.bf16 %v2755_v29, %v2753_v45  ;;  %v2689_v48 = vpop.f32.mrf.mxu0 }
 0x1de   : > { %v2762_v5 = vpop.f32.mrf.mxu1  ;;  %v2784_v8 = vadd.f32 %v2783_v42, %v2757_v63  ;;  %v2839_v61 = vmul.f32 %v2757_v63, %v2757_v63  ;;  %v2759_v11 = vadd.f32 %v2758_v33, %v2686_v0  ;;  %v2690_v62 = vadd.f32 %v2689_v48, %v2617_v2  ;;  %v5158_v2 = vld [vmem:[#allocation25_spill] sm:$0xff] }
 0x1df   : > { %v2863_v59 = vadd.f32 %v2862_v25, %v2838_v54  ;;  %2945 = vst [vmem:[%s5046_s5 + $0x10] sm:$0xff] %v3442_v38  ;;  %v2691_v13 = vpop.f32.mrf.mxu0  ;;  %v2487_v37 = vadd.f32 %v5155_v32, %v2414_v22  ;;  %v2558_v31 = vadd.f32 %v4998_v9, %v2485_v20  ;;  %v2627_v22 = vadd.f32 %v5157_v57, %v2554_v10 }
 0x1e0   : > { %v2764_v6 = vpop.f32.mrf.mxu1  ;;  %v2851_v14 = vadd.f32 %v2850_v44, %v2839_v61  ;;  %v2797_v18 = vadd.f32 %v2796_v7, %v2759_v11  ;;  %v2840_v23 = vmul.f32 %v2759_v11, %v2759_v11  ;;  %v3443_v49 = vpack.c.bf16 %v2759_v11, %v2757_v63 }
 0x1e1   : > { %v2763_v52 = vadd.f32 %v2762_v5, %v2690_v62  ;;  %v2692_v24 = vadd.f32 %v2691_v13, %v2619_v4  ;;  %v2693_v21 = vpop.f32.mrf.mxu0  ;;  %v2560_v25 = vadd.f32 %v5012_v16, %v2487_v37  ;;  %v2629_v39 = vadd.f32 %v5158_v2, %v2556_v43 }
 0x1e2   : > { %v2766_v26 = vpop.f32.mrf.mxu1  ;;  %v2864_v1 = vadd.f32 %v2863_v59, %v2840_v23  ;;  %2946 = vst [vmem:[%s5046_s5 + $0x18] sm:$0xff] %v3443_v49  ;;  %v2694_v45 = vadd.f32 %v2693_v21, %v2621_v35  ;;  %v2631_v46 = vadd.f32 %v5000_v12, %v2558_v31 }
 0x1e3   : > { %v2785_v53 = vadd.f32 %v2784_v8, %v2763_v52  ;;  %v2841_v34 = vmul.f32 %v2763_v52, %v2763_v52  ;;  %v2765_v30 = vadd.f32 %v2764_v6, %v2692_v24  ;;  %v2695_v50 = vpop.f32.mrf.mxu0  ;;  %v2633_v11 = vadd.f32 %v5014_v19, %v2560_v25 }
 0x1e4   : > { %v2768_v3 = vpop.f32.mrf.mxu1  ;;  %v2767_v51 = vadd.f32 %v2766_v26, %v2694_v45  ;;  %v2696_v27 = vadd.f32 %v2695_v50, %v2623_v28 }
 0x1e5   : > { %v2852_v56 = vadd.f32 %v2851_v14, %v2841_v34  ;;  %v2798_v42 = vadd.f32 %v2797_v18, %v2765_v30  ;;  %v2842_v55 = vmul.f32 %v2765_v30, %v2765_v30  ;;  %v3444_v40 = vpack.c.bf16 %v2765_v30, %v2763_v52  ;;  %v2699_v58 = vpop.f32.mrf.mxu0 }
 0x1e6   : > { %v2772_v29 = vpop.f32.mrf.mxu1  ;;  %v2786_v60 = vadd.f32 %v2785_v53, %v2767_v51  ;;  %v2843_v9 = vmul.f32 %v2767_v51, %v2767_v51  ;;  %v2769_v33 = vadd.f32 %v2768_v3, %v2696_v27  ;;  %v2700_v36 = vadd.f32 %v2699_v58, %v2627_v22 }
 0x1e7   : > { %v2865_v63 = vadd.f32 %v2864_v1, %v2842_v55  ;;  %2947 = vst [vmem:[%s5046_s5 + $0x20] sm:$0xff] %v3444_v40  ;;  %v2701_v16 = vpop.f32.mrf.mxu0  ;;  %v3885_v1 = vmov 1966171168  }
 0x1e8   : > { %v2774_v0 = vpop.f32.mrf.mxu1  ;;  %v2853_v44 = vadd.f32 %v2852_v56, %v2843_v9  ;;  %v2799_v7 = vadd.f32 %v2798_v42, %v2769_v33  ;;  %v2844_v54 = vmul.f32 %v2769_v33, %v2769_v33  ;;  %v3445_v38 = vpack.c.bf16 %v2769_v33, %v2767_v51  ;;  %v5159_v9 = vld [vmem:[#allocation4_spill] sm:$0xff] }
 0x1e9   : > { %v2773_v48 = vadd.f32 %v2772_v29, %v2700_v36  ;;  %v2702_v5 = vadd.f32 %v2701_v16, %v2629_v39  ;;  %v2703_v8 = vpop.f32.mrf.mxu0  ;;  %v2812_v45 = vunpack.c.l.s4 %v3885_v1 }
 0x1ea   : > { %v2776_v61 = vpop.f32.mrf.mxu1  ;;  %v2866_v62 = vadd.f32 %v2865_v63, %v2844_v54  ;;  %2948 = vst [vmem:[%s5046_s5 + $0x28] sm:$0xff] %v3445_v38  ;;  %v2704_v15 = vadd.f32 %v2703_v8, %v2631_v46  ;;  %v2832_v54 = vld [vmem:[#allocation3] sm:$0x3] }
 0x1eb   : > { %v2787_v4 = vadd.f32 %v2786_v60, %v2773_v48  ;;  %v2845_v12 = vmul.f32 %v2773_v48, %v2773_v48  ;;  %v2775_v17 = vadd.f32 %v2774_v0, %v2702_v5  ;;  %v2705_v35 = vpop.f32.mrf.mxu0  ;;  %v2813_v25 = vunpack.c.0.s8 %v2812_v45  ;;  %v2781_v0 = vld [vmem:[#allocation2] sm:$0x3] }
 0x1ec   : > { %v2777_v10 = vadd.f32 %v2776_v61, %v2704_v15  ;;  %v2706_v59 = vadd.f32 %v2705_v35, %v2633_v11  ;;  %v2778_v23 = vpop.f32.mrf.mxu1 }
 0x1ed   : > { %v2854_v13 = vadd.f32 %v2853_v44, %v2845_v12  ;;  %v2800_v6 = vadd.f32 %v2799_v7, %v2775_v17  ;;  %v2846_v14 = vmul.f32 %v2775_v17, %v2775_v17  ;;  %v3446_v18 = vpack.c.bf16 %v2775_v17, %v2773_v48 }
 0x1ee   : > { %v2788_v49 = vadd.f32 %v2787_v4, %v2777_v10  ;;  %v2847_v47 = vmul.f32 %v2777_v10, %v2777_v10  ;;  %v2779_v20 = vadd.f32 %v2778_v23, %v2706_v59  ;;  %v2816_v33 = vsub.s32 %v2813_v25, %v5159_v9 }
 0x1ef   : > { %v2867_v19 = vadd.f32 %v2866_v62, %v2846_v14  ;;  %2949 = vst [vmem:[%s5046_s5 + $0x30] sm:$0xff] %v3446_v18 }
 0x1f0   : > { %v2789_v32 = vrot.slane %v2788_v49, 4  ;;  %v2855_v37 = vadd.f32 %v2854_v13, %v2847_v47  ;;  %v2801_v52 = vadd.f32 %v2800_v6, %v2779_v20  ;;  %v2848_v24 = vmul.f32 %v2779_v20, %v2779_v20 }
 0x1f1   : > { %v3447_v21 = vpack.c.bf16 %v2779_v20, %v2777_v10 }
 0x1f2   : > { %v2790_v26 = vadd.f32 %v2789_v32, %v2788_v49  ;;  %v2856_v41 = vrot.slane %v2855_v37, 4  ;;  %v2802_v28 = vrot.slane %v2801_v52, 4  ;;  %v2868_v43 = vadd.f32 %v2867_v19, %v2848_v24 }
 0x1f3   : > { %2950 = vst [vmem:[%s5046_s5 + $0x38] sm:$0xff] %v3447_v21 }
 0x1f4   : > { %v2791_v31 = vrot.slane %v2790_v26, 2  ;;  %v2857_v53 = vadd.f32 %v2856_v41, %v2855_v37  ;;  %v2803_v34 = vadd.f32 %v2802_v28, %v2801_v52  ;;  %v2869_v30 = vrot.slane %v2868_v43, 4 }
 0x1f6   : > { %v2792_v50 = vadd.f32 %v2791_v31, %v2790_v26  ;;  %v2858_v3 = vrot.slane %v2857_v53, 2  ;;  %v2804_v57 = vrot.slane %v2803_v34, 2  ;;  %v2870_v22 = vadd.f32 %v2869_v30, %v2868_v43 }
 0x1f8   : > { %v2793_v51 = vrot.slane %v2792_v50, 1  ;;  %v2859_v27 = vadd.f32 %v2858_v3, %v2857_v53  ;;  %v2805_v56 = vadd.f32 %v2804_v57, %v2803_v34  ;;  %v2871_v42 = vrot.slane %v2870_v22, 2 }
 0x1fa   : > { %v2860_v55 = vrot.slane %v2859_v27, 1  ;;  %v2806_v40 = vrot.slane %v2805_v56, 1  ;;  %v2872_v58 = vadd.f32 %v2871_v42, %v2870_v22  ;;  %v2794_v29 = vadd.f32 %v2793_v51, %v2792_v50 }
 0x1fc   : > { %v2807_v60 = vadd.f32 %v2806_v40, %v2805_v56  ;;  %v2873_v36 = vrot.slane %v2872_v58, 1  ;;  %v2861_v2 = vadd.f32 %v2860_v55, %v2859_v27 }
 0x1fe   : > { %v2810_v39 = vcombine.low %v2794_v29, %v2807_v60  ;;  %v2874_v46 = vadd.f32 %v2873_v36, %v2872_v58 }
 0x200   : > { %v2817_v63 = vrot.slane %v2810_v39, %v2816_v33  ;;  %v2877_v16 = vcombine.low %v2861_v2, %v2874_v46 }
 0x202   : > { %v2824_v44 = vrot.slane %v2817_v63, %v2816_v33  ;;  %v2884_v7 = vrot.slane %v2877_v16, %v2816_v33 }
 0x204   : > { %v2826_v38 = vadd.f32 %v2824_v44, %v2781_v0  ;;  %v2891_v48 = vrot.slane %v2884_v7, %v2816_v33 }
 0x206   : > { %2831 = vst.msk [vmem:[#allocation2] sm:$0x3] %vm4924_vm0, %v2826_v38  ;;  %v2893_v8 = vadd.f32 %v2891_v48, %v2832_v54 }
 0x208   : > { %2894 = vst.msk [vmem:[#allocation3] sm:$0x3] %vm4924_vm0, %v2893_v8 }
 0x20d   : > { %v2954_v61 = vld [vmem:[#allocation2] sm:$0x3] }
 0x20e   : > { %v2955_v11 = vmul.f32 0.015625, %v2954_v61 }
 0x20f   : > { %v2956_v62 = vld [vmem:[#allocation3] sm:$0x3] }
 0x210   : > { %v2957_v15 = vmul.f32 0.015625, %v2956_v62  ;;  %v2958_v4 = vmul.f32 %v2955_v11, %v2955_v11  ;;  %2963 = vst.msk [vmem:[%s254_s9] ss:$2 sm:$0x3] %vm4924_vm0, %v2955_v11 }
 0x212   : > { %v2959_v12 = vsub.f32 %v2957_v15, %v2958_v4 }
 0x214   : > { %v2960_v17 = vmax.f32 %v2959_v12, 0.0 }
 0x216   : > { %v2961_v35 = vadd.f32 1e-05, %v2960_v17 }
 0x218   : > { %3858 = vrsqrt.f32 %v2961_v35 }
 0x225   : > { %v3859_v10 = vpop.eup %3858 }
 0x226   : > { %3434 = vst.msk [vmem:[%s254_s9 + $0x1] ss:$2 sm:$0x3] %vm4924_vm0, %v3859_v10 }
 0x227 PF: > { %s15_s17 = sadd.s32 1, %s3882_s17   ;;  %s5161_s15 = smov %s3878_s16 }
 0x228   : > { %p12_p5 = scmp.ge.s32.totalorder %s15_s17, 4   ;;  %s5162_s16 = smov %s5164_s18 }
 0x22a   :  { %14 = sbr.rel (!%p12_p5) target bundleno = 2 (0x2), region = 83 }

// kernel: style_encoder_forward.6
= control target key start
LH: loop header
LB: loop body
LE: loop exit
PB: predicated region body
PF: predicated region fallthrough
CT: control target
= control target key end

     0   :  { %s5877_s15 = smov 0   ;;  %s5879_s16 = smov 0   ;;  %s7628_s0 = inlined_call_operand.vmem [shape: bf16[2,16,4096], index: 0, kind: input, shape index: {}]   ;;  %s7629_s1 = inlined_call_operand.vmem [shape: bf16[4096,256], index: 1, kind: input, shape index: {}]   ;;  %s7630_s2 = inlined_call_operand.vmem [shape: f32[1,256], index: 2, kind: input, shape index: {}]   ;;  %s7631_s3 = inlined_call_operand.vmem [shape: bf16[2,16,256], index: 3, kind: output, shape index: {0}]   ;;  %s7632_s4 = inlined_call_operand.vmem [shape: f32[2,2,256], index: 4, kind: output, shape index: {1}]  }
   0x1   :  { %s5881_s17 = smov 0  }
   0x2 LB: > { %s27_s18 = sadd.s32 1, %s5844_s16  ;;  %p4469_p0 = scmp.ge.s32.totalorder %s5848_s17, 1  ;;  %s5848_s17 = sphi %s5881_s17, %s15_s17   ;;  %s5844_s16 = sphi %s5879_s16, %s7636_s16   ;;  %s5840_s15 = sphi %s5877_s15, %s7635_s15  }
   0x3   : > { %p29_p1 = scmp.ge.s32.totalorder %s27_s18, 2  ;;  %p187_p2 = scmp.lt.s32.totalorder %s5848_s17, 3 }
   0x5   : > { %s7638_s18 = smov (%p29_p1, %s27_s18), 0  ;;  %p188_p3 = pnand %p4469_p0, %p187_p2 }
   0x6   : > { %p229_p4 = scmp.lt.s32.totalorder (!%p188_p3), %s5840_s15, 1 }
   0x7   : > { %191 = sbr.rel (%p188_p3) target bundleno = 783 (0x30f), region = 32 }
   0xc   : > { %v5056_v0 = vld [vmem:[%s7629_s1 + $0x74] ss:$8 sps:$4 sm:$0xff]   ;;  %v5060_v2 = vld [vmem:[%s7629_s1 + $0x70] ss:$8 sps:$4 sm:$0xff]   ;;  %v5062_v4 = vld [vmem:[%s7629_s1 + $0x64] ss:$8 sps:$4 sm:$0xff]  }
   0xd   : > { %v5058_v1 = vld [vmem:[%s7629_s1 + $0x174] ss:$8 sps:$4 sm:$0xff]   ;;  %3541 = vmatprep.subr.bf16.mxu0 %v5056_v0  ;;  %v5061_v3 = vld [vmem:[%s7629_s1 + $0x170] ss:$8 sps:$4 sm:$0xff]   ;;  %v5064_v5 = vld [vmem:[%s7629_s1 + $0x164] ss:$8 sps:$4 sm:$0xff]  }
   0xe   : > { %3584 = vmatprep.subr.bf16.mxu1 %v5058_v1  ;;  %3542 = vmatpush1.bf16.msra.mxu0 %v5060_v2  ;;  %v5066_v6 = vld [vmem:[%s7629_s1 + $0x60] ss:$8 sps:$4 sm:$0xff]   ;;  %v5068_v8 = vld [vmem:[%s7629_s1 + $0x54] ss:$8 sps:$4 sm:$0xff]   ;;  %v5072_v10 = vld [vmem:[%s7629_s1 + $0x50] ss:$8 sps:$4 sm:$0xff]  }
   0xf   : > { %3585 = vmatpush1.bf16.msra.mxu1 %v5061_v3  ;;  %3543 = vmatprep.subr.bf16.mxu0 %v5062_v4  ;;  %v5067_v7 = vld [vmem:[%s7629_s1 + $0x160] ss:$8 sps:$4 sm:$0xff]   ;;  %v5070_v9 = vld [vmem:[%s7629_s1 + $0x154] ss:$8 sps:$4 sm:$0xff]   ;;  %v5073_v11 = vld [vmem:[%s7629_s1 + $0x150] ss:$8 sps:$4 sm:$0xff]  }
  0x10   : > { %3586 = vmatprep.subr.bf16.mxu1 %v5064_v5  ;;  %v5074_v12 = vld [vmem:[%s7629_s1 + $0x44] ss:$8 sps:$4 sm:$0xff]   ;;  %v5078_v14 = vld [vmem:[%s7629_s1 + $0x40] ss:$8 sps:$4 sm:$0xff]   ;;  %v5080_v16 = vld [vmem:[%s7629_s1 + $0x34] ss:$8 sps:$4 sm:$0xff]  }
  0x11   : > { %v5076_v13 = vld [vmem:[%s7629_s1 + $0x144] ss:$8 sps:$4 sm:$0xff]   ;;  %v5079_v15 = vld [vmem:[%s7629_s1 + $0x140] ss:$8 sps:$4 sm:$0xff]   ;;  %v5082_v17 = vld [vmem:[%s7629_s1 + $0x134] ss:$8 sps:$4 sm:$0xff]  }
  0x12   : > { %3544 = vmatpush1.bf16.msra.mxu0 %v5066_v6  ;;  %v5084_v18 = vld [vmem:[%s7629_s1 + $0x30] ss:$8 sps:$4 sm:$0xff]   ;;  %v5086_v20 = vld [vmem:[%s7629_s1 + $0x24] ss:$8 sps:$4 sm:$0xff]   ;;  %v5090_v22 = vld [vmem:[%s7629_s1 + $0x20] ss:$8 sps:$4 sm:$0xff]  }
  0x13   : > { %3587 = vmatpush1.bf16.msra.mxu1 %v5067_v7  ;;  %3545 = vmatprep.subr.bf16.mxu0 %v5068_v8  ;;  %v5085_v19 = vld [vmem:[%s7629_s1 + $0x130] ss:$8 sps:$4 sm:$0xff]   ;;  %v5088_v21 = vld [vmem:[%s7629_s1 + $0x124] ss:$8 sps:$4 sm:$0xff]   ;;  %v5091_v23 = vld [vmem:[%s7629_s1 + $0x120] ss:$8 sps:$4 sm:$0xff]  }
  0x14   : > { %3588 = vmatprep.subr.bf16.mxu1 %v5070_v9  ;;  %v5092_v24 = vld [vmem:[%s7629_s1 + $0x14] ss:$8 sps:$4 sm:$0xff]   ;;  %v5096_v26 = vld [vmem:[%s7629_s1 + $0x10] ss:$8 sps:$4 sm:$0xff]   ;;  %v5098_v28 = vld [vmem:[%s7629_s1 + $0x4] ss:$8 sps:$4 sm:$0xff]  }
  0x15   : > { %v5094_v25 = vld [vmem:[%s7629_s1 + $0x114] ss:$8 sps:$4 sm:$0xff]   ;;  %v5097_v27 = vld [vmem:[%s7629_s1 + $0x110] ss:$8 sps:$4 sm:$0xff]   ;;  %v5100_v29 = vld [vmem:[%s7629_s1 + $0x104] ss:$8 sps:$4 sm:$0xff]  }
  0x16   : > { %3546 = vmatpush1.bf16.msra.mxu0 %v5072_v10  ;;  %v5102_v30 = vld [vmem:[%s7629_s1] ss:$8 sps:$4 sm:$0xff]   ;;  %v5104_v32 = vld [vmem:[%s7629_s1 + $0xf4] ss:$8 sps:$4 sm:$0xff]   ;;  %v5108_v34 = vld [vmem:[%s7629_s1 + $0xf0] ss:$8 sps:$4 sm:$0xff]  }
  0x17   : > { %3589 = vmatpush1.bf16.msra.mxu1 %v5073_v11  ;;  %3547 = vmatprep.subr.bf16.mxu0 %v5074_v12  ;;  %v5103_v31 = vld [vmem:[%s7629_s1 + $0x100] ss:$8 sps:$4 sm:$0xff]   ;;  %v5106_v33 = vld [vmem:[%s7629_s1 + $0x1f4] ss:$8 sps:$4 sm:$0xff]   ;;  %v5109_v35 = vld [vmem:[%s7629_s1 + $0x1f0] ss:$8 sps:$4 sm:$0xff]  }
  0x18   : > { %3590 = vmatprep.subr.bf16.mxu1 %v5076_v13  ;;  %v5110_v36 = vld [vmem:[%s7629_s1 + $0xe4] ss:$8 sps:$4 sm:$0xff]   ;;  %s7640_s15 = smov (!%p229_p4, %s5840_s15), 1  ;;  %v5114_v38 = vld [vmem:[%s7629_s1 + $0xe0] ss:$8 sps:$4 sm:$0xff]  }
  0x19   : > { %v5112_v37 = vld [vmem:[%s7629_s1 + $0x1e4] ss:$8 sps:$4 sm:$0xff]   ;;  %v5115_v39 = vld [vmem:[%s7629_s1 + $0x1e0] ss:$8 sps:$4 sm:$0xff]   ;;  %v5116_v40 = vld [vmem:[%s7629_s1 + $0xd4] ss:$8 sps:$4 sm:$0xff]  }
  0x1a   : > { %3548 = vmatpush1.bf16.msra.mxu0 %v5078_v14  ;;  %s5025_s9 = sshll.u32 %s7640_s15, 8  ;;  %v5118_v41 = vld [vmem:[%s7629_s1 + $0x1d4] ss:$8 sps:$4 sm:$0xff]   ;;  %v5120_v42 = vld [vmem:[%s7629_s1 + $0xd0] ss:$8 sps:$4 sm:$0xff]   ;;  %s5026_s5 = sshll.u32 %s7640_s15, 4 }
  0x1b   : > { %3591 = vmatpush1.bf16.msra.mxu1 %v5079_v15  ;;  %3549 = vmatprep.subr.bf16.mxu0 %v5080_v16  ;;  %v5121_v43 = vld [vmem:[%s7629_s1 + $0x1d0] ss:$8 sps:$4 sm:$0xff]   ;;  %s6037_s22 = scalar_lea.vmem %s7628_s0, %s5025_s9  ;;  %v5122_v44 = vld [vmem:[%s7629_s1 + $0xc4] ss:$8 sps:$4 sm:$0xff]   ;;  %v5126_v46 = vld [vmem:[%s7629_s1 + $0xc0] ss:$8 sps:$4 sm:$0xff]   ;;  %s248_s8 = scalar_lea.vmem %s7631_s3, %s5026_s5 }
  0x1c   : > { %3592 = vmatprep.subr.bf16.mxu1 %v5082_v17  ;;  %v5124_v45 = vld [vmem:[%s7629_s1 + $0x1c4] ss:$8 sps:$4 sm:$0xff]   ;;  %v5127_v47 = vld [vmem:[%s7629_s1 + $0x1c0] ss:$8 sps:$4 sm:$0xff]   ;;  %v5128_v52 = vld [vmem:[%s7629_s1 + $0xb4] ss:$8 sps:$4 sm:$0xff]  }
  0x1d   : > { %v265_v48 = vld [vmem:[%s6037_s22] sm:$0xff]  ;;  %v266_v50 = vld [vmem:[%s6037_s22 + $0x8] sm:$0xff]  ;;  %v5130_v54 = vld [vmem:[%s7629_s1 + $0x1b4] ss:$8 sps:$4 sm:$0xff]   ;;  %s5027_s9 = sshll.u32 %s7640_s15, 2 }
  0x1e   : > { %3550 = vmatpush1.bf16.msra.mxu0 %v5084_v18  ;;  %v281_v49 = vld [vmem:[%s6037_s22 + $0x80] sm:$0xff]  ;;  %v282_v51 = vld [vmem:[%s6037_s22 + $0x88] sm:$0xff]  ;;  %v5132_v56 = vld [vmem:[%s7629_s1 + $0xb0] ss:$8 sps:$4 sm:$0xff]   ;;  %s254_s12 = scalar_lea.vmem %s7632_s4, %s5027_s9 }
  0x1f   : > { %3593 = vmatpush1.bf16.msra.mxu1 %v5085_v19  ;;  %3551 = vmatprep.subr.bf16.mxu0 %v5086_v20  ;;  %v4477_v53 = vcombine.high %v265_v48, %v281_v49  ;;  %v4479_v55 = vcombine.high %v266_v50, %v282_v51  ;;  %v5133_v57 = vld [vmem:[%s7629_s1 + $0x1b0] ss:$8 sps:$4 sm:$0xff]   ;;  %v5134_v58 = vld [vmem:[%s7629_s1 + $0xa4] ss:$8 sps:$4 sm:$0xff]   ;;  %v5138_v60 = vld [vmem:[%s7629_s1 + $0xa0] ss:$8 sps:$4 sm:$0xff]   ;;  %v4476_v8 = vcombine.low %v265_v48, %v281_v49 }
  0x20   : > { %3594 = vmatprep.subr.bf16.mxu1 %v5088_v21  ;;  %v5136_v59 = vld [vmem:[%s7629_s1 + $0x1a4] ss:$8 sps:$4 sm:$0xff]   ;;  %v5139_v61 = vld [vmem:[%s7629_s1 + $0x1a0] ss:$8 sps:$4 sm:$0xff]   ;;  %v5140_v62 = vld [vmem:[%s7629_s1 + $0x94] ss:$8 sps:$4 sm:$0xff]   ;;  %v4478_v9 = vcombine.low %v266_v50, %v282_v51 }
  0x21   : > { %3573 = vmatprep.mubr.bf16.mxu0 %v4477_v53  ;;  %3616 = vmatprep.mubr.bf16.mxu1 %v4479_v55  ;;  %v5142_v63 = vld [vmem:[%s7629_s1 + $0x194] ss:$8 sps:$4 sm:$0xff]   ;;  %v5144_v0 = vld [vmem:[%s7629_s1 + $0x90] ss:$8 sps:$4 sm:$0xff]   ;;  %v5146_v2 = vld [vmem:[%s7629_s1 + $0x84] ss:$8 sps:$4 sm:$0xff]  }
  0x22   : > { %3552 = vmatpush1.bf16.msra.mxu0 %v5090_v22  ;;  %v5145_v1 = vld [vmem:[%s7629_s1 + $0x190] ss:$8 sps:$4 sm:$0xff]   ;;  %v5148_v3 = vld [vmem:[%s7629_s1 + $0x184] ss:$8 sps:$4 sm:$0xff]   ;;  %v5150_v4 = vld [vmem:[%s7629_s1 + $0x80] ss:$8 sps:$4 sm:$0xff]  }
  0x23   : > { %3595 = vmatpush1.bf16.msra.mxu1 %v5091_v23  ;;  %3553 = vmatprep.subr.bf16.mxu0 %v5092_v24  ;;  %v5151_v5 = vld [vmem:[%s7629_s1 + $0x180] ss:$8 sps:$4 sm:$0xff]   ;;  %v5154_v6 = vld [vmem:[%s7629_s1 + $0x274] ss:$8 sps:$4 sm:$0xff]   ;;  %v5152_v10 = vld [vmem:[%s7629_s1 + $0x270] ss:$8 sps:$4 sm:$0xff]  }
  0x24   : > { %3596 = vmatprep.subr.bf16.mxu1 %v5094_v25  ;;  %v5157_v7 = vld [vmem:[%s7629_s1 + $0x374] ss:$8 sps:$4 sm:$0xff]   ;;  %v5155_v11 = vld [vmem:[%s7629_s1 + $0x370] ss:$8 sps:$4 sm:$0xff]   ;;  %v5160_v12 = vld [vmem:[%s7629_s1 + $0x264] ss:$8 sps:$4 sm:$0xff]  }
  0x25   : > { %v5163_v13 = vld [vmem:[%s7629_s1 + $0x364] ss:$8 sps:$4 sm:$0xff]   ;;  %v5158_v14 = vld [vmem:[%s7629_s1 + $0x260] ss:$8 sps:$4 sm:$0xff]   ;;  %v5166_v16 = vld [vmem:[%s7629_s1 + $0x254] ss:$8 sps:$4 sm:$0xff]  }
  0x26   : > { %3554 = vmatpush1.bf16.msra.mxu0 %v5096_v26  ;;  %v5161_v15 = vld [vmem:[%s7629_s1 + $0x360] ss:$8 sps:$4 sm:$0xff]   ;;  %v5169_v17 = vld [vmem:[%s7629_s1 + $0x354] ss:$8 sps:$4 sm:$0xff]   ;;  %v5164_v18 = vld [vmem:[%s7629_s1 + $0x250] ss:$8 sps:$4 sm:$0xff]  }
  0x27   : > { %3597 = vmatpush1.bf16.msra.mxu1 %v5097_v27  ;;  %3555 = vmatprep.subr.bf16.mxu0 %v5098_v28  ;;  %v5167_v19 = vld [vmem:[%s7629_s1 + $0x350] ss:$8 sps:$4 sm:$0xff]   ;;  %v5172_v20 = vld [vmem:[%s7629_s1 + $0x244] ss:$8 sps:$4 sm:$0xff]   ;;  %v5170_v22 = vld [vmem:[%s7629_s1 + $0x240] ss:$8 sps:$4 sm:$0xff]  }
  0x28   : > { %3598 = vmatprep.subr.bf16.mxu1 %v5100_v29  ;;  %v5175_v21 = vld [vmem:[%s7629_s1 + $0x344] ss:$8 sps:$4 sm:$0xff]   ;;  %v5173_v23 = vld [vmem:[%s7629_s1 + $0x340] ss:$8 sps:$4 sm:$0xff]   ;;  %v5178_v24 = vld [vmem:[%s7629_s1 + $0x234] ss:$8 sps:$4 sm:$0xff]  }
  0x29   : > { %v5181_v25 = vld [vmem:[%s7629_s1 + $0x334] ss:$8 sps:$4 sm:$0xff]   ;;  %v5176_v26 = vld [vmem:[%s7629_s1 + $0x230] ss:$8 sps:$4 sm:$0xff]   ;;  %v5184_v28 = vld [vmem:[%s7629_s1 + $0x224] ss:$8 sps:$4 sm:$0xff]  }
  0x2a   : > { %3556 = vmatpush1.bf16.msra.mxu0 %v5102_v30  ;;  %v5179_v27 = vld [vmem:[%s7629_s1 + $0x330] ss:$8 sps:$4 sm:$0xff]   ;;  %v5187_v29 = vld [vmem:[%s7629_s1 + $0x324] ss:$8 sps:$4 sm:$0xff]   ;;  %v5182_v30 = vld [vmem:[%s7629_s1 + $0x220] ss:$8 sps:$4 sm:$0xff]  }
  0x2b   : > { %3599 = vmatpush1.bf16.msra.mxu1 %v5103_v31  ;;  %3557 = vmatprep.subr.bf16.mxu0 %v5104_v32  ;;  %v5185_v31 = vld [vmem:[%s7629_s1 + $0x320] ss:$8 sps:$4 sm:$0xff]   ;;  %v5190_v32 = vld [vmem:[%s7629_s1 + $0x214] ss:$8 sps:$4 sm:$0xff]   ;;  %v5200_v48 = vld [vmem:[%s7629_s1 + $0x2f0] ss:$8 sps:$4 sm:$0xff]  }
  0x2c   : > { %3600 = vmatprep.subr.bf16.mxu1 %v5106_v33  ;;  %v5193_v33 = vld [vmem:[%s7629_s1 + $0x314] ss:$8 sps:$4 sm:$0xff]   ;;  %v5203_v49 = vld [vmem:[%s7629_s1 + $0x3f0] ss:$8 sps:$4 sm:$0xff]   ;;  %v5208_v50 = vld [vmem:[%s7629_s1 + $0x2e4] ss:$8 sps:$4 sm:$0xff]  }
  0x2d   : > { %v5211_v51 = vld [vmem:[%s7629_s1 + $0x3e4] ss:$8 sps:$4 sm:$0xff]   ;;  %v5209_v53 = vld [vmem:[%s7629_s1 + $0x3e0] ss:$8 sps:$4 sm:$0xff]   ;;  %v5217_v55 = vld [vmem:[%s7629_s1 + $0x3d4] ss:$8 sps:$4 sm:$0xff]  }
  0x2e   : > { %3558 = vmatpush2.bf16.msra.mxu0 %v5108_v34  ;;  %v5188_v34 = vld [vmem:[%s7629_s1 + $0x210] ss:$8 sps:$4 sm:$0xff]  }
  0x2f   : > { %3601 = vmatpush2.bf16.msra.mxu1 %v5109_v35  ;;  %3559 = vmatprep.subr.bf16.mxu0 %v5110_v36  ;;  %v5191_v35 = vld [vmem:[%s7629_s1 + $0x310] ss:$8 sps:$4 sm:$0xff]  }
  0x30   : > { %3602 = vmatprep.subr.bf16.mxu1 %v5112_v37  ;;  %v6188_v36 = vld [vmem:[%s6037_s22 + $0x10] sm:$0xff] }
  0x31   : > { %v6191_v37 = vld [vmem:[%s6037_s22 + $0x90] sm:$0xff] }
  0x32   : > { %3560 = vmatpush2.bf16.msra.mxu0 %v5114_v38  ;;  %v6194_v38 = vld [vmem:[%s6037_s22 + $0x18] sm:$0xff] }
  0x33   : > { %3603 = vmatpush2.bf16.msra.mxu1 %v5115_v39  ;;  %3561 = vmatprep.subr.bf16.mxu0 %v5116_v40  ;;  %v6197_v39 = vld [vmem:[%s6037_s22 + $0x98] sm:$0xff]  ;;  %v5196_v40 = vld [vmem:[%s7629_s1 + $0x204] ss:$8 sps:$4 sm:$0xff]  }
  0x34   : > { %3604 = vmatprep.subr.bf16.mxu1 %v5118_v41  ;;  %v4481_v41 = vcombine.high %v6188_v36, %v6191_v37 }
  0x36   : > { %3562 = vmatpush2.bf16.msra.mxu0 %v5120_v42  ;;  %v5199_v42 = vld [vmem:[%s7629_s1 + $0x304] ss:$8 sps:$4 sm:$0xff]  }
  0x37   : > { %3605 = vmatpush2.bf16.msra.mxu1 %v5121_v43  ;;  %3563 = vmatprep.subr.bf16.mxu0 %v5122_v44  ;;  %v4483_v43 = vcombine.high %v6194_v38, %v6197_v39  ;;  %v5194_v44 = vld [vmem:[%s7629_s1 + $0x200] ss:$8 sps:$4 sm:$0xff]  }
  0x38   : > { %3606 = vmatprep.subr.bf16.mxu1 %v5124_v45  ;;  %v5197_v45 = vld [vmem:[%s7629_s1 + $0x300] ss:$8 sps:$4 sm:$0xff]  }
  0x3a   : > { %3564 = vmatpush2.bf16.msra.mxu0 %v5126_v46  ;;  %v5202_v46 = vld [vmem:[%s7629_s1 + $0x2f4] ss:$8 sps:$4 sm:$0xff]  }
  0x3b   : > { %3607 = vmatpush2.bf16.msra.mxu1 %v5127_v47  ;;  %3565 = vmatprep.subr.bf16.mxu0 %v5128_v52  ;;  %v5205_v47 = vld [vmem:[%s7629_s1 + $0x3f4] ss:$8 sps:$4 sm:$0xff]   ;;  %v5206_v52 = vld [vmem:[%s7629_s1 + $0x2e0] ss:$8 sps:$4 sm:$0xff]  }
  0x3c   : > { %3608 = vmatprep.subr.bf16.mxu1 %v5130_v54  ;;  %v5214_v54 = vld [vmem:[%s7629_s1 + $0x2d4] ss:$8 sps:$4 sm:$0xff]  }
  0x3e   : > { %3566 = vmatpush2.bf16.msra.mxu0 %v5132_v56  ;;  %v5212_v56 = vld [vmem:[%s7629_s1 + $0x2d0] ss:$8 sps:$4 sm:$0xff]  }
  0x3f   : > { %3609 = vmatpush2.bf16.msra.mxu1 %v5133_v57  ;;  %3567 = vmatprep.subr.bf16.mxu0 %v5134_v58  ;;  %v5215_v57 = vld [vmem:[%s7629_s1 + $0x3d0] ss:$8 sps:$4 sm:$0xff]   ;;  %v5220_v58 = vld [vmem:[%s7629_s1 + $0x2c4] ss:$8 sps:$4 sm:$0xff]  }
  0x40   : > { %3610 = vmatprep.subr.bf16.mxu1 %v5136_v59  ;;  %v5223_v59 = vld [vmem:[%s7629_s1 + $0x3c4] ss:$8 sps:$4 sm:$0xff]  }
  0x42   : > { %3568 = vmatpush2.bf16.msra.mxu0 %v5138_v60  ;;  %v5218_v60 = vld [vmem:[%s7629_s1 + $0x2c0] ss:$8 sps:$4 sm:$0xff]  }
  0x43   : > { %3611 = vmatpush2.bf16.msra.mxu1 %v5139_v61  ;;  %3569 = vmatprep.subr.bf16.mxu0 %v5140_v62  ;;  %v5221_v61 = vld [vmem:[%s7629_s1 + $0x3c0] ss:$8 sps:$4 sm:$0xff]   ;;  %v5226_v62 = vld [vmem:[%s7629_s1 + $0x2b4] ss:$8 sps:$4 sm:$0xff]  }
  0x44   : > { %3612 = vmatprep.subr.bf16.mxu1 %v5142_v63  ;;  %v5229_v63 = vld [vmem:[%s7629_s1 + $0x3b4] ss:$8 sps:$4 sm:$0xff]  }
  0x46   : > { %3570 = vmatpush2.bf16.msra.mxu0 %v5144_v0  ;;  %v5224_v0 = vld [vmem:[%s7629_s1 + $0x2b0] ss:$8 sps:$4 sm:$0xff]  }
  0x47   : > { %3613 = vmatpush2.bf16.msra.mxu1 %v5145_v1  ;;  %3571 = vmatprep.subr.bf16.mxu0 %v5146_v2  ;;  %v5227_v1 = vld [vmem:[%s7629_s1 + $0x3b0] ss:$8 sps:$4 sm:$0xff]   ;;  %v5232_v2 = vld [vmem:[%s7629_s1 + $0x2a4] ss:$8 sps:$4 sm:$0xff]  }
  0x48   : > { %3614 = vmatprep.subr.bf16.mxu1 %v5148_v3  ;;  %v5235_v3 = vld [vmem:[%s7629_s1 + $0x3a4] ss:$8 sps:$4 sm:$0xff]  }
  0x4a   : > { %3572 = vmatpush2.bf16.msra.mxu0 %v5150_v4  ;;  %v5230_v4 = vld [vmem:[%s7629_s1 + $0x2a0] ss:$8 sps:$4 sm:$0xff]  }
  0x4b   : > { %3615 = vmatpush2.bf16.msra.mxu1 %v5151_v5  ;;  %3627 = vmatprep.subr.bf16.mxu0 %v5154_v6  ;;  %v5233_v5 = vld [vmem:[%s7629_s1 + $0x3a0] ss:$8 sps:$4 sm:$0xff]   ;;  %v5238_v6 = vld [vmem:[%s7629_s1 + $0x294] ss:$8 sps:$4 sm:$0xff]  }
  0x4c   : > { %3670 = vmatprep.subr.bf16.mxu1 %v5157_v7  ;;  %v5241_v7 = vld [vmem:[%s7629_s1 + $0x394] ss:$8 sps:$4 sm:$0xff]  }
  0x4d   : > { %3574 = vmatmul.mubr.bf16.vlgmr.msra.gmra.mxu0 %v4476_v8  ;;  %v5236_v8 = vld [vmem:[%s7629_s1 + $0x290] ss:$8 sps:$4 sm:$0xff]  }
  0x4e   : > { %3617 = vmatmul.mubr.bf16.vlgmr.msra.gmra.mxu1 %v4478_v9  ;;  %3628 = vmatpush1.bf16.msra.mxu0 %v5152_v10  ;;  %v5239_v9 = vld [vmem:[%s7629_s1 + $0x390] ss:$8 sps:$4 sm:$0xff]   ;;  %v5244_v10 = vld [vmem:[%s7629_s1 + $0x284] ss:$8 sps:$4 sm:$0xff]  }
  0x4f   : > { %3671 = vmatpush1.bf16.msra.mxu1 %v5155_v11  ;;  %3629 = vmatprep.subr.bf16.mxu0 %v5160_v12  ;;  %v5247_v11 = vld [vmem:[%s7629_s1 + $0x384] ss:$8 sps:$4 sm:$0xff]   ;;  %v5242_v12 = vld [vmem:[%s7629_s1 + $0x280] ss:$8 sps:$4 sm:$0xff]  }
  0x50   : > { %3672 = vmatprep.subr.bf16.mxu1 %v5163_v13  ;;  %3659 = vmatprep.mubr.bf16.mxu0 %v4481_v41  ;;  %v5245_v13 = vld [vmem:[%s7629_s1 + $0x380] ss:$8 sps:$4 sm:$0xff]   ;;  %v5275_v41 = vld [vmem:[%s7629_s1 + $0x530] ss:$8 sps:$4 sm:$0xff]  }
  0x51   : > { %3702 = vmatprep.mubr.bf16.mxu1 %v4483_v43  ;;  %v5283_v43 = vld [vmem:[%s7629_s1 + $0x524] ss:$8 sps:$4 sm:$0xff]  }
  0x52   : > { %3630 = vmatpush1.bf16.msra.mxu0 %v5158_v14  ;;  %v5250_v14 = vld [vmem:[%s7629_s1 + $0x474] ss:$8 sps:$4 sm:$0xff]  }
  0x53   : > { %3673 = vmatpush1.bf16.msra.mxu1 %v5161_v15  ;;  %3631 = vmatprep.subr.bf16.mxu0 %v5166_v16  ;;  %v5253_v15 = vld [vmem:[%s7629_s1 + $0x574] ss:$8 sps:$4 sm:$0xff]   ;;  %v4480_v16 = vcombine.low %v6188_v36, %v6191_v37  ;;  %v5266_v36 = vld [vmem:[%s7629_s1 + $0x440] ss:$8 sps:$4 sm:$0xff]  }
  0x54   : > { %3674 = vmatprep.subr.bf16.mxu1 %v5169_v17  ;;  %v4482_v17 = vcombine.low %v6194_v38, %v6197_v39  ;;  %v5269_v37 = vld [vmem:[%s7629_s1 + $0x540] ss:$8 sps:$4 sm:$0xff]   ;;  %v5274_v38 = vld [vmem:[%s7629_s1 + $0x434] ss:$8 sps:$4 sm:$0xff]  }
  0x55   : > { %v5277_v39 = vld [vmem:[%s7629_s1 + $0x534] ss:$8 sps:$4 sm:$0xff]  }
  0x56   : > { %3632 = vmatpush1.bf16.msra.mxu0 %v5164_v18  ;;  %v5248_v18 = vld [vmem:[%s7629_s1 + $0x470] ss:$8 sps:$4 sm:$0xff]  }
  0x57   : > { %3675 = vmatpush1.bf16.msra.mxu1 %v5167_v19  ;;  %3633 = vmatprep.subr.bf16.mxu0 %v5172_v20  ;;  %v5251_v19 = vld [vmem:[%s7629_s1 + $0x570] ss:$8 sps:$4 sm:$0xff]   ;;  %v5256_v20 = vld [vmem:[%s7629_s1 + $0x464] ss:$8 sps:$4 sm:$0xff]  }
  0x58   : > { %3676 = vmatprep.subr.bf16.mxu1 %v5175_v21  ;;  %v5259_v21 = vld [vmem:[%s7629_s1 + $0x564] ss:$8 sps:$4 sm:$0xff]  }
  0x5a   : > { %3634 = vmatpush1.bf16.msra.mxu0 %v5170_v22  ;;  %v5254_v22 = vld [vmem:[%s7629_s1 + $0x460] ss:$8 sps:$4 sm:$0xff]  }
  0x5b   : > { %3677 = vmatpush1.bf16.msra.mxu1 %v5173_v23  ;;  %3635 = vmatprep.subr.bf16.mxu0 %v5178_v24  ;;  %v5257_v23 = vld [vmem:[%s7629_s1 + $0x560] ss:$8 sps:$4 sm:$0xff]  }
  0x5c   : > { %3678 = vmatprep.subr.bf16.mxu1 %v5181_v25  ;;  %v6340_v24 = vld [vmem:[%s6037_s22 + $0x20] sm:$0xff] }
  0x5d   : > { %v6343_v25 = vld [vmem:[%s6037_s22 + $0xa0] sm:$0xff] }
  0x5e   : > { %3636 = vmatpush1.bf16.msra.mxu0 %v5176_v26  ;;  %v6346_v26 = vld [vmem:[%s6037_s22 + $0x28] sm:$0xff] }
  0x5f   : > { %3679 = vmatpush1.bf16.msra.mxu1 %v5179_v27  ;;  %3637 = vmatprep.subr.bf16.mxu0 %v5184_v28  ;;  %v6349_v27 = vld [vmem:[%s6037_s22 + $0xa8] sm:$0xff]  ;;  %v5262_v28 = vld [vmem:[%s7629_s1 + $0x454] ss:$8 sps:$4 sm:$0xff]  }
  0x60   : > { %3680 = vmatprep.subr.bf16.mxu1 %v5187_v29  ;;  %v4485_v29 = vcombine.high %v6340_v24, %v6343_v25 }
  0x62   : > { %3638 = vmatpush1.bf16.msra.mxu0 %v5182_v30  ;;  %v5265_v30 = vld [vmem:[%s7629_s1 + $0x554] ss:$8 sps:$4 sm:$0xff]  }
  0x63   : > { %3681 = vmatpush1.bf16.msra.mxu1 %v5185_v31  ;;  %3639 = vmatprep.subr.bf16.mxu0 %v5190_v32  ;;  %v4487_v31 = vcombine.high %v6346_v26, %v6349_v27  ;;  %v5260_v32 = vld [vmem:[%s7629_s1 + $0x450] ss:$8 sps:$4 sm:$0xff]  }
  0x64   : > { %3682 = vmatprep.subr.bf16.mxu1 %v5193_v33  ;;  %v5263_v33 = vld [vmem:[%s7629_s1 + $0x550] ss:$8 sps:$4 sm:$0xff]  }
  0x66   : > { %3640 = vmatpush1.bf16.msra.mxu0 %v5188_v34  ;;  %v5268_v34 = vld [vmem:[%s7629_s1 + $0x444] ss:$8 sps:$4 sm:$0xff]  }
  0x67   : > { %3683 = vmatpush1.bf16.msra.mxu1 %v5191_v35  ;;  %3641 = vmatprep.subr.bf16.mxu0 %v5196_v40  ;;  %v5271_v35 = vld [vmem:[%s7629_s1 + $0x544] ss:$8 sps:$4 sm:$0xff]   ;;  %v5272_v40 = vld [vmem:[%s7629_s1 + $0x430] ss:$8 sps:$4 sm:$0xff]  }
  0x68   : > { %3684 = vmatprep.subr.bf16.mxu1 %v5199_v42  ;;  %v5280_v42 = vld [vmem:[%s7629_s1 + $0x424] ss:$8 sps:$4 sm:$0xff]  }
  0x6a   : > { %3642 = vmatpush1.bf16.msra.mxu0 %v5194_v44  ;;  %v5278_v44 = vld [vmem:[%s7629_s1 + $0x420] ss:$8 sps:$4 sm:$0xff]  }
  0x6b   : > { %3685 = vmatpush1.bf16.msra.mxu1 %v5197_v45  ;;  %3643 = vmatprep.subr.bf16.mxu0 %v5202_v46  ;;  %v5281_v45 = vld [vmem:[%s7629_s1 + $0x520] ss:$8 sps:$4 sm:$0xff]   ;;  %v5286_v46 = vld [vmem:[%s7629_s1 + $0x414] ss:$8 sps:$4 sm:$0xff]  }
  0x6c   : > { %3686 = vmatprep.subr.bf16.mxu1 %v5205_v47  ;;  %v5289_v47 = vld [vmem:[%s7629_s1 + $0x514] ss:$8 sps:$4 sm:$0xff]  }
  0x6e   : > { %3644 = vmatpush2.bf16.msra.mxu0 %v5200_v48  ;;  %v5284_v48 = vld [vmem:[%s7629_s1 + $0x410] ss:$8 sps:$4 sm:$0xff]  }
  0x6f   : > { %3687 = vmatpush2.bf16.msra.mxu1 %v5203_v49  ;;  %3645 = vmatprep.subr.bf16.mxu0 %v5208_v50  ;;  %v5287_v49 = vld [vmem:[%s7629_s1 + $0x510] ss:$8 sps:$4 sm:$0xff]   ;;  %v5292_v50 = vld [vmem:[%s7629_s1 + $0x404] ss:$8 sps:$4 sm:$0xff]  }
  0x70   : > { %3688 = vmatprep.subr.bf16.mxu1 %v5211_v51  ;;  %v5295_v51 = vld [vmem:[%s7629_s1 + $0x504] ss:$8 sps:$4 sm:$0xff]  }
  0x72   : > { %3646 = vmatpush2.bf16.msra.mxu0 %v5206_v52  ;;  %v5290_v52 = vld [vmem:[%s7629_s1 + $0x400] ss:$8 sps:$4 sm:$0xff]  }
  0x73   : > { %3689 = vmatpush2.bf16.msra.mxu1 %v5209_v53  ;;  %3647 = vmatprep.subr.bf16.mxu0 %v5214_v54  ;;  %v5293_v53 = vld [vmem:[%s7629_s1 + $0x500] ss:$8 sps:$4 sm:$0xff]   ;;  %v5298_v54 = vld [vmem:[%s7629_s1 + $0x4f4] ss:$8 sps:$4 sm:$0xff]  }
  0x74   : > { %3690 = vmatprep.subr.bf16.mxu1 %v5217_v55  ;;  %v5301_v55 = vld [vmem:[%s7629_s1 + $0x5f4] ss:$8 sps:$4 sm:$0xff]  }
  0x76   : > { %3648 = vmatpush2.bf16.msra.mxu0 %v5212_v56  ;;  %v5296_v56 = vld [vmem:[%s7629_s1 + $0x4f0] ss:$8 sps:$4 sm:$0xff]  }
  0x77   : > { %3691 = vmatpush2.bf16.msra.mxu1 %v5215_v57  ;;  %3649 = vmatprep.subr.bf16.mxu0 %v5220_v58  ;;  %v5299_v57 = vld [vmem:[%s7629_s1 + $0x5f0] ss:$8 sps:$4 sm:$0xff]   ;;  %v5304_v58 = vld [vmem:[%s7629_s1 + $0x4e4] ss:$8 sps:$4 sm:$0xff]  }
  0x78   : > { %3692 = vmatprep.subr.bf16.mxu1 %v5223_v59  ;;  %v5307_v59 = vld [vmem:[%s7629_s1 + $0x5e4] ss:$8 sps:$4 sm:$0xff]  }
  0x7a   : > { %3650 = vmatpush2.bf16.msra.mxu0 %v5218_v60  ;;  %v5302_v60 = vld [vmem:[%s7629_s1 + $0x4e0] ss:$8 sps:$4 sm:$0xff]  }
  0x7b   : > { %3693 = vmatpush2.bf16.msra.mxu1 %v5221_v61  ;;  %3651 = vmatprep.subr.bf16.mxu0 %v5226_v62  ;;  %v5305_v61 = vld [vmem:[%s7629_s1 + $0x5e0] ss:$8 sps:$4 sm:$0xff]   ;;  %v5310_v62 = vld [vmem:[%s7629_s1 + $0x4d4] ss:$8 sps:$4 sm:$0xff]  }
  0x7c   : > { %3694 = vmatprep.subr.bf16.mxu1 %v5229_v63  ;;  %v5313_v63 = vld [vmem:[%s7629_s1 + $0x5d4] ss:$8 sps:$4 sm:$0xff]  }
  0x7e   : > { %3652 = vmatpush2.bf16.msra.mxu0 %v5224_v0  ;;  %v5308_v0 = vld [vmem:[%s7629_s1 + $0x4d0] ss:$8 sps:$4 sm:$0xff]  }
  0x7f   : > { %3695 = vmatpush2.bf16.msra.mxu1 %v5227_v1  ;;  %3653 = vmatprep.subr.bf16.mxu0 %v5232_v2  ;;  %v5311_v1 = vld [vmem:[%s7629_s1 + $0x5d0] ss:$8 sps:$4 sm:$0xff]   ;;  %v5316_v2 = vld [vmem:[%s7629_s1 + $0x4c4] ss:$8 sps:$4 sm:$0xff]  }
  0x80   : > { %3696 = vmatprep.subr.bf16.mxu1 %v5235_v3  ;;  %v5319_v3 = vld [vmem:[%s7629_s1 + $0x5c4] ss:$8 sps:$4 sm:$0xff]  }
  0x82   : > { %3654 = vmatpush2.bf16.msra.mxu0 %v5230_v4  ;;  %v5314_v4 = vld [vmem:[%s7629_s1 + $0x4c0] ss:$8 sps:$4 sm:$0xff]  }
  0x83   : > { %3697 = vmatpush2.bf16.msra.mxu1 %v5233_v5  ;;  %3655 = vmatprep.subr.bf16.mxu0 %v5238_v6  ;;  %v5317_v5 = vld [vmem:[%s7629_s1 + $0x5c0] ss:$8 sps:$4 sm:$0xff]   ;;  %v5322_v6 = vld [vmem:[%s7629_s1 + $0x4b4] ss:$8 sps:$4 sm:$0xff]  }
  0x84   : > { %3698 = vmatprep.subr.bf16.mxu1 %v5241_v7  ;;  %v5325_v7 = vld [vmem:[%s7629_s1 + $0x5b4] ss:$8 sps:$4 sm:$0xff]  }
  0x86   : > { %3656 = vmatpush2.bf16.msra.mxu0 %v5236_v8  ;;  %v5320_v8 = vld [vmem:[%s7629_s1 + $0x4b0] ss:$8 sps:$4 sm:$0xff]  }
  0x87   : > { %3699 = vmatpush2.bf16.msra.mxu1 %v5239_v9  ;;  %3657 = vmatprep.subr.bf16.mxu0 %v5244_v10  ;;  %v5323_v9 = vld [vmem:[%s7629_s1 + $0x5b0] ss:$8 sps:$4 sm:$0xff]   ;;  %v5328_v10 = vld [vmem:[%s7629_s1 + $0x4a4] ss:$8 sps:$4 sm:$0xff]  }
  0x88   : > { %3700 = vmatprep.subr.bf16.mxu1 %v5247_v11  ;;  %v5331_v11 = vld [vmem:[%s7629_s1 + $0x5a4] ss:$8 sps:$4 sm:$0xff]  }
  0x8a   : > { %3658 = vmatpush2.bf16.msra.mxu0 %v5242_v12  ;;  %v5326_v12 = vld [vmem:[%s7629_s1 + $0x4a0] ss:$8 sps:$4 sm:$0xff]  }
  0x8b   : > { %3701 = vmatpush2.bf16.msra.mxu1 %v5245_v13  ;;  %3713 = vmatprep.subr.bf16.mxu0 %v5250_v14  ;;  %v5329_v13 = vld [vmem:[%s7629_s1 + $0x5a0] ss:$8 sps:$4 sm:$0xff]   ;;  %v5334_v14 = vld [vmem:[%s7629_s1 + $0x494] ss:$8 sps:$4 sm:$0xff]  }
  0x8c   : > { %3756 = vmatprep.subr.bf16.mxu1 %v5253_v15  ;;  %v5337_v15 = vld [vmem:[%s7629_s1 + $0x594] ss:$8 sps:$4 sm:$0xff]  }
  0x8d   : > { %3660 = vmatmul.mubr.bf16.vlgmr.msra.gmra.mxu0 %v4480_v16  ;;  %v5332_v16 = vld [vmem:[%s7629_s1 + $0x490] ss:$8 sps:$4 sm:$0xff]  }
  0x8e   : > { %3703 = vmatmul.mubr.bf16.vlgmr.msra.gmra.mxu1 %v4482_v17  ;;  %3714 = vmatpush1.bf16.msra.mxu0 %v5248_v18  ;;  %v5335_v17 = vld [vmem:[%s7629_s1 + $0x590] ss:$8 sps:$4 sm:$0xff]   ;;  %v5340_v18 = vld [vmem:[%s7629_s1 + $0x484] ss:$8 sps:$4 sm:$0xff]  }
  0x8f   : > { %3757 = vmatpush1.bf16.msra.mxu1 %v5251_v19  ;;  %3715 = vmatprep.subr.bf16.mxu0 %v5256_v20  ;;  %v5343_v19 = vld [vmem:[%s7629_s1 + $0x584] ss:$8 sps:$4 sm:$0xff]   ;;  %v5338_v20 = vld [vmem:[%s7629_s1 + $0x480] ss:$8 sps:$4 sm:$0xff]  }
  0x90   : > { %3758 = vmatprep.subr.bf16.mxu1 %v5259_v21  ;;  %3745 = vmatprep.mubr.bf16.mxu0 %v4485_v29  ;;  %v5341_v21 = vld [vmem:[%s7629_s1 + $0x580] ss:$8 sps:$4 sm:$0xff]   ;;  %v5344_v29 = vld [vmem:[%s7629_s1 + $0x670] ss:$8 sps:$4 sm:$0xff]  }
  0x91   : > { %3788 = vmatprep.mubr.bf16.mxu1 %v4487_v31  ;;  %v6539_v31 = vld [vmem:[%s6037_s22 + $0x38] sm:$0xff] }
  0x92   : > { %3716 = vmatpush1.bf16.msra.mxu0 %v5254_v22  ;;  %v5346_v22 = vld [vmem:[%s7629_s1 + $0x674] ss:$8 sps:$4 sm:$0xff]  }
  0x93   : > { %3759 = vmatpush1.bf16.msra.mxu1 %v5257_v23  ;;  %3717 = vmatprep.subr.bf16.mxu0 %v5262_v28  ;;  %v5349_v23 = vld [vmem:[%s7629_s1 + $0x774] ss:$8 sps:$4 sm:$0xff]  }
  0x94   : > { %3760 = vmatprep.subr.bf16.mxu1 %v5265_v30  ;;  %v6530_v28 = vld [vmem:[%s6037_s22 + $0x30] sm:$0xff] }
  0x95   : > { %v6536_v30 = vld [vmem:[%s6037_s22 + $0xb0] sm:$0xff] }
  0x96   : > { %3718 = vmatpush1.bf16.msra.mxu0 %v5260_v32  ;;  %v4484_v32 = vcombine.low %v6340_v24, %v6343_v25  ;;  %v5355_v24 = vld [vmem:[%s7629_s1 + $0x764] ss:$8 sps:$4 sm:$0xff]   ;;  %v4489_v25 = vcombine.high %v6530_v28, %v6536_v30 }
  0x97   : > { %3761 = vmatpush1.bf16.msra.mxu1 %v5263_v33  ;;  %3719 = vmatprep.subr.bf16.mxu0 %v5268_v34  ;;  %v4486_v33 = vcombine.low %v6346_v26, %v6349_v27  ;;  %v6546_v34 = vld [vmem:[%s6037_s22 + $0xb8] sm:$0xff]  ;;  %v5350_v27 = vld [vmem:[%s7629_s1 + $0x660] ss:$8 sps:$4 sm:$0xff]  }
  0x98   : > { %3762 = vmatprep.subr.bf16.mxu1 %v5271_v35  ;;  %v5347_v35 = vld [vmem:[%s7629_s1 + $0x770] ss:$8 sps:$4 sm:$0xff]   ;;  %v4491_v26 = vcombine.high %v6539_v31, %v6546_v34 }
  0x9a   : > { %3720 = vmatpush1.bf16.msra.mxu0 %v5266_v36  ;;  %v5352_v36 = vld [vmem:[%s7629_s1 + $0x664] ss:$8 sps:$4 sm:$0xff]  }
  0x9b   : > { %3763 = vmatpush1.bf16.msra.mxu1 %v5269_v37  ;;  %3721 = vmatprep.subr.bf16.mxu0 %v5274_v38  ;;  %v5353_v37 = vld [vmem:[%s7629_s1 + $0x760] ss:$8 sps:$4 sm:$0xff]   ;;  %v5358_v38 = vld [vmem:[%s7629_s1 + $0x654] ss:$8 sps:$4 sm:$0xff]  }
  0x9c   : > { %3764 = vmatprep.subr.bf16.mxu1 %v5277_v39  ;;  %v5361_v39 = vld [vmem:[%s7629_s1 + $0x754] ss:$8 sps:$4 sm:$0xff]  }
  0x9e   : > { %3722 = vmatpush1.bf16.msra.mxu0 %v5272_v40  ;;  %v5356_v40 = vld [vmem:[%s7629_s1 + $0x650] ss:$8 sps:$4 sm:$0xff]  }
  0x9f   : > { %3765 = vmatpush1.bf16.msra.mxu1 %v5275_v41  ;;  %3723 = vmatprep.subr.bf16.mxu0 %v5280_v42  ;;  %v5359_v41 = vld [vmem:[%s7629_s1 + $0x750] ss:$8 sps:$4 sm:$0xff]   ;;  %v5364_v42 = vld [vmem:[%s7629_s1 + $0x644] ss:$8 sps:$4 sm:$0xff]  }
  0xa0   : > { %3766 = vmatprep.subr.bf16.mxu1 %v5283_v43  ;;  %v5367_v43 = vld [vmem:[%s7629_s1 + $0x744] ss:$8 sps:$4 sm:$0xff]  }
  0xa2   : > { %3724 = vmatpush1.bf16.msra.mxu0 %v5278_v44  ;;  %v5362_v44 = vld [vmem:[%s7629_s1 + $0x640] ss:$8 sps:$4 sm:$0xff]  }
  0xa3   : > { %3767 = vmatpush1.bf16.msra.mxu1 %v5281_v45  ;;  %3725 = vmatprep.subr.bf16.mxu0 %v5286_v46  ;;  %v5365_v45 = vld [vmem:[%s7629_s1 + $0x740] ss:$8 sps:$4 sm:$0xff]   ;;  %v5370_v46 = vld [vmem:[%s7629_s1 + $0x634] ss:$8 sps:$4 sm:$0xff]  }
  0xa4   : > { %3768 = vmatprep.subr.bf16.mxu1 %v5289_v47  ;;  %v5373_v47 = vld [vmem:[%s7629_s1 + $0x734] ss:$8 sps:$4 sm:$0xff]  }
  0xa6   : > { %3726 = vmatpush1.bf16.msra.mxu0 %v5284_v48  ;;  %v5368_v48 = vld [vmem:[%s7629_s1 + $0x630] ss:$8 sps:$4 sm:$0xff]  }
  0xa7   : > { %3769 = vmatpush1.bf16.msra.mxu1 %v5287_v49  ;;  %3727 = vmatprep.subr.bf16.mxu0 %v5292_v50  ;;  %v5371_v49 = vld [vmem:[%s7629_s1 + $0x730] ss:$8 sps:$4 sm:$0xff]   ;;  %v5376_v50 = vld [vmem:[%s7629_s1 + $0x624] ss:$8 sps:$4 sm:$0xff]  }
  0xa8   : > { %3770 = vmatprep.subr.bf16.mxu1 %v5295_v51  ;;  %v5379_v51 = vld [vmem:[%s7629_s1 + $0x724] ss:$8 sps:$4 sm:$0xff]  }
  0xaa   : > { %3728 = vmatpush1.bf16.msra.mxu0 %v5290_v52  ;;  %v5374_v52 = vld [vmem:[%s7629_s1 + $0x620] ss:$8 sps:$4 sm:$0xff]  }
  0xab   : > { %3771 = vmatpush1.bf16.msra.mxu1 %v5293_v53  ;;  %3729 = vmatprep.subr.bf16.mxu0 %v5298_v54  ;;  %v5377_v53 = vld [vmem:[%s7629_s1 + $0x720] ss:$8 sps:$4 sm:$0xff]   ;;  %v5382_v54 = vld [vmem:[%s7629_s1 + $0x614] ss:$8 sps:$4 sm:$0xff]  }
  0xac   : > { %3772 = vmatprep.subr.bf16.mxu1 %v5301_v55  ;;  %v5385_v55 = vld [vmem:[%s7629_s1 + $0x714] ss:$8 sps:$4 sm:$0xff]  }
  0xae   : > { %3730 = vmatpush2.bf16.msra.mxu0 %v5296_v56  ;;  %v5380_v56 = vld [vmem:[%s7629_s1 + $0x610] ss:$8 sps:$4 sm:$0xff]  }
  0xaf   : > { %3773 = vmatpush2.bf16.msra.mxu1 %v5299_v57  ;;  %3731 = vmatprep.subr.bf16.mxu0 %v5304_v58  ;;  %v5383_v57 = vld [vmem:[%s7629_s1 + $0x710] ss:$8 sps:$4 sm:$0xff]   ;;  %v5388_v58 = vld [vmem:[%s7629_s1 + $0x604] ss:$8 sps:$4 sm:$0xff]  }
  0xb0   : > { %3774 = vmatprep.subr.bf16.mxu1 %v5307_v59  ;;  %v5391_v59 = vld [vmem:[%s7629_s1 + $0x704] ss:$8 sps:$4 sm:$0xff]  }
  0xb2   : > { %3732 = vmatpush2.bf16.msra.mxu0 %v5302_v60  ;;  %v5386_v60 = vld [vmem:[%s7629_s1 + $0x600] ss:$8 sps:$4 sm:$0xff]  }
  0xb3   : > { %3775 = vmatpush2.bf16.msra.mxu1 %v5305_v61  ;;  %3733 = vmatprep.subr.bf16.mxu0 %v5310_v62  ;;  %v5389_v61 = vld [vmem:[%s7629_s1 + $0x700] ss:$8 sps:$4 sm:$0xff]   ;;  %v5394_v62 = vld [vmem:[%s7629_s1 + $0x6f4] ss:$8 sps:$4 sm:$0xff]  }
  0xb4   : > { %3776 = vmatprep.subr.bf16.mxu1 %v5313_v63  ;;  %v5397_v63 = vld [vmem:[%s7629_s1 + $0x7f4] ss:$8 sps:$4 sm:$0xff]  }
  0xb6   : > { %3734 = vmatpush2.bf16.msra.mxu0 %v5308_v0  ;;  %v5392_v0 = vld [vmem:[%s7629_s1 + $0x6f0] ss:$8 sps:$4 sm:$0xff]  }
  0xb7   : > { %3777 = vmatpush2.bf16.msra.mxu1 %v5311_v1  ;;  %3735 = vmatprep.subr.bf16.mxu0 %v5316_v2  ;;  %v5395_v1 = vld [vmem:[%s7629_s1 + $0x7f0] ss:$8 sps:$4 sm:$0xff]   ;;  %v5400_v2 = vld [vmem:[%s7629_s1 + $0x6e4] ss:$8 sps:$4 sm:$0xff]  }
  0xb8   : > { %3778 = vmatprep.subr.bf16.mxu1 %v5319_v3  ;;  %v5403_v3 = vld [vmem:[%s7629_s1 + $0x7e4] ss:$8 sps:$4 sm:$0xff]  }
  0xba   : > { %3736 = vmatpush2.bf16.msra.mxu0 %v5314_v4  ;;  %v5398_v4 = vld [vmem:[%s7629_s1 + $0x6e0] ss:$8 sps:$4 sm:$0xff]  }
  0xbb   : > { %3779 = vmatpush2.bf16.msra.mxu1 %v5317_v5  ;;  %3737 = vmatprep.subr.bf16.mxu0 %v5322_v6  ;;  %v5401_v5 = vld [vmem:[%s7629_s1 + $0x7e0] ss:$8 sps:$4 sm:$0xff]   ;;  %v5406_v6 = vld [vmem:[%s7629_s1 + $0x6d4] ss:$8 sps:$4 sm:$0xff]  }
  0xbc   : > { %3780 = vmatprep.subr.bf16.mxu1 %v5325_v7  ;;  %v5409_v7 = vld [vmem:[%s7629_s1 + $0x7d4] ss:$8 sps:$4 sm:$0xff]  }
  0xbe   : > { %3738 = vmatpush2.bf16.msra.mxu0 %v5320_v8  ;;  %v5404_v8 = vld [vmem:[%s7629_s1 + $0x6d0] ss:$8 sps:$4 sm:$0xff]  }
  0xbf   : > { %3781 = vmatpush2.bf16.msra.mxu1 %v5323_v9  ;;  %3739 = vmatprep.subr.bf16.mxu0 %v5328_v10  ;;  %v5407_v9 = vld [vmem:[%s7629_s1 + $0x7d0] ss:$8 sps:$4 sm:$0xff]   ;;  %v5412_v10 = vld [vmem:[%s7629_s1 + $0x6c4] ss:$8 sps:$4 sm:$0xff]  }
  0xc0   : > { %3782 = vmatprep.subr.bf16.mxu1 %v5331_v11  ;;  %v5415_v11 = vld [vmem:[%s7629_s1 + $0x7c4] ss:$8 sps:$4 sm:$0xff]  }
  0xc2   : > { %3740 = vmatpush2.bf16.msra.mxu0 %v5326_v12  ;;  %v5410_v12 = vld [vmem:[%s7629_s1 + $0x6c0] ss:$8 sps:$4 sm:$0xff]  }
  0xc3   : > { %3783 = vmatpush2.bf16.msra.mxu1 %v5329_v13  ;;  %3741 = vmatprep.subr.bf16.mxu0 %v5334_v14  ;;  %v5413_v13 = vld [vmem:[%s7629_s1 + $0x7c0] ss:$8 sps:$4 sm:$0xff]   ;;  %v5418_v14 = vld [vmem:[%s7629_s1 + $0x6b4] ss:$8 sps:$4 sm:$0xff]  }
  0xc4   : > { %3784 = vmatprep.subr.bf16.mxu1 %v5337_v15  ;;  %v5421_v15 = vld [vmem:[%s7629_s1 + $0x7b4] ss:$8 sps:$4 sm:$0xff]  }
  0xc6   : > { %3742 = vmatpush2.bf16.msra.mxu0 %v5332_v16  ;;  %v5416_v16 = vld [vmem:[%s7629_s1 + $0x6b0] ss:$8 sps:$4 sm:$0xff]  }
  0xc7   : > { %3785 = vmatpush2.bf16.msra.mxu1 %v5335_v17  ;;  %3743 = vmatprep.subr.bf16.mxu0 %v5340_v18  ;;  %v5419_v17 = vld [vmem:[%s7629_s1 + $0x7b0] ss:$8 sps:$4 sm:$0xff]   ;;  %v5424_v18 = vld [vmem:[%s7629_s1 + $0x6a4] ss:$8 sps:$4 sm:$0xff]  }
  0xc8   : > { %3786 = vmatprep.subr.bf16.mxu1 %v5343_v19  ;;  %v5427_v19 = vld [vmem:[%s7629_s1 + $0x7a4] ss:$8 sps:$4 sm:$0xff]  }
  0xca   : > { %3744 = vmatpush2.bf16.msra.mxu0 %v5338_v20  ;;  %v5422_v20 = vld [vmem:[%s7629_s1 + $0x6a0] ss:$8 sps:$4 sm:$0xff]  }
  0xcb   : > { %3787 = vmatpush2.bf16.msra.mxu1 %v5341_v21  ;;  %3799 = vmatprep.subr.bf16.mxu0 %v5346_v22  ;;  %v5425_v21 = vld [vmem:[%s7629_s1 + $0x7a0] ss:$8 sps:$4 sm:$0xff]   ;;  %v5430_v22 = vld [vmem:[%s7629_s1 + $0x694] ss:$8 sps:$4 sm:$0xff]  }
  0xcc   : > { %3842 = vmatprep.subr.bf16.mxu1 %v5349_v23  ;;  %v5433_v23 = vld [vmem:[%s7629_s1 + $0x794] ss:$8 sps:$4 sm:$0xff]  }
  0xcd   : > { %3746 = vmatmul.mubr.bf16.vlgmr.msra.gmra.mxu0 %v4484_v32  ;;  %v5431_v32 = vld [vmem:[%s7629_s1 + $0x790] ss:$8 sps:$4 sm:$0xff]  }
  0xce   : > { %3789 = vmatmul.mubr.bf16.vlgmr.msra.gmra.mxu1 %v4486_v33  ;;  %3800 = vmatpush1.bf16.msra.mxu0 %v5344_v29  ;;  %v5428_v29 = vld [vmem:[%s7629_s1 + $0x690] ss:$8 sps:$4 sm:$0xff]   ;;  %v5436_v33 = vld [vmem:[%s7629_s1 + $0x684] ss:$8 sps:$4 sm:$0xff]  }
  0xcf   : > { %3843 = vmatpush1.bf16.msra.mxu1 %v5347_v35  ;;  %3801 = vmatprep.subr.bf16.mxu0 %v5352_v36  ;;  %v5439_v35 = vld [vmem:[%s7629_s1 + $0x784] ss:$8 sps:$4 sm:$0xff]   ;;  %v5434_v36 = vld [vmem:[%s7629_s1 + $0x680] ss:$8 sps:$4 sm:$0xff]  }
  0xd0   : > { %3844 = vmatprep.subr.bf16.mxu1 %v5355_v24  ;;  %3831 = vmatprep.mubr.bf16.mxu0 %v4489_v25  ;;  %v5437_v24 = vld [vmem:[%s7629_s1 + $0x780] ss:$8 sps:$4 sm:$0xff]   ;;  %v5442_v25 = vld [vmem:[%s7629_s1 + $0x874] ss:$8 sps:$4 sm:$0xff]  }
  0xd1   : > { %3874 = vmatprep.mubr.bf16.mxu1 %v4491_v26  ;;  %v5445_v26 = vld [vmem:[%s7629_s1 + $0x974] ss:$8 sps:$4 sm:$0xff]  }
  0xd2   : > { %3802 = vmatpush1.bf16.msra.mxu0 %v5350_v27  ;;  %v6742_v27 = vld [vmem:[%s6037_s22 + $0x40] sm:$0xff] }
  0xd3   : > { %3845 = vmatpush1.bf16.msra.mxu1 %v5353_v37  ;;  %3803 = vmatprep.subr.bf16.mxu0 %v5358_v38  ;;  %v5440_v37 = vld [vmem:[%s7629_s1 + $0x870] ss:$8 sps:$4 sm:$0xff]   ;;  %v6748_v38 = vld [vmem:[%s6037_s22 + $0xc0] sm:$0xff] }
  0xd4   : > { %3846 = vmatprep.subr.bf16.mxu1 %v5361_v39  ;;  %v6751_v39 = vld [vmem:[%s6037_s22 + $0x48] sm:$0xff] }
  0xd6   : > { %3804 = vmatpush1.bf16.msra.mxu0 %v5356_v40  ;;  %v4488_v40 = vcombine.low %v6530_v28, %v6536_v30  ;;  %v5451_v28 = vld [vmem:[%s7629_s1 + $0x964] ss:$8 sps:$4 sm:$0xff]   ;;  %v4493_v30 = vcombine.high %v6742_v27, %v6748_v38 }
  0xd7   : > { %3847 = vmatpush1.bf16.msra.mxu1 %v5359_v41  ;;  %3805 = vmatprep.subr.bf16.mxu0 %v5364_v42  ;;  %v4490_v41 = vcombine.low %v6539_v31, %v6546_v34  ;;  %v6758_v42 = vld [vmem:[%s6037_s22 + $0xc8] sm:$0xff] }
  0xd8   : > { %3848 = vmatprep.subr.bf16.mxu1 %v5367_v43  ;;  %v5443_v43 = vld [vmem:[%s7629_s1 + $0x970] ss:$8 sps:$4 sm:$0xff]   ;;  %v4495_v31 = vcombine.high %v6751_v39, %v6758_v42  ;;  %v5446_v34 = vld [vmem:[%s7629_s1 + $0x860] ss:$8 sps:$4 sm:$0xff]  }
  0xda   : > { %3806 = vmatpush1.bf16.msra.mxu0 %v5362_v44  ;;  %v5448_v44 = vld [vmem:[%s7629_s1 + $0x864] ss:$8 sps:$4 sm:$0xff]  }
  0xdb   : > { %3849 = vmatpush1.bf16.msra.mxu1 %v5365_v45  ;;  %3807 = vmatprep.subr.bf16.mxu0 %v5370_v46  ;;  %v5449_v45 = vld [vmem:[%s7629_s1 + $0x960] ss:$8 sps:$4 sm:$0xff]   ;;  %v5454_v46 = vld [vmem:[%s7629_s1 + $0x854] ss:$8 sps:$4 sm:$0xff]  }
  0xdc   : > { %3850 = vmatprep.subr.bf16.mxu1 %v5373_v47  ;;  %v5457_v47 = vld [vmem:[%s7629_s1 + $0x954] ss:$8 sps:$4 sm:$0xff]  }
  0xde   : > { %3808 = vmatpush1.bf16.msra.mxu0 %v5368_v48  ;;  %v5452_v48 = vld [vmem:[%s7629_s1 + $0x850] ss:$8 sps:$4 sm:$0xff]  }
  0xdf   : > { %3851 = vmatpush1.bf16.msra.mxu1 %v5371_v49  ;;  %3809 = vmatprep.subr.bf16.mxu0 %v5376_v50  ;;  %v5455_v49 = vld [vmem:[%s7629_s1 + $0x950] ss:$8 sps:$4 sm:$0xff]   ;;  %v5460_v50 = vld [vmem:[%s7629_s1 + $0x844] ss:$8 sps:$4 sm:$0xff]  }
  0xe0   : > { %3852 = vmatprep.subr.bf16.mxu1 %v5379_v51  ;;  %v5463_v51 = vld [vmem:[%s7629_s1 + $0x944] ss:$8 sps:$4 sm:$0xff]  }
  0xe2   : > { %3810 = vmatpush1.bf16.msra.mxu0 %v5374_v52  ;;  %v5458_v52 = vld [vmem:[%s7629_s1 + $0x840] ss:$8 sps:$4 sm:$0xff]  }
  0xe3   : > { %3853 = vmatpush1.bf16.msra.mxu1 %v5377_v53  ;;  %3811 = vmatprep.subr.bf16.mxu0 %v5382_v54  ;;  %v5461_v53 = vld [vmem:[%s7629_s1 + $0x940] ss:$8 sps:$4 sm:$0xff]   ;;  %v5466_v54 = vld [vmem:[%s7629_s1 + $0x834] ss:$8 sps:$4 sm:$0xff]  }
  0xe4   : > { %3854 = vmatprep.subr.bf16.mxu1 %v5385_v55  ;;  %v5469_v55 = vld [vmem:[%s7629_s1 + $0x934] ss:$8 sps:$4 sm:$0xff]  }
  0xe6   : > { %3812 = vmatpush1.bf16.msra.mxu0 %v5380_v56  ;;  %v5464_v56 = vld [vmem:[%s7629_s1 + $0x830] ss:$8 sps:$4 sm:$0xff]  }
  0xe7   : > { %3855 = vmatpush1.bf16.msra.mxu1 %v5383_v57  ;;  %3813 = vmatprep.subr.bf16.mxu0 %v5388_v58  ;;  %v5467_v57 = vld [vmem:[%s7629_s1 + $0x930] ss:$8 sps:$4 sm:$0xff]   ;;  %v5472_v58 = vld [vmem:[%s7629_s1 + $0x824] ss:$8 sps:$4 sm:$0xff]  }
  0xe8   : > { %3856 = vmatprep.subr.bf16.mxu1 %v5391_v59  ;;  %v5475_v59 = vld [vmem:[%s7629_s1 + $0x924] ss:$8 sps:$4 sm:$0xff]  }
  0xea   : > { %3814 = vmatpush1.bf16.msra.mxu0 %v5386_v60  ;;  %v5470_v60 = vld [vmem:[%s7629_s1 + $0x820] ss:$8 sps:$4 sm:$0xff]  }
  0xeb   : > { %3857 = vmatpush1.bf16.msra.mxu1 %v5389_v61  ;;  %3815 = vmatprep.subr.bf16.mxu0 %v5394_v62  ;;  %v5473_v61 = vld [vmem:[%s7629_s1 + $0x920] ss:$8 sps:$4 sm:$0xff]   ;;  %v5478_v62 = vld [vmem:[%s7629_s1 + $0x814] ss:$8 sps:$4 sm:$0xff]  }
  0xec   : > { %3858 = vmatprep.subr.bf16.mxu1 %v5397_v63  ;;  %v5481_v63 = vld [vmem:[%s7629_s1 + $0x914] ss:$8 sps:$4 sm:$0xff]  }
  0xee   : > { %3816 = vmatpush2.bf16.msra.mxu0 %v5392_v0  ;;  %v5476_v0 = vld [vmem:[%s7629_s1 + $0x810] ss:$8 sps:$4 sm:$0xff]  }
  0xef   : > { %3859 = vmatpush2.bf16.msra.mxu1 %v5395_v1  ;;  %3817 = vmatprep.subr.bf16.mxu0 %v5400_v2  ;;  %v5479_v1 = vld [vmem:[%s7629_s1 + $0x910] ss:$8 sps:$4 sm:$0xff]   ;;  %v5484_v2 = vld [vmem:[%s7629_s1 + $0x804] ss:$8 sps:$4 sm:$0xff]  }
  0xf0   : > { %3860 = vmatprep.subr.bf16.mxu1 %v5403_v3  ;;  %v5487_v3 = vld [vmem:[%s7629_s1 + $0x904] ss:$8 sps:$4 sm:$0xff]  }
  0xf2   : > { %3818 = vmatpush2.bf16.msra.mxu0 %v5398_v4  ;;  %v5482_v4 = vld [vmem:[%s7629_s1 + $0x800] ss:$8 sps:$4 sm:$0xff]  }
  0xf3   : > { %3861 = vmatpush2.bf16.msra.mxu1 %v5401_v5  ;;  %3819 = vmatprep.subr.bf16.mxu0 %v5406_v6  ;;  %v5485_v5 = vld [vmem:[%s7629_s1 + $0x900] ss:$8 sps:$4 sm:$0xff]   ;;  %v5490_v6 = vld [vmem:[%s7629_s1 + $0x8f4] ss:$8 sps:$4 sm:$0xff]  }
  0xf4   : > { %3862 = vmatprep.subr.bf16.mxu1 %v5409_v7  ;;  %v5493_v7 = vld [vmem:[%s7629_s1 + $0x9f4] ss:$8 sps:$4 sm:$0xff]  }
  0xf6   : > { %3820 = vmatpush2.bf16.msra.mxu0 %v5404_v8  ;;  %v5488_v8 = vld [vmem:[%s7629_s1 + $0x8f0] ss:$8 sps:$4 sm:$0xff]  }
  0xf7   : > { %3863 = vmatpush2.bf16.msra.mxu1 %v5407_v9  ;;  %3821 = vmatprep.subr.bf16.mxu0 %v5412_v10  ;;  %v5491_v9 = vld [vmem:[%s7629_s1 + $0x9f0] ss:$8 sps:$4 sm:$0xff]   ;;  %v5496_v10 = vld [vmem:[%s7629_s1 + $0x8e4] ss:$8 sps:$4 sm:$0xff]  }
  0xf8   : > { %3864 = vmatprep.subr.bf16.mxu1 %v5415_v11  ;;  %v5499_v11 = vld [vmem:[%s7629_s1 + $0x9e4] ss:$8 sps:$4 sm:$0xff]  }
  0xfa   : > { %3822 = vmatpush2.bf16.msra.mxu0 %v5410_v12  ;;  %v5494_v12 = vld [vmem:[%s7629_s1 + $0x8e0] ss:$8 sps:$4 sm:$0xff]  }
  0xfb   : > { %3865 = vmatpush2.bf16.msra.mxu1 %v5413_v13  ;;  %3823 = vmatprep.subr.bf16.mxu0 %v5418_v14  ;;  %v5497_v13 = vld [vmem:[%s7629_s1 + $0x9e0] ss:$8 sps:$4 sm:$0xff]   ;;  %v5502_v14 = vld [vmem:[%s7629_s1 + $0x8d4] ss:$8 sps:$4 sm:$0xff]  }
  0xfc   : > { %3866 = vmatprep.subr.bf16.mxu1 %v5421_v15  ;;  %v5505_v15 = vld [vmem:[%s7629_s1 + $0x9d4] ss:$8 sps:$4 sm:$0xff]  }
  0xfe   : > { %3824 = vmatpush2.bf16.msra.mxu0 %v5416_v16  ;;  %v5500_v16 = vld [vmem:[%s7629_s1 + $0x8d0] ss:$8 sps:$4 sm:$0xff]  }
  0xff   : > { %3867 = vmatpush2.bf16.msra.mxu1 %v5419_v17  ;;  %3825 = vmatprep.subr.bf16.mxu0 %v5424_v18  ;;  %v5503_v17 = vld [vmem:[%s7629_s1 + $0x9d0] ss:$8 sps:$4 sm:$0xff]   ;;  %v5508_v18 = vld [vmem:[%s7629_s1 + $0x8c4] ss:$8 sps:$4 sm:$0xff]  }
 0x100   : > { %3868 = vmatprep.subr.bf16.mxu1 %v5427_v19  ;;  %v5511_v19 = vld [vmem:[%s7629_s1 + $0x9c4] ss:$8 sps:$4 sm:$0xff]  }
 0x102   : > { %3826 = vmatpush2.bf16.msra.mxu0 %v5422_v20  ;;  %v5506_v20 = vld [vmem:[%s7629_s1 + $0x8c0] ss:$8 sps:$4 sm:$0xff]  }
 0x103   : > { %3869 = vmatpush2.bf16.msra.mxu1 %v5425_v21  ;;  %3827 = vmatprep.subr.bf16.mxu0 %v5430_v22  ;;  %v5509_v21 = vld [vmem:[%s7629_s1 + $0x9c0] ss:$8 sps:$4 sm:$0xff]   ;;  %v5514_v22 = vld [vmem:[%s7629_s1 + $0x8b4] ss:$8 sps:$4 sm:$0xff]  }
 0x104   : > { %3870 = vmatprep.subr.bf16.mxu1 %v5433_v23  ;;  %v5517_v23 = vld [vmem:[%s7629_s1 + $0x9b4] ss:$8 sps:$4 sm:$0xff]  }
 0x106   : > { %3828 = vmatpush2.bf16.msra.mxu0 %v5428_v29  ;;  %v5512_v29 = vld [vmem:[%s7629_s1 + $0x8b0] ss:$8 sps:$4 sm:$0xff]  }
 0x107   : > { %3871 = vmatpush2.bf16.msra.mxu1 %v5431_v32  ;;  %3829 = vmatprep.subr.bf16.mxu0 %v5436_v33  ;;  %v5515_v32 = vld [vmem:[%s7629_s1 + $0x9b0] ss:$8 sps:$4 sm:$0xff]   ;;  %v5520_v33 = vld [vmem:[%s7629_s1 + $0x8a4] ss:$8 sps:$4 sm:$0xff]  }
 0x108   : > { %3872 = vmatprep.subr.bf16.mxu1 %v5439_v35  ;;  %v5523_v35 = vld [vmem:[%s7629_s1 + $0x9a4] ss:$8 sps:$4 sm:$0xff]  }
 0x10a   : > { %3830 = vmatpush2.bf16.msra.mxu0 %v5434_v36  ;;  %v5518_v36 = vld [vmem:[%s7629_s1 + $0x8a0] ss:$8 sps:$4 sm:$0xff]  }
 0x10b   : > { %3873 = vmatpush2.bf16.msra.mxu1 %v5437_v24  ;;  %3885 = vmatprep.subr.bf16.mxu0 %v5442_v25  ;;  %v5521_v24 = vld [vmem:[%s7629_s1 + $0x9a0] ss:$8 sps:$4 sm:$0xff]   ;;  %v5526_v25 = vld [vmem:[%s7629_s1 + $0x894] ss:$8 sps:$4 sm:$0xff]  }
 0x10c   : > { %3928 = vmatprep.subr.bf16.mxu1 %v5445_v26  ;;  %v5529_v26 = vld [vmem:[%s7629_s1 + $0x994] ss:$8 sps:$4 sm:$0xff]  }
 0x10d   : > { %3832 = vmatmul.mubr.bf16.vlgmr.msra.gmra.mxu0 %v4488_v40  ;;  %v5527_v40 = vld [vmem:[%s7629_s1 + $0x990] ss:$8 sps:$4 sm:$0xff]  }
 0x10e   : > { %3875 = vmatmul.mubr.bf16.vlgmr.msra.gmra.mxu1 %v4490_v41  ;;  %3886 = vmatpush1.bf16.msra.mxu0 %v5440_v37  ;;  %v5524_v37 = vld [vmem:[%s7629_s1 + $0x890] ss:$8 sps:$4 sm:$0xff]   ;;  %v5532_v41 = vld [vmem:[%s7629_s1 + $0x884] ss:$8 sps:$4 sm:$0xff]  }
 0x10f   : > { %3929 = vmatpush1.bf16.msra.mxu1 %v5443_v43  ;;  %3887 = vmatprep.subr.bf16.mxu0 %v5448_v44  ;;  %v5535_v43 = vld [vmem:[%s7629_s1 + $0x984] ss:$8 sps:$4 sm:$0xff]   ;;  %v5530_v44 = vld [vmem:[%s7629_s1 + $0x880] ss:$8 sps:$4 sm:$0xff]  }
 0x110   : > { %3930 = vmatprep.subr.bf16.mxu1 %v5451_v28  ;;  %3917 = vmatprep.mubr.bf16.mxu0 %v4493_v30  ;;  %v5533_v28 = vld [vmem:[%s7629_s1 + $0x980] ss:$8 sps:$4 sm:$0xff]   ;;  %v5538_v30 = vld [vmem:[%s7629_s1 + $0xa74] ss:$8 sps:$4 sm:$0xff]  }
 0x111   : > { %3960 = vmatprep.mubr.bf16.mxu1 %v4495_v31  ;;  %v5541_v31 = vld [vmem:[%s7629_s1 + $0xb74] ss:$8 sps:$4 sm:$0xff]  }
 0x112   : > { %3888 = vmatpush1.bf16.msra.mxu0 %v5446_v34  ;;  %v6954_v34 = vld [vmem:[%s6037_s22 + $0x50] sm:$0xff] }
 0x113   : > { %3931 = vmatpush1.bf16.msra.mxu1 %v5449_v45  ;;  %3889 = vmatprep.subr.bf16.mxu0 %v5454_v46  ;;  %v5536_v45 = vld [vmem:[%s7629_s1 + $0xa70] ss:$8 sps:$4 sm:$0xff]   ;;  %v4492_v46 = vcombine.low %v6742_v27, %v6748_v38  ;;  %v5544_v27 = vld [vmem:[%s7629_s1 + $0xa64] ss:$8 sps:$4 sm:$0xff]  }
 0x114   : > { %3932 = vmatprep.subr.bf16.mxu1 %v5457_v47  ;;  %v4494_v47 = vcombine.low %v6751_v39, %v6758_v42  ;;  %v5547_v38 = vld [vmem:[%s7629_s1 + $0xb64] ss:$8 sps:$4 sm:$0xff]   ;;  %v5542_v39 = vld [vmem:[%s7629_s1 + $0xa60] ss:$8 sps:$4 sm:$0xff]  }
 0x115   : > { %v5545_v42 = vld [vmem:[%s7629_s1 + $0xb60] ss:$8 sps:$4 sm:$0xff]  }
 0x116   : > { %3890 = vmatpush1.bf16.msra.mxu0 %v5452_v48  ;;  %v6964_v48 = vld [vmem:[%s6037_s22 + $0xd0] sm:$0xff] }
 0x117   : > { %3933 = vmatpush1.bf16.msra.mxu1 %v5455_v49  ;;  %3891 = vmatprep.subr.bf16.mxu0 %v5460_v50  ;;  %v6967_v49 = vld [vmem:[%s6037_s22 + $0x58] sm:$0xff] }
 0x118   : > { %3934 = vmatprep.subr.bf16.mxu1 %v5463_v51  ;;  %v6970_v50 = vld [vmem:[%s6037_s22 + $0xd8] sm:$0xff] }
 0x119   : > { %v5539_v51 = vld [vmem:[%s7629_s1 + $0xb70] ss:$8 sps:$4 sm:$0xff]  }
 0x11a   : > { %3892 = vmatpush1.bf16.msra.mxu0 %v5458_v52  ;;  %v4497_v52 = vcombine.high %v6954_v34, %v6964_v48 }
 0x11b   : > { %3935 = vmatpush1.bf16.msra.mxu1 %v5461_v53  ;;  %3893 = vmatprep.subr.bf16.mxu0 %v5466_v54  ;;  %v4499_v53 = vcombine.high %v6967_v49, %v6970_v50  ;;  %v5550_v54 = vld [vmem:[%s7629_s1 + $0xa54] ss:$8 sps:$4 sm:$0xff]  }
 0x11c   : > { %3936 = vmatprep.subr.bf16.mxu1 %v5469_v55  ;;  %v5553_v55 = vld [vmem:[%s7629_s1 + $0xb54] ss:$8 sps:$4 sm:$0xff]  }
 0x11e   : > { %3894 = vmatpush1.bf16.msra.mxu0 %v5464_v56  ;;  %v5548_v56 = vld [vmem:[%s7629_s1 + $0xa50] ss:$8 sps:$4 sm:$0xff]  }
 0x11f   : > { %3937 = vmatpush1.bf16.msra.mxu1 %v5467_v57  ;;  %3895 = vmatprep.subr.bf16.mxu0 %v5472_v58  ;;  %v5551_v57 = vld [vmem:[%s7629_s1 + $0xb50] ss:$8 sps:$4 sm:$0xff]   ;;  %v5556_v58 = vld [vmem:[%s7629_s1 + $0xa44] ss:$8 sps:$4 sm:$0xff]  }
 0x120   : > { %3938 = vmatprep.subr.bf16.mxu1 %v5475_v59  ;;  %v5559_v59 = vld [vmem:[%s7629_s1 + $0xb44] ss:$8 sps:$4 sm:$0xff]  }
 0x122   : > { %3896 = vmatpush1.bf16.msra.mxu0 %v5470_v60  ;;  %v5554_v60 = vld [vmem:[%s7629_s1 + $0xa40] ss:$8 sps:$4 sm:$0xff]  }
 0x123   : > { %3939 = vmatpush1.bf16.msra.mxu1 %v5473_v61  ;;  %3897 = vmatprep.subr.bf16.mxu0 %v5478_v62  ;;  %v5557_v61 = vld [vmem:[%s7629_s1 + $0xb40] ss:$8 sps:$4 sm:$0xff]   ;;  %v5562_v62 = vld [vmem:[%s7629_s1 + $0xa34] ss:$8 sps:$4 sm:$0xff]  }
 0x124   : > { %3940 = vmatprep.subr.bf16.mxu1 %v5481_v63  ;;  %v5565_v63 = vld [vmem:[%s7629_s1 + $0xb34] ss:$8 sps:$4 sm:$0xff]  }
 0x126   : > { %3898 = vmatpush1.bf16.msra.mxu0 %v5476_v0  ;;  %v5560_v0 = vld [vmem:[%s7629_s1 + $0xa30] ss:$8 sps:$4 sm:$0xff]  }
 0x127   : > { %3941 = vmatpush1.bf16.msra.mxu1 %v5479_v1  ;;  %3899 = vmatprep.subr.bf16.mxu0 %v5484_v2  ;;  %v5563_v1 = vld [vmem:[%s7629_s1 + $0xb30] ss:$8 sps:$4 sm:$0xff]   ;;  %v5568_v2 = vld [vmem:[%s7629_s1 + $0xa24] ss:$8 sps:$4 sm:$0xff]  }
 0x128   : > { %3942 = vmatprep.subr.bf16.mxu1 %v5487_v3  ;;  %v5571_v3 = vld [vmem:[%s7629_s1 + $0xb24] ss:$8 sps:$4 sm:$0xff]  }
 0x12a   : > { %3900 = vmatpush1.bf16.msra.mxu0 %v5482_v4  ;;  %v5566_v4 = vld [vmem:[%s7629_s1 + $0xa20] ss:$8 sps:$4 sm:$0xff]  }
 0x12b   : > { %3943 = vmatpush1.bf16.msra.mxu1 %v5485_v5  ;;  %3901 = vmatprep.subr.bf16.mxu0 %v5490_v6  ;;  %v5569_v5 = vld [vmem:[%s7629_s1 + $0xb20] ss:$8 sps:$4 sm:$0xff]   ;;  %v5574_v6 = vld [vmem:[%s7629_s1 + $0xa14] ss:$8 sps:$4 sm:$0xff]  }
 0x12c   : > { %3944 = vmatprep.subr.bf16.mxu1 %v5493_v7  ;;  %v5577_v7 = vld [vmem:[%s7629_s1 + $0xb14] ss:$8 sps:$4 sm:$0xff]  }
 0x12e   : > { %3902 = vmatpush2.bf16.msra.mxu0 %v5488_v8  ;;  %v5572_v8 = vld [vmem:[%s7629_s1 + $0xa10] ss:$8 sps:$4 sm:$0xff]  }
 0x12f   : > { %3945 = vmatpush2.bf16.msra.mxu1 %v5491_v9  ;;  %3903 = vmatprep.subr.bf16.mxu0 %v5496_v10  ;;  %v5575_v9 = vld [vmem:[%s7629_s1 + $0xb10] ss:$8 sps:$4 sm:$0xff]   ;;  %v5580_v10 = vld [vmem:[%s7629_s1 + $0xa04] ss:$8 sps:$4 sm:$0xff]  }
 0x130   : > { %3946 = vmatprep.subr.bf16.mxu1 %v5499_v11  ;;  %v5583_v11 = vld [vmem:[%s7629_s1 + $0xb04] ss:$8 sps:$4 sm:$0xff]  }
 0x132   : > { %3904 = vmatpush2.bf16.msra.mxu0 %v5494_v12  ;;  %v5578_v12 = vld [vmem:[%s7629_s1 + $0xa00] ss:$8 sps:$4 sm:$0xff]  }
 0x133   : > { %3947 = vmatpush2.bf16.msra.mxu1 %v5497_v13  ;;  %3905 = vmatprep.subr.bf16.mxu0 %v5502_v14  ;;  %v5581_v13 = vld [vmem:[%s7629_s1 + $0xb00] ss:$8 sps:$4 sm:$0xff]   ;;  %v5586_v14 = vld [vmem:[%s7629_s1 + $0xaf4] ss:$8 sps:$4 sm:$0xff]  }
 0x134   : > { %3948 = vmatprep.subr.bf16.mxu1 %v5505_v15  ;;  %v5589_v15 = vld [vmem:[%s7629_s1 + $0xbf4] ss:$8 sps:$4 sm:$0xff]  }
 0x136   : > { %3906 = vmatpush2.bf16.msra.mxu0 %v5500_v16  ;;  %v5584_v16 = vld [vmem:[%s7629_s1 + $0xaf0] ss:$8 sps:$4 sm:$0xff]  }
 0x137   : > { %3949 = vmatpush2.bf16.msra.mxu1 %v5503_v17  ;;  %3907 = vmatprep.subr.bf16.mxu0 %v5508_v18  ;;  %v5587_v17 = vld [vmem:[%s7629_s1 + $0xbf0] ss:$8 sps:$4 sm:$0xff]   ;;  %v5592_v18 = vld [vmem:[%s7629_s1 + $0xae4] ss:$8 sps:$4 sm:$0xff]  }
 0x138   : > { %3950 = vmatprep.subr.bf16.mxu1 %v5511_v19  ;;  %v5595_v19 = vld [vmem:[%s7629_s1 + $0xbe4] ss:$8 sps:$4 sm:$0xff]  }
 0x13a   : > { %3908 = vmatpush2.bf16.msra.mxu0 %v5506_v20  ;;  %v5590_v20 = vld [vmem:[%s7629_s1 + $0xae0] ss:$8 sps:$4 sm:$0xff]  }
 0x13b   : > { %3951 = vmatpush2.bf16.msra.mxu1 %v5509_v21  ;;  %3909 = vmatprep.subr.bf16.mxu0 %v5514_v22  ;;  %v5593_v21 = vld [vmem:[%s7629_s1 + $0xbe0] ss:$8 sps:$4 sm:$0xff]   ;;  %v5598_v22 = vld [vmem:[%s7629_s1 + $0xad4] ss:$8 sps:$4 sm:$0xff]  }
 0x13c   : > { %3952 = vmatprep.subr.bf16.mxu1 %v5517_v23  ;;  %v5601_v23 = vld [vmem:[%s7629_s1 + $0xbd4] ss:$8 sps:$4 sm:$0xff]  }
 0x13e   : > { %3910 = vmatpush2.bf16.msra.mxu0 %v5512_v29  ;;  %v5596_v29 = vld [vmem:[%s7629_s1 + $0xad0] ss:$8 sps:$4 sm:$0xff]  }
 0x13f   : > { %3953 = vmatpush2.bf16.msra.mxu1 %v5515_v32  ;;  %3911 = vmatprep.subr.bf16.mxu0 %v5520_v33  ;;  %v5599_v32 = vld [vmem:[%s7629_s1 + $0xbd0] ss:$8 sps:$4 sm:$0xff]   ;;  %v5604_v33 = vld [vmem:[%s7629_s1 + $0xac4] ss:$8 sps:$4 sm:$0xff]  }
 0x140   : > { %3954 = vmatprep.subr.bf16.mxu1 %v5523_v35  ;;  %v5607_v35 = vld [vmem:[%s7629_s1 + $0xbc4] ss:$8 sps:$4 sm:$0xff]  }
 0x142   : > { %3912 = vmatpush2.bf16.msra.mxu0 %v5518_v36  ;;  %v5602_v36 = vld [vmem:[%s7629_s1 + $0xac0] ss:$8 sps:$4 sm:$0xff]  }
 0x143   : > { %3955 = vmatpush2.bf16.msra.mxu1 %v5521_v24  ;;  %3913 = vmatprep.subr.bf16.mxu0 %v5526_v25  ;;  %v5605_v24 = vld [vmem:[%s7629_s1 + $0xbc0] ss:$8 sps:$4 sm:$0xff]   ;;  %v5610_v25 = vld [vmem:[%s7629_s1 + $0xab4] ss:$8 sps:$4 sm:$0xff]  }
 0x144   : > { %3956 = vmatprep.subr.bf16.mxu1 %v5529_v26  ;;  %v5613_v26 = vld [vmem:[%s7629_s1 + $0xbb4] ss:$8 sps:$4 sm:$0xff]  }
 0x146   : > { %3914 = vmatpush2.bf16.msra.mxu0 %v5524_v37  ;;  %v5608_v37 = vld [vmem:[%s7629_s1 + $0xab0] ss:$8 sps:$4 sm:$0xff]  }
 0x147   : > { %3957 = vmatpush2.bf16.msra.mxu1 %v5527_v40  ;;  %3915 = vmatprep.subr.bf16.mxu0 %v5532_v41  ;;  %v5611_v40 = vld [vmem:[%s7629_s1 + $0xbb0] ss:$8 sps:$4 sm:$0xff]   ;;  %v5616_v41 = vld [vmem:[%s7629_s1 + $0xaa4] ss:$8 sps:$4 sm:$0xff]  }
 0x148   : > { %3958 = vmatprep.subr.bf16.mxu1 %v5535_v43  ;;  %v5619_v43 = vld [vmem:[%s7629_s1 + $0xba4] ss:$8 sps:$4 sm:$0xff]  }
 0x14a   : > { %3916 = vmatpush2.bf16.msra.mxu0 %v5530_v44  ;;  %v5614_v44 = vld [vmem:[%s7629_s1 + $0xaa0] ss:$8 sps:$4 sm:$0xff]  }
 0x14b   : > { %3959 = vmatpush2.bf16.msra.mxu1 %v5533_v28  ;;  %3971 = vmatprep.subr.bf16.mxu0 %v5538_v30  ;;  %v5617_v28 = vld [vmem:[%s7629_s1 + $0xba0] ss:$8 sps:$4 sm:$0xff]   ;;  %v5622_v30 = vld [vmem:[%s7629_s1 + $0xa94] ss:$8 sps:$4 sm:$0xff]  }
 0x14c   : > { %4014 = vmatprep.subr.bf16.mxu1 %v5541_v31  ;;  %v5625_v31 = vld [vmem:[%s7629_s1 + $0xb94] ss:$8 sps:$4 sm:$0xff]  }
 0x14d   : > { %3918 = vmatmul.mubr.bf16.vlgmr.msra.gmra.mxu0 %v4492_v46  ;;  %v5623_v46 = vld [vmem:[%s7629_s1 + $0xb90] ss:$8 sps:$4 sm:$0xff]  }
 0x14e   : > { %3961 = vmatmul.mubr.bf16.vlgmr.msra.gmra.mxu1 %v4494_v47  ;;  %3972 = vmatpush1.bf16.msra.mxu0 %v5536_v45  ;;  %v5620_v45 = vld [vmem:[%s7629_s1 + $0xa90] ss:$8 sps:$4 sm:$0xff]   ;;  %v5628_v47 = vld [vmem:[%s7629_s1 + $0xa84] ss:$8 sps:$4 sm:$0xff]  }
 0x14f   : > { %4015 = vmatpush1.bf16.msra.mxu1 %v5539_v51  ;;  %3973 = vmatprep.subr.bf16.mxu0 %v5544_v27  ;;  %v5631_v51 = vld [vmem:[%s7629_s1 + $0xb84] ss:$8 sps:$4 sm:$0xff]   ;;  %v5626_v27 = vld [vmem:[%s7629_s1 + $0xa80] ss:$8 sps:$4 sm:$0xff]  }
 0x150   : > { %4016 = vmatprep.subr.bf16.mxu1 %v5547_v38  ;;  %4003 = vmatprep.mubr.bf16.mxu0 %v4497_v52  ;;  %v5629_v38 = vld [vmem:[%s7629_s1 + $0xb80] ss:$8 sps:$4 sm:$0xff]  }
 0x151   : > { %4046 = vmatprep.mubr.bf16.mxu1 %v4499_v53  ;;  %v7166_v52 = vld [vmem:[%s6037_s22 + $0x60] sm:$0xff]  ;;  %v4496_v53 = vcombine.low %v6954_v34, %v6964_v48 }
 0x152   : > { %3974 = vmatpush1.bf16.msra.mxu0 %v5542_v39  ;;  %v5634_v39 = vld [vmem:[%s7629_s1 + $0xc74] ss:$8 sps:$4 sm:$0xff]   ;;  %v5640_v34 = vld [vmem:[%s7629_s1 + $0xc64] ss:$8 sps:$4 sm:$0xff]  }
 0x153   : > { %4017 = vmatpush1.bf16.msra.mxu1 %v5545_v42  ;;  %3975 = vmatprep.subr.bf16.mxu0 %v5550_v54  ;;  %v5637_v42 = vld [vmem:[%s7629_s1 + $0xd74] ss:$8 sps:$4 sm:$0xff]   ;;  %v4498_v54 = vcombine.low %v6967_v49, %v6970_v50  ;;  %v5643_v48 = vld [vmem:[%s7629_s1 + $0xd64] ss:$8 sps:$4 sm:$0xff]  }
 0x154   : > { %4018 = vmatprep.subr.bf16.mxu1 %v5553_v55  ;;  %v7173_v55 = vld [vmem:[%s6037_s22 + $0xe0] sm:$0xff] }
 0x155   : > { %v4501_v49 = vcombine.high %v7166_v52, %v7173_v55 }
 0x156   : > { %3976 = vmatpush1.bf16.msra.mxu0 %v5548_v56  ;;  %v7176_v56 = vld [vmem:[%s6037_s22 + $0x68] sm:$0xff] }
 0x157   : > { %4019 = vmatpush1.bf16.msra.mxu1 %v5551_v57  ;;  %3977 = vmatprep.subr.bf16.mxu0 %v5556_v58  ;;  %v7179_v57 = vld [vmem:[%s6037_s22 + $0xe8] sm:$0xff]  ;;  %v5632_v58 = vld [vmem:[%s7629_s1 + $0xc70] ss:$8 sps:$4 sm:$0xff]  }
 0x158   : > { %4020 = vmatprep.subr.bf16.mxu1 %v5559_v59  ;;  %v5635_v59 = vld [vmem:[%s7629_s1 + $0xd70] ss:$8 sps:$4 sm:$0xff]   ;;  %v4503_v50 = vcombine.high %v7176_v56, %v7179_v57 }
 0x15a   : > { %3978 = vmatpush1.bf16.msra.mxu0 %v5554_v60  ;;  %v5638_v60 = vld [vmem:[%s7629_s1 + $0xc60] ss:$8 sps:$4 sm:$0xff]  }
 0x15b   : > { %4021 = vmatpush1.bf16.msra.mxu1 %v5557_v61  ;;  %3979 = vmatprep.subr.bf16.mxu0 %v5562_v62  ;;  %v5641_v61 = vld [vmem:[%s7629_s1 + $0xd60] ss:$8 sps:$4 sm:$0xff]   ;;  %v5646_v62 = vld [vmem:[%s7629_s1 + $0xc54] ss:$8 sps:$4 sm:$0xff]  }
 0x15c   : > { %4022 = vmatprep.subr.bf16.mxu1 %v5565_v63  ;;  %v5649_v63 = vld [vmem:[%s7629_s1 + $0xd54] ss:$8 sps:$4 sm:$0xff]  }
 0x15e   : > { %3980 = vmatpush1.bf16.msra.mxu0 %v5560_v0  ;;  %v5644_v0 = vld [vmem:[%s7629_s1 + $0xc50] ss:$8 sps:$4 sm:$0xff]  }
 0x15f   : > { %4023 = vmatpush1.bf16.msra.mxu1 %v5563_v1  ;;  %3981 = vmatprep.subr.bf16.mxu0 %v5568_v2  ;;  %v5647_v1 = vld [vmem:[%s7629_s1 + $0xd50] ss:$8 sps:$4 sm:$0xff]   ;;  %v5652_v2 = vld [vmem:[%s7629_s1 + $0xc44] ss:$8 sps:$4 sm:$0xff]  }
 0x160   : > { %4024 = vmatprep.subr.bf16.mxu1 %v5571_v3  ;;  %v5655_v3 = vld [vmem:[%s7629_s1 + $0xd44] ss:$8 sps:$4 sm:$0xff]  }
 0x162   : > { %3982 = vmatpush1.bf16.msra.mxu0 %v5566_v4  ;;  %v5650_v4 = vld [vmem:[%s7629_s1 + $0xc40] ss:$8 sps:$4 sm:$0xff]  }
 0x163   : > { %4025 = vmatpush1.bf16.msra.mxu1 %v5569_v5  ;;  %3983 = vmatprep.subr.bf16.mxu0 %v5574_v6  ;;  %v5653_v5 = vld [vmem:[%s7629_s1 + $0xd40] ss:$8 sps:$4 sm:$0xff]   ;;  %v5658_v6 = vld [vmem:[%s7629_s1 + $0xc34] ss:$8 sps:$4 sm:$0xff]  }
 0x164   : > { %4026 = vmatprep.subr.bf16.mxu1 %v5577_v7  ;;  %v5661_v7 = vld [vmem:[%s7629_s1 + $0xd34] ss:$8 sps:$4 sm:$0xff]  }
 0x166   : > { %3984 = vmatpush1.bf16.msra.mxu0 %v5572_v8  ;;  %v5656_v8 = vld [vmem:[%s7629_s1 + $0xc30] ss:$8 sps:$4 sm:$0xff]  }
 0x167   : > { %4027 = vmatpush1.bf16.msra.mxu1 %v5575_v9  ;;  %3985 = vmatprep.subr.bf16.mxu0 %v5580_v10  ;;  %v5659_v9 = vld [vmem:[%s7629_s1 + $0xd30] ss:$8 sps:$4 sm:$0xff]   ;;  %v5664_v10 = vld [vmem:[%s7629_s1 + $0xc24] ss:$8 sps:$4 sm:$0xff]  }
 0x168   : > { %4028 = vmatprep.subr.bf16.mxu1 %v5583_v11  ;;  %v5667_v11 = vld [vmem:[%s7629_s1 + $0xd24] ss:$8 sps:$4 sm:$0xff]  }
 0x16a   : > { %3986 = vmatpush1.bf16.msra.mxu0 %v5578_v12  ;;  %v5662_v12 = vld [vmem:[%s7629_s1 + $0xc20] ss:$8 sps:$4 sm:$0xff]  }
 0x16b   : > { %4029 = vmatpush1.bf16.msra.mxu1 %v5581_v13  ;;  %3987 = vmatprep.subr.bf16.mxu0 %v5586_v14  ;;  %v5665_v13 = vld [vmem:[%s7629_s1 + $0xd20] ss:$8 sps:$4 sm:$0xff]   ;;  %v5670_v14 = vld [vmem:[%s7629_s1 + $0xc14] ss:$8 sps:$4 sm:$0xff]  }
 0x16c   : > { %4030 = vmatprep.subr.bf16.mxu1 %v5589_v15  ;;  %v5673_v15 = vld [vmem:[%s7629_s1 + $0xd14] ss:$8 sps:$4 sm:$0xff]  }
 0x16e   : > { %3988 = vmatpush2.bf16.msra.mxu0 %v5584_v16  ;;  %v5668_v16 = vld [vmem:[%s7629_s1 + $0xc10] ss:$8 sps:$4 sm:$0xff]  }
 0x16f   : > { %4031 = vmatpush2.bf16.msra.mxu1 %v5587_v17  ;;  %3989 = vmatprep.subr.bf16.mxu0 %v5592_v18  ;;  %v5671_v17 = vld [vmem:[%s7629_s1 + $0xd10] ss:$8 sps:$4 sm:$0xff]   ;;  %v5676_v18 = vld [vmem:[%s7629_s1 + $0xc04] ss:$8 sps:$4 sm:$0xff]  }
 0x170   : > { %4032 = vmatprep.subr.bf16.mxu1 %v5595_v19  ;;  %v5679_v19 = vld [vmem:[%s7629_s1 + $0xd04] ss:$8 sps:$4 sm:$0xff]  }
 0x172   : > { %3990 = vmatpush2.bf16.msra.mxu0 %v5590_v20  ;;  %v5674_v20 = vld [vmem:[%s7629_s1 + $0xc00] ss:$8 sps:$4 sm:$0xff]  }
 0x173   : > { %4033 = vmatpush2.bf16.msra.mxu1 %v5593_v21  ;;  %3991 = vmatprep.subr.bf16.mxu0 %v5598_v22  ;;  %v5677_v21 = vld [vmem:[%s7629_s1 + $0xd00] ss:$8 sps:$4 sm:$0xff]   ;;  %v5682_v22 = vld [vmem:[%s7629_s1 + $0xcf4] ss:$8 sps:$4 sm:$0xff]  }
 0x174   : > { %4034 = vmatprep.subr.bf16.mxu1 %v5601_v23  ;;  %v5685_v23 = vld [vmem:[%s7629_s1 + $0xdf4] ss:$8 sps:$4 sm:$0xff]  }
 0x176   : > { %3992 = vmatpush2.bf16.msra.mxu0 %v5596_v29  ;;  %v5680_v29 = vld [vmem:[%s7629_s1 + $0xcf0] ss:$8 sps:$4 sm:$0xff]  }
 0x177   : > { %4035 = vmatpush2.bf16.msra.mxu1 %v5599_v32  ;;  %3993 = vmatprep.subr.bf16.mxu0 %v5604_v33  ;;  %v5683_v32 = vld [vmem:[%s7629_s1 + $0xdf0] ss:$8 sps:$4 sm:$0xff]   ;;  %v5688_v33 = vld [vmem:[%s7629_s1 + $0xce4] ss:$8 sps:$4 sm:$0xff]  }
 0x178   : > { %4036 = vmatprep.subr.bf16.mxu1 %v5607_v35  ;;  %v5691_v35 = vld [vmem:[%s7629_s1 + $0xde4] ss:$8 sps:$4 sm:$0xff]  }
 0x17a   : > { %3994 = vmatpush2.bf16.msra.mxu0 %v5602_v36  ;;  %v5686_v36 = vld [vmem:[%s7629_s1 + $0xce0] ss:$8 sps:$4 sm:$0xff]  }
 0x17b   : > { %4037 = vmatpush2.bf16.msra.mxu1 %v5605_v24  ;;  %3995 = vmatprep.subr.bf16.mxu0 %v5610_v25  ;;  %v5689_v24 = vld [vmem:[%s7629_s1 + $0xde0] ss:$8 sps:$4 sm:$0xff]   ;;  %v5694_v25 = vld [vmem:[%s7629_s1 + $0xcd4] ss:$8 sps:$4 sm:$0xff]  }
 0x17c   : > { %4038 = vmatprep.subr.bf16.mxu1 %v5613_v26  ;;  %v5697_v26 = vld [vmem:[%s7629_s1 + $0xdd4] ss:$8 sps:$4 sm:$0xff]  }
 0x17e   : > { %3996 = vmatpush2.bf16.msra.mxu0 %v5608_v37  ;;  %v5692_v37 = vld [vmem:[%s7629_s1 + $0xcd0] ss:$8 sps:$4 sm:$0xff]  }
 0x17f   : > { %4039 = vmatpush2.bf16.msra.mxu1 %v5611_v40  ;;  %3997 = vmatprep.subr.bf16.mxu0 %v5616_v41  ;;  %v5695_v40 = vld [vmem:[%s7629_s1 + $0xdd0] ss:$8 sps:$4 sm:$0xff]   ;;  %v5700_v41 = vld [vmem:[%s7629_s1 + $0xcc4] ss:$8 sps:$4 sm:$0xff]  }
 0x180   : > { %4040 = vmatprep.subr.bf16.mxu1 %v5619_v43  ;;  %v5703_v43 = vld [vmem:[%s7629_s1 + $0xdc4] ss:$8 sps:$4 sm:$0xff]  }
 0x182   : > { %3998 = vmatpush2.bf16.msra.mxu0 %v5614_v44  ;;  %v5698_v44 = vld [vmem:[%s7629_s1 + $0xcc0] ss:$8 sps:$4 sm:$0xff]  }
 0x183   : > { %4041 = vmatpush2.bf16.msra.mxu1 %v5617_v28  ;;  %3999 = vmatprep.subr.bf16.mxu0 %v5622_v30  ;;  %v5701_v28 = vld [vmem:[%s7629_s1 + $0xdc0] ss:$8 sps:$4 sm:$0xff]   ;;  %v5706_v30 = vld [vmem:[%s7629_s1 + $0xcb4] ss:$8 sps:$4 sm:$0xff]  }
 0x184   : > { %4042 = vmatprep.subr.bf16.mxu1 %v5625_v31  ;;  %v5709_v31 = vld [vmem:[%s7629_s1 + $0xdb4] ss:$8 sps:$4 sm:$0xff]  }
 0x186   : > { %4000 = vmatpush2.bf16.msra.mxu0 %v5620_v45  ;;  %v5704_v45 = vld [vmem:[%s7629_s1 + $0xcb0] ss:$8 sps:$4 sm:$0xff]  }
 0x187   : > { %4043 = vmatpush2.bf16.msra.mxu1 %v5623_v46  ;;  %4001 = vmatprep.subr.bf16.mxu0 %v5628_v47  ;;  %v5707_v46 = vld [vmem:[%s7629_s1 + $0xdb0] ss:$8 sps:$4 sm:$0xff]   ;;  %v5712_v47 = vld [vmem:[%s7629_s1 + $0xca4] ss:$8 sps:$4 sm:$0xff]  }
 0x188   : > { %4044 = vmatprep.subr.bf16.mxu1 %v5631_v51  ;;  %v5715_v51 = vld [vmem:[%s7629_s1 + $0xda4] ss:$8 sps:$4 sm:$0xff]  }
 0x18a   : > { %4002 = vmatpush2.bf16.msra.mxu0 %v5626_v27  ;;  %v5710_v27 = vld [vmem:[%s7629_s1 + $0xca0] ss:$8 sps:$4 sm:$0xff]  }
 0x18b   : > { %4045 = vmatpush2.bf16.msra.mxu1 %v5629_v38  ;;  %4057 = vmatprep.subr.bf16.mxu0 %v5634_v39  ;;  %v5713_v38 = vld [vmem:[%s7629_s1 + $0xda0] ss:$8 sps:$4 sm:$0xff]   ;;  %v5718_v39 = vld [vmem:[%s7629_s1 + $0xc94] ss:$8 sps:$4 sm:$0xff]  }
 0x18c   : > { %4100 = vmatprep.subr.bf16.mxu1 %v5637_v42  ;;  %v5721_v42 = vld [vmem:[%s7629_s1 + $0xd94] ss:$8 sps:$4 sm:$0xff]  }
 0x18d   : > { %4004 = vmatmul.mubr.bf16.vlgmr.msra.gmra.mxu0 %v4496_v53  ;;  %v5716_v53 = vld [vmem:[%s7629_s1 + $0xc90] ss:$8 sps:$4 sm:$0xff]  }
 0x18e   : > { %4047 = vmatmul.mubr.bf16.vlgmr.msra.gmra.mxu1 %v4498_v54  ;;  %4058 = vmatpush1.bf16.msra.mxu0 %v5632_v58  ;;  %v5719_v54 = vld [vmem:[%s7629_s1 + $0xd90] ss:$8 sps:$4 sm:$0xff]   ;;  %v5724_v58 = vld [vmem:[%s7629_s1 + $0xc84] ss:$8 sps:$4 sm:$0xff]  }
 0x18f   : > { %4101 = vmatpush1.bf16.msra.mxu1 %v5635_v59  ;;  %4059 = vmatprep.subr.bf16.mxu0 %v5640_v34  ;;  %v5727_v59 = vld [vmem:[%s7629_s1 + $0xd84] ss:$8 sps:$4 sm:$0xff]   ;;  %v5722_v34 = vld [vmem:[%s7629_s1 + $0xc80] ss:$8 sps:$4 sm:$0xff]  }
 0x190   : > { %4102 = vmatprep.subr.bf16.mxu1 %v5643_v48  ;;  %4089 = vmatprep.mubr.bf16.mxu0 %v4501_v49  ;;  %v5725_v48 = vld [vmem:[%s7629_s1 + $0xd80] ss:$8 sps:$4 sm:$0xff]   ;;  %v5730_v49 = vld [vmem:[%s7629_s1 + $0xe74] ss:$8 sps:$4 sm:$0xff]  }
 0x191   : > { %4132 = vmatprep.mubr.bf16.mxu1 %v4503_v50  ;;  %v5733_v50 = vld [vmem:[%s7629_s1 + $0xf74] ss:$8 sps:$4 sm:$0xff]  }
 0x192   : > { %4060 = vmatpush1.bf16.msra.mxu0 %v5638_v60  ;;  %v7378_v60 = vld [vmem:[%s6037_s22 + $0x70] sm:$0xff] }
 0x193   : > { %4103 = vmatpush1.bf16.msra.mxu1 %v5641_v61  ;;  %4061 = vmatprep.subr.bf16.mxu0 %v5646_v62  ;;  %v4500_v61 = vcombine.low %v7166_v52, %v7173_v55  ;;  %v4502_v62 = vcombine.low %v7176_v56, %v7179_v57  ;;  %v5736_v52 = vld [vmem:[%s7629_s1 + $0xe64] ss:$8 sps:$4 sm:$0xff]  }
 0x194   : > { %4104 = vmatprep.subr.bf16.mxu1 %v5649_v63  ;;  %v7385_v63 = vld [vmem:[%s6037_s22 + $0xf0] sm:$0xff]  ;;  %v5739_v55 = vld [vmem:[%s7629_s1 + $0xf64] ss:$8 sps:$4 sm:$0xff]  }
 0x195   : > { %v4505_v56 = vcombine.high %v7378_v60, %v7385_v63 }
 0x196   : > { %4062 = vmatpush1.bf16.msra.mxu0 %v5644_v0  ;;  %v7388_v0 = vld [vmem:[%s6037_s22 + $0x78] sm:$0xff] }
 0x197   : > { %4105 = vmatpush1.bf16.msra.mxu1 %v5647_v1  ;;  %4063 = vmatprep.subr.bf16.mxu0 %v5652_v2  ;;  %v7391_v1 = vld [vmem:[%s6037_s22 + $0xf8] sm:$0xff] }
 0x198   : > { %4106 = vmatprep.subr.bf16.mxu1 %v5655_v3  ;;  %v5728_v2 = vld [vmem:[%s7629_s1 + $0xe70] ss:$8 sps:$4 sm:$0xff]   ;;  %v4507_v57 = vcombine.high %v7388_v0, %v7391_v1 }
 0x199   : > { %v5731_v3 = vld [vmem:[%s7629_s1 + $0xf70] ss:$8 sps:$4 sm:$0xff]  }
 0x19a   : > { %4064 = vmatpush1.bf16.msra.mxu0 %v5650_v4  ;;  %v5734_v4 = vld [vmem:[%s7629_s1 + $0xe60] ss:$8 sps:$4 sm:$0xff]  }
 0x19b   : > { %4107 = vmatpush1.bf16.msra.mxu1 %v5653_v5  ;;  %4065 = vmatprep.subr.bf16.mxu0 %v5658_v6  ;;  %v5737_v5 = vld [vmem:[%s7629_s1 + $0xf60] ss:$8 sps:$4 sm:$0xff]   ;;  %v5742_v6 = vld [vmem:[%s7629_s1 + $0xe54] ss:$8 sps:$4 sm:$0xff]  }
 0x19c   : > { %4108 = vmatprep.subr.bf16.mxu1 %v5661_v7  ;;  %v5745_v7 = vld [vmem:[%s7629_s1 + $0xf54] ss:$8 sps:$4 sm:$0xff]  }
 0x19e   : > { %4066 = vmatpush1.bf16.msra.mxu0 %v5656_v8  ;;  %v5740_v8 = vld [vmem:[%s7629_s1 + $0xe50] ss:$8 sps:$4 sm:$0xff]  }
 0x19f   : > { %4109 = vmatpush1.bf16.msra.mxu1 %v5659_v9  ;;  %4067 = vmatprep.subr.bf16.mxu0 %v5664_v10  ;;  %v5743_v9 = vld [vmem:[%s7629_s1 + $0xf50] ss:$8 sps:$4 sm:$0xff]   ;;  %v5748_v10 = vld [vmem:[%s7629_s1 + $0xe44] ss:$8 sps:$4 sm:$0xff]  }
 0x1a0   : > { %4110 = vmatprep.subr.bf16.mxu1 %v5667_v11  ;;  %v5751_v11 = vld [vmem:[%s7629_s1 + $0xf44] ss:$8 sps:$4 sm:$0xff]  }
 0x1a2   : > { %4068 = vmatpush1.bf16.msra.mxu0 %v5662_v12  ;;  %v5746_v12 = vld [vmem:[%s7629_s1 + $0xe40] ss:$8 sps:$4 sm:$0xff]  }
 0x1a3   : > { %4111 = vmatpush1.bf16.msra.mxu1 %v5665_v13  ;;  %4069 = vmatprep.subr.bf16.mxu0 %v5670_v14  ;;  %v5749_v13 = vld [vmem:[%s7629_s1 + $0xf40] ss:$8 sps:$4 sm:$0xff]   ;;  %v5754_v14 = vld [vmem:[%s7629_s1 + $0xe34] ss:$8 sps:$4 sm:$0xff]  }
 0x1a4   : > { %4112 = vmatprep.subr.bf16.mxu1 %v5673_v15  ;;  %v5757_v15 = vld [vmem:[%s7629_s1 + $0xf34] ss:$8 sps:$4 sm:$0xff]  }
 0x1a6   : > { %4070 = vmatpush1.bf16.msra.mxu0 %v5668_v16  ;;  %v5752_v16 = vld [vmem:[%s7629_s1 + $0xe30] ss:$8 sps:$4 sm:$0xff]  }
 0x1a7   : > { %4113 = vmatpush1.bf16.msra.mxu1 %v5671_v17  ;;  %4071 = vmatprep.subr.bf16.mxu0 %v5676_v18  ;;  %v5755_v17 = vld [vmem:[%s7629_s1 + $0xf30] ss:$8 sps:$4 sm:$0xff]   ;;  %v5760_v18 = vld [vmem:[%s7629_s1 + $0xe24] ss:$8 sps:$4 sm:$0xff]  }
 0x1a8   : > { %4114 = vmatprep.subr.bf16.mxu1 %v5679_v19  ;;  %v5763_v19 = vld [vmem:[%s7629_s1 + $0xf24] ss:$8 sps:$4 sm:$0xff]  }
 0x1aa   : > { %4072 = vmatpush1.bf16.msra.mxu0 %v5674_v20  ;;  %v5758_v20 = vld [vmem:[%s7629_s1 + $0xe20] ss:$8 sps:$4 sm:$0xff]  }
 0x1ab   : > { %4115 = vmatpush1.bf16.msra.mxu1 %v5677_v21  ;;  %4073 = vmatprep.subr.bf16.mxu0 %v5682_v22  ;;  %v5761_v21 = vld [vmem:[%s7629_s1 + $0xf20] ss:$8 sps:$4 sm:$0xff]   ;;  %v5766_v22 = vld [vmem:[%s7629_s1 + $0xe14] ss:$8 sps:$4 sm:$0xff]  }
 0x1ac   : > { %4116 = vmatprep.subr.bf16.mxu1 %v5685_v23  ;;  %v5769_v23 = vld [vmem:[%s7629_s1 + $0xf14] ss:$8 sps:$4 sm:$0xff]  }
 0x1ae   : > { %4074 = vmatpush2.bf16.msra.mxu0 %v5680_v29  ;;  %v5764_v29 = vld [vmem:[%s7629_s1 + $0xe10] ss:$8 sps:$4 sm:$0xff]  }
 0x1af   : > { %4117 = vmatpush2.bf16.msra.mxu1 %v5683_v32  ;;  %4075 = vmatprep.subr.bf16.mxu0 %v5688_v33  ;;  %v5767_v32 = vld [vmem:[%s7629_s1 + $0xf10] ss:$8 sps:$4 sm:$0xff]   ;;  %v5772_v33 = vld [vmem:[%s7629_s1 + $0xe04] ss:$8 sps:$4 sm:$0xff]  }
 0x1b0   : > { %4118 = vmatprep.subr.bf16.mxu1 %v5691_v35  ;;  %v5775_v35 = vld [vmem:[%s7629_s1 + $0xf04] ss:$8 sps:$4 sm:$0xff]  }
 0x1b2   : > { %4076 = vmatpush2.bf16.msra.mxu0 %v5686_v36  ;;  %v5770_v36 = vld [vmem:[%s7629_s1 + $0xe00] ss:$8 sps:$4 sm:$0xff]  }
 0x1b3   : > { %4119 = vmatpush2.bf16.msra.mxu1 %v5689_v24  ;;  %4077 = vmatprep.subr.bf16.mxu0 %v5694_v25  ;;  %v5773_v24 = vld [vmem:[%s7629_s1 + $0xf00] ss:$8 sps:$4 sm:$0xff]   ;;  %v5778_v25 = vld [vmem:[%s7629_s1 + $0xef4] ss:$8 sps:$4 sm:$0xff]  }
 0x1b4   : > { %4120 = vmatprep.subr.bf16.mxu1 %v5697_v26  ;;  %v5781_v26 = vld [vmem:[%s7629_s1 + $0xff4] ss:$8 sps:$4 sm:$0xff]  }
 0x1b6   : > { %4078 = vmatpush2.bf16.msra.mxu0 %v5692_v37  ;;  %v5776_v37 = vld [vmem:[%s7629_s1 + $0xef0] ss:$8 sps:$4 sm:$0xff]  }
 0x1b7   : > { %4121 = vmatpush2.bf16.msra.mxu1 %v5695_v40  ;;  %4079 = vmatprep.subr.bf16.mxu0 %v5700_v41  ;;  %v5779_v40 = vld [vmem:[%s7629_s1 + $0xff0] ss:$8 sps:$4 sm:$0xff]   ;;  %v5784_v41 = vld [vmem:[%s7629_s1 + $0xee4] ss:$8 sps:$4 sm:$0xff]  }
 0x1b8   : > { %4122 = vmatprep.subr.bf16.mxu1 %v5703_v43  ;;  %v5787_v43 = vld [vmem:[%s7629_s1 + $0xfe4] ss:$8 sps:$4 sm:$0xff]  }
 0x1ba   : > { %4080 = vmatpush2.bf16.msra.mxu0 %v5698_v44  ;;  %v5782_v44 = vld [vmem:[%s7629_s1 + $0xee0] ss:$8 sps:$4 sm:$0xff]  }
 0x1bb   : > { %4123 = vmatpush2.bf16.msra.mxu1 %v5701_v28  ;;  %4081 = vmatprep.subr.bf16.mxu0 %v5706_v30  ;;  %v5785_v28 = vld [vmem:[%s7629_s1 + $0xfe0] ss:$8 sps:$4 sm:$0xff]   ;;  %v5790_v30 = vld [vmem:[%s7629_s1 + $0xed4] ss:$8 sps:$4 sm:$0xff]  }
 0x1bc   : > { %4124 = vmatprep.subr.bf16.mxu1 %v5709_v31  ;;  %v5793_v31 = vld [vmem:[%s7629_s1 + $0xfd4] ss:$8 sps:$4 sm:$0xff]  }
 0x1be   : > { %4082 = vmatpush2.bf16.msra.mxu0 %v5704_v45  ;;  %v5788_v45 = vld [vmem:[%s7629_s1 + $0xed0] ss:$8 sps:$4 sm:$0xff]  }
 0x1bf   : > { %4125 = vmatpush2.bf16.msra.mxu1 %v5707_v46  ;;  %4083 = vmatprep.subr.bf16.mxu0 %v5712_v47  ;;  %v5791_v46 = vld [vmem:[%s7629_s1 + $0xfd0] ss:$8 sps:$4 sm:$0xff]   ;;  %v5796_v47 = vld [vmem:[%s7629_s1 + $0xec4] ss:$8 sps:$4 sm:$0xff]  }
 0x1c0   : > { %4126 = vmatprep.subr.bf16.mxu1 %v5715_v51  ;;  %v5799_v51 = vld [vmem:[%s7629_s1 + $0xfc4] ss:$8 sps:$4 sm:$0xff]  }
 0x1c2   : > { %4084 = vmatpush2.bf16.msra.mxu0 %v5710_v27  ;;  %v5794_v27 = vld [vmem:[%s7629_s1 + $0xec0] ss:$8 sps:$4 sm:$0xff]  }
 0x1c3   : > { %4127 = vmatpush2.bf16.msra.mxu1 %v5713_v38  ;;  %4085 = vmatprep.subr.bf16.mxu0 %v5718_v39  ;;  %v5797_v38 = vld [vmem:[%s7629_s1 + $0xfc0] ss:$8 sps:$4 sm:$0xff]   ;;  %v5802_v39 = vld [vmem:[%s7629_s1 + $0xeb4] ss:$8 sps:$4 sm:$0xff]  }
 0x1c4   : > { %4128 = vmatprep.subr.bf16.mxu1 %v5721_v42  ;;  %v5805_v42 = vld [vmem:[%s7629_s1 + $0xfb4] ss:$8 sps:$4 sm:$0xff]  }
 0x1c6   : > { %4086 = vmatpush2.bf16.msra.mxu0 %v5716_v53  ;;  %v5800_v53 = vld [vmem:[%s7629_s1 + $0xeb0] ss:$8 sps:$4 sm:$0xff]  }
 0x1c7   : > { %4129 = vmatpush2.bf16.msra.mxu1 %v5719_v54  ;;  %4087 = vmatprep.subr.bf16.mxu0 %v5724_v58  ;;  %v5803_v54 = vld [vmem:[%s7629_s1 + $0xfb0] ss:$8 sps:$4 sm:$0xff]   ;;  %v5808_v58 = vld [vmem:[%s7629_s1 + $0xea4] ss:$8 sps:$4 sm:$0xff]  }
 0x1c8   : > { %4130 = vmatprep.subr.bf16.mxu1 %v5727_v59  ;;  %v5811_v59 = vld [vmem:[%s7629_s1 + $0xfa4] ss:$8 sps:$4 sm:$0xff]  }
 0x1ca   : > { %4088 = vmatpush2.bf16.msra.mxu0 %v5722_v34  ;;  %v5806_v34 = vld [vmem:[%s7629_s1 + $0xea0] ss:$8 sps:$4 sm:$0xff]  }
 0x1cb   : > { %4131 = vmatpush2.bf16.msra.mxu1 %v5725_v48  ;;  %4143 = vmatprep.subr.bf16.mxu0 %v5730_v49  ;;  %v5809_v48 = vld [vmem:[%s7629_s1 + $0xfa0] ss:$8 sps:$4 sm:$0xff]   ;;  %v5814_v49 = vld [vmem:[%s7629_s1 + $0xe94] ss:$8 sps:$4 sm:$0xff]  }
 0x1cc   : > { %4186 = vmatprep.subr.bf16.mxu1 %v5733_v50  ;;  %v5817_v50 = vld [vmem:[%s7629_s1 + $0xf94] ss:$8 sps:$4 sm:$0xff]  }
 0x1cd   : > { %4090 = vmatmul.mubr.bf16.vlgmr.msra.gmra.mxu0 %v4500_v61  ;;  %v5812_v61 = vld [vmem:[%s7629_s1 + $0xe90] ss:$8 sps:$4 sm:$0xff]  }
 0x1ce   : > { %4133 = vmatmul.mubr.bf16.vlgmr.msra.gmra.mxu1 %v4502_v62  ;;  %4144 = vmatpush1.bf16.msra.mxu0 %v5728_v2  ;;  %v5815_v62 = vld [vmem:[%s7629_s1 + $0xf90] ss:$8 sps:$4 sm:$0xff]   ;;  %v5820_v2 = vld [vmem:[%s7629_s1 + $0xe84] ss:$8 sps:$4 sm:$0xff]  }
 0x1cf   : > { %4187 = vmatpush1.bf16.msra.mxu1 %v5731_v3  ;;  %4145 = vmatprep.subr.bf16.mxu0 %v5736_v52  ;;  %v5823_v3 = vld [vmem:[%s7629_s1 + $0xf84] ss:$8 sps:$4 sm:$0xff]   ;;  %v5818_v52 = vld [vmem:[%s7629_s1 + $0xe80] ss:$8 sps:$4 sm:$0xff]  }
 0x1d0   : > { %4188 = vmatprep.subr.bf16.mxu1 %v5739_v55  ;;  %4175 = vmatprep.mubr.bf16.mxu0 %v4505_v56  ;;  %v5821_v55 = vld [vmem:[%s7629_s1 + $0xf80] ss:$8 sps:$4 sm:$0xff]   ;;  %v4504_v56 = vcombine.low %v7378_v60, %v7385_v63  ;;  %v3575_v60 = vpop.f32.mrf.mxu0  ;;  %v3618_v63 = vpop.f32.mrf.mxu1 }
 0x1d1   : > { %4218 = vmatprep.mubr.bf16.mxu1 %v4507_v57  ;;  %v4506_v57 = vcombine.low %v7388_v0, %v7391_v1 }
 0x1d2   : > { %4146 = vmatpush1.bf16.msra.mxu0 %v5734_v4  ;;  %v259_v4 = vlaneseq  ;;  %v3620_v0 = vpop.f32.mrf.mxu1 }
 0x1d3   : > { %4189 = vmatpush1.bf16.msra.mxu1 %v5737_v5  ;;  %4147 = vmatprep.subr.bf16.mxu0 %v5742_v6  ;;  %v5850_v6 = vmov 0.0  }
 0x1d4   : > { %4190 = vmatprep.subr.bf16.mxu1 %v5745_v7  ;;  %vm7587_vm0 = vcmp.lt.s32.totalorder %v259_v4, 256  ;;  %v3577_v7 = vpop.f32.mrf.mxu0 }
 0x1d5   : > { %263 = vst.msk [vmem:[#allocation2] sm:$0x3] %vm7587_vm0, %v5850_v6  ;;  %264 = vst.msk [vmem:[#allocation3] sm:$0x3] %vm7587_vm0, %v5850_v6 }
 0x1d6   : > { %4148 = vmatpush1.bf16.msra.mxu0 %v5740_v8  ;;  %v3579_v1 = vpop.f32.mrf.mxu0  ;;  %v3622_v8 = vpop.f32.mrf.mxu1 }
 0x1d7   : > { %4191 = vmatpush1.bf16.msra.mxu1 %v5743_v9  ;;  %4149 = vmatprep.subr.bf16.mxu0 %v5748_v10 }
 0x1d8   : > { %4192 = vmatprep.subr.bf16.mxu1 %v5751_v11  ;;  %v3581_v9 = vpop.f32.mrf.mxu0  ;;  %v3624_v10 = vpop.f32.mrf.mxu1 }
 0x1da   : > { %4150 = vmatpush1.bf16.msra.mxu0 %v5746_v12  ;;  %v3661_v11 = vpop.f32.mrf.mxu0  ;;  %v3704_v12 = vpop.f32.mrf.mxu1 }
 0x1db   : > { %4193 = vmatpush1.bf16.msra.mxu1 %v5749_v13  ;;  %4151 = vmatprep.subr.bf16.mxu0 %v5754_v14 }
 0x1dc   : > { %4194 = vmatprep.subr.bf16.mxu1 %v5757_v15  ;;  %v3663_v13 = vpop.f32.mrf.mxu0  ;;  %v3706_v14 = vpop.f32.mrf.mxu1 }
 0x1de   : > { %4152 = vmatpush1.bf16.msra.mxu0 %v5752_v16  ;;  %v3665_v15 = vpop.f32.mrf.mxu0  ;;  %v3708_v16 = vpop.f32.mrf.mxu1 }
 0x1df   : > { %4195 = vmatpush1.bf16.msra.mxu1 %v5755_v17  ;;  %4153 = vmatprep.subr.bf16.mxu0 %v5760_v18 }
 0x1e0   : > { %4196 = vmatprep.subr.bf16.mxu1 %v5763_v19  ;;  %v3667_v17 = vpop.f32.mrf.mxu0  ;;  %v3710_v18 = vpop.f32.mrf.mxu1 }
 0x1e2   : > { %4154 = vmatpush1.bf16.msra.mxu0 %v5758_v20  ;;  %v3747_v19 = vpop.f32.mrf.mxu0  ;;  %v3790_v20 = vpop.f32.mrf.mxu1 }
 0x1e3   : > { %4197 = vmatpush1.bf16.msra.mxu1 %v5761_v21  ;;  %4155 = vmatprep.subr.bf16.mxu0 %v5766_v22 }
 0x1e4   : > { %4198 = vmatprep.subr.bf16.mxu1 %v5769_v23  ;;  %v3749_v21 = vpop.f32.mrf.mxu0  ;;  %v3792_v22 = vpop.f32.mrf.mxu1 }
 0x1e6   : > { %4156 = vmatpush1.bf16.msra.mxu0 %v5764_v29  ;;  %v3751_v23 = vpop.f32.mrf.mxu0  ;;  %v3794_v29 = vpop.f32.mrf.mxu1 }
 0x1e7   : > { %4199 = vmatpush1.bf16.msra.mxu1 %v5767_v32  ;;  %4157 = vmatprep.subr.bf16.mxu0 %v5772_v33 }
 0x1e8   : > { %4200 = vmatprep.subr.bf16.mxu1 %v5775_v35  ;;  %v3753_v32 = vpop.f32.mrf.mxu0  ;;  %v3796_v33 = vpop.f32.mrf.mxu1 }
 0x1ea   : > { %4158 = vmatpush1.bf16.msra.mxu0 %v5770_v36  ;;  %v3833_v35 = vpop.f32.mrf.mxu0  ;;  %v3876_v36 = vpop.f32.mrf.mxu1 }
 0x1eb   : > { %4201 = vmatpush1.bf16.msra.mxu1 %v5773_v24  ;;  %4159 = vmatprep.subr.bf16.mxu0 %v5778_v25  ;;  %v7595_v24 = vshrl.u32 %v259_v4, 7 }
 0x1ec   : > { %4202 = vmatprep.subr.bf16.mxu1 %v5781_v26  ;;  %v3835_v25 = vpop.f32.mrf.mxu0  ;;  %v3878_v26 = vpop.f32.mrf.mxu1 }
 0x1ee   : > { %4160 = vmatpush2.bf16.msra.mxu0 %v5776_v37  ;;  %v813_v37 = vsub.s32 0, %v7595_v24 }
 0x1ef   : > { %4203 = vmatpush2.bf16.msra.mxu1 %v5779_v40  ;;  %4161 = vmatprep.subr.bf16.mxu0 %v5784_v41  ;;  %v809_v40 = vld [vmem:[%s7630_s2] sm:$0x3]  ;;  %v3837_v41 = vpop.f32.mrf.mxu0 }
 0x1f0   : > { %4204 = vmatprep.subr.bf16.mxu1 %v5787_v43  ;;  %v3880_v43 = vpop.f32.mrf.mxu1 }
 0x1f2   : > { %4162 = vmatpush2.bf16.msra.mxu0 %v5782_v44  ;;  %v817_v44 = vsub.s32 1, %v7595_v24 }
 0x1f3   : > { %4205 = vmatpush2.bf16.msra.mxu1 %v5785_v28  ;;  %4163 = vmatprep.subr.bf16.mxu0 %v5790_v30  ;;  %v814_v28 = vrot.slane %v809_v40, %v813_v37  ;;  %v3839_v30 = vpop.f32.mrf.mxu0 }
 0x1f4   : > { %4206 = vmatprep.subr.bf16.mxu1 %v5793_v31  ;;  %v3882_v31 = vpop.f32.mrf.mxu1 }
 0x1f6   : > { %4164 = vmatpush2.bf16.msra.mxu0 %v5788_v45  ;;  %v818_v45 = vrot.slane %v809_v40, %v817_v44 }
 0x1f7   : > { %4207 = vmatpush2.bf16.msra.mxu1 %v5791_v46  ;;  %4165 = vmatprep.subr.bf16.mxu0 %v5796_v47 }
 0x1f8   : > { %4208 = vmatprep.subr.bf16.mxu1 %v5799_v51  ;;  %v3576_v51 = vadd.f32 %v3575_v60, %v814_v28 }
 0x1fa   : > { %4166 = vmatpush2.bf16.msra.mxu0 %v5794_v27  ;;  %v3578_v27 = vadd.f32 %v3577_v7, %v818_v45 }
 0x1fb   : > { %4209 = vmatpush2.bf16.msra.mxu1 %v5797_v38  ;;  %4167 = vmatprep.subr.bf16.mxu0 %v5802_v39 }
 0x1fc   : > { %4210 = vmatprep.subr.bf16.mxu1 %v5805_v42  ;;  %v3619_v42 = vadd.f32 %v3618_v63, %v3576_v51 }
 0x1fe   : > { %4168 = vmatpush2.bf16.msra.mxu0 %v5800_v53  ;;  %v3580_v53 = vadd.f32 %v3579_v1, %v814_v28 }
 0x1ff   : > { %4211 = vmatpush2.bf16.msra.mxu1 %v5803_v54  ;;  %4169 = vmatprep.subr.bf16.mxu0 %v5808_v58  ;;  %v3621_v54 = vadd.f32 %v3620_v0, %v3578_v27  ;;  %v3582_v58 = vadd.f32 %v3581_v9, %v818_v45 }
 0x200   : > { %4212 = vmatprep.subr.bf16.mxu1 %v5811_v59  ;;  %v3662_v59 = vadd.f32 %v3661_v11, %v3619_v42 }
 0x202   : > { %4170 = vmatpush2.bf16.msra.mxu0 %v5806_v34 }
 0x203   : > { %4213 = vmatpush2.bf16.msra.mxu1 %v5809_v48  ;;  %4171 = vmatprep.subr.bf16.mxu0 %v5814_v49  ;;  %v3623_v49 = vadd.f32 %v3622_v8, %v3580_v53 }
 0x204   : > { %4214 = vmatprep.subr.bf16.mxu1 %v5817_v50  ;;  %v3664_v50 = vadd.f32 %v3663_v13, %v3621_v54 }
 0x206   : > { %4172 = vmatpush2.bf16.msra.mxu0 %v5812_v61  ;;  %v3625_v61 = vadd.f32 %v3624_v10, %v3582_v58 }
 0x207   : > { %4215 = vmatpush2.bf16.msra.mxu1 %v5815_v62  ;;  %4173 = vmatprep.subr.bf16.mxu0 %v5820_v2  ;;  %v3705_v62 = vadd.f32 %v3704_v12, %v3662_v59  ;;  %v3666_v2 = vadd.f32 %v3665_v15, %v3623_v49 }
 0x208   : > { %4216 = vmatprep.subr.bf16.mxu1 %v5823_v3 }
 0x209   : > { %v3709_v60 = vadd.f32 %v3708_v16, %v3666_v2 }
 0x20a   : > { %4174 = vmatpush2.bf16.msra.mxu0 %v5818_v52 }
 0x20b   : > { %4217 = vmatpush2.bf16.msra.mxu1 %v5821_v55  ;;  %v3707_v55 = vadd.f32 %v3706_v14, %v3664_v50  ;;  %v3752_v1 = vadd.f32 %v3751_v23, %v3709_v60 }
 0x20d   : > { %4176 = vmatmul.mubr.bf16.vlgmr.msra.gmra.mxu0 %v4504_v56  ;;  %v3919_v46 = vpop.f32.mrf.mxu0  ;;  %v3668_v56 = vadd.f32 %v3667_v17, %v3625_v61  ;;  %v3750_v63 = vadd.f32 %v3749_v21, %v3707_v55  ;;  %v3795_v10 = vadd.f32 %v3794_v29, %v3752_v1 }
 0x20e   : > { %4219 = vmatmul.mubr.bf16.vlgmr.msra.gmra.mxu1 %v4506_v57  ;;  %v3962_v47 = vpop.f32.mrf.mxu1  ;;  %v3748_v57 = vadd.f32 %v3747_v19, %v3705_v62 }
 0x20f   : > { %v3921_v38 = vpop.f32.mrf.mxu0  ;;  %v3711_v7 = vadd.f32 %v3710_v18, %v3668_v56  ;;  %v3793_v37 = vadd.f32 %v3792_v22, %v3750_v63  ;;  %v3838_v17 = vadd.f32 %v3837_v41, %v3795_v10 }
 0x210   : > { %v3964_v39 = vpop.f32.mrf.mxu1  ;;  %v3791_v0 = vadd.f32 %v3790_v20, %v3748_v57 }
 0x211   : > { %v3923_v34 = vpop.f32.mrf.mxu0  ;;  %v3754_v8 = vadd.f32 %v3753_v32, %v3711_v7  ;;  %v3836_v12 = vadd.f32 %v3835_v25, %v3793_v37  ;;  %v3881_v18 = vadd.f32 %v3880_v43, %v3838_v17 }
 0x212   : > { %v3966_v48 = vpop.f32.mrf.mxu1  ;;  %v3834_v13 = vadd.f32 %v3833_v35, %v3791_v0 }
 0x213   : > { %v3925_v3 = vpop.f32.mrf.mxu0  ;;  %v3797_v44 = vadd.f32 %v3796_v33, %v3754_v8  ;;  %v3879_v19 = vadd.f32 %v3878_v26, %v3836_v12  ;;  %v3924_v32 = vadd.f32 %v3923_v34, %v3881_v18 }
 0x214   : > { %v3968_v52 = vpop.f32.mrf.mxu1  ;;  %v3877_v14 = vadd.f32 %v3876_v36, %v3834_v13 }
 0x215   : > { %v3840_v28 = vadd.f32 %v3839_v30, %v3797_v44  ;;  %v3922_v20 = vadd.f32 %v3921_v38, %v3879_v19  ;;  %v3967_v33 = vadd.f32 %v3966_v48, %v3924_v32 }
 0x216   : > { %v3920_v45 = vadd.f32 %v3919_v46, %v3877_v14 }
 0x217   : > { %v3883_v27 = vadd.f32 %v3882_v31, %v3840_v28  ;;  %v3965_v35 = vadd.f32 %v3964_v39, %v3922_v20  ;;  %v5851_v20 = vmov 1966171168  }
 0x218   : > { %v3963_v22 = vadd.f32 %v3962_v47, %v3920_v45 }
 0x219   : > { %v3926_v29 = vadd.f32 %v3925_v3, %v3883_v27 }
 0x21b   : > { %v3969_v41 = vadd.f32 %v3968_v52, %v3926_v29 }
 0x24d   : > { %v4005_v4 = vpop.f32.mrf.mxu0 }
 0x24e   : > { %v4048_v6 = vpop.f32.mrf.mxu1  ;;  %v4006_v25 = vadd.f32 %v4005_v4, %v3963_v22 }
 0x24f   : > { %v4007_v9 = vpop.f32.mrf.mxu0 }
 0x250   : > { %v4050_v11 = vpop.f32.mrf.mxu1  ;;  %v4008_v36 = vadd.f32 %v4007_v9, %v3965_v35  ;;  %v4049_v26 = vadd.f32 %v4048_v6, %v4006_v25 }
 0x251   : > { %v4009_v15 = vpop.f32.mrf.mxu0 }
 0x252   : > { %v4052_v40 = vpop.f32.mrf.mxu1  ;;  %v4010_v30 = vadd.f32 %v4009_v15, %v3967_v33  ;;  %v4051_v58 = vadd.f32 %v4050_v11, %v4008_v36 }
 0x253   : > { %v4011_v16 = vpop.f32.mrf.mxu0 }
 0x254   : > { %v4054_v21 = vpop.f32.mrf.mxu1  ;;  %v4012_v43 = vadd.f32 %v4011_v16, %v3969_v41  ;;  %v4053_v59 = vadd.f32 %v4052_v40, %v4010_v30 }
 0x256   : > { %v4055_v39 = vadd.f32 %v4054_v21, %v4012_v43 }
 0x28d   : > { %v4091_v23 = vpop.f32.mrf.mxu0 }
 0x28e   : > { %v4134_v51 = vpop.f32.mrf.mxu1  ;;  %v4092_v38 = vadd.f32 %v4091_v23, %v4049_v26  ;;  %v4248_v23 = vunpack.c.l.s4 %v5851_v20 }
 0x28f   : > { %v4093_v42 = vpop.f32.mrf.mxu0 }
 0x290   : > { %v4136_v53 = vpop.f32.mrf.mxu1  ;;  %v4094_v31 = vadd.f32 %v4093_v42, %v4051_v58  ;;  %v4135_v49 = vadd.f32 %v4134_v51, %v4092_v38 }
 0x291   : > { %v4095_v46 = vpop.f32.mrf.mxu0 }
 0x292   : > { %v4138_v54 = vpop.f32.mrf.mxu1  ;;  %v4096_v50 = vadd.f32 %v4095_v46, %v4053_v59  ;;  %v4137_v48 = vadd.f32 %v4136_v53, %v4094_v31  ;;  %v4249_v53 = vunpack.c.0.s8 %v4248_v23 }
 0x293   : > { %v4097_v47 = vpop.f32.mrf.mxu0 }
 0x294   : > { %v4140_v34 = vpop.f32.mrf.mxu1  ;;  %v4098_v2 = vadd.f32 %v4097_v47, %v4055_v39  ;;  %v4139_v56 = vadd.f32 %v4138_v54, %v4096_v50  ;;  %v4252_v38 = vsub.s32 %v4249_v53, %v7595_v24  ;;  %v4229_v50 = vld [vmem:[#allocation2] sm:$0x3] }
 0x296   : > { %v4141_v60 = vadd.f32 %v4140_v34, %v4098_v2 }
 0x2cd   : > { %v4177_v61 = vpop.f32.mrf.mxu0 }
 0x2ce   : > { %v4220_v62 = vpop.f32.mrf.mxu1  ;;  %v4178_v3 = vadd.f32 %v4177_v61, %v4135_v49 }
 0x2cf   : > { %v4179_v52 = vpop.f32.mrf.mxu0 }
 0x2d0   : > { %v4222_v55 = vpop.f32.mrf.mxu1  ;;  %v4180_v57 = vadd.f32 %v4179_v52, %v4137_v48  ;;  %v4221_v63 = vadd.f32 %v4220_v62, %v4178_v3  ;;  %v4268_v48 = vld [vmem:[#allocation3] sm:$0x3] }
 0x2d1   : > { %v4181_v4 = vpop.f32.mrf.mxu0 }
 0x2d2   : > { %v4224_v6 = vpop.f32.mrf.mxu1  ;;  %v4223_v7 = vadd.f32 %v4222_v55, %v4180_v57  ;;  %v4182_v0 = vadd.f32 %v4181_v4, %v4139_v56  ;;  %v4269_v13 = vmul.f32 %v4221_v63, %v4221_v63 }
 0x2d3   : > { %v4183_v1 = vpop.f32.mrf.mxu0 }
 0x2d4   : > { %v5028_v9 = vpack.c.bf16 %v4223_v7, %v4221_v63  ;;  %v4225_v11 = vadd.f32 %v4224_v6, %v4182_v0  ;;  %v4184_v37 = vadd.f32 %v4183_v1, %v4141_v60  ;;  %v4226_v8 = vpop.f32.mrf.mxu1  ;;  %v4270_v40 = vmul.f32 %v4223_v7, %v4223_v7 }
 0x2d6   : > { %4319 = vst [vmem:[%s248_s8] sm:$0xff] %v5028_v9  ;;  %v4230_v10 = vadd.f32 %v4225_v11, %v4221_v63  ;;  %v4271_v12 = vmul.f32 %v4225_v11, %v4225_v11  ;;  %v4227_v15 = vadd.f32 %v4226_v8, %v4184_v37 }
 0x2d8   : > { %v4231_v44 = vrot.slane %v4230_v10, 4  ;;  %v4273_v14 = vadd.f32 %v4271_v12, %v4269_v13  ;;  %v4237_v17 = vadd.f32 %v4227_v15, %v4223_v7  ;;  %v4272_v19 = vmul.f32 %v4227_v15, %v4227_v15 }
 0x2d9   : > { %v5029_v28 = vpack.c.bf16 %v4227_v15, %v4225_v11 }
 0x2da   : > { %v4232_v45 = vadd.f32 %v4231_v44, %v4230_v10  ;;  %v4274_v16 = vrot.slane %v4273_v14, 4  ;;  %v4238_v21 = vrot.slane %v4237_v17, 4  ;;  %v4280_v18 = vadd.f32 %v4272_v19, %v4270_v40 }
 0x2db   : > { %4320 = vst [vmem:[%s248_s8 + $0x8] sm:$0xff] %v5029_v28 }
 0x2dc   : > { %v4233_v51 = vrot.slane %v4232_v45, 2  ;;  %v4275_v27 = vadd.f32 %v4274_v16, %v4273_v14  ;;  %v4239_v22 = vadd.f32 %v4238_v21, %v4237_v17  ;;  %v4281_v32 = vrot.slane %v4280_v18, 4 }
 0x2de   : > { %v4234_v35 = vadd.f32 %v4233_v51, %v4232_v45  ;;  %v4276_v29 = vrot.slane %v4275_v27, 2  ;;  %v4240_v25 = vrot.slane %v4239_v22, 2  ;;  %v4282_v42 = vadd.f32 %v4281_v32, %v4280_v18 }
 0x2e0   : > { %v4235_v33 = vrot.slane %v4234_v35, 1  ;;  %v4277_v36 = vadd.f32 %v4276_v29, %v4275_v27  ;;  %v4241_v41 = vadd.f32 %v4240_v25, %v4239_v22  ;;  %v4283_v26 = vrot.slane %v4282_v42, 2 }
 0x2e2   : > { %v4278_v30 = vrot.slane %v4277_v36, 1  ;;  %v4242_v46 = vrot.slane %v4241_v41, 1  ;;  %v4284_v54 = vadd.f32 %v4283_v26, %v4282_v42  ;;  %v4236_v58 = vadd.f32 %v4235_v33, %v4234_v35 }
 0x2e4   : > { %v4243_v43 = vadd.f32 %v4242_v46, %v4241_v41  ;;  %v4285_v59 = vrot.slane %v4284_v54, 1  ;;  %v4279_v31 = vadd.f32 %v4278_v30, %v4277_v36 }
 0x2e6   : > { %v4246_v47 = vcombine.low %v4236_v58, %v4243_v43  ;;  %v4286_v34 = vadd.f32 %v4285_v59, %v4284_v54 }
 0x2e8   : > { %v4253_v39 = vrot.slane %v4246_v47, %v4252_v38  ;;  %v4289_v49 = vcombine.low %v4279_v31, %v4286_v34 }
 0x2ea   : > { %v4260_v61 = vrot.slane %v4253_v39, %v4252_v38  ;;  %v4296_v62 = vrot.slane %v4289_v49, %v4252_v38 }
 0x2ec   : > { %v4262_v2 = vadd.f32 %v4260_v61, %v4229_v50  ;;  %v4303_v3 = vrot.slane %v4296_v62, %v4252_v38 }
 0x2ee   : > { %4267 = vst.msk [vmem:[#allocation2] sm:$0x3] %vm7587_vm0, %v4262_v2  ;;  %v4305_v52 = vadd.f32 %v4303_v3, %v4268_v48 }
 0x2f0   : > { %4306 = vst.msk [vmem:[#allocation3] sm:$0x3] %vm7587_vm0, %v4305_v52 }
 0x2f5   : > { %v4324_v24 = vld [vmem:[#allocation2] sm:$0x3] }
 0x2f6   : > { %v4325_v55 = vmul.f32 0.0625, %v4324_v24 }
 0x2f7   : > { %v4326_v56 = vld [vmem:[#allocation3] sm:$0x3] }
 0x2f8   : > { %v4327_v57 = vmul.f32 0.0625, %v4326_v56  ;;  %v4328_v4 = vmul.f32 %v4325_v55, %v4325_v55  ;;  %4333 = vst.msk [vmem:[%s254_s12] ss:$2 sm:$0x3] %vm7587_vm0, %v4325_v55 }
 0x2fa   : > { %v4329_v6 = vsub.f32 %v4327_v57, %v4328_v4 }
 0x2fc   : > { %v4330_v60 = vmax.f32 %v4329_v6, 0.0 }
 0x2fe   : > { %v4331_v63 = vadd.f32 1e-05, %v4330_v60 }
 0x300   : > { %5824 = vrsqrt.f32 %v4331_v63 }
 0x30d   : > { %v5825_v7 = vpop.eup %5824 }
 0x30e   : > { %5022 = vst.msk [vmem:[%s254_s12 + $0x1] ss:$2 sm:$0x3] %vm7587_vm0, %v5825_v7 }
 0x30f PF: > { %s15_s17 = sadd.s32 1, %s5848_s17   ;;  %s7635_s15 = smov %s5844_s16 }
 0x310   : > { %p12_p5 = scmp.ge.s32.totalorder %s15_s17, 4   ;;  %s7636_s16 = smov %s7638_s18 }
 0x312   :  { %14 = sbr.rel (!%p12_p5) target bundleno = 2 (0x2), region = 83 }

// kernel: style_encoder_forward.7
= control target key start
LH: loop header
LB: loop body
LE: loop exit
PB: predicated region body
PF: predicated region fallthrough
CT: control target
= control target key end

     0   :  { %10 = vsyncpa [#allocation6], 0  ;;  %s8079_s0 = inlined_call_operand.vmem [shape: bf16[2,16,4096], index: 0, kind: input, shape index: {}]   ;;  %s8080_s1 = inlined_call_operand.vmem [shape: bf16[4096,256], index: 1, kind: input, shape index: {}]   ;;  %s8081_s2 = inlined_call_operand.vmem [shape: f32[1,256], index: 2, kind: input, shape index: {}]   ;;  %s8082_s3 = inlined_call_operand.vmem [shape: f32[256,8], index: 3, kind: input, shape index: {}]   ;;  %s8083_s4 = inlined_call_operand.vmem [shape: f32[1,8], index: 4, kind: input, shape index: {}]   ;;  %s8084_s5 = inlined_call_operand.hbm [shape: f32[2,1,8], index: 5, kind: output, shape index: {}]  }
   0x1   :  { %12 = vsyncpa [#allocation6 + $0x1], 0  ;;  %s6127_s18 = smov 0   ;;  %s6129_s19 = smov 0  }
   0x2   :  { %s6131_s20 = smov 0   ;;  %s6133_s21 = smov 0  }
   0x3   :  { %s6135_s22 = smov 0   ;;  %s6137_s23 = smov 0  }
   0x4 LB: > { %s4599_s24 = sadd.s32 4294967295, %s6092_s23   ;;  %s4600_s25 = sadd.s32 4294967294, %s6092_s23   ;;  %s6092_s23 = sphi %s6137_s23, %s18_s23   ;;  %s6088_s22 = sphi %s6135_s22, %s8093_s22   ;;  %s6084_s21 = sphi %s6133_s21, %s8092_s21   ;;  %s6080_s20 = sphi %s6131_s20, %s8091_s20   ;;  %s6076_s19 = sphi %s6129_s19, %s8090_s19   ;;  %s6072_s18 = sphi %s6127_s18, %s8089_s18  }
   0x5   : > { %s30_s26 = sadd.s32 1, %s6088_s22  ;;  %s149_s27 = sadd.s32 1, %s6080_s20 }
   0x6   : > { %p32_p0 = scmp.ge.s32.totalorder %s30_s26, 2  ;;  %p159_p1 = scmp.ne.s32.totalorder %s6080_s20, %s6076_s19 }
   0x7   : > { %p160_p2 = scmp.eq.s32.totalorder %s4599_s24, 1  ;;  %p165_p3 = scmp.ne.s32.totalorder %s6076_s19, %s6072_s18 }
   0x8   : > { %s8095_s26 = smov (%p32_p0, %s30_s26), 0  ;;  %p166_p5 = scmp.eq.s32.totalorder %s4600_s25, 1 }
   0x9   : > { %p6167_p4 = por %p160_p2, %p159_p1  ;;  %s146_s29 = ssub.s32 %s6088_s22, %s8095_s26 }
   0xa   : > { %p4603_p6 = scmp.ge.s32.totalorder %s6092_s23, 1  ;;  %p147_p7 = scmp.eq.s32.totalorder %s146_s29, 0 }
   0xb   : > { %p6174_p8 = por %p166_p5, %p165_p3  ;;  %p210_p9 = scmp.lt.s32.totalorder %s6092_s23, 3 }
   0xc   : > { %s6180_s6 = scalar_select %p147_p7, %s6080_s20, %s149_s27  }
   0xd   : > { %p211_p10 = pnand %p4603_p6, %p210_p9 }
   0xe   : > { %p243_p11 = scmp.lt.s32.totalorder (!%p211_p10), %s6084_s21, 1  ;;  %s5150_s8 = sshll.u32 (!%p211_p10), %s6084_s21, 4 }
   0xf   : > { %214 = sbr.rel (%p211_p10) target bundleno = 1019 (0x3fb), region = 40  ;;  %s4523_s13 = scalar_lea.hbm (!%p211_p10), %s8084_s5, %s5150_s8 }
  0x14   : > { %v5246_v0 = vld [vmem:[%s8080_s1 + $0x74] ss:$8 sps:$4 sm:$0xff]   ;;  %v5250_v2 = vld [vmem:[%s8080_s1 + $0x70] ss:$8 sps:$4 sm:$0xff]   ;;  %v5252_v4 = vld [vmem:[%s8080_s1 + $0x64] ss:$8 sps:$4 sm:$0xff]  }
  0x15   : > { %v5248_v1 = vld [vmem:[%s8080_s1 + $0x174] ss:$8 sps:$4 sm:$0xff]   ;;  %3539 = vmatprep.subr.bf16.mxu0 %v5246_v0  ;;  %v5251_v3 = vld [vmem:[%s8080_s1 + $0x170] ss:$8 sps:$4 sm:$0xff]   ;;  %v5254_v5 = vld [vmem:[%s8080_s1 + $0x164] ss:$8 sps:$4 sm:$0xff]  }
  0x16   : > { %3582 = vmatprep.subr.bf16.mxu1 %v5248_v1  ;;  %3540 = vmatpush1.bf16.msra.mxu0 %v5250_v2  ;;  %v5256_v6 = vld [vmem:[%s8080_s1 + $0x60] ss:$8 sps:$4 sm:$0xff]   ;;  %v5258_v8 = vld [vmem:[%s8080_s1 + $0x54] ss:$8 sps:$4 sm:$0xff]   ;;  %v5262_v10 = vld [vmem:[%s8080_s1 + $0x50] ss:$8 sps:$4 sm:$0xff]  }
  0x17   : > { %3583 = vmatpush1.bf16.msra.mxu1 %v5251_v3  ;;  %3541 = vmatprep.subr.bf16.mxu0 %v5252_v4  ;;  %v5257_v7 = vld [vmem:[%s8080_s1 + $0x160] ss:$8 sps:$4 sm:$0xff]   ;;  %v5260_v9 = vld [vmem:[%s8080_s1 + $0x154] ss:$8 sps:$4 sm:$0xff]   ;;  %v5263_v11 = vld [vmem:[%s8080_s1 + $0x150] ss:$8 sps:$4 sm:$0xff]  }
  0x18   : > { %3584 = vmatprep.subr.bf16.mxu1 %v5254_v5  ;;  %v5264_v12 = vld [vmem:[%s8080_s1 + $0x44] ss:$8 sps:$4 sm:$0xff]   ;;  %v5268_v14 = vld [vmem:[%s8080_s1 + $0x40] ss:$8 sps:$4 sm:$0xff]   ;;  %v5270_v16 = vld [vmem:[%s8080_s1 + $0x34] ss:$8 sps:$4 sm:$0xff]  }
  0x19   : > { %v5266_v13 = vld [vmem:[%s8080_s1 + $0x144] ss:$8 sps:$4 sm:$0xff]   ;;  %v5269_v15 = vld [vmem:[%s8080_s1 + $0x140] ss:$8 sps:$4 sm:$0xff]   ;;  %v5272_v17 = vld [vmem:[%s8080_s1 + $0x134] ss:$8 sps:$4 sm:$0xff]  }
  0x1a   : > { %3542 = vmatpush1.bf16.msra.mxu0 %v5256_v6  ;;  %v5274_v18 = vld [vmem:[%s8080_s1 + $0x30] ss:$8 sps:$4 sm:$0xff]   ;;  %v5276_v20 = vld [vmem:[%s8080_s1 + $0x24] ss:$8 sps:$4 sm:$0xff]   ;;  %v5280_v22 = vld [vmem:[%s8080_s1 + $0x20] ss:$8 sps:$4 sm:$0xff]  }
  0x1b   : > { %3585 = vmatpush1.bf16.msra.mxu1 %v5257_v7  ;;  %3543 = vmatprep.subr.bf16.mxu0 %v5258_v8  ;;  %v5275_v19 = vld [vmem:[%s8080_s1 + $0x130] ss:$8 sps:$4 sm:$0xff]   ;;  %v5278_v21 = vld [vmem:[%s8080_s1 + $0x124] ss:$8 sps:$4 sm:$0xff]   ;;  %v5281_v23 = vld [vmem:[%s8080_s1 + $0x120] ss:$8 sps:$4 sm:$0xff]  }
  0x1c   : > { %3586 = vmatprep.subr.bf16.mxu1 %v5260_v9  ;;  %v5282_v24 = vld [vmem:[%s8080_s1 + $0x14] ss:$8 sps:$4 sm:$0xff]   ;;  %v5286_v26 = vld [vmem:[%s8080_s1 + $0x10] ss:$8 sps:$4 sm:$0xff]   ;;  %v5288_v28 = vld [vmem:[%s8080_s1 + $0x4] ss:$8 sps:$4 sm:$0xff]  }
  0x1d   : > { %v5284_v25 = vld [vmem:[%s8080_s1 + $0x114] ss:$8 sps:$4 sm:$0xff]   ;;  %v5287_v27 = vld [vmem:[%s8080_s1 + $0x110] ss:$8 sps:$4 sm:$0xff]   ;;  %v5290_v29 = vld [vmem:[%s8080_s1 + $0x104] ss:$8 sps:$4 sm:$0xff]  }
  0x1e   : > { %3544 = vmatpush1.bf16.msra.mxu0 %v5262_v10  ;;  %v5292_v30 = vld [vmem:[%s8080_s1] ss:$8 sps:$4 sm:$0xff]   ;;  %v5294_v32 = vld [vmem:[%s8080_s1 + $0xf4] ss:$8 sps:$4 sm:$0xff]   ;;  %v5298_v34 = vld [vmem:[%s8080_s1 + $0xf0] ss:$8 sps:$4 sm:$0xff]  }
  0x1f   : > { %3587 = vmatpush1.bf16.msra.mxu1 %v5263_v11  ;;  %3545 = vmatprep.subr.bf16.mxu0 %v5264_v12  ;;  %v5293_v31 = vld [vmem:[%s8080_s1 + $0x100] ss:$8 sps:$4 sm:$0xff]   ;;  %v5296_v33 = vld [vmem:[%s8080_s1 + $0x1f4] ss:$8 sps:$4 sm:$0xff]   ;;  %v5299_v35 = vld [vmem:[%s8080_s1 + $0x1f0] ss:$8 sps:$4 sm:$0xff]  }
  0x20   : > { %3588 = vmatprep.subr.bf16.mxu1 %v5266_v13  ;;  %v5300_v36 = vld [vmem:[%s8080_s1 + $0xe4] ss:$8 sps:$4 sm:$0xff]   ;;  %s244_s29 = scalar_select %p243_p11, %s6084_s21, 1  ;;  %v5304_v38 = vld [vmem:[%s8080_s1 + $0xe0] ss:$8 sps:$4 sm:$0xff]   ;;  %vm4510_vm2 = vcmask 57344  }
  0x21   : > { %v5302_v37 = vld [vmem:[%s8080_s1 + $0x1e4] ss:$8 sps:$4 sm:$0xff]   ;;  %v5305_v39 = vld [vmem:[%s8080_s1 + $0x1e0] ss:$8 sps:$4 sm:$0xff]   ;;  %v5306_v40 = vld [vmem:[%s8080_s1 + $0xd4] ss:$8 sps:$4 sm:$0xff]  }
  0x22   : > { %3546 = vmatpush1.bf16.msra.mxu0 %v5268_v14  ;;  %s5153_s15 = sshll.u32 %s244_s29, 8  ;;  %v5308_v41 = vld [vmem:[%s8080_s1 + $0x1d4] ss:$8 sps:$4 sm:$0xff]   ;;  %v5310_v42 = vld [vmem:[%s8080_s1 + $0xd0] ss:$8 sps:$4 sm:$0xff]  }
  0x23   : > { %3589 = vmatpush1.bf16.msra.mxu1 %v5269_v15  ;;  %3547 = vmatprep.subr.bf16.mxu0 %v5270_v16  ;;  %v5311_v43 = vld [vmem:[%s8080_s1 + $0x1d0] ss:$8 sps:$4 sm:$0xff]   ;;  %s6319_s10 = scalar_lea.vmem %s8079_s0, %s5153_s15  ;;  %v5312_v44 = vld [vmem:[%s8080_s1 + $0xc4] ss:$8 sps:$4 sm:$0xff]   ;;  %v5316_v46 = vld [vmem:[%s8080_s1 + $0xc0] ss:$8 sps:$4 sm:$0xff]  }
  0x24   : > { %3590 = vmatprep.subr.bf16.mxu1 %v5272_v17  ;;  %v5314_v45 = vld [vmem:[%s8080_s1 + $0x1c4] ss:$8 sps:$4 sm:$0xff]   ;;  %v5317_v47 = vld [vmem:[%s8080_s1 + $0x1c0] ss:$8 sps:$4 sm:$0xff]   ;;  %v5318_v52 = vld [vmem:[%s8080_s1 + $0xb4] ss:$8 sps:$4 sm:$0xff]  }
  0x25   : > { %v263_v48 = vld [vmem:[%s6319_s10] sm:$0xff]  ;;  %v264_v50 = vld [vmem:[%s6319_s10 + $0x8] sm:$0xff]  ;;  %v5320_v54 = vld [vmem:[%s8080_s1 + $0x1b4] ss:$8 sps:$4 sm:$0xff]   ;;  %s6096_s15 = smov [#allocation5]  }
  0x26   : > { %3548 = vmatpush1.bf16.msra.mxu0 %v5274_v18  ;;  %v279_v49 = vld [vmem:[%s6319_s10 + $0x80] sm:$0xff]  ;;  %v280_v51 = vld [vmem:[%s6319_s10 + $0x88] sm:$0xff]  ;;  %v5322_v56 = vld [vmem:[%s8080_s1 + $0xb0] ss:$8 sps:$4 sm:$0xff]   ;;  %s6020_s17 = sshll.u32 %s6096_s15, 4  ;;  %s6021_s17 = int_to_ptr.vmem [resolvable:$false] %s6020_s17 }
  0x27   : > { %3591 = vmatpush1.bf16.msra.mxu1 %v5275_v19  ;;  %3549 = vmatprep.subr.bf16.mxu0 %v5276_v20  ;;  %v4607_v53 = vcombine.high %v263_v48, %v279_v49  ;;  %v4609_v55 = vcombine.high %v264_v50, %v280_v51  ;;  %v5323_v57 = vld [vmem:[%s8080_s1 + $0x1b0] ss:$8 sps:$4 sm:$0xff]   ;;  %v5324_v58 = vld [vmem:[%s8080_s1 + $0xa4] ss:$8 sps:$4 sm:$0xff]   ;;  %v5328_v60 = vld [vmem:[%s8080_s1 + $0xa0] ss:$8 sps:$4 sm:$0xff]   ;;  %v4606_v8 = vcombine.low %v263_v48, %v279_v49 }
  0x28   : > { %3592 = vmatprep.subr.bf16.mxu1 %v5278_v21  ;;  %v5326_v59 = vld [vmem:[%s8080_s1 + $0x1a4] ss:$8 sps:$4 sm:$0xff]   ;;  %v5329_v61 = vld [vmem:[%s8080_s1 + $0x1a0] ss:$8 sps:$4 sm:$0xff]   ;;  %v5330_v62 = vld [vmem:[%s8080_s1 + $0x94] ss:$8 sps:$4 sm:$0xff]   ;;  %v4608_v9 = vcombine.low %v264_v50, %v280_v51 }
  0x29   : > { %3571 = vmatprep.mubr.bf16.mxu0 %v4607_v53  ;;  %3614 = vmatprep.mubr.bf16.mxu1 %v4609_v55  ;;  %v5332_v63 = vld [vmem:[%s8080_s1 + $0x194] ss:$8 sps:$4 sm:$0xff]   ;;  %v5334_v0 = vld [vmem:[%s8080_s1 + $0x90] ss:$8 sps:$4 sm:$0xff]   ;;  %v5336_v2 = vld [vmem:[%s8080_s1 + $0x84] ss:$8 sps:$4 sm:$0xff]  }
  0x2a   : > { %3550 = vmatpush1.bf16.msra.mxu0 %v5280_v22  ;;  %v5335_v1 = vld [vmem:[%s8080_s1 + $0x190] ss:$8 sps:$4 sm:$0xff]   ;;  %v5338_v3 = vld [vmem:[%s8080_s1 + $0x184] ss:$8 sps:$4 sm:$0xff]   ;;  %v5340_v4 = vld [vmem:[%s8080_s1 + $0x80] ss:$8 sps:$4 sm:$0xff]  }
  0x2b   : > { %3593 = vmatpush1.bf16.msra.mxu1 %v5281_v23  ;;  %3551 = vmatprep.subr.bf16.mxu0 %v5282_v24  ;;  %v5341_v5 = vld [vmem:[%s8080_s1 + $0x180] ss:$8 sps:$4 sm:$0xff]   ;;  %v5344_v6 = vld [vmem:[%s8080_s1 + $0x274] ss:$8 sps:$4 sm:$0xff]   ;;  %v5342_v10 = vld [vmem:[%s8080_s1 + $0x270] ss:$8 sps:$4 sm:$0xff]  }
  0x2c   : > { %3594 = vmatprep.subr.bf16.mxu1 %v5284_v25  ;;  %v5347_v7 = vld [vmem:[%s8080_s1 + $0x374] ss:$8 sps:$4 sm:$0xff]   ;;  %v5345_v11 = vld [vmem:[%s8080_s1 + $0x370] ss:$8 sps:$4 sm:$0xff]   ;;  %v5350_v12 = vld [vmem:[%s8080_s1 + $0x264] ss:$8 sps:$4 sm:$0xff]  }
  0x2d   : > { %v5353_v13 = vld [vmem:[%s8080_s1 + $0x364] ss:$8 sps:$4 sm:$0xff]   ;;  %v5348_v14 = vld [vmem:[%s8080_s1 + $0x260] ss:$8 sps:$4 sm:$0xff]   ;;  %v5356_v16 = vld [vmem:[%s8080_s1 + $0x254] ss:$8 sps:$4 sm:$0xff]  }
  0x2e   : > { %3552 = vmatpush1.bf16.msra.mxu0 %v5286_v26  ;;  %v5351_v15 = vld [vmem:[%s8080_s1 + $0x360] ss:$8 sps:$4 sm:$0xff]   ;;  %v5359_v17 = vld [vmem:[%s8080_s1 + $0x354] ss:$8 sps:$4 sm:$0xff]   ;;  %v5354_v18 = vld [vmem:[%s8080_s1 + $0x250] ss:$8 sps:$4 sm:$0xff]  }
  0x2f   : > { %3595 = vmatpush1.bf16.msra.mxu1 %v5287_v27  ;;  %3553 = vmatprep.subr.bf16.mxu0 %v5288_v28  ;;  %v5357_v19 = vld [vmem:[%s8080_s1 + $0x350] ss:$8 sps:$4 sm:$0xff]   ;;  %v5362_v20 = vld [vmem:[%s8080_s1 + $0x244] ss:$8 sps:$4 sm:$0xff]   ;;  %v5360_v22 = vld [vmem:[%s8080_s1 + $0x240] ss:$8 sps:$4 sm:$0xff]  }
  0x30   : > { %3596 = vmatprep.subr.bf16.mxu1 %v5290_v29  ;;  %v5365_v21 = vld [vmem:[%s8080_s1 + $0x344] ss:$8 sps:$4 sm:$0xff]   ;;  %v5363_v23 = vld [vmem:[%s8080_s1 + $0x340] ss:$8 sps:$4 sm:$0xff]   ;;  %v5368_v24 = vld [vmem:[%s8080_s1 + $0x234] ss:$8 sps:$4 sm:$0xff]  }
  0x31   : > { %v5371_v25 = vld [vmem:[%s8080_s1 + $0x334] ss:$8 sps:$4 sm:$0xff]   ;;  %v5366_v26 = vld [vmem:[%s8080_s1 + $0x230] ss:$8 sps:$4 sm:$0xff]   ;;  %v5374_v28 = vld [vmem:[%s8080_s1 + $0x224] ss:$8 sps:$4 sm:$0xff]  }
  0x32   : > { %3554 = vmatpush1.bf16.msra.mxu0 %v5292_v30  ;;  %v5369_v27 = vld [vmem:[%s8080_s1 + $0x330] ss:$8 sps:$4 sm:$0xff]   ;;  %v5377_v29 = vld [vmem:[%s8080_s1 + $0x324] ss:$8 sps:$4 sm:$0xff]   ;;  %v5372_v30 = vld [vmem:[%s8080_s1 + $0x220] ss:$8 sps:$4 sm:$0xff]  }
  0x33   : > { %3597 = vmatpush1.bf16.msra.mxu1 %v5293_v31  ;;  %3555 = vmatprep.subr.bf16.mxu0 %v5294_v32  ;;  %v5375_v31 = vld [vmem:[%s8080_s1 + $0x320] ss:$8 sps:$4 sm:$0xff]   ;;  %v5380_v32 = vld [vmem:[%s8080_s1 + $0x214] ss:$8 sps:$4 sm:$0xff]   ;;  %v5390_v48 = vld [vmem:[%s8080_s1 + $0x2f0] ss:$8 sps:$4 sm:$0xff]  }
  0x34   : > { %3598 = vmatprep.subr.bf16.mxu1 %v5296_v33  ;;  %v5383_v33 = vld [vmem:[%s8080_s1 + $0x314] ss:$8 sps:$4 sm:$0xff]   ;;  %v5393_v49 = vld [vmem:[%s8080_s1 + $0x3f0] ss:$8 sps:$4 sm:$0xff]   ;;  %v5398_v50 = vld [vmem:[%s8080_s1 + $0x2e4] ss:$8 sps:$4 sm:$0xff]  }
  0x35   : > { %v5401_v51 = vld [vmem:[%s8080_s1 + $0x3e4] ss:$8 sps:$4 sm:$0xff]   ;;  %v5399_v53 = vld [vmem:[%s8080_s1 + $0x3e0] ss:$8 sps:$4 sm:$0xff]   ;;  %v5407_v55 = vld [vmem:[%s8080_s1 + $0x3d4] ss:$8 sps:$4 sm:$0xff]  }
  0x36   : > { %3556 = vmatpush2.bf16.msra.mxu0 %v5298_v34  ;;  %v5378_v34 = vld [vmem:[%s8080_s1 + $0x210] ss:$8 sps:$4 sm:$0xff]   ;;  %s6022_s21 = scalar_lea.vmem %s6021_s17, 32 }
  0x37   : > { %3599 = vmatpush2.bf16.msra.mxu1 %v5299_v35  ;;  %3557 = vmatprep.subr.bf16.mxu0 %v5300_v36  ;;  %v5381_v35 = vld [vmem:[%s8080_s1 + $0x310] ss:$8 sps:$4 sm:$0xff]  }
  0x38   : > { %3600 = vmatprep.subr.bf16.mxu1 %v5302_v37  ;;  %v6470_v36 = vld [vmem:[%s6319_s10 + $0x10] sm:$0xff] }
  0x39   : > { %v6473_v37 = vld [vmem:[%s6319_s10 + $0x90] sm:$0xff] }
  0x3a   : > { %3558 = vmatpush2.bf16.msra.mxu0 %v5304_v38  ;;  %v6476_v38 = vld [vmem:[%s6319_s10 + $0x18] sm:$0xff] }
  0x3b   : > { %3601 = vmatpush2.bf16.msra.mxu1 %v5305_v39  ;;  %3559 = vmatprep.subr.bf16.mxu0 %v5306_v40  ;;  %v6479_v39 = vld [vmem:[%s6319_s10 + $0x98] sm:$0xff]  ;;  %v5386_v40 = vld [vmem:[%s8080_s1 + $0x204] ss:$8 sps:$4 sm:$0xff]  }
  0x3c   : > { %3602 = vmatprep.subr.bf16.mxu1 %v5308_v41  ;;  %v4611_v41 = vcombine.high %v6470_v36, %v6473_v37 }
  0x3e   : > { %3560 = vmatpush2.bf16.msra.mxu0 %v5310_v42  ;;  %v5389_v42 = vld [vmem:[%s8080_s1 + $0x304] ss:$8 sps:$4 sm:$0xff]  }
  0x3f   : > { %3603 = vmatpush2.bf16.msra.mxu1 %v5311_v43  ;;  %3561 = vmatprep.subr.bf16.mxu0 %v5312_v44  ;;  %v4613_v43 = vcombine.high %v6476_v38, %v6479_v39  ;;  %v5384_v44 = vld [vmem:[%s8080_s1 + $0x200] ss:$8 sps:$4 sm:$0xff]  }
  0x40   : > { %3604 = vmatprep.subr.bf16.mxu1 %v5314_v45  ;;  %v5387_v45 = vld [vmem:[%s8080_s1 + $0x300] ss:$8 sps:$4 sm:$0xff]  }
  0x42   : > { %3562 = vmatpush2.bf16.msra.mxu0 %v5316_v46  ;;  %v5392_v46 = vld [vmem:[%s8080_s1 + $0x2f4] ss:$8 sps:$4 sm:$0xff]  }
  0x43   : > { %3605 = vmatpush2.bf16.msra.mxu1 %v5317_v47  ;;  %3563 = vmatprep.subr.bf16.mxu0 %v5318_v52  ;;  %v5395_v47 = vld [vmem:[%s8080_s1 + $0x3f4] ss:$8 sps:$4 sm:$0xff]   ;;  %v5396_v52 = vld [vmem:[%s8080_s1 + $0x2e0] ss:$8 sps:$4 sm:$0xff]  }
  0x44   : > { %3606 = vmatprep.subr.bf16.mxu1 %v5320_v54  ;;  %v5404_v54 = vld [vmem:[%s8080_s1 + $0x2d4] ss:$8 sps:$4 sm:$0xff]  }
  0x46   : > { %3564 = vmatpush2.bf16.msra.mxu0 %v5322_v56  ;;  %v5402_v56 = vld [vmem:[%s8080_s1 + $0x2d0] ss:$8 sps:$4 sm:$0xff]  }
  0x47   : > { %3607 = vmatpush2.bf16.msra.mxu1 %v5323_v57  ;;  %3565 = vmatprep.subr.bf16.mxu0 %v5324_v58  ;;  %v5405_v57 = vld [vmem:[%s8080_s1 + $0x3d0] ss:$8 sps:$4 sm:$0xff]   ;;  %v5410_v58 = vld [vmem:[%s8080_s1 + $0x2c4] ss:$8 sps:$4 sm:$0xff]  }
  0x48   : > { %3608 = vmatprep.subr.bf16.mxu1 %v5326_v59  ;;  %v5413_v59 = vld [vmem:[%s8080_s1 + $0x3c4] ss:$8 sps:$4 sm:$0xff]  }
  0x4a   : > { %3566 = vmatpush2.bf16.msra.mxu0 %v5328_v60  ;;  %v5408_v60 = vld [vmem:[%s8080_s1 + $0x2c0] ss:$8 sps:$4 sm:$0xff]  }
  0x4b   : > { %3609 = vmatpush2.bf16.msra.mxu1 %v5329_v61  ;;  %3567 = vmatprep.subr.bf16.mxu0 %v5330_v62  ;;  %v5411_v61 = vld [vmem:[%s8080_s1 + $0x3c0] ss:$8 sps:$4 sm:$0xff]   ;;  %v5416_v62 = vld [vmem:[%s8080_s1 + $0x2b4] ss:$8 sps:$4 sm:$0xff]  }
  0x4c   : > { %3610 = vmatprep.subr.bf16.mxu1 %v5332_v63  ;;  %v5419_v63 = vld [vmem:[%s8080_s1 + $0x3b4] ss:$8 sps:$4 sm:$0xff]  }
  0x4e   : > { %3568 = vmatpush2.bf16.msra.mxu0 %v5334_v0  ;;  %v5414_v0 = vld [vmem:[%s8080_s1 + $0x2b0] ss:$8 sps:$4 sm:$0xff]  }
  0x4f   : > { %3611 = vmatpush2.bf16.msra.mxu1 %v5335_v1  ;;  %3569 = vmatprep.subr.bf16.mxu0 %v5336_v2  ;;  %v5417_v1 = vld [vmem:[%s8080_s1 + $0x3b0] ss:$8 sps:$4 sm:$0xff]   ;;  %v5422_v2 = vld [vmem:[%s8080_s1 + $0x2a4] ss:$8 sps:$4 sm:$0xff]  }
  0x50   : > { %3612 = vmatprep.subr.bf16.mxu1 %v5338_v3  ;;  %v5425_v3 = vld [vmem:[%s8080_s1 + $0x3a4] ss:$8 sps:$4 sm:$0xff]  }
  0x52   : > { %3570 = vmatpush2.bf16.msra.mxu0 %v5340_v4  ;;  %v5420_v4 = vld [vmem:[%s8080_s1 + $0x2a0] ss:$8 sps:$4 sm:$0xff]  }
  0x53   : > { %3613 = vmatpush2.bf16.msra.mxu1 %v5341_v5  ;;  %3625 = vmatprep.subr.bf16.mxu0 %v5344_v6  ;;  %v5423_v5 = vld [vmem:[%s8080_s1 + $0x3a0] ss:$8 sps:$4 sm:$0xff]   ;;  %v5428_v6 = vld [vmem:[%s8080_s1 + $0x294] ss:$8 sps:$4 sm:$0xff]  }
  0x54   : > { %3668 = vmatprep.subr.bf16.mxu1 %v5347_v7  ;;  %v5431_v7 = vld [vmem:[%s8080_s1 + $0x394] ss:$8 sps:$4 sm:$0xff]  }
  0x55   : > { %3572 = vmatmul.mubr.bf16.vlgmr.msra.gmra.mxu0 %v4606_v8  ;;  %v5426_v8 = vld [vmem:[%s8080_s1 + $0x290] ss:$8 sps:$4 sm:$0xff]  }
  0x56   : > { %3615 = vmatmul.mubr.bf16.vlgmr.msra.gmra.mxu1 %v4608_v9  ;;  %3626 = vmatpush1.bf16.msra.mxu0 %v5342_v10  ;;  %v5429_v9 = vld [vmem:[%s8080_s1 + $0x390] ss:$8 sps:$4 sm:$0xff]   ;;  %v5434_v10 = vld [vmem:[%s8080_s1 + $0x284] ss:$8 sps:$4 sm:$0xff]  }
  0x57   : > { %3669 = vmatpush1.bf16.msra.mxu1 %v5345_v11  ;;  %3627 = vmatprep.subr.bf16.mxu0 %v5350_v12  ;;  %v5437_v11 = vld [vmem:[%s8080_s1 + $0x384] ss:$8 sps:$4 sm:$0xff]   ;;  %v5432_v12 = vld [vmem:[%s8080_s1 + $0x280] ss:$8 sps:$4 sm:$0xff]  }
  0x58   : > { %3670 = vmatprep.subr.bf16.mxu1 %v5353_v13  ;;  %3657 = vmatprep.mubr.bf16.mxu0 %v4611_v41  ;;  %v5435_v13 = vld [vmem:[%s8080_s1 + $0x380] ss:$8 sps:$4 sm:$0xff]   ;;  %v5465_v41 = vld [vmem:[%s8080_s1 + $0x530] ss:$8 sps:$4 sm:$0xff]  }
  0x59   : > { %3700 = vmatprep.mubr.bf16.mxu1 %v4613_v43  ;;  %v5473_v43 = vld [vmem:[%s8080_s1 + $0x524] ss:$8 sps:$4 sm:$0xff]  }
  0x5a   : > { %3628 = vmatpush1.bf16.msra.mxu0 %v5348_v14  ;;  %v5440_v14 = vld [vmem:[%s8080_s1 + $0x474] ss:$8 sps:$4 sm:$0xff]  }
  0x5b   : > { %3671 = vmatpush1.bf16.msra.mxu1 %v5351_v15  ;;  %3629 = vmatprep.subr.bf16.mxu0 %v5356_v16  ;;  %v5443_v15 = vld [vmem:[%s8080_s1 + $0x574] ss:$8 sps:$4 sm:$0xff]   ;;  %v4610_v16 = vcombine.low %v6470_v36, %v6473_v37  ;;  %v5456_v36 = vld [vmem:[%s8080_s1 + $0x440] ss:$8 sps:$4 sm:$0xff]  }
  0x5c   : > { %3672 = vmatprep.subr.bf16.mxu1 %v5359_v17  ;;  %v4612_v17 = vcombine.low %v6476_v38, %v6479_v39  ;;  %v5459_v37 = vld [vmem:[%s8080_s1 + $0x540] ss:$8 sps:$4 sm:$0xff]   ;;  %v5464_v38 = vld [vmem:[%s8080_s1 + $0x434] ss:$8 sps:$4 sm:$0xff]  }
  0x5d   : > { %v5467_v39 = vld [vmem:[%s8080_s1 + $0x534] ss:$8 sps:$4 sm:$0xff]  }
  0x5e   : > { %3630 = vmatpush1.bf16.msra.mxu0 %v5354_v18  ;;  %v5438_v18 = vld [vmem:[%s8080_s1 + $0x470] ss:$8 sps:$4 sm:$0xff]  }
  0x5f   : > { %3673 = vmatpush1.bf16.msra.mxu1 %v5357_v19  ;;  %3631 = vmatprep.subr.bf16.mxu0 %v5362_v20  ;;  %v5441_v19 = vld [vmem:[%s8080_s1 + $0x570] ss:$8 sps:$4 sm:$0xff]   ;;  %v5446_v20 = vld [vmem:[%s8080_s1 + $0x464] ss:$8 sps:$4 sm:$0xff]  }
  0x60   : > { %3674 = vmatprep.subr.bf16.mxu1 %v5365_v21  ;;  %v5449_v21 = vld [vmem:[%s8080_s1 + $0x564] ss:$8 sps:$4 sm:$0xff]  }
  0x62   : > { %3632 = vmatpush1.bf16.msra.mxu0 %v5360_v22  ;;  %v5444_v22 = vld [vmem:[%s8080_s1 + $0x460] ss:$8 sps:$4 sm:$0xff]  }
  0x63   : > { %3675 = vmatpush1.bf16.msra.mxu1 %v5363_v23  ;;  %3633 = vmatprep.subr.bf16.mxu0 %v5368_v24  ;;  %v5447_v23 = vld [vmem:[%s8080_s1 + $0x560] ss:$8 sps:$4 sm:$0xff]  }
  0x64   : > { %3676 = vmatprep.subr.bf16.mxu1 %v5371_v25  ;;  %v6622_v24 = vld [vmem:[%s6319_s10 + $0x20] sm:$0xff] }
  0x65   : > { %v6625_v25 = vld [vmem:[%s6319_s10 + $0xa0] sm:$0xff] }
  0x66   : > { %3634 = vmatpush1.bf16.msra.mxu0 %v5366_v26  ;;  %v6628_v26 = vld [vmem:[%s6319_s10 + $0x28] sm:$0xff] }
  0x67   : > { %3677 = vmatpush1.bf16.msra.mxu1 %v5369_v27  ;;  %3635 = vmatprep.subr.bf16.mxu0 %v5374_v28  ;;  %v6631_v27 = vld [vmem:[%s6319_s10 + $0xa8] sm:$0xff]  ;;  %v5452_v28 = vld [vmem:[%s8080_s1 + $0x454] ss:$8 sps:$4 sm:$0xff]  }
  0x68   : > { %3678 = vmatprep.subr.bf16.mxu1 %v5377_v29  ;;  %v4615_v29 = vcombine.high %v6622_v24, %v6625_v25 }
  0x6a   : > { %3636 = vmatpush1.bf16.msra.mxu0 %v5372_v30  ;;  %v5455_v30 = vld [vmem:[%s8080_s1 + $0x554] ss:$8 sps:$4 sm:$0xff]  }
  0x6b   : > { %3679 = vmatpush1.bf16.msra.mxu1 %v5375_v31  ;;  %3637 = vmatprep.subr.bf16.mxu0 %v5380_v32  ;;  %v4617_v31 = vcombine.high %v6628_v26, %v6631_v27  ;;  %v5450_v32 = vld [vmem:[%s8080_s1 + $0x450] ss:$8 sps:$4 sm:$0xff]  }
  0x6c   : > { %3680 = vmatprep.subr.bf16.mxu1 %v5383_v33  ;;  %v5453_v33 = vld [vmem:[%s8080_s1 + $0x550] ss:$8 sps:$4 sm:$0xff]  }
  0x6e   : > { %3638 = vmatpush1.bf16.msra.mxu0 %v5378_v34  ;;  %v5458_v34 = vld [vmem:[%s8080_s1 + $0x444] ss:$8 sps:$4 sm:$0xff]  }
  0x6f   : > { %3681 = vmatpush1.bf16.msra.mxu1 %v5381_v35  ;;  %3639 = vmatprep.subr.bf16.mxu0 %v5386_v40  ;;  %v5461_v35 = vld [vmem:[%s8080_s1 + $0x544] ss:$8 sps:$4 sm:$0xff]   ;;  %v5462_v40 = vld [vmem:[%s8080_s1 + $0x430] ss:$8 sps:$4 sm:$0xff]  }
  0x70   : > { %3682 = vmatprep.subr.bf16.mxu1 %v5389_v42  ;;  %v5470_v42 = vld [vmem:[%s8080_s1 + $0x424] ss:$8 sps:$4 sm:$0xff]  }
  0x72   : > { %3640 = vmatpush1.bf16.msra.mxu0 %v5384_v44  ;;  %v5468_v44 = vld [vmem:[%s8080_s1 + $0x420] ss:$8 sps:$4 sm:$0xff]  }
  0x73   : > { %3683 = vmatpush1.bf16.msra.mxu1 %v5387_v45  ;;  %3641 = vmatprep.subr.bf16.mxu0 %v5392_v46  ;;  %v5471_v45 = vld [vmem:[%s8080_s1 + $0x520] ss:$8 sps:$4 sm:$0xff]   ;;  %v5476_v46 = vld [vmem:[%s8080_s1 + $0x414] ss:$8 sps:$4 sm:$0xff]  }
  0x74   : > { %3684 = vmatprep.subr.bf16.mxu1 %v5395_v47  ;;  %v5479_v47 = vld [vmem:[%s8080_s1 + $0x514] ss:$8 sps:$4 sm:$0xff]  }
  0x76   : > { %3642 = vmatpush2.bf16.msra.mxu0 %v5390_v48  ;;  %v5474_v48 = vld [vmem:[%s8080_s1 + $0x410] ss:$8 sps:$4 sm:$0xff]  }
  0x77   : > { %3685 = vmatpush2.bf16.msra.mxu1 %v5393_v49  ;;  %3643 = vmatprep.subr.bf16.mxu0 %v5398_v50  ;;  %v5477_v49 = vld [vmem:[%s8080_s1 + $0x510] ss:$8 sps:$4 sm:$0xff]   ;;  %v5482_v50 = vld [vmem:[%s8080_s1 + $0x404] ss:$8 sps:$4 sm:$0xff]  }
  0x78   : > { %3686 = vmatprep.subr.bf16.mxu1 %v5401_v51  ;;  %v5485_v51 = vld [vmem:[%s8080_s1 + $0x504] ss:$8 sps:$4 sm:$0xff]  }
  0x7a   : > { %3644 = vmatpush2.bf16.msra.mxu0 %v5396_v52  ;;  %v5480_v52 = vld [vmem:[%s8080_s1 + $0x400] ss:$8 sps:$4 sm:$0xff]  }
  0x7b   : > { %3687 = vmatpush2.bf16.msra.mxu1 %v5399_v53  ;;  %3645 = vmatprep.subr.bf16.mxu0 %v5404_v54  ;;  %v5483_v53 = vld [vmem:[%s8080_s1 + $0x500] ss:$8 sps:$4 sm:$0xff]   ;;  %v5488_v54 = vld [vmem:[%s8080_s1 + $0x4f4] ss:$8 sps:$4 sm:$0xff]  }
  0x7c   : > { %3688 = vmatprep.subr.bf16.mxu1 %v5407_v55  ;;  %v5491_v55 = vld [vmem:[%s8080_s1 + $0x5f4] ss:$8 sps:$4 sm:$0xff]  }
  0x7e   : > { %3646 = vmatpush2.bf16.msra.mxu0 %v5402_v56  ;;  %v5486_v56 = vld [vmem:[%s8080_s1 + $0x4f0] ss:$8 sps:$4 sm:$0xff]  }
  0x7f   : > { %3689 = vmatpush2.bf16.msra.mxu1 %v5405_v57  ;;  %3647 = vmatprep.subr.bf16.mxu0 %v5410_v58  ;;  %v5489_v57 = vld [vmem:[%s8080_s1 + $0x5f0] ss:$8 sps:$4 sm:$0xff]   ;;  %v5494_v58 = vld [vmem:[%s8080_s1 + $0x4e4] ss:$8 sps:$4 sm:$0xff]  }
  0x80   : > { %3690 = vmatprep.subr.bf16.mxu1 %v5413_v59  ;;  %v5497_v59 = vld [vmem:[%s8080_s1 + $0x5e4] ss:$8 sps:$4 sm:$0xff]  }
  0x82   : > { %3648 = vmatpush2.bf16.msra.mxu0 %v5408_v60  ;;  %v5492_v60 = vld [vmem:[%s8080_s1 + $0x4e0] ss:$8 sps:$4 sm:$0xff]  }
  0x83   : > { %3691 = vmatpush2.bf16.msra.mxu1 %v5411_v61  ;;  %3649 = vmatprep.subr.bf16.mxu0 %v5416_v62  ;;  %v5495_v61 = vld [vmem:[%s8080_s1 + $0x5e0] ss:$8 sps:$4 sm:$0xff]   ;;  %v5500_v62 = vld [vmem:[%s8080_s1 + $0x4d4] ss:$8 sps:$4 sm:$0xff]  }
  0x84   : > { %3692 = vmatprep.subr.bf16.mxu1 %v5419_v63  ;;  %v5503_v63 = vld [vmem:[%s8080_s1 + $0x5d4] ss:$8 sps:$4 sm:$0xff]  }
  0x86   : > { %3650 = vmatpush2.bf16.msra.mxu0 %v5414_v0  ;;  %v5498_v0 = vld [vmem:[%s8080_s1 + $0x4d0] ss:$8 sps:$4 sm:$0xff]  }
  0x87   : > { %3693 = vmatpush2.bf16.msra.mxu1 %v5417_v1  ;;  %3651 = vmatprep.subr.bf16.mxu0 %v5422_v2  ;;  %v5501_v1 = vld [vmem:[%s8080_s1 + $0x5d0] ss:$8 sps:$4 sm:$0xff]   ;;  %v5506_v2 = vld [vmem:[%s8080_s1 + $0x4c4] ss:$8 sps:$4 sm:$0xff]  }
  0x88   : > { %3694 = vmatprep.subr.bf16.mxu1 %v5425_v3  ;;  %v5509_v3 = vld [vmem:[%s8080_s1 + $0x5c4] ss:$8 sps:$4 sm:$0xff]  }
  0x8a   : > { %3652 = vmatpush2.bf16.msra.mxu0 %v5420_v4  ;;  %v5504_v4 = vld [vmem:[%s8080_s1 + $0x4c0] ss:$8 sps:$4 sm:$0xff]  }
  0x8b   : > { %3695 = vmatpush2.bf16.msra.mxu1 %v5423_v5  ;;  %3653 = vmatprep.subr.bf16.mxu0 %v5428_v6  ;;  %v5507_v5 = vld [vmem:[%s8080_s1 + $0x5c0] ss:$8 sps:$4 sm:$0xff]   ;;  %v5512_v6 = vld [vmem:[%s8080_s1 + $0x4b4] ss:$8 sps:$4 sm:$0xff]  }
  0x8c   : > { %3696 = vmatprep.subr.bf16.mxu1 %v5431_v7  ;;  %v5515_v7 = vld [vmem:[%s8080_s1 + $0x5b4] ss:$8 sps:$4 sm:$0xff]  }
  0x8e   : > { %3654 = vmatpush2.bf16.msra.mxu0 %v5426_v8  ;;  %v5510_v8 = vld [vmem:[%s8080_s1 + $0x4b0] ss:$8 sps:$4 sm:$0xff]  }
  0x8f   : > { %3697 = vmatpush2.bf16.msra.mxu1 %v5429_v9  ;;  %3655 = vmatprep.subr.bf16.mxu0 %v5434_v10  ;;  %v5513_v9 = vld [vmem:[%s8080_s1 + $0x5b0] ss:$8 sps:$4 sm:$0xff]   ;;  %v5518_v10 = vld [vmem:[%s8080_s1 + $0x4a4] ss:$8 sps:$4 sm:$0xff]  }
  0x90   : > { %3698 = vmatprep.subr.bf16.mxu1 %v5437_v11  ;;  %v5521_v11 = vld [vmem:[%s8080_s1 + $0x5a4] ss:$8 sps:$4 sm:$0xff]  }
  0x92   : > { %3656 = vmatpush2.bf16.msra.mxu0 %v5432_v12  ;;  %v5516_v12 = vld [vmem:[%s8080_s1 + $0x4a0] ss:$8 sps:$4 sm:$0xff]  }
  0x93   : > { %3699 = vmatpush2.bf16.msra.mxu1 %v5435_v13  ;;  %3711 = vmatprep.subr.bf16.mxu0 %v5440_v14  ;;  %v5519_v13 = vld [vmem:[%s8080_s1 + $0x5a0] ss:$8 sps:$4 sm:$0xff]   ;;  %v5524_v14 = vld [vmem:[%s8080_s1 + $0x494] ss:$8 sps:$4 sm:$0xff]  }
  0x94   : > { %3754 = vmatprep.subr.bf16.mxu1 %v5443_v15  ;;  %v5527_v15 = vld [vmem:[%s8080_s1 + $0x594] ss:$8 sps:$4 sm:$0xff]  }
  0x95   : > { %3658 = vmatmul.mubr.bf16.vlgmr.msra.gmra.mxu0 %v4610_v16  ;;  %v5522_v16 = vld [vmem:[%s8080_s1 + $0x490] ss:$8 sps:$4 sm:$0xff]  }
  0x96   : > { %3701 = vmatmul.mubr.bf16.vlgmr.msra.gmra.mxu1 %v4612_v17  ;;  %3712 = vmatpush1.bf16.msra.mxu0 %v5438_v18  ;;  %v5525_v17 = vld [vmem:[%s8080_s1 + $0x590] ss:$8 sps:$4 sm:$0xff]   ;;  %v5530_v18 = vld [vmem:[%s8080_s1 + $0x484] ss:$8 sps:$4 sm:$0xff]  }
  0x97   : > { %3755 = vmatpush1.bf16.msra.mxu1 %v5441_v19  ;;  %3713 = vmatprep.subr.bf16.mxu0 %v5446_v20  ;;  %v5533_v19 = vld [vmem:[%s8080_s1 + $0x584] ss:$8 sps:$4 sm:$0xff]   ;;  %v5528_v20 = vld [vmem:[%s8080_s1 + $0x480] ss:$8 sps:$4 sm:$0xff]  }
  0x98   : > { %3756 = vmatprep.subr.bf16.mxu1 %v5449_v21  ;;  %3743 = vmatprep.mubr.bf16.mxu0 %v4615_v29  ;;  %v5531_v21 = vld [vmem:[%s8080_s1 + $0x580] ss:$8 sps:$4 sm:$0xff]   ;;  %v5534_v29 = vld [vmem:[%s8080_s1 + $0x670] ss:$8 sps:$4 sm:$0xff]  }
  0x99   : > { %3786 = vmatprep.mubr.bf16.mxu1 %v4617_v31  ;;  %v6821_v31 = vld [vmem:[%s6319_s10 + $0x38] sm:$0xff] }
  0x9a   : > { %3714 = vmatpush1.bf16.msra.mxu0 %v5444_v22  ;;  %v5536_v22 = vld [vmem:[%s8080_s1 + $0x674] ss:$8 sps:$4 sm:$0xff]  }
  0x9b   : > { %3757 = vmatpush1.bf16.msra.mxu1 %v5447_v23  ;;  %3715 = vmatprep.subr.bf16.mxu0 %v5452_v28  ;;  %v5539_v23 = vld [vmem:[%s8080_s1 + $0x774] ss:$8 sps:$4 sm:$0xff]  }
  0x9c   : > { %3758 = vmatprep.subr.bf16.mxu1 %v5455_v30  ;;  %v6812_v28 = vld [vmem:[%s6319_s10 + $0x30] sm:$0xff] }
  0x9d   : > { %v6818_v30 = vld [vmem:[%s6319_s10 + $0xb0] sm:$0xff] }
  0x9e   : > { %3716 = vmatpush1.bf16.msra.mxu0 %v5450_v32  ;;  %v4614_v32 = vcombine.low %v6622_v24, %v6625_v25  ;;  %v5545_v24 = vld [vmem:[%s8080_s1 + $0x764] ss:$8 sps:$4 sm:$0xff]   ;;  %v4619_v25 = vcombine.high %v6812_v28, %v6818_v30 }
  0x9f   : > { %3759 = vmatpush1.bf16.msra.mxu1 %v5453_v33  ;;  %3717 = vmatprep.subr.bf16.mxu0 %v5458_v34  ;;  %v4616_v33 = vcombine.low %v6628_v26, %v6631_v27  ;;  %v6828_v34 = vld [vmem:[%s6319_s10 + $0xb8] sm:$0xff]  ;;  %v5540_v27 = vld [vmem:[%s8080_s1 + $0x660] ss:$8 sps:$4 sm:$0xff]  }
  0xa0   : > { %3760 = vmatprep.subr.bf16.mxu1 %v5461_v35  ;;  %v5537_v35 = vld [vmem:[%s8080_s1 + $0x770] ss:$8 sps:$4 sm:$0xff]   ;;  %v4621_v26 = vcombine.high %v6821_v31, %v6828_v34 }
  0xa2   : > { %3718 = vmatpush1.bf16.msra.mxu0 %v5456_v36  ;;  %v5542_v36 = vld [vmem:[%s8080_s1 + $0x664] ss:$8 sps:$4 sm:$0xff]  }
  0xa3   : > { %3761 = vmatpush1.bf16.msra.mxu1 %v5459_v37  ;;  %3719 = vmatprep.subr.bf16.mxu0 %v5464_v38  ;;  %v5543_v37 = vld [vmem:[%s8080_s1 + $0x760] ss:$8 sps:$4 sm:$0xff]   ;;  %v5548_v38 = vld [vmem:[%s8080_s1 + $0x654] ss:$8 sps:$4 sm:$0xff]  }
  0xa4   : > { %3762 = vmatprep.subr.bf16.mxu1 %v5467_v39  ;;  %v5551_v39 = vld [vmem:[%s8080_s1 + $0x754] ss:$8 sps:$4 sm:$0xff]  }
  0xa6   : > { %3720 = vmatpush1.bf16.msra.mxu0 %v5462_v40  ;;  %v5546_v40 = vld [vmem:[%s8080_s1 + $0x650] ss:$8 sps:$4 sm:$0xff]  }
  0xa7   : > { %3763 = vmatpush1.bf16.msra.mxu1 %v5465_v41  ;;  %3721 = vmatprep.subr.bf16.mxu0 %v5470_v42  ;;  %v5549_v41 = vld [vmem:[%s8080_s1 + $0x750] ss:$8 sps:$4 sm:$0xff]   ;;  %v5554_v42 = vld [vmem:[%s8080_s1 + $0x644] ss:$8 sps:$4 sm:$0xff]  }
  0xa8   : > { %3764 = vmatprep.subr.bf16.mxu1 %v5473_v43  ;;  %v5557_v43 = vld [vmem:[%s8080_s1 + $0x744] ss:$8 sps:$4 sm:$0xff]  }
  0xaa   : > { %3722 = vmatpush1.bf16.msra.mxu0 %v5468_v44  ;;  %v5552_v44 = vld [vmem:[%s8080_s1 + $0x640] ss:$8 sps:$4 sm:$0xff]  }
  0xab   : > { %3765 = vmatpush1.bf16.msra.mxu1 %v5471_v45  ;;  %3723 = vmatprep.subr.bf16.mxu0 %v5476_v46  ;;  %v5555_v45 = vld [vmem:[%s8080_s1 + $0x740] ss:$8 sps:$4 sm:$0xff]   ;;  %v5560_v46 = vld [vmem:[%s8080_s1 + $0x634] ss:$8 sps:$4 sm:$0xff]  }
  0xac   : > { %3766 = vmatprep.subr.bf16.mxu1 %v5479_v47  ;;  %v5563_v47 = vld [vmem:[%s8080_s1 + $0x734] ss:$8 sps:$4 sm:$0xff]  }
  0xae   : > { %3724 = vmatpush1.bf16.msra.mxu0 %v5474_v48  ;;  %v5558_v48 = vld [vmem:[%s8080_s1 + $0x630] ss:$8 sps:$4 sm:$0xff]  }
  0xaf   : > { %3767 = vmatpush1.bf16.msra.mxu1 %v5477_v49  ;;  %3725 = vmatprep.subr.bf16.mxu0 %v5482_v50  ;;  %v5561_v49 = vld [vmem:[%s8080_s1 + $0x730] ss:$8 sps:$4 sm:$0xff]   ;;  %v5566_v50 = vld [vmem:[%s8080_s1 + $0x624] ss:$8 sps:$4 sm:$0xff]  }
  0xb0   : > { %3768 = vmatprep.subr.bf16.mxu1 %v5485_v51  ;;  %v5569_v51 = vld [vmem:[%s8080_s1 + $0x724] ss:$8 sps:$4 sm:$0xff]  }
  0xb2   : > { %3726 = vmatpush1.bf16.msra.mxu0 %v5480_v52  ;;  %v5564_v52 = vld [vmem:[%s8080_s1 + $0x620] ss:$8 sps:$4 sm:$0xff]  }
  0xb3   : > { %3769 = vmatpush1.bf16.msra.mxu1 %v5483_v53  ;;  %3727 = vmatprep.subr.bf16.mxu0 %v5488_v54  ;;  %v5567_v53 = vld [vmem:[%s8080_s1 + $0x720] ss:$8 sps:$4 sm:$0xff]   ;;  %v5572_v54 = vld [vmem:[%s8080_s1 + $0x614] ss:$8 sps:$4 sm:$0xff]  }
  0xb4   : > { %3770 = vmatprep.subr.bf16.mxu1 %v5491_v55  ;;  %v5575_v55 = vld [vmem:[%s8080_s1 + $0x714] ss:$8 sps:$4 sm:$0xff]  }
  0xb6   : > { %3728 = vmatpush2.bf16.msra.mxu0 %v5486_v56  ;;  %v5570_v56 = vld [vmem:[%s8080_s1 + $0x610] ss:$8 sps:$4 sm:$0xff]  }
  0xb7   : > { %3771 = vmatpush2.bf16.msra.mxu1 %v5489_v57  ;;  %3729 = vmatprep.subr.bf16.mxu0 %v5494_v58  ;;  %v5573_v57 = vld [vmem:[%s8080_s1 + $0x710] ss:$8 sps:$4 sm:$0xff]   ;;  %v5578_v58 = vld [vmem:[%s8080_s1 + $0x604] ss:$8 sps:$4 sm:$0xff]  }
  0xb8   : > { %3772 = vmatprep.subr.bf16.mxu1 %v5497_v59  ;;  %v5581_v59 = vld [vmem:[%s8080_s1 + $0x704] ss:$8 sps:$4 sm:$0xff]  }
  0xba   : > { %3730 = vmatpush2.bf16.msra.mxu0 %v5492_v60  ;;  %v5576_v60 = vld [vmem:[%s8080_s1 + $0x600] ss:$8 sps:$4 sm:$0xff]  }
  0xbb   : > { %3773 = vmatpush2.bf16.msra.mxu1 %v5495_v61  ;;  %3731 = vmatprep.subr.bf16.mxu0 %v5500_v62  ;;  %v5579_v61 = vld [vmem:[%s8080_s1 + $0x700] ss:$8 sps:$4 sm:$0xff]   ;;  %v5584_v62 = vld [vmem:[%s8080_s1 + $0x6f4] ss:$8 sps:$4 sm:$0xff]  }
  0xbc   : > { %3774 = vmatprep.subr.bf16.mxu1 %v5503_v63  ;;  %v5587_v63 = vld [vmem:[%s8080_s1 + $0x7f4] ss:$8 sps:$4 sm:$0xff]  }
  0xbe   : > { %3732 = vmatpush2.bf16.msra.mxu0 %v5498_v0  ;;  %v5582_v0 = vld [vmem:[%s8080_s1 + $0x6f0] ss:$8 sps:$4 sm:$0xff]  }
  0xbf   : > { %3775 = vmatpush2.bf16.msra.mxu1 %v5501_v1  ;;  %3733 = vmatprep.subr.bf16.mxu0 %v5506_v2  ;;  %v5585_v1 = vld [vmem:[%s8080_s1 + $0x7f0] ss:$8 sps:$4 sm:$0xff]   ;;  %v5590_v2 = vld [vmem:[%s8080_s1 + $0x6e4] ss:$8 sps:$4 sm:$0xff]  }
  0xc0   : > { %3776 = vmatprep.subr.bf16.mxu1 %v5509_v3  ;;  %v5593_v3 = vld [vmem:[%s8080_s1 + $0x7e4] ss:$8 sps:$4 sm:$0xff]  }
  0xc2   : > { %3734 = vmatpush2.bf16.msra.mxu0 %v5504_v4  ;;  %v5588_v4 = vld [vmem:[%s8080_s1 + $0x6e0] ss:$8 sps:$4 sm:$0xff]  }
  0xc3   : > { %3777 = vmatpush2.bf16.msra.mxu1 %v5507_v5  ;;  %3735 = vmatprep.subr.bf16.mxu0 %v5512_v6  ;;  %v5591_v5 = vld [vmem:[%s8080_s1 + $0x7e0] ss:$8 sps:$4 sm:$0xff]   ;;  %v5596_v6 = vld [vmem:[%s8080_s1 + $0x6d4] ss:$8 sps:$4 sm:$0xff]  }
  0xc4   : > { %3778 = vmatprep.subr.bf16.mxu1 %v5515_v7  ;;  %v5599_v7 = vld [vmem:[%s8080_s1 + $0x7d4] ss:$8 sps:$4 sm:$0xff]  }
  0xc6   : > { %3736 = vmatpush2.bf16.msra.mxu0 %v5510_v8  ;;  %v5594_v8 = vld [vmem:[%s8080_s1 + $0x6d0] ss:$8 sps:$4 sm:$0xff]  }
  0xc7   : > { %3779 = vmatpush2.bf16.msra.mxu1 %v5513_v9  ;;  %3737 = vmatprep.subr.bf16.mxu0 %v5518_v10  ;;  %v5597_v9 = vld [vmem:[%s8080_s1 + $0x7d0] ss:$8 sps:$4 sm:$0xff]   ;;  %v5602_v10 = vld [vmem:[%s8080_s1 + $0x6c4] ss:$8 sps:$4 sm:$0xff]  }
  0xc8   : > { %3780 = vmatprep.subr.bf16.mxu1 %v5521_v11  ;;  %v5605_v11 = vld [vmem:[%s8080_s1 + $0x7c4] ss:$8 sps:$4 sm:$0xff]  }
  0xca   : > { %3738 = vmatpush2.bf16.msra.mxu0 %v5516_v12  ;;  %v5600_v12 = vld [vmem:[%s8080_s1 + $0x6c0] ss:$8 sps:$4 sm:$0xff]  }
  0xcb   : > { %3781 = vmatpush2.bf16.msra.mxu1 %v5519_v13  ;;  %3739 = vmatprep.subr.bf16.mxu0 %v5524_v14  ;;  %v5603_v13 = vld [vmem:[%s8080_s1 + $0x7c0] ss:$8 sps:$4 sm:$0xff]   ;;  %v5608_v14 = vld [vmem:[%s8080_s1 + $0x6b4] ss:$8 sps:$4 sm:$0xff]  }
  0xcc   : > { %3782 = vmatprep.subr.bf16.mxu1 %v5527_v15  ;;  %v5611_v15 = vld [vmem:[%s8080_s1 + $0x7b4] ss:$8 sps:$4 sm:$0xff]  }
  0xce   : > { %3740 = vmatpush2.bf16.msra.mxu0 %v5522_v16  ;;  %v5606_v16 = vld [vmem:[%s8080_s1 + $0x6b0] ss:$8 sps:$4 sm:$0xff]  }
  0xcf   : > { %3783 = vmatpush2.bf16.msra.mxu1 %v5525_v17  ;;  %3741 = vmatprep.subr.bf16.mxu0 %v5530_v18  ;;  %v5609_v17 = vld [vmem:[%s8080_s1 + $0x7b0] ss:$8 sps:$4 sm:$0xff]   ;;  %v5614_v18 = vld [vmem:[%s8080_s1 + $0x6a4] ss:$8 sps:$4 sm:$0xff]  }
  0xd0   : > { %3784 = vmatprep.subr.bf16.mxu1 %v5533_v19  ;;  %v5617_v19 = vld [vmem:[%s8080_s1 + $0x7a4] ss:$8 sps:$4 sm:$0xff]  }
  0xd2   : > { %3742 = vmatpush2.bf16.msra.mxu0 %v5528_v20  ;;  %v5612_v20 = vld [vmem:[%s8080_s1 + $0x6a0] ss:$8 sps:$4 sm:$0xff]  }
  0xd3   : > { %3785 = vmatpush2.bf16.msra.mxu1 %v5531_v21  ;;  %3797 = vmatprep.subr.bf16.mxu0 %v5536_v22  ;;  %v5615_v21 = vld [vmem:[%s8080_s1 + $0x7a0] ss:$8 sps:$4 sm:$0xff]   ;;  %v257_v22 = vlaneseq }
  0xd4   : > { %3840 = vmatprep.subr.bf16.mxu1 %v5539_v23  ;;  %v5620_v23 = vld [vmem:[%s8080_s1 + $0x694] ss:$8 sps:$4 sm:$0xff]  }
  0xd5   : > { %3744 = vmatmul.mubr.bf16.vlgmr.msra.gmra.mxu0 %v4614_v32  ;;  %v5618_v32 = vld [vmem:[%s8080_s1 + $0x690] ss:$8 sps:$4 sm:$0xff]   ;;  %vm7910_vm0 = vcmp.lt.s32.totalorder %v257_v22, 256 }
  0xd6   : > { %3787 = vmatmul.mubr.bf16.vlgmr.msra.gmra.mxu1 %v4616_v33  ;;  %3798 = vmatpush1.bf16.msra.mxu0 %v5534_v29  ;;  %v5623_v29 = vld [vmem:[%s8080_s1 + $0x794] ss:$8 sps:$4 sm:$0xff]   ;;  %v5621_v33 = vld [vmem:[%s8080_s1 + $0x790] ss:$8 sps:$4 sm:$0xff]  }
  0xd7   : > { %3841 = vmatpush1.bf16.msra.mxu1 %v5537_v35  ;;  %3799 = vmatprep.subr.bf16.mxu0 %v5542_v36  ;;  %v7006_v35 = vshrl.u32 %v257_v22, 7  ;;  %v5626_v36 = vld [vmem:[%s8080_s1 + $0x684] ss:$8 sps:$4 sm:$0xff]   ;;  %v4437_v22 = vld [vmem:[%s8082_s3 + $0xf0] sm:$0xff] }
  0xd8   : > { %3842 = vmatprep.subr.bf16.mxu1 %v5545_v24  ;;  %3829 = vmatprep.mubr.bf16.mxu0 %v4619_v25  ;;  %v5629_v24 = vld [vmem:[%s8080_s1 + $0x784] ss:$8 sps:$4 sm:$0xff]   ;;  %v5624_v25 = vld [vmem:[%s8080_s1 + $0x680] ss:$8 sps:$4 sm:$0xff]  }
  0xd9   : > { %3872 = vmatprep.mubr.bf16.mxu1 %v4621_v26  ;;  %v5627_v26 = vld [vmem:[%s8080_s1 + $0x780] ss:$8 sps:$4 sm:$0xff]   ;;  %vm4234_vm1 = vcmp.lt.s32.totalorder %v7006_v35, 4 }
  0xda   : > { %3800 = vmatpush1.bf16.msra.mxu0 %v5540_v27  ;;  %v807_v27 = vld [vmem:[%s8081_s2] sm:$0x3] }
  0xdb   : > { %3843 = vmatpush1.bf16.msra.mxu1 %v5543_v37  ;;  %3801 = vmatprep.subr.bf16.mxu0 %v5548_v38  ;;  %v7024_v37 = vsub.s32 0, %v7006_v35  ;;  %v5632_v38 = vld [vmem:[%s8080_s1 + $0x874] ss:$8 sps:$4 sm:$0xff]  }
  0xdc   : > { %3844 = vmatprep.subr.bf16.mxu1 %v5551_v39  ;;  %v5635_v39 = vld [vmem:[%s8080_s1 + $0x974] ss:$8 sps:$4 sm:$0xff]  }
  0xde   : > { %3802 = vmatpush1.bf16.msra.mxu0 %v5546_v40  ;;  %v7033_v40 = vld [vmem:[%s6319_s10 + $0x40] sm:$0xff] }
  0xdf   : > { %3845 = vmatpush1.bf16.msra.mxu1 %v5549_v41  ;;  %3803 = vmatprep.subr.bf16.mxu0 %v5554_v42  ;;  %v5630_v41 = vld [vmem:[%s8080_s1 + $0x870] ss:$8 sps:$4 sm:$0xff]   ;;  %v7039_v42 = vsub.s32 1, %v7006_v35 }
  0xe0   : > { %3846 = vmatprep.subr.bf16.mxu1 %v5557_v43  ;;  %v7042_v43 = vld [vmem:[%s6319_s10 + $0xc0] sm:$0xff] }
  0xe2   : > { %3804 = vmatpush1.bf16.msra.mxu0 %v5552_v44  ;;  %v7045_v44 = vld [vmem:[%s6319_s10 + $0x48] sm:$0xff] }
  0xe3   : > { %3847 = vmatpush1.bf16.msra.mxu1 %v5555_v45  ;;  %3805 = vmatprep.subr.bf16.mxu0 %v5560_v46  ;;  %v4618_v45 = vcombine.low %v6812_v28, %v6818_v30  ;;  %v4620_v46 = vcombine.low %v6821_v31, %v6828_v34  ;;  %v5641_v28 = vld [vmem:[%s8080_s1 + $0x964] ss:$8 sps:$4 sm:$0xff]   ;;  %v816_v30 = vrot.slane %v807_v27, %v7039_v42 }
  0xe4   : > { %3848 = vmatprep.subr.bf16.mxu1 %v5563_v47  ;;  %v7052_v47 = vld [vmem:[%s6319_s10 + $0xc8] sm:$0xff]  ;;  %v4623_v31 = vcombine.high %v7033_v40, %v7042_v43 }
  0xe5   : > { %v4625_v34 = vcombine.high %v7045_v44, %v7052_v47 }
  0xe6   : > { %3806 = vmatpush1.bf16.msra.mxu0 %v5558_v48  ;;  %v812_v48 = vrot.slane %v807_v27, %v7024_v37  ;;  %v5689_v27 = vld [vmem:[%s8080_s1 + $0x9e4] ss:$8 sps:$4 sm:$0xff]  }
  0xe7   : > { %3849 = vmatpush1.bf16.msra.mxu1 %v5561_v49  ;;  %3807 = vmatprep.subr.bf16.mxu0 %v5566_v50  ;;  %v5633_v49 = vld [vmem:[%s8080_s1 + $0x970] ss:$8 sps:$4 sm:$0xff]   ;;  %v5638_v50 = vld [vmem:[%s8080_s1 + $0x864] ss:$8 sps:$4 sm:$0xff]  }
  0xe8   : > { %3850 = vmatprep.subr.bf16.mxu1 %v5569_v51 }
  0xea   : > { %3808 = vmatpush1.bf16.msra.mxu0 %v5564_v52 }
  0xeb   : > { %3851 = vmatpush1.bf16.msra.mxu1 %v5567_v53  ;;  %3809 = vmatprep.subr.bf16.mxu0 %v5572_v54  ;;  %v5636_v53 = vld [vmem:[%s8080_s1 + $0x860] ss:$8 sps:$4 sm:$0xff]  }
  0xec   : > { %3852 = vmatprep.subr.bf16.mxu1 %v5575_v55  ;;  %v5639_v55 = vld [vmem:[%s8080_s1 + $0x960] ss:$8 sps:$4 sm:$0xff]  }
  0xee   : > { %3810 = vmatpush1.bf16.msra.mxu0 %v5570_v56 }
  0xef   : > { %3853 = vmatpush1.bf16.msra.mxu1 %v5573_v57  ;;  %3811 = vmatprep.subr.bf16.mxu0 %v5578_v58  ;;  %v5644_v58 = vld [vmem:[%s8080_s1 + $0x854] ss:$8 sps:$4 sm:$0xff]  }
  0xf0   : > { %3854 = vmatprep.subr.bf16.mxu1 %v5581_v59  ;;  %v5647_v59 = vld [vmem:[%s8080_s1 + $0x954] ss:$8 sps:$4 sm:$0xff]  }
  0xf2   : > { %3812 = vmatpush1.bf16.msra.mxu0 %v5576_v60 }
  0xf3   : > { %3855 = vmatpush1.bf16.msra.mxu1 %v5579_v61  ;;  %3813 = vmatprep.subr.bf16.mxu0 %v5584_v62 }
  0xf4   : > { %3856 = vmatprep.subr.bf16.mxu1 %v5587_v63 }
  0xf6   : > { %3814 = vmatpush2.bf16.msra.mxu0 %v5582_v0  ;;  %v5642_v0 = vld [vmem:[%s8080_s1 + $0x850] ss:$8 sps:$4 sm:$0xff]  }
  0xf7   : > { %3857 = vmatpush2.bf16.msra.mxu1 %v5585_v1  ;;  %3815 = vmatprep.subr.bf16.mxu0 %v5590_v2  ;;  %v5645_v2 = vld [vmem:[%s8080_s1 + $0x950] ss:$8 sps:$4 sm:$0xff]  }
  0xf8   : > { %3858 = vmatprep.subr.bf16.mxu1 %v5593_v3 }
  0xfa   : > { %3816 = vmatpush2.bf16.msra.mxu0 %v5588_v4 }
  0xfb   : > { %3859 = vmatpush2.bf16.msra.mxu1 %v5591_v5  ;;  %3817 = vmatprep.subr.bf16.mxu0 %v5596_v6  ;;  %v5650_v5 = vld [vmem:[%s8080_s1 + $0x844] ss:$8 sps:$4 sm:$0xff]  }
  0xfc   : > { %3860 = vmatprep.subr.bf16.mxu1 %v5599_v7  ;;  %v5653_v6 = vld [vmem:[%s8080_s1 + $0x944] ss:$8 sps:$4 sm:$0xff]   ;;  %v5648_v7 = vld [vmem:[%s8080_s1 + $0x840] ss:$8 sps:$4 sm:$0xff]  }
  0xfe   : > { %3818 = vmatpush2.bf16.msra.mxu0 %v5594_v8  ;;  %v5651_v8 = vld [vmem:[%s8080_s1 + $0x940] ss:$8 sps:$4 sm:$0xff]  }
  0xff   : > { %3861 = vmatpush2.bf16.msra.mxu1 %v5597_v9  ;;  %3819 = vmatprep.subr.bf16.mxu0 %v5602_v10  ;;  %v5656_v9 = vld [vmem:[%s8080_s1 + $0x834] ss:$8 sps:$4 sm:$0xff]  }
 0x100   : > { %3862 = vmatprep.subr.bf16.mxu1 %v5605_v11  ;;  %v5659_v10 = vld [vmem:[%s8080_s1 + $0x934] ss:$8 sps:$4 sm:$0xff]   ;;  %v5654_v11 = vld [vmem:[%s8080_s1 + $0x830] ss:$8 sps:$4 sm:$0xff]  }
 0x102   : > { %3820 = vmatpush2.bf16.msra.mxu0 %v5600_v12  ;;  %v5657_v12 = vld [vmem:[%s8080_s1 + $0x930] ss:$8 sps:$4 sm:$0xff]  }
 0x103   : > { %3863 = vmatpush2.bf16.msra.mxu1 %v5603_v13  ;;  %3821 = vmatprep.subr.bf16.mxu0 %v5608_v14  ;;  %v5662_v13 = vld [vmem:[%s8080_s1 + $0x824] ss:$8 sps:$4 sm:$0xff]  }
 0x104   : > { %3864 = vmatprep.subr.bf16.mxu1 %v5611_v15  ;;  %v5665_v14 = vld [vmem:[%s8080_s1 + $0x924] ss:$8 sps:$4 sm:$0xff]   ;;  %v5660_v15 = vld [vmem:[%s8080_s1 + $0x820] ss:$8 sps:$4 sm:$0xff]  }
 0x106   : > { %3822 = vmatpush2.bf16.msra.mxu0 %v5606_v16  ;;  %v5663_v16 = vld [vmem:[%s8080_s1 + $0x920] ss:$8 sps:$4 sm:$0xff]  }
 0x107   : > { %3865 = vmatpush2.bf16.msra.mxu1 %v5609_v17  ;;  %3823 = vmatprep.subr.bf16.mxu0 %v5614_v18  ;;  %v5668_v17 = vld [vmem:[%s8080_s1 + $0x814] ss:$8 sps:$4 sm:$0xff]  }
 0x108   : > { %3866 = vmatprep.subr.bf16.mxu1 %v5617_v19  ;;  %v5671_v18 = vld [vmem:[%s8080_s1 + $0x914] ss:$8 sps:$4 sm:$0xff]   ;;  %v5666_v19 = vld [vmem:[%s8080_s1 + $0x810] ss:$8 sps:$4 sm:$0xff]  }
 0x10a   : > { %3824 = vmatpush2.bf16.msra.mxu0 %v5612_v20  ;;  %v5669_v20 = vld [vmem:[%s8080_s1 + $0x910] ss:$8 sps:$4 sm:$0xff]  }
 0x10b   : > { %3867 = vmatpush2.bf16.msra.mxu1 %v5615_v21  ;;  %3825 = vmatprep.subr.bf16.mxu0 %v5620_v23  ;;  %v5674_v21 = vld [vmem:[%s8080_s1 + $0x804] ss:$8 sps:$4 sm:$0xff]  }
 0x10c   : > { %3868 = vmatprep.subr.bf16.mxu1 %v5623_v29  ;;  %v5677_v23 = vld [vmem:[%s8080_s1 + $0x904] ss:$8 sps:$4 sm:$0xff]   ;;  %v5672_v29 = vld [vmem:[%s8080_s1 + $0x800] ss:$8 sps:$4 sm:$0xff]  }
 0x10e   : > { %3826 = vmatpush2.bf16.msra.mxu0 %v5618_v32  ;;  %v5675_v32 = vld [vmem:[%s8080_s1 + $0x900] ss:$8 sps:$4 sm:$0xff]  }
 0x10f   : > { %3869 = vmatpush2.bf16.msra.mxu1 %v5621_v33  ;;  %3827 = vmatprep.subr.bf16.mxu0 %v5626_v36  ;;  %v5680_v33 = vld [vmem:[%s8080_s1 + $0x8f4] ss:$8 sps:$4 sm:$0xff]  }
 0x110   : > { %3870 = vmatprep.subr.bf16.mxu1 %v5629_v24  ;;  %v5683_v36 = vld [vmem:[%s8080_s1 + $0x9f4] ss:$8 sps:$4 sm:$0xff]   ;;  %v5678_v24 = vld [vmem:[%s8080_s1 + $0x8f0] ss:$8 sps:$4 sm:$0xff]  }
 0x112   : > { %3828 = vmatpush2.bf16.msra.mxu0 %v5624_v25  ;;  %v5681_v25 = vld [vmem:[%s8080_s1 + $0x9f0] ss:$8 sps:$4 sm:$0xff]  }
 0x113   : > { %3871 = vmatpush2.bf16.msra.mxu1 %v5627_v26  ;;  %3883 = vmatprep.subr.bf16.mxu0 %v5632_v38  ;;  %v5686_v26 = vld [vmem:[%s8080_s1 + $0x8e4] ss:$8 sps:$4 sm:$0xff]   ;;  %v5684_v38 = vld [vmem:[%s8080_s1 + $0x8e0] ss:$8 sps:$4 sm:$0xff]  }
 0x114   : > { %3926 = vmatprep.subr.bf16.mxu1 %v5635_v39  ;;  %v5687_v39 = vld [vmem:[%s8080_s1 + $0x9e0] ss:$8 sps:$4 sm:$0xff]  }
 0x115   : > { %v3573_v51 = vpop.f32.mrf.mxu0  ;;  %3830 = vmatmul.mubr.bf16.vlgmr.msra.gmra.mxu0 %v4618_v45  ;;  %v5695_v45 = vld [vmem:[%s8080_s1 + $0x9d4] ss:$8 sps:$4 sm:$0xff]  }
 0x116   : > { %v3616_v52 = vpop.f32.mrf.mxu1  ;;  %3873 = vmatmul.mubr.bf16.vlgmr.msra.gmra.mxu1 %v4620_v46  ;;  %v3574_v54 = vadd.f32 %v3573_v51, %v812_v48  ;;  %3884 = vmatpush1.bf16.msra.mxu0 %v5630_v41  ;;  %v5692_v41 = vld [vmem:[%s8080_s1 + $0x8d4] ss:$8 sps:$4 sm:$0xff]   ;;  %v5690_v46 = vld [vmem:[%s8080_s1 + $0x8d0] ss:$8 sps:$4 sm:$0xff]  }
 0x117   : > { %3927 = vmatpush1.bf16.msra.mxu1 %v5633_v49  ;;  %v3575_v56 = vpop.f32.mrf.mxu0  ;;  %3885 = vmatprep.subr.bf16.mxu0 %v5638_v50  ;;  %v5693_v48 = vld [vmem:[%s8080_s1 + $0x9d0] ss:$8 sps:$4 sm:$0xff]   ;;  %v5698_v49 = vld [vmem:[%s8080_s1 + $0x8c4] ss:$8 sps:$4 sm:$0xff]  }
 0x118   : > { %v3618_v57 = vpop.f32.mrf.mxu1  ;;  %3928 = vmatprep.subr.bf16.mxu1 %v5641_v28  ;;  %v7081_v60 = vadd.f32 %v3616_v52, %v3574_v54  ;;  %v3576_v61 = vadd.f32 %v3575_v56, %v816_v30  ;;  %3915 = vmatprep.mubr.bf16.mxu0 %v4623_v31  ;;  %v5701_v50 = vld [vmem:[%s8080_s1 + $0x9c4] ss:$8 sps:$4 sm:$0xff]   ;;  %v5696_v28 = vld [vmem:[%s8080_s1 + $0x8c0] ss:$8 sps:$4 sm:$0xff]   ;;  %v5704_v31 = vld [vmem:[%s8080_s1 + $0x8b4] ss:$8 sps:$4 sm:$0xff]  }
 0x119   : > { %3958 = vmatprep.mubr.bf16.mxu1 %v4625_v34  ;;  %v3577_v62 = vpop.f32.mrf.mxu0  ;;  %v5699_v30 = vld [vmem:[%s8080_s1 + $0x9c0] ss:$8 sps:$4 sm:$0xff]   ;;  %v5707_v34 = vld [vmem:[%s8080_s1 + $0x9b4] ss:$8 sps:$4 sm:$0xff]   ;;  %v5702_v51 = vld [vmem:[%s8080_s1 + $0x8b0] ss:$8 sps:$4 sm:$0xff]  }
 0x11a   : > { %v3620_v63 = vpop.f32.mrf.mxu1  ;;  %v7086_v1 = vadd.f32 %v3618_v57, %v3576_v61  ;;  %3886 = vmatpush1.bf16.msra.mxu0 %v5636_v53  ;;  %v5705_v52 = vld [vmem:[%s8080_s1 + $0x9b0] ss:$8 sps:$4 sm:$0xff]   ;;  %v5710_v53 = vld [vmem:[%s8080_s1 + $0x8a4] ss:$8 sps:$4 sm:$0xff]   ;;  %v5711_v56 = vld [vmem:[%s8080_s1 + $0x9a0] ss:$8 sps:$4 sm:$0xff]  }
 0x11b   : > { %3929 = vmatpush1.bf16.msra.mxu1 %v5639_v55  ;;  %v3579_v3 = vpop.f32.mrf.mxu0  ;;  %3887 = vmatprep.subr.bf16.mxu0 %v5644_v58  ;;  %v5713_v54 = vld [vmem:[%s8080_s1 + $0x9a4] ss:$8 sps:$4 sm:$0xff]   ;;  %v5708_v55 = vld [vmem:[%s8080_s1 + $0x8a0] ss:$8 sps:$4 sm:$0xff]   ;;  %v5716_v57 = vld [vmem:[%s8080_s1 + $0x894] ss:$8 sps:$4 sm:$0xff]  }
 0x11c   : > { %v3622_v4 = vpop.f32.mrf.mxu1  ;;  %3930 = vmatprep.subr.bf16.mxu1 %v5647_v59  ;;  %v5719_v58 = vld [vmem:[%s8080_s1 + $0x994] ss:$8 sps:$4 sm:$0xff]   ;;  %v5714_v59 = vld [vmem:[%s8080_s1 + $0x890] ss:$8 sps:$4 sm:$0xff]   ;;  %v5722_v62 = vld [vmem:[%s8080_s1 + $0x884] ss:$8 sps:$4 sm:$0xff]  }
 0x11d   : > { %v5717_v61 = vld [vmem:[%s8080_s1 + $0x990] ss:$8 sps:$4 sm:$0xff]   ;;  %v5725_v63 = vld [vmem:[%s8080_s1 + $0x984] ss:$8 sps:$4 sm:$0xff]   ;;  %v5728_v3 = vld [vmem:[%s8080_s1 + $0xa74] ss:$8 sps:$4 sm:$0xff]  }
 0x11e   : > { %3888 = vmatpush1.bf16.msra.mxu0 %v5642_v0  ;;  %v5720_v0 = vld [vmem:[%s8080_s1 + $0x880] ss:$8 sps:$4 sm:$0xff]   ;;  %v5731_v4 = vld [vmem:[%s8080_s1 + $0xb74] ss:$8 sps:$4 sm:$0xff]  }
 0x11f   : > { %3931 = vmatpush1.bf16.msra.mxu1 %v5645_v2  ;;  %3889 = vmatprep.subr.bf16.mxu0 %v5650_v5  ;;  %v5723_v2 = vld [vmem:[%s8080_s1 + $0x980] ss:$8 sps:$4 sm:$0xff]   ;;  %v7254_v5 = vld [vmem:[%s6319_s10 + $0x50] sm:$0xff] }
 0x120   : > { %3932 = vmatprep.subr.bf16.mxu1 %v5653_v6  ;;  %v5726_v6 = vld [vmem:[%s8080_s1 + $0xa70] ss:$8 sps:$4 sm:$0xff]  }
 0x122   : > { %3890 = vmatpush1.bf16.msra.mxu0 %v5648_v7  ;;  %v4622_v7 = vcombine.low %v7033_v40, %v7042_v43  ;;  %v5734_v40 = vld [vmem:[%s8080_s1 + $0xa64] ss:$8 sps:$4 sm:$0xff]  }
 0x123   : > { %3933 = vmatpush1.bf16.msra.mxu1 %v5651_v8  ;;  %3891 = vmatprep.subr.bf16.mxu0 %v5656_v9  ;;  %v4624_v8 = vcombine.low %v7045_v44, %v7052_v47  ;;  %v7264_v9 = vld [vmem:[%s6319_s10 + $0xd0] sm:$0xff]  ;;  %v5737_v43 = vld [vmem:[%s8080_s1 + $0xb64] ss:$8 sps:$4 sm:$0xff]   ;;  %v5732_v44 = vld [vmem:[%s8080_s1 + $0xa60] ss:$8 sps:$4 sm:$0xff]  }
 0x124   : > { %3934 = vmatprep.subr.bf16.mxu1 %v5659_v10  ;;  %v7267_v10 = vld [vmem:[%s6319_s10 + $0x58] sm:$0xff]  ;;  %v5735_v47 = vld [vmem:[%s8080_s1 + $0xb60] ss:$8 sps:$4 sm:$0xff]  }
 0x126   : > { %3892 = vmatpush1.bf16.msra.mxu0 %v5654_v11  ;;  %v7270_v11 = vld [vmem:[%s6319_s10 + $0xd8] sm:$0xff] }
 0x127   : > { %3935 = vmatpush1.bf16.msra.mxu1 %v5657_v12  ;;  %3893 = vmatprep.subr.bf16.mxu0 %v5662_v13  ;;  %v5729_v12 = vld [vmem:[%s8080_s1 + $0xb70] ss:$8 sps:$4 sm:$0xff]   ;;  %v4627_v13 = vcombine.high %v7254_v5, %v7264_v9 }
 0x128   : > { %3936 = vmatprep.subr.bf16.mxu1 %v5665_v14  ;;  %v4629_v14 = vcombine.high %v7267_v10, %v7270_v11 }
 0x12a   : > { %3894 = vmatpush1.bf16.msra.mxu0 %v5660_v15 }
 0x12b   : > { %3937 = vmatpush1.bf16.msra.mxu1 %v5663_v16  ;;  %3895 = vmatprep.subr.bf16.mxu0 %v5668_v17 }
 0x12c   : > { %3938 = vmatprep.subr.bf16.mxu1 %v5671_v18 }
 0x12e   : > { %3896 = vmatpush1.bf16.msra.mxu0 %v5666_v19 }
 0x12f   : > { %3939 = vmatpush1.bf16.msra.mxu1 %v5669_v20  ;;  %3897 = vmatprep.subr.bf16.mxu0 %v5674_v21  ;;  %v5740_v20 = vld [vmem:[%s8080_s1 + $0xa54] ss:$8 sps:$4 sm:$0xff]  }
 0x130   : > { %3940 = vmatprep.subr.bf16.mxu1 %v5677_v23  ;;  %v5743_v21 = vld [vmem:[%s8080_s1 + $0xb54] ss:$8 sps:$4 sm:$0xff]  }
 0x132   : > { %3898 = vmatpush1.bf16.msra.mxu0 %v5672_v29 }
 0x133   : > { %3941 = vmatpush1.bf16.msra.mxu1 %v5675_v32  ;;  %3899 = vmatprep.subr.bf16.mxu0 %v5680_v33  ;;  %v5741_v32 = vld [vmem:[%s8080_s1 + $0xb50] ss:$8 sps:$4 sm:$0xff]  }
 0x134   : > { %3942 = vmatprep.subr.bf16.mxu1 %v5683_v36 }
 0x136   : > { %3900 = vmatpush2.bf16.msra.mxu0 %v5678_v24 }
 0x137   : > { %3943 = vmatpush2.bf16.msra.mxu1 %v5681_v25  ;;  %3901 = vmatprep.subr.bf16.mxu0 %v5686_v26 }
 0x138   : > { %3944 = vmatprep.subr.bf16.mxu1 %v5689_v27  ;;  %v5749_v27 = vld [vmem:[%s8080_s1 + $0xb44] ss:$8 sps:$4 sm:$0xff]  }
 0x13a   : > { %3902 = vmatpush2.bf16.msra.mxu0 %v5684_v38  ;;  %v5744_v38 = vld [vmem:[%s8080_s1 + $0xa40] ss:$8 sps:$4 sm:$0xff]  }
 0x13b   : > { %3945 = vmatpush2.bf16.msra.mxu1 %v5687_v39  ;;  %3903 = vmatprep.subr.bf16.mxu0 %v5692_v41  ;;  %v5747_v39 = vld [vmem:[%s8080_s1 + $0xb40] ss:$8 sps:$4 sm:$0xff]   ;;  %v5752_v41 = vld [vmem:[%s8080_s1 + $0xa34] ss:$8 sps:$4 sm:$0xff]  }
 0x13c   : > { %3946 = vmatprep.subr.bf16.mxu1 %v5695_v45  ;;  %v5755_v45 = vld [vmem:[%s8080_s1 + $0xb34] ss:$8 sps:$4 sm:$0xff]  }
 0x13e   : > { %3904 = vmatpush2.bf16.msra.mxu0 %v5690_v46  ;;  %v5750_v46 = vld [vmem:[%s8080_s1 + $0xa30] ss:$8 sps:$4 sm:$0xff]  }
 0x13f   : > { %3947 = vmatpush2.bf16.msra.mxu1 %v5693_v48  ;;  %3905 = vmatprep.subr.bf16.mxu0 %v5698_v49  ;;  %v5753_v48 = vld [vmem:[%s8080_s1 + $0xb30] ss:$8 sps:$4 sm:$0xff]   ;;  %v5758_v49 = vld [vmem:[%s8080_s1 + $0xa24] ss:$8 sps:$4 sm:$0xff]  }
 0x140   : > { %3948 = vmatprep.subr.bf16.mxu1 %v5701_v50  ;;  %v5761_v50 = vld [vmem:[%s8080_s1 + $0xb24] ss:$8 sps:$4 sm:$0xff]  }
 0x142   : > { %3906 = vmatpush2.bf16.msra.mxu0 %v5696_v28  ;;  %v5756_v28 = vld [vmem:[%s8080_s1 + $0xa20] ss:$8 sps:$4 sm:$0xff]  }
 0x143   : > { %3949 = vmatpush2.bf16.msra.mxu1 %v5699_v30  ;;  %3907 = vmatprep.subr.bf16.mxu0 %v5704_v31  ;;  %v5759_v30 = vld [vmem:[%s8080_s1 + $0xb20] ss:$8 sps:$4 sm:$0xff]   ;;  %v5764_v31 = vld [vmem:[%s8080_s1 + $0xa14] ss:$8 sps:$4 sm:$0xff]  }
 0x144   : > { %3950 = vmatprep.subr.bf16.mxu1 %v5707_v34  ;;  %v5767_v34 = vld [vmem:[%s8080_s1 + $0xb14] ss:$8 sps:$4 sm:$0xff]  }
 0x146   : > { %3908 = vmatpush2.bf16.msra.mxu0 %v5702_v51  ;;  %v5762_v51 = vld [vmem:[%s8080_s1 + $0xa10] ss:$8 sps:$4 sm:$0xff]  }
 0x147   : > { %3951 = vmatpush2.bf16.msra.mxu1 %v5705_v52  ;;  %3909 = vmatprep.subr.bf16.mxu0 %v5710_v53  ;;  %v5765_v52 = vld [vmem:[%s8080_s1 + $0xb10] ss:$8 sps:$4 sm:$0xff]   ;;  %v5770_v53 = vld [vmem:[%s8080_s1 + $0xa04] ss:$8 sps:$4 sm:$0xff]  }
 0x148   : > { %3952 = vmatprep.subr.bf16.mxu1 %v5713_v54  ;;  %v5773_v54 = vld [vmem:[%s8080_s1 + $0xb04] ss:$8 sps:$4 sm:$0xff]  }
 0x14a   : > { %3910 = vmatpush2.bf16.msra.mxu0 %v5708_v55  ;;  %v5768_v55 = vld [vmem:[%s8080_s1 + $0xa00] ss:$8 sps:$4 sm:$0xff]  }
 0x14b   : > { %3953 = vmatpush2.bf16.msra.mxu1 %v5711_v56  ;;  %3911 = vmatprep.subr.bf16.mxu0 %v5716_v57  ;;  %v5771_v56 = vld [vmem:[%s8080_s1 + $0xb00] ss:$8 sps:$4 sm:$0xff]   ;;  %v5776_v57 = vld [vmem:[%s8080_s1 + $0xaf4] ss:$8 sps:$4 sm:$0xff]  }
 0x14c   : > { %3954 = vmatprep.subr.bf16.mxu1 %v5719_v58  ;;  %v5779_v58 = vld [vmem:[%s8080_s1 + $0xbf4] ss:$8 sps:$4 sm:$0xff]  }
 0x14e   : > { %3912 = vmatpush2.bf16.msra.mxu0 %v5714_v59  ;;  %v5774_v59 = vld [vmem:[%s8080_s1 + $0xaf0] ss:$8 sps:$4 sm:$0xff]  }
 0x14f   : > { %3955 = vmatpush2.bf16.msra.mxu1 %v5717_v61  ;;  %3913 = vmatprep.subr.bf16.mxu0 %v5722_v62  ;;  %v5777_v61 = vld [vmem:[%s8080_s1 + $0xbf0] ss:$8 sps:$4 sm:$0xff]   ;;  %v5782_v62 = vld [vmem:[%s8080_s1 + $0xae4] ss:$8 sps:$4 sm:$0xff]  }
 0x150   : > { %3956 = vmatprep.subr.bf16.mxu1 %v5725_v63  ;;  %v5785_v63 = vld [vmem:[%s8080_s1 + $0xbe4] ss:$8 sps:$4 sm:$0xff]  }
 0x152   : > { %3914 = vmatpush2.bf16.msra.mxu0 %v5720_v0  ;;  %v5780_v0 = vld [vmem:[%s8080_s1 + $0xae0] ss:$8 sps:$4 sm:$0xff]  }
 0x153   : > { %3957 = vmatpush2.bf16.msra.mxu1 %v5723_v2  ;;  %3969 = vmatprep.subr.bf16.mxu0 %v5728_v3  ;;  %v5783_v2 = vld [vmem:[%s8080_s1 + $0xbe0] ss:$8 sps:$4 sm:$0xff]   ;;  %v5788_v3 = vld [vmem:[%s8080_s1 + $0xad4] ss:$8 sps:$4 sm:$0xff]  }
 0x154   : > { %4012 = vmatprep.subr.bf16.mxu1 %v5731_v4  ;;  %v5791_v4 = vld [vmem:[%s8080_s1 + $0xbd4] ss:$8 sps:$4 sm:$0xff]  }
 0x155   : > { %v3659_v15 = vpop.f32.mrf.mxu0  ;;  %3916 = vmatmul.mubr.bf16.vlgmr.msra.gmra.mxu0 %v4622_v7  ;;  %v5789_v7 = vld [vmem:[%s8080_s1 + $0xbd0] ss:$8 sps:$4 sm:$0xff]  }
 0x156   : > { %v3702_v16 = vpop.f32.mrf.mxu1  ;;  %3959 = vmatmul.mubr.bf16.vlgmr.msra.gmra.mxu1 %v4624_v8  ;;  %v3660_v17 = vadd.f32 %v3659_v15, %v7081_v60  ;;  %3970 = vmatpush1.bf16.msra.mxu0 %v5726_v6  ;;  %v5738_v60 = vld [vmem:[%s8080_s1 + $0xa50] ss:$8 sps:$4 sm:$0xff]   ;;  %v5794_v8 = vld [vmem:[%s8080_s1 + $0xac4] ss:$8 sps:$4 sm:$0xff]  }
 0x157   : > { %4013 = vmatpush1.bf16.msra.mxu1 %v5729_v12  ;;  %v3661_v18 = vpop.f32.mrf.mxu0  ;;  %3971 = vmatprep.subr.bf16.mxu0 %v5734_v40  ;;  %v5786_v6 = vld [vmem:[%s8080_s1 + $0xad0] ss:$8 sps:$4 sm:$0xff]   ;;  %v5797_v12 = vld [vmem:[%s8080_s1 + $0xbc4] ss:$8 sps:$4 sm:$0xff]   ;;  %v5792_v40 = vld [vmem:[%s8080_s1 + $0xac0] ss:$8 sps:$4 sm:$0xff]  }
 0x158   : > { %v3704_v19 = vpop.f32.mrf.mxu1  ;;  %4014 = vmatprep.subr.bf16.mxu1 %v5737_v43  ;;  %v7298_v23 = vadd.f32 %v3702_v16, %v3660_v17  ;;  %v3662_v29 = vadd.f32 %v3661_v18, %v7086_v1  ;;  %4001 = vmatprep.mubr.bf16.mxu0 %v4627_v13  ;;  %v5746_v1 = vld [vmem:[%s8080_s1 + $0xa44] ss:$8 sps:$4 sm:$0xff]   ;;  %v5795_v43 = vld [vmem:[%s8080_s1 + $0xbc0] ss:$8 sps:$4 sm:$0xff]   ;;  %v5798_v13 = vld [vmem:[%s8080_s1 + $0xab0] ss:$8 sps:$4 sm:$0xff]  }
 0x159   : > { %4044 = vmatprep.mubr.bf16.mxu1 %v4629_v14  ;;  %v3663_v33 = vpop.f32.mrf.mxu0  ;;  %v5801_v14 = vld [vmem:[%s8080_s1 + $0xbb0] ss:$8 sps:$4 sm:$0xff]   ;;  %v5806_v15 = vld [vmem:[%s8080_s1 + $0xaa4] ss:$8 sps:$4 sm:$0xff]   ;;  %v5804_v17 = vld [vmem:[%s8080_s1 + $0xaa0] ss:$8 sps:$4 sm:$0xff]  }
 0x15a   : > { %v3706_v36 = vpop.f32.mrf.mxu1  ;;  %v7307_v24 = vadd.f32 %v3704_v19, %v3662_v29  ;;  %3972 = vmatpush1.bf16.msra.mxu0 %v5732_v44  ;;  %v5800_v44 = vld [vmem:[%s8080_s1 + $0xab4] ss:$8 sps:$4 sm:$0xff]   ;;  %v5809_v16 = vld [vmem:[%s8080_s1 + $0xba4] ss:$8 sps:$4 sm:$0xff]   ;;  %v5807_v18 = vld [vmem:[%s8080_s1 + $0xba0] ss:$8 sps:$4 sm:$0xff]  }
 0x15b   : > { %4015 = vmatpush1.bf16.msra.mxu1 %v5735_v47  ;;  %v3665_v25 = vpop.f32.mrf.mxu0  ;;  %3973 = vmatprep.subr.bf16.mxu0 %v5740_v20  ;;  %v5803_v47 = vld [vmem:[%s8080_s1 + $0xbb4] ss:$8 sps:$4 sm:$0xff]   ;;  %v5813_v29 = vld [vmem:[%s8080_s1 + $0xb90] ss:$8 sps:$4 sm:$0xff]   ;;  %v5816_v33 = vld [vmem:[%s8080_s1 + $0xa80] ss:$8 sps:$4 sm:$0xff]  }
 0x15c   : > { %v3708_v26 = vpop.f32.mrf.mxu1  ;;  %4016 = vmatprep.subr.bf16.mxu1 %v5743_v21  ;;  %v5812_v19 = vld [vmem:[%s8080_s1 + $0xa94] ss:$8 sps:$4 sm:$0xff]   ;;  %v5810_v21 = vld [vmem:[%s8080_s1 + $0xa90] ss:$8 sps:$4 sm:$0xff]   ;;  %v5819_v36 = vld [vmem:[%s8080_s1 + $0xb80] ss:$8 sps:$4 sm:$0xff]  }
 0x15d   : > { %v5815_v20 = vld [vmem:[%s8080_s1 + $0xb94] ss:$8 sps:$4 sm:$0xff]  }
 0x15e   : > { %3974 = vmatpush1.bf16.msra.mxu0 %v5738_v60  ;;  %v5818_v60 = vld [vmem:[%s8080_s1 + $0xa84] ss:$8 sps:$4 sm:$0xff]   ;;  %v5824_v25 = vld [vmem:[%s8080_s1 + $0xc74] ss:$8 sps:$4 sm:$0xff]  }
 0x15f   : > { %4017 = vmatpush1.bf16.msra.mxu1 %v5741_v32  ;;  %3975 = vmatprep.subr.bf16.mxu0 %v5746_v1  ;;  %v5821_v32 = vld [vmem:[%s8080_s1 + $0xb84] ss:$8 sps:$4 sm:$0xff]   ;;  %v5827_v26 = vld [vmem:[%s8080_s1 + $0xd74] ss:$8 sps:$4 sm:$0xff]  }
 0x160   : > { %4018 = vmatprep.subr.bf16.mxu1 %v5749_v27  ;;  %v7472_v1 = vld [vmem:[%s6319_s10 + $0x60] sm:$0xff]  ;;  %v4626_v27 = vcombine.low %v7254_v5, %v7264_v9 }
 0x161   : > { %v5830_v5 = vld [vmem:[%s8080_s1 + $0xc64] ss:$8 sps:$4 sm:$0xff]  }
 0x162   : > { %3976 = vmatpush1.bf16.msra.mxu0 %v5744_v38  ;;  %v4628_v38 = vcombine.low %v7267_v10, %v7270_v11  ;;  %v5833_v9 = vld [vmem:[%s8080_s1 + $0xd64] ss:$8 sps:$4 sm:$0xff]  }
 0x163   : > { %4019 = vmatpush1.bf16.msra.mxu1 %v5747_v39  ;;  %3977 = vmatprep.subr.bf16.mxu0 %v5752_v41  ;;  %v7479_v39 = vld [vmem:[%s6319_s10 + $0xe0] sm:$0xff]  ;;  %v7482_v41 = vld [vmem:[%s6319_s10 + $0x68] sm:$0xff] }
 0x164   : > { %4020 = vmatprep.subr.bf16.mxu1 %v5755_v45  ;;  %v7485_v45 = vld [vmem:[%s6319_s10 + $0xe8] sm:$0xff]  ;;  %v4631_v10 = vcombine.high %v7472_v1, %v7479_v39 }
 0x165   : > { %v4633_v11 = vcombine.high %v7482_v41, %v7485_v45 }
 0x166   : > { %3978 = vmatpush1.bf16.msra.mxu0 %v5750_v46  ;;  %v5822_v46 = vld [vmem:[%s8080_s1 + $0xc70] ss:$8 sps:$4 sm:$0xff]  }
 0x167   : > { %4021 = vmatpush1.bf16.msra.mxu1 %v5753_v48  ;;  %3979 = vmatprep.subr.bf16.mxu0 %v5758_v49  ;;  %v5825_v48 = vld [vmem:[%s8080_s1 + $0xd70] ss:$8 sps:$4 sm:$0xff]  }
 0x168   : > { %4022 = vmatprep.subr.bf16.mxu1 %v5761_v50 }
 0x16a   : > { %3980 = vmatpush1.bf16.msra.mxu0 %v5756_v28 }
 0x16b   : > { %4023 = vmatpush1.bf16.msra.mxu1 %v5759_v30  ;;  %3981 = vmatprep.subr.bf16.mxu0 %v5764_v31  ;;  %v5828_v30 = vld [vmem:[%s8080_s1 + $0xc60] ss:$8 sps:$4 sm:$0xff]  }
 0x16c   : > { %4024 = vmatprep.subr.bf16.mxu1 %v5767_v34  ;;  %v5831_v31 = vld [vmem:[%s8080_s1 + $0xd60] ss:$8 sps:$4 sm:$0xff]  }
 0x16e   : > { %3982 = vmatpush1.bf16.msra.mxu0 %v5762_v51 }
 0x16f   : > { %4025 = vmatpush1.bf16.msra.mxu1 %v5765_v52  ;;  %3983 = vmatprep.subr.bf16.mxu0 %v5770_v53  ;;  %v5836_v52 = vld [vmem:[%s8080_s1 + $0xc54] ss:$8 sps:$4 sm:$0xff]  }
 0x170   : > { %4026 = vmatprep.subr.bf16.mxu1 %v5773_v54 }
 0x172   : > { %3984 = vmatpush1.bf16.msra.mxu0 %v5768_v55 }
 0x173   : > { %4027 = vmatpush1.bf16.msra.mxu1 %v5771_v56  ;;  %3985 = vmatprep.subr.bf16.mxu0 %v5776_v57 }
 0x174   : > { %4028 = vmatprep.subr.bf16.mxu1 %v5779_v58  ;;  %v5834_v58 = vld [vmem:[%s8080_s1 + $0xc50] ss:$8 sps:$4 sm:$0xff]  }
 0x176   : > { %3986 = vmatpush2.bf16.msra.mxu0 %v5774_v59  ;;  %v5837_v59 = vld [vmem:[%s8080_s1 + $0xd50] ss:$8 sps:$4 sm:$0xff]  }
 0x177   : > { %4029 = vmatpush2.bf16.msra.mxu1 %v5777_v61  ;;  %3987 = vmatprep.subr.bf16.mxu0 %v5782_v62 }
 0x178   : > { %4030 = vmatprep.subr.bf16.mxu1 %v5785_v63  ;;  %v5845_v63 = vld [vmem:[%s8080_s1 + $0xd44] ss:$8 sps:$4 sm:$0xff]  }
 0x17a   : > { %3988 = vmatpush2.bf16.msra.mxu0 %v5780_v0  ;;  %v5840_v0 = vld [vmem:[%s8080_s1 + $0xc40] ss:$8 sps:$4 sm:$0xff]  }
 0x17b   : > { %4031 = vmatpush2.bf16.msra.mxu1 %v5783_v2  ;;  %3989 = vmatprep.subr.bf16.mxu0 %v5788_v3  ;;  %v5843_v2 = vld [vmem:[%s8080_s1 + $0xd40] ss:$8 sps:$4 sm:$0xff]   ;;  %v5848_v3 = vld [vmem:[%s8080_s1 + $0xc34] ss:$8 sps:$4 sm:$0xff]  }
 0x17c   : > { %4032 = vmatprep.subr.bf16.mxu1 %v5791_v4  ;;  %v5851_v4 = vld [vmem:[%s8080_s1 + $0xd34] ss:$8 sps:$4 sm:$0xff]  }
 0x17e   : > { %3990 = vmatpush2.bf16.msra.mxu0 %v5786_v6  ;;  %v5846_v6 = vld [vmem:[%s8080_s1 + $0xc30] ss:$8 sps:$4 sm:$0xff]  }
 0x17f   : > { %4033 = vmatpush2.bf16.msra.mxu1 %v5789_v7  ;;  %3991 = vmatprep.subr.bf16.mxu0 %v5794_v8  ;;  %v5849_v7 = vld [vmem:[%s8080_s1 + $0xd30] ss:$8 sps:$4 sm:$0xff]   ;;  %v5854_v8 = vld [vmem:[%s8080_s1 + $0xc24] ss:$8 sps:$4 sm:$0xff]  }
 0x180   : > { %4034 = vmatprep.subr.bf16.mxu1 %v5797_v12  ;;  %v5857_v12 = vld [vmem:[%s8080_s1 + $0xd24] ss:$8 sps:$4 sm:$0xff]  }
 0x182   : > { %3992 = vmatpush2.bf16.msra.mxu0 %v5792_v40  ;;  %v5852_v40 = vld [vmem:[%s8080_s1 + $0xc20] ss:$8 sps:$4 sm:$0xff]  }
 0x183   : > { %4035 = vmatpush2.bf16.msra.mxu1 %v5795_v43  ;;  %3993 = vmatprep.subr.bf16.mxu0 %v5800_v44  ;;  %v5855_v43 = vld [vmem:[%s8080_s1 + $0xd20] ss:$8 sps:$4 sm:$0xff]   ;;  %v5860_v44 = vld [vmem:[%s8080_s1 + $0xc14] ss:$8 sps:$4 sm:$0xff]  }
 0x184   : > { %4036 = vmatprep.subr.bf16.mxu1 %v5803_v47  ;;  %v5863_v47 = vld [vmem:[%s8080_s1 + $0xd14] ss:$8 sps:$4 sm:$0xff]  }
 0x186   : > { %3994 = vmatpush2.bf16.msra.mxu0 %v5798_v13  ;;  %v5858_v13 = vld [vmem:[%s8080_s1 + $0xc10] ss:$8 sps:$4 sm:$0xff]  }
 0x187   : > { %4037 = vmatpush2.bf16.msra.mxu1 %v5801_v14  ;;  %3995 = vmatprep.subr.bf16.mxu0 %v5806_v15  ;;  %v5861_v14 = vld [vmem:[%s8080_s1 + $0xd10] ss:$8 sps:$4 sm:$0xff]   ;;  %v5866_v15 = vld [vmem:[%s8080_s1 + $0xc04] ss:$8 sps:$4 sm:$0xff]  }
 0x188   : > { %4038 = vmatprep.subr.bf16.mxu1 %v5809_v16  ;;  %v5869_v16 = vld [vmem:[%s8080_s1 + $0xd04] ss:$8 sps:$4 sm:$0xff]  }
 0x18a   : > { %3996 = vmatpush2.bf16.msra.mxu0 %v5804_v17  ;;  %v5864_v17 = vld [vmem:[%s8080_s1 + $0xc00] ss:$8 sps:$4 sm:$0xff]  }
 0x18b   : > { %4039 = vmatpush2.bf16.msra.mxu1 %v5807_v18  ;;  %3997 = vmatprep.subr.bf16.mxu0 %v5812_v19  ;;  %v5867_v18 = vld [vmem:[%s8080_s1 + $0xd00] ss:$8 sps:$4 sm:$0xff]   ;;  %v5872_v19 = vld [vmem:[%s8080_s1 + $0xcf4] ss:$8 sps:$4 sm:$0xff]  }
 0x18c   : > { %4040 = vmatprep.subr.bf16.mxu1 %v5815_v20  ;;  %v5875_v20 = vld [vmem:[%s8080_s1 + $0xdf4] ss:$8 sps:$4 sm:$0xff]  }
 0x18e   : > { %3998 = vmatpush2.bf16.msra.mxu0 %v5810_v21  ;;  %v5870_v21 = vld [vmem:[%s8080_s1 + $0xcf0] ss:$8 sps:$4 sm:$0xff]  }
 0x18f   : > { %4041 = vmatpush2.bf16.msra.mxu1 %v5813_v29  ;;  %3999 = vmatprep.subr.bf16.mxu0 %v5818_v60  ;;  %v5873_v29 = vld [vmem:[%s8080_s1 + $0xdf0] ss:$8 sps:$4 sm:$0xff]   ;;  %v5878_v60 = vld [vmem:[%s8080_s1 + $0xce4] ss:$8 sps:$4 sm:$0xff]  }
 0x190   : > { %4042 = vmatprep.subr.bf16.mxu1 %v5821_v32  ;;  %v5881_v32 = vld [vmem:[%s8080_s1 + $0xde4] ss:$8 sps:$4 sm:$0xff]  }
 0x192   : > { %4000 = vmatpush2.bf16.msra.mxu0 %v5816_v33  ;;  %v5876_v33 = vld [vmem:[%s8080_s1 + $0xce0] ss:$8 sps:$4 sm:$0xff]  }
 0x193   : > { %4043 = vmatpush2.bf16.msra.mxu1 %v5819_v36  ;;  %4055 = vmatprep.subr.bf16.mxu0 %v5824_v25  ;;  %v5879_v36 = vld [vmem:[%s8080_s1 + $0xde0] ss:$8 sps:$4 sm:$0xff]   ;;  %v5884_v25 = vld [vmem:[%s8080_s1 + $0xcd4] ss:$8 sps:$4 sm:$0xff]  }
 0x194   : > { %4098 = vmatprep.subr.bf16.mxu1 %v5827_v26  ;;  %v5887_v26 = vld [vmem:[%s8080_s1 + $0xdd4] ss:$8 sps:$4 sm:$0xff]  }
 0x195   : > { %v3745_v49 = vpop.f32.mrf.mxu0  ;;  %4002 = vmatmul.mubr.bf16.vlgmr.msra.gmra.mxu0 %v4626_v27  ;;  %v5882_v27 = vld [vmem:[%s8080_s1 + $0xcd0] ss:$8 sps:$4 sm:$0xff]  }
 0x196   : > { %v3788_v50 = vpop.f32.mrf.mxu1  ;;  %4045 = vmatmul.mubr.bf16.vlgmr.msra.gmra.mxu1 %v4628_v38  ;;  %v3746_v28 = vadd.f32 %v3745_v49, %v7298_v23  ;;  %4056 = vmatpush1.bf16.msra.mxu0 %v5822_v46  ;;  %v5839_v23 = vld [vmem:[%s8080_s1 + $0xd54] ss:$8 sps:$4 sm:$0xff]   ;;  %v5885_v38 = vld [vmem:[%s8080_s1 + $0xdd0] ss:$8 sps:$4 sm:$0xff]   ;;  %v5890_v46 = vld [vmem:[%s8080_s1 + $0xcc4] ss:$8 sps:$4 sm:$0xff]  }
 0x197   : > { %4099 = vmatpush1.bf16.msra.mxu1 %v5825_v48  ;;  %v3747_v34 = vpop.f32.mrf.mxu0  ;;  %4057 = vmatprep.subr.bf16.mxu0 %v5830_v5  ;;  %v5893_v48 = vld [vmem:[%s8080_s1 + $0xdc4] ss:$8 sps:$4 sm:$0xff]   ;;  %v5888_v5 = vld [vmem:[%s8080_s1 + $0xcc0] ss:$8 sps:$4 sm:$0xff]   ;;  %v5894_v49 = vld [vmem:[%s8080_s1 + $0xcb0] ss:$8 sps:$4 sm:$0xff]  }
 0x198   : > { %v3790_v51 = vpop.f32.mrf.mxu1  ;;  %4100 = vmatprep.subr.bf16.mxu1 %v5833_v9  ;;  %v7516_v53 = vadd.f32 %v3788_v50, %v3746_v28  ;;  %v3748_v54 = vadd.f32 %v3747_v34, %v7307_v24  ;;  %4087 = vmatprep.mubr.bf16.mxu0 %v4631_v10  ;;  %v5842_v24 = vld [vmem:[%s8080_s1 + $0xc44] ss:$8 sps:$4 sm:$0xff]   ;;  %v5891_v9 = vld [vmem:[%s8080_s1 + $0xdc0] ss:$8 sps:$4 sm:$0xff]   ;;  %v5896_v10 = vld [vmem:[%s8080_s1 + $0xcb4] ss:$8 sps:$4 sm:$0xff]  }
 0x199   : > { %4130 = vmatprep.mubr.bf16.mxu1 %v4633_v11  ;;  %v3749_v55 = vpop.f32.mrf.mxu0  ;;  %v5899_v11 = vld [vmem:[%s8080_s1 + $0xdb4] ss:$8 sps:$4 sm:$0xff]   ;;  %v5897_v50 = vld [vmem:[%s8080_s1 + $0xdb0] ss:$8 sps:$4 sm:$0xff]   ;;  %v5902_v28 = vld [vmem:[%s8080_s1 + $0xca4] ss:$8 sps:$4 sm:$0xff]  }
 0x19a   : > { %v3792_v56 = vpop.f32.mrf.mxu1  ;;  %v7519_v57 = vadd.f32 %v3790_v51, %v3748_v54  ;;  %4058 = vmatpush1.bf16.msra.mxu0 %v5828_v30  ;;  %v5905_v30 = vld [vmem:[%s8080_s1 + $0xda4] ss:$8 sps:$4 sm:$0xff]   ;;  %v5903_v34 = vld [vmem:[%s8080_s1 + $0xda0] ss:$8 sps:$4 sm:$0xff]   ;;  %v5908_v51 = vld [vmem:[%s8080_s1 + $0xc94] ss:$8 sps:$4 sm:$0xff]  }
 0x19b   : > { %4101 = vmatpush1.bf16.msra.mxu1 %v5831_v31  ;;  %v3751_v61 = vpop.f32.mrf.mxu0  ;;  %4059 = vmatprep.subr.bf16.mxu0 %v5836_v52  ;;  %v5900_v31 = vld [vmem:[%s8080_s1 + $0xca0] ss:$8 sps:$4 sm:$0xff]   ;;  %v5911_v52 = vld [vmem:[%s8080_s1 + $0xd94] ss:$8 sps:$4 sm:$0xff]   ;;  %v5909_v54 = vld [vmem:[%s8080_s1 + $0xd90] ss:$8 sps:$4 sm:$0xff]  }
 0x19c   : > { %v3794_v62 = vpop.f32.mrf.mxu1  ;;  %4102 = vmatprep.subr.bf16.mxu1 %v5839_v23  ;;  %v5906_v23 = vld [vmem:[%s8080_s1 + $0xc90] ss:$8 sps:$4 sm:$0xff]   ;;  %v5914_v55 = vld [vmem:[%s8080_s1 + $0xc84] ss:$8 sps:$4 sm:$0xff]   ;;  %v5920_v61 = vld [vmem:[%s8080_s1 + $0xe74] ss:$8 sps:$4 sm:$0xff]  }
 0x19d   : > { %v5917_v56 = vld [vmem:[%s8080_s1 + $0xd84] ss:$8 sps:$4 sm:$0xff]   ;;  %v5923_v62 = vld [vmem:[%s8080_s1 + $0xf74] ss:$8 sps:$4 sm:$0xff]  }
 0x19e   : > { %4060 = vmatpush1.bf16.msra.mxu0 %v5834_v58  ;;  %v5912_v58 = vld [vmem:[%s8080_s1 + $0xc80] ss:$8 sps:$4 sm:$0xff]  }
 0x19f   : > { %4103 = vmatpush1.bf16.msra.mxu1 %v5837_v59  ;;  %4061 = vmatprep.subr.bf16.mxu0 %v5842_v24  ;;  %v5915_v59 = vld [vmem:[%s8080_s1 + $0xd80] ss:$8 sps:$4 sm:$0xff]   ;;  %v7690_v24 = vld [vmem:[%s6319_s10 + $0x70] sm:$0xff] }
 0x1a0   : > { %4104 = vmatprep.subr.bf16.mxu1 %v5845_v63  ;;  %v4630_v63 = vcombine.low %v7472_v1, %v7479_v39  ;;  %v5926_v1 = vld [vmem:[%s8080_s1 + $0xe64] ss:$8 sps:$4 sm:$0xff]  }
 0x1a1   : > { %v5929_v39 = vld [vmem:[%s8080_s1 + $0xf64] ss:$8 sps:$4 sm:$0xff]  }
 0x1a2   : > { %4062 = vmatpush1.bf16.msra.mxu0 %v5840_v0  ;;  %v4632_v0 = vcombine.low %v7482_v41, %v7485_v45 }
 0x1a3   : > { %4105 = vmatpush1.bf16.msra.mxu1 %v5843_v2  ;;  %4063 = vmatprep.subr.bf16.mxu0 %v5848_v3  ;;  %v7697_v2 = vld [vmem:[%s6319_s10 + $0xf0] sm:$0xff]  ;;  %v7700_v3 = vld [vmem:[%s6319_s10 + $0x78] sm:$0xff] }
 0x1a4   : > { %4106 = vmatprep.subr.bf16.mxu1 %v5851_v4  ;;  %v7703_v4 = vld [vmem:[%s6319_s10 + $0xf8] sm:$0xff]  ;;  %v4635_v41 = vcombine.high %v7690_v24, %v7697_v2  ;;  %s240_s10 = sand.u32 1, %s6076_s19  }
 0x1a5   : > { %v4637_v45 = vcombine.high %v7700_v3, %v7703_v4  ;;  %s241_s9 = scalar_lea.vmem [#allocation5], %s240_s10  ;;  %s4513_s14 = scalar_lea.sflag [#allocation6], %s240_s10 }
 0x1a6   : > { %4064 = vmatpush1.bf16.msra.mxu0 %v5846_v6  ;;  %v5918_v6 = vld [vmem:[%s8080_s1 + $0xe70] ss:$8 sps:$4 sm:$0xff]   ;;  %s4525_s29 = sshll.u32 %s241_s9, 4  ;;  %s4526_s29 = int_to_ptr.vmem [resolvable:$true] %s4525_s29 }
 0x1a7   : > { %4107 = vmatpush1.bf16.msra.mxu1 %v5849_v7  ;;  %4065 = vmatprep.subr.bf16.mxu0 %v5854_v8  ;;  %v5921_v7 = vld [vmem:[%s8080_s1 + $0xf70] ss:$8 sps:$4 sm:$0xff]   ;;  %s6016_s16 = scalar_lea.vmem %s4526_s29, 16  ;;  %p6023_p1 = scmp.lt.s32.totalorder %s4526_s29, %s6021_s17 }
 0x1a8   : > { %4108 = vmatprep.subr.bf16.mxu1 %v5857_v12  ;;  %p6017_p12 = scmp.ne.s32.totalorder %s4526_s29, %s6016_s16  ;;  %p6024_p2 = scmp.lt.s32.totalorder %s6022_s21, %s6016_s16 }
 0x1aa   : > { %4066 = vmatpush1.bf16.msra.mxu0 %v5852_v40  ;;  %p6018_p13 = pnand %p6017_p12, %p6167_p4  ;;  %p6025_p3 = por %p6024_p2, %p6023_p1 }
 0x1ab   : > { %4109 = vmatpush1.bf16.msra.mxu1 %v5855_v43  ;;  %4067 = vmatprep.subr.bf16.mxu0 %v5860_v44  ;;  %v5924_v43 = vld [vmem:[%s8080_s1 + $0xe60] ss:$8 sps:$4 sm:$0xff]  }
 0x1ac   : > { %4110 = vmatprep.subr.bf16.mxu1 %v5863_v47  ;;  %v5927_v44 = vld [vmem:[%s8080_s1 + $0xf60] ss:$8 sps:$4 sm:$0xff]   ;;  %p6019_p0 = pneg %p6018_p13 }
 0x1ae   : > { %4068 = vmatpush1.bf16.msra.mxu0 %v5858_v13  ;;  %p6026_p5 = pnand %p6025_p3, %p6019_p0 }
 0x1af   : > { %4111 = vmatpush1.bf16.msra.mxu1 %v5861_v14  ;;  %4069 = vmatprep.subr.bf16.mxu0 %v5866_v15  ;;  %v5932_v14 = vld [vmem:[%s8080_s1 + $0xe54] ss:$8 sps:$4 sm:$0xff]  }
 0x1b0   : > { %4112 = vmatprep.subr.bf16.mxu1 %v5869_v16 }
 0x1b2   : > { %4070 = vmatpush1.bf16.msra.mxu0 %v5864_v17 }
 0x1b3   : > { %4113 = vmatpush1.bf16.msra.mxu1 %v5867_v18  ;;  %4071 = vmatprep.subr.bf16.mxu0 %v5872_v19 }
 0x1b4   : > { %4114 = vmatprep.subr.bf16.mxu1 %v5875_v20  ;;  %v5930_v20 = vld [vmem:[%s8080_s1 + $0xe50] ss:$8 sps:$4 sm:$0xff]  }
 0x1b6   : > { %4072 = vmatpush2.bf16.msra.mxu0 %v5870_v21  ;;  %v5933_v21 = vld [vmem:[%s8080_s1 + $0xf50] ss:$8 sps:$4 sm:$0xff]  }
 0x1b7   : > { %4115 = vmatpush2.bf16.msra.mxu1 %v5873_v29  ;;  %4073 = vmatprep.subr.bf16.mxu0 %v5878_v60 }
 0x1b8   : > { %4116 = vmatprep.subr.bf16.mxu1 %v5881_v32  ;;  %v5941_v32 = vld [vmem:[%s8080_s1 + $0xf44] ss:$8 sps:$4 sm:$0xff]  }
 0x1ba   : > { %4074 = vmatpush2.bf16.msra.mxu0 %v5876_v33  ;;  %v5936_v33 = vld [vmem:[%s8080_s1 + $0xe40] ss:$8 sps:$4 sm:$0xff]  }
 0x1bb   : > { %4117 = vmatpush2.bf16.msra.mxu1 %v5879_v36  ;;  %4075 = vmatprep.subr.bf16.mxu0 %v5884_v25  ;;  %v5939_v36 = vld [vmem:[%s8080_s1 + $0xf40] ss:$8 sps:$4 sm:$0xff]   ;;  %v5944_v25 = vld [vmem:[%s8080_s1 + $0xe34] ss:$8 sps:$4 sm:$0xff]  }
 0x1bc   : > { %4118 = vmatprep.subr.bf16.mxu1 %v5887_v26  ;;  %v5947_v26 = vld [vmem:[%s8080_s1 + $0xf34] ss:$8 sps:$4 sm:$0xff]  }
 0x1be   : > { %4076 = vmatpush2.bf16.msra.mxu0 %v5882_v27  ;;  %v5942_v27 = vld [vmem:[%s8080_s1 + $0xe30] ss:$8 sps:$4 sm:$0xff]  }
 0x1bf   : > { %4119 = vmatpush2.bf16.msra.mxu1 %v5885_v38  ;;  %4077 = vmatprep.subr.bf16.mxu0 %v5890_v46  ;;  %v5945_v38 = vld [vmem:[%s8080_s1 + $0xf30] ss:$8 sps:$4 sm:$0xff]   ;;  %v5950_v46 = vld [vmem:[%s8080_s1 + $0xe24] ss:$8 sps:$4 sm:$0xff]  }
 0x1c0   : > { %4120 = vmatprep.subr.bf16.mxu1 %v5893_v48  ;;  %v5953_v48 = vld [vmem:[%s8080_s1 + $0xf24] ss:$8 sps:$4 sm:$0xff]  }
 0x1c2   : > { %4078 = vmatpush2.bf16.msra.mxu0 %v5888_v5  ;;  %v5948_v5 = vld [vmem:[%s8080_s1 + $0xe20] ss:$8 sps:$4 sm:$0xff]  }
 0x1c3   : > { %4121 = vmatpush2.bf16.msra.mxu1 %v5891_v9  ;;  %4079 = vmatprep.subr.bf16.mxu0 %v5896_v10  ;;  %v5951_v9 = vld [vmem:[%s8080_s1 + $0xf20] ss:$8 sps:$4 sm:$0xff]   ;;  %v5956_v10 = vld [vmem:[%s8080_s1 + $0xe14] ss:$8 sps:$4 sm:$0xff]  }
 0x1c4   : > { %4122 = vmatprep.subr.bf16.mxu1 %v5899_v11  ;;  %v5959_v11 = vld [vmem:[%s8080_s1 + $0xf14] ss:$8 sps:$4 sm:$0xff]  }
 0x1c6   : > { %4080 = vmatpush2.bf16.msra.mxu0 %v5894_v49  ;;  %v5954_v49 = vld [vmem:[%s8080_s1 + $0xe10] ss:$8 sps:$4 sm:$0xff]  }
 0x1c7   : > { %4123 = vmatpush2.bf16.msra.mxu1 %v5897_v50  ;;  %4081 = vmatprep.subr.bf16.mxu0 %v5902_v28  ;;  %v5957_v50 = vld [vmem:[%s8080_s1 + $0xf10] ss:$8 sps:$4 sm:$0xff]   ;;  %v5962_v28 = vld [vmem:[%s8080_s1 + $0xe04] ss:$8 sps:$4 sm:$0xff]  }
 0x1c8   : > { %4124 = vmatprep.subr.bf16.mxu1 %v5905_v30  ;;  %v5965_v30 = vld [vmem:[%s8080_s1 + $0xf04] ss:$8 sps:$4 sm:$0xff]  }
 0x1ca   : > { %4082 = vmatpush2.bf16.msra.mxu0 %v5900_v31  ;;  %v5960_v31 = vld [vmem:[%s8080_s1 + $0xe00] ss:$8 sps:$4 sm:$0xff]  }
 0x1cb   : > { %4125 = vmatpush2.bf16.msra.mxu1 %v5903_v34  ;;  %4083 = vmatprep.subr.bf16.mxu0 %v5908_v51  ;;  %v5963_v34 = vld [vmem:[%s8080_s1 + $0xf00] ss:$8 sps:$4 sm:$0xff]   ;;  %v5968_v51 = vld [vmem:[%s8080_s1 + $0xef4] ss:$8 sps:$4 sm:$0xff]  }
 0x1cc   : > { %4126 = vmatprep.subr.bf16.mxu1 %v5911_v52  ;;  %v5971_v52 = vld [vmem:[%s8080_s1 + $0xff4] ss:$8 sps:$4 sm:$0xff]  }
 0x1ce   : > { %4084 = vmatpush2.bf16.msra.mxu0 %v5906_v23  ;;  %v5966_v23 = vld [vmem:[%s8080_s1 + $0xef0] ss:$8 sps:$4 sm:$0xff]  }
 0x1cf   : > { %4127 = vmatpush2.bf16.msra.mxu1 %v5909_v54  ;;  %4085 = vmatprep.subr.bf16.mxu0 %v5914_v55  ;;  %v5969_v54 = vld [vmem:[%s8080_s1 + $0xff0] ss:$8 sps:$4 sm:$0xff]   ;;  %v5974_v55 = vld [vmem:[%s8080_s1 + $0xee4] ss:$8 sps:$4 sm:$0xff]  }
 0x1d0   : > { %4128 = vmatprep.subr.bf16.mxu1 %v5917_v56  ;;  %v5977_v56 = vld [vmem:[%s8080_s1 + $0xfe4] ss:$8 sps:$4 sm:$0xff]  }
 0x1d2   : > { %4086 = vmatpush2.bf16.msra.mxu0 %v5912_v58  ;;  %v5972_v58 = vld [vmem:[%s8080_s1 + $0xee0] ss:$8 sps:$4 sm:$0xff]  }
 0x1d3   : > { %4129 = vmatpush2.bf16.msra.mxu1 %v5915_v59  ;;  %4141 = vmatprep.subr.bf16.mxu0 %v5920_v61  ;;  %v5975_v59 = vld [vmem:[%s8080_s1 + $0xfe0] ss:$8 sps:$4 sm:$0xff]   ;;  %v5980_v61 = vld [vmem:[%s8080_s1 + $0xed4] ss:$8 sps:$4 sm:$0xff]  }
 0x1d4   : > { %4184 = vmatprep.subr.bf16.mxu1 %v5923_v62  ;;  %v5983_v62 = vld [vmem:[%s8080_s1 + $0xfd4] ss:$8 sps:$4 sm:$0xff]  }
 0x1d5   : > { %v3831_v8 = vpop.f32.mrf.mxu0  ;;  %4088 = vmatmul.mubr.bf16.vlgmr.msra.gmra.mxu0 %v4630_v63  ;;  %v5978_v63 = vld [vmem:[%s8080_s1 + $0xed0] ss:$8 sps:$4 sm:$0xff]  }
 0x1d6   : > { %v3874_v12 = vpop.f32.mrf.mxu1  ;;  %4131 = vmatmul.mubr.bf16.vlgmr.msra.gmra.mxu1 %v4632_v0  ;;  %v3832_v40 = vadd.f32 %v3831_v8, %v7516_v53  ;;  %4142 = vmatpush1.bf16.msra.mxu0 %v5918_v6  ;;  %v5935_v53 = vld [vmem:[%s8080_s1 + $0xf54] ss:$8 sps:$4 sm:$0xff]   ;;  %v5981_v0 = vld [vmem:[%s8080_s1 + $0xfd0] ss:$8 sps:$4 sm:$0xff]   ;;  %v5986_v6 = vld [vmem:[%s8080_s1 + $0xec4] ss:$8 sps:$4 sm:$0xff]  }
 0x1d7   : > { %4185 = vmatpush1.bf16.msra.mxu1 %v5921_v7  ;;  %v3833_v47 = vpop.f32.mrf.mxu0  ;;  %4143 = vmatprep.subr.bf16.mxu0 %v5926_v1  ;;  %v5989_v7 = vld [vmem:[%s8080_s1 + $0xfc4] ss:$8 sps:$4 sm:$0xff]   ;;  %v5984_v1 = vld [vmem:[%s8080_s1 + $0xec0] ss:$8 sps:$4 sm:$0xff]   ;;  %v5990_v8 = vld [vmem:[%s8080_s1 + $0xeb0] ss:$8 sps:$4 sm:$0xff]  }
 0x1d8   : > { %v3876_v13 = vpop.f32.mrf.mxu1  ;;  %4186 = vmatprep.subr.bf16.mxu1 %v5929_v39  ;;  %v7734_v15 = vadd.f32 %v3874_v12, %v3832_v40  ;;  %v3834_v16 = vadd.f32 %v3833_v47, %v7519_v57  ;;  %4173 = vmatprep.mubr.bf16.mxu0 %v4635_v41  ;;  %v5938_v57 = vld [vmem:[%s8080_s1 + $0xe44] ss:$8 sps:$4 sm:$0xff]   ;;  %v5987_v39 = vld [vmem:[%s8080_s1 + $0xfc0] ss:$8 sps:$4 sm:$0xff]   ;;  %v5992_v41 = vld [vmem:[%s8080_s1 + $0xeb4] ss:$8 sps:$4 sm:$0xff]  }
 0x1d9   : > { %4216 = vmatprep.mubr.bf16.mxu1 %v4637_v45  ;;  %v3835_v17 = vpop.f32.mrf.mxu0  ;;  %v5995_v45 = vld [vmem:[%s8080_s1 + $0xfb4] ss:$8 sps:$4 sm:$0xff]   ;;  %v5993_v12 = vld [vmem:[%s8080_s1 + $0xfb0] ss:$8 sps:$4 sm:$0xff]   ;;  %v5998_v40 = vld [vmem:[%s8080_s1 + $0xea4] ss:$8 sps:$4 sm:$0xff]  }
 0x1da   : > { %v3878_v18 = vpop.f32.mrf.mxu1  ;;  %v7737_v19 = vadd.f32 %v3876_v13, %v3834_v16  ;;  %4144 = vmatpush1.bf16.msra.mxu0 %v5924_v43  ;;  %v6001_v43 = vld [vmem:[%s8080_s1 + $0xfa4] ss:$8 sps:$4 sm:$0xff]   ;;  %v5999_v47 = vld [vmem:[%s8080_s1 + $0xfa0] ss:$8 sps:$4 sm:$0xff]   ;;  %v6004_v13 = vld [vmem:[%s8080_s1 + $0xe94] ss:$8 sps:$4 sm:$0xff]  }
 0x1db   : > { %4187 = vmatpush1.bf16.msra.mxu1 %v5927_v44  ;;  %v3837_v29 = vpop.f32.mrf.mxu0  ;;  %4145 = vmatprep.subr.bf16.mxu0 %v5932_v14  ;;  %v5996_v44 = vld [vmem:[%s8080_s1 + $0xea0] ss:$8 sps:$4 sm:$0xff]   ;;  %v6007_v14 = vld [vmem:[%s8080_s1 + $0xf94] ss:$8 sps:$4 sm:$0xff]   ;;  %v6005_v16 = vld [vmem:[%s8080_s1 + $0xf90] ss:$8 sps:$4 sm:$0xff]  }
 0x1dc   : > { %v3880_v60 = vpop.f32.mrf.mxu1  ;;  %4188 = vmatprep.subr.bf16.mxu1 %v5935_v53  ;;  %v6002_v53 = vld [vmem:[%s8080_s1 + $0xe90] ss:$8 sps:$4 sm:$0xff]   ;;  %v6010_v17 = vld [vmem:[%s8080_s1 + $0xe84] ss:$8 sps:$4 sm:$0xff]   ;;  %v4634_v29 = vcombine.low %v7690_v24, %v7697_v2 }
 0x1dd   : > { %v6013_v18 = vld [vmem:[%s8080_s1 + $0xf84] ss:$8 sps:$4 sm:$0xff]   ;;  %v4636_v60 = vcombine.low %v7700_v3, %v7703_v4 }
 0x1de   : > { %4146 = vmatpush1.bf16.msra.mxu0 %v5930_v20  ;;  %v6008_v20 = vld [vmem:[%s8080_s1 + $0xe80] ss:$8 sps:$4 sm:$0xff]  }
 0x1df   : > { %4189 = vmatpush1.bf16.msra.mxu1 %v5933_v21  ;;  %4147 = vmatprep.subr.bf16.mxu0 %v5938_v57  ;;  %v6011_v21 = vld [vmem:[%s8080_s1 + $0xf80] ss:$8 sps:$4 sm:$0xff]  }
 0x1e0   : > { %4190 = vmatprep.subr.bf16.mxu1 %v5941_v32 }
 0x1e2   : > { %4148 = vmatpush1.bf16.msra.mxu0 %v5936_v33 }
 0x1e3   : > { %4191 = vmatpush1.bf16.msra.mxu1 %v5939_v36  ;;  %4149 = vmatprep.subr.bf16.mxu0 %v5944_v25 }
 0x1e4   : > { %4192 = vmatprep.subr.bf16.mxu1 %v5947_v26 }
 0x1e6   : > { %4150 = vmatpush1.bf16.msra.mxu0 %v5942_v27 }
 0x1e7   : > { %4193 = vmatpush1.bf16.msra.mxu1 %v5945_v38  ;;  %4151 = vmatprep.subr.bf16.mxu0 %v5950_v46 }
 0x1e8   : > { %4194 = vmatprep.subr.bf16.mxu1 %v5953_v48 }
 0x1ea   : > { %4152 = vmatpush1.bf16.msra.mxu0 %v5948_v5 }
 0x1eb   : > { %4195 = vmatpush1.bf16.msra.mxu1 %v5951_v9  ;;  %4153 = vmatprep.subr.bf16.mxu0 %v5956_v10 }
 0x1ec   : > { %4196 = vmatprep.subr.bf16.mxu1 %v5959_v11 }
 0x1ee   : > { %4154 = vmatpush1.bf16.msra.mxu0 %v5954_v49 }
 0x1ef   : > { %4197 = vmatpush1.bf16.msra.mxu1 %v5957_v50  ;;  %4155 = vmatprep.subr.bf16.mxu0 %v5962_v28 }
 0x1f0   : > { %4198 = vmatprep.subr.bf16.mxu1 %v5965_v30 }
 0x1f2   : > { %4156 = vmatpush1.bf16.msra.mxu0 %v5960_v31 }
 0x1f3   : > { %4199 = vmatpush1.bf16.msra.mxu1 %v5963_v34  ;;  %4157 = vmatprep.subr.bf16.mxu0 %v5968_v51  ;;  %v6094_v34 = vmov 0.0   ;;  %v4438_v51 = vld [vmem:[%s8082_s3 + $0xf8] sm:$0xff] }
 0x1f4   : > { %4200 = vmatprep.subr.bf16.mxu1 %v5971_v52  ;;  %261 = vst.msk [vmem:[#allocation3] sm:$0x3] %vm7910_vm0, %v6094_v34  ;;  %262 = vst.msk [vmem:[#allocation4] sm:$0x3] %vm7910_vm0, %v6094_v34  ;;  %v4422_v52 = vld [vmem:[%s8082_s3 + $0x78] sm:$0xff] }
 0x1f6   : > { %4158 = vmatpush2.bf16.msra.mxu0 %v5966_v23  ;;  %v4421_v23 = vld [vmem:[%s8082_s3 + $0x70] sm:$0xff] }
 0x1f7   : > { %4201 = vmatpush2.bf16.msra.mxu1 %v5969_v54  ;;  %4159 = vmatprep.subr.bf16.mxu0 %v5974_v55  ;;  %v4436_v54 = vld [vmem:[%s8082_s3 + $0xe8] sm:$0xff] }
 0x1f8   : > { %4202 = vmatprep.subr.bf16.mxu1 %v5977_v56  ;;  %v4420_v55 = vld [vmem:[%s8082_s3 + $0x68] sm:$0xff]  ;;  %v4435_v56 = vld [vmem:[%s8082_s3 + $0xe0] sm:$0xff] }
 0x1fa   : > { %4160 = vmatpush2.bf16.msra.mxu0 %v5972_v58  ;;  %v4419_v58 = vld [vmem:[%s8082_s3 + $0x60] sm:$0xff] }
 0x1fb   : > { %4203 = vmatpush2.bf16.msra.mxu1 %v5975_v59  ;;  %4161 = vmatprep.subr.bf16.mxu0 %v5980_v61  ;;  %v4434_v59 = vld [vmem:[%s8082_s3 + $0xd8] sm:$0xff] }
 0x1fc   : > { %4204 = vmatprep.subr.bf16.mxu1 %v5983_v62  ;;  %v4418_v61 = vld [vmem:[%s8082_s3 + $0x58] sm:$0xff]  ;;  %v4433_v62 = vld [vmem:[%s8082_s3 + $0xd0] sm:$0xff] }
 0x1fe   : > { %4162 = vmatpush2.bf16.msra.mxu0 %v5978_v63  ;;  %v4417_v63 = vld [vmem:[%s8082_s3 + $0x50] sm:$0xff] }
 0x1ff   : > { %4205 = vmatpush2.bf16.msra.mxu1 %v5981_v0  ;;  %4163 = vmatprep.subr.bf16.mxu0 %v5986_v6  ;;  %v4432_v0 = vld [vmem:[%s8082_s3 + $0xc8] sm:$0xff] }
 0x200   : > { %4206 = vmatprep.subr.bf16.mxu1 %v5989_v7  ;;  %v4416_v6 = vld [vmem:[%s8082_s3 + $0x48] sm:$0xff]  ;;  %v4431_v7 = vld [vmem:[%s8082_s3 + $0xc0] sm:$0xff] }
 0x202   : > { %4164 = vmatpush2.bf16.msra.mxu0 %v5984_v1 }
 0x203   : > { %4207 = vmatpush2.bf16.msra.mxu1 %v5987_v39  ;;  %4165 = vmatprep.subr.bf16.mxu0 %v5992_v41  ;;  %v4415_v41 = vld [vmem:[%s8082_s3 + $0x40] sm:$0xff] }
 0x204   : > { %4208 = vmatprep.subr.bf16.mxu1 %v5995_v45 }
 0x206   : > { %4166 = vmatpush2.bf16.msra.mxu0 %v5990_v8  ;;  %v4430_v8 = vld [vmem:[%s8082_s3 + $0xb8] sm:$0xff] }
 0x207   : > { %4209 = vmatpush2.bf16.msra.mxu1 %v5993_v12  ;;  %4167 = vmatprep.subr.bf16.mxu0 %v5998_v40 }
 0x208   : > { %4210 = vmatprep.subr.bf16.mxu1 %v6001_v43  ;;  %v4414_v43 = vld [vmem:[%s8082_s3 + $0x38] sm:$0xff] }
 0x20a   : > { %4168 = vmatpush2.bf16.msra.mxu0 %v5996_v44 }
 0x20b   : > { %4211 = vmatpush2.bf16.msra.mxu1 %v5999_v47  ;;  %4169 = vmatprep.subr.bf16.mxu0 %v6004_v13  ;;  %v4429_v47 = vld [vmem:[%s8082_s3 + $0xb0] sm:$0xff] }
 0x20c   : > { %4212 = vmatprep.subr.bf16.mxu1 %v6007_v14 }
 0x20e   : > { %4170 = vmatpush2.bf16.msra.mxu0 %v6002_v53  ;;  %v4413_v53 = vld [vmem:[%s8082_s3 + $0x30] sm:$0xff] }
 0x20f   : > { %4213 = vmatpush2.bf16.msra.mxu1 %v6005_v16  ;;  %4171 = vmatprep.subr.bf16.mxu0 %v6010_v17  ;;  %v4428_v16 = vld [vmem:[%s8082_s3 + $0xa8] sm:$0xff] }
 0x210   : > { %4214 = vmatprep.subr.bf16.mxu1 %v6013_v18  ;;  %v4412_v17 = vld [vmem:[%s8082_s3 + $0x28] sm:$0xff]  ;;  %v4427_v18 = vld [vmem:[%s8082_s3 + $0xa0] sm:$0xff] }
 0x212   : > { %4172 = vmatpush2.bf16.msra.mxu0 %v6008_v20 }
 0x213   : > { %4215 = vmatpush2.bf16.msra.mxu1 %v6011_v21  ;;  %5154 = vmatprep.subr.mxu0 %v4438_v51 }
 0x215   : > { %v3917_v57 = vpop.f32.mrf.mxu0  ;;  %4174 = vmatmul.mubr.bf16.vlgmr.msra.gmra.mxu0 %v4634_v29  ;;  %v4411_v29 = vld [vmem:[%s8082_s3 + $0x20] sm:$0xff] }
 0x216   : > { %v3960_v32 = vpop.f32.mrf.mxu1  ;;  %4217 = vmatmul.mubr.bf16.vlgmr.msra.gmra.mxu1 %v4636_v60  ;;  %v3918_v33 = vadd.f32 %v3917_v57, %v7734_v15  ;;  %5155 = vmatpush3.msra.mxu0 %v4422_v52  ;;  %v4426_v60 = vld [vmem:[%s8082_s3 + $0x98] sm:$0xff] }
 0x217   : > { %v3919_v36 = vpop.f32.mrf.mxu0  ;;  %5156 = vmatprep.subr.mxu0 %v4437_v22  ;;  %v4410_v57 = vld [vmem:[%s8082_s3 + $0x18] sm:$0xff] }
 0x218   : > { %v3962_v25 = vpop.f32.mrf.mxu1  ;;  %v3961_v26 = vadd.f32 %v3960_v32, %v3918_v33  ;;  %v3920_v27 = vadd.f32 %v3919_v36, %v7737_v19  ;;  %5157 = vmatpush3.msra.mxu0 %v4421_v23  ;;  %v4425_v32 = vld [vmem:[%s8082_s3 + $0x90] sm:$0xff]  ;;  %v4424_v36 = vld [vmem:[%s8082_s3 + $0x88] sm:$0xff] }
 0x219   : > { %v3921_v38 = vpop.f32.mrf.mxu0  ;;  %5158 = vmatprep.subr.mxu0 %v4436_v54  ;;  %v4409_v33 = vld [vmem:[%s8082_s3 + $0x10] sm:$0xff]  ;;  %v6095_v54 = vmov 1966171168  }
 0x21a   : > { %v3964_v46 = vpop.f32.mrf.mxu1  ;;  %v3963_v48 = vadd.f32 %v3962_v25, %v3920_v27  ;;  %5159 = vmatpush3.msra.mxu0 %v4420_v55  ;;  %v4408_v25 = vld [vmem:[%s8082_s3 + $0x8] sm:$0xff]  ;;  %v4407_v27 = vld [vmem:[%s8082_s3] sm:$0xff]  ;;  %v4263_v55 = vunpack.c.l.s4 %v6095_v54 }
 0x21b   : > { %v3923_v24 = vpop.f32.mrf.mxu0  ;;  %5160 = vmatprep.subr.mxu0 %v4435_v56 }
 0x21c   : > { %v3966_v2 = vpop.f32.mrf.mxu1  ;;  %5161 = vmatpush3.msra.mxu0 %v4419_v58 }
 0x21d   : > { %5162 = vmatprep.subr.mxu0 %v4434_v59 }
 0x21e   : > { %5163 = vmatpush3.msra.mxu0 %v4418_v61 }
 0x21f   : > { %5164 = vmatprep.subr.mxu0 %v4433_v62 }
 0x220   : > { %5165 = vmatpush3.msra.mxu0 %v4417_v63 }
 0x221   : > { %5166 = vmatprep.subr.mxu0 %v4432_v0 }
 0x222   : > { %5167 = vmatpush3.msra.mxu0 %v4416_v6 }
 0x223   : > { %5168 = vmatprep.subr.mxu0 %v4431_v7  ;;  %v4264_v7 = vunpack.c.0.s8 %v4263_v55 }
 0x224   : > { %5169 = vmatpush3.msra.mxu0 %v4415_v41 }
 0x225   : > { %5170 = vmatprep.subr.mxu0 %v4430_v8 }
 0x226   : > { %5171 = vmatpush3.msra.mxu0 %v4414_v43 }
 0x227   : > { %5172 = vmatprep.subr.mxu0 %v4429_v47  ;;  %v4267_v47 = vsub.s32 %v4264_v7, %v7006_v35 }
 0x228   : > { %5173 = vmatpush3.msra.mxu0 %v4413_v53 }
 0x229   : > { %5174 = vmatprep.subr.mxu0 %v4428_v16 }
 0x22a   : > { %5175 = vmatpush3.msra.mxu0 %v4412_v17 }
 0x22b   : > { %5176 = vmatprep.subr.mxu0 %v4427_v18 }
 0x22c   : > { %5177 = vmatpush3.msra.mxu0 %v4411_v29 }
 0x22d   : > { %5178 = vmatprep.subr.mxu0 %v4426_v60  ;;  %v4283_v60 = vld [vmem:[#allocation4] sm:$0x3] }
 0x22e   : > { %5179 = vmatpush3.msra.mxu0 %v4410_v57 }
 0x22f   : > { %5180 = vmatprep.subr.mxu0 %v4425_v32 }
 0x230   : > { %5181 = vmatpush3.msra.mxu0 %v4409_v33 }
 0x231   : > { %5182 = vmatprep.subr.mxu0 %v4424_v36 }
 0x232   : > { %5183 = vmatpush3.msra.mxu0 %v4408_v25 }
 0x255   : > { %v4003_v5 = vpop.f32.mrf.mxu0 }
 0x256   : > { %v4046_v3 = vpop.f32.mrf.mxu1  ;;  %v4004_v4 = vadd.f32 %v4003_v5, %v3961_v26  ;;  %v4423_v26 = vld [vmem:[%s8082_s3 + $0x80] sm:$0xff] }
 0x257   : > { %v4005_v9 = vpop.f32.mrf.mxu0  ;;  %5184 = vmatprep.subr.mxu0 %v4423_v26 }
 0x258   : > { %v4048_v10 = vpop.f32.mrf.mxu1  ;;  %v4047_v11 = vadd.f32 %v4046_v3, %v4004_v4  ;;  %v4006_v49 = vadd.f32 %v4005_v9, %v3963_v48  ;;  %5185 = vmatpush3.msra.mxu0 %v4407_v27 }
 0x259   : > { %v4007_v50 = vpop.f32.mrf.mxu0 }
 0x25a   : > { %v4050_v28 = vpop.f32.mrf.mxu1  ;;  %v7907_v15 = vadd.f32 %v4048_v10, %v4006_v49 }
 0x25b   : > { %v4009_v30 = vpop.f32.mrf.mxu0 }
 0x25c   : > { %v4052_v31 = vpop.f32.mrf.mxu1 }
 0x295   : > { %v4089_v1 = vpop.f32.mrf.mxu0 }
 0x296   : > { %v4132_v39 = vpop.f32.mrf.mxu1  ;;  %v4090_v45 = vadd.f32 %v4089_v1, %v4047_v11 }
 0x297   : > { %v4091_v12 = vpop.f32.mrf.mxu0 }
 0x298   : > { %v4134_v40 = vpop.f32.mrf.mxu1  ;;  %v4133_v44 = vadd.f32 %v4132_v39, %v4090_v45  ;;  %v4092_v38 = vadd.f32 %v4091_v12, %v7907_v15 }
 0x299   : > { %v4093_v13 = vpop.f32.mrf.mxu0 }
 0x29a   : > { %v4136_v14 = vpop.f32.mrf.mxu1  ;;  %v4135_v24 = vadd.f32 %v4134_v40, %v4092_v38 }
 0x29b   : > { %v4095_v20 = vpop.f32.mrf.mxu0 }
 0x29c   : > { %v4138_v21 = vpop.f32.mrf.mxu1  ;;  %v4244_v20 = vld [vmem:[#allocation3] sm:$0x3] }
 0x2d5   : > { %v4175_v46 = vpop.f32.mrf.mxu0 }
 0x2d6   : > { %v4218_v48 = vpop.f32.mrf.mxu1  ;;  %v4176_v2 = vadd.f32 %v4175_v46, %v4133_v44 }
 0x2d7   : > { %v4177_v5 = vpop.f32.mrf.mxu0 }
 0x2d8   : > { %v4220_v3 = vpop.f32.mrf.mxu1  ;;  %v8016_v4 = vadd.f32 %v4218_v48, %v4176_v2  ;;  %v4178_v9 = vadd.f32 %v4177_v5, %v4135_v24 }
 0x2d9   : > { %v4179_v10 = vpop.f32.mrf.mxu0 }
 0x2da   : > { %v4222_v11 = vpop.f32.mrf.mxu1  ;;  %v4240_v49 = vsel %vm4234_vm1, %v8016_v4, 0.0  ;;  %v4221_v50 = vadd.f32 %v4220_v3, %v4178_v9 }
 0x2db   : > { %v4246_v28 = vrot.slane %v4240_v49, 4  ;;  %v4284_v15 = vmul.f32 %v4240_v49, %v4240_v49  ;;  %v4181_v30 = vpop.f32.mrf.mxu0 }
 0x2dc   : > { %v4224_v31 = vpop.f32.mrf.mxu1  ;;  %v4241_v34 = vsel %vm4234_vm1, %v4221_v50, 0.0 }
 0x2dd   : > { %v4247_v51 = vadd.f32 %v4246_v28, %v4240_v49  ;;  %v4289_v52 = vrot.slane %v4284_v15, 4  ;;  %v4253_v22 = vrot.slane %v4241_v34, 4  ;;  %v4285_v23 = vmul.f32 %v4241_v34, %v4241_v34 }
 0x2df   : > { %v4248_v56 = vrot.slane %v4247_v51, 2  ;;  %v4290_v58 = vadd.f32 %v4289_v52, %v4284_v15  ;;  %v4254_v59 = vadd.f32 %v4253_v22, %v4241_v34  ;;  %v4296_v61 = vrot.slane %v4285_v23, 4 }
 0x2e1   : > { %v4249_v62 = vadd.f32 %v4248_v56, %v4247_v51  ;;  %v4291_v63 = vrot.slane %v4290_v58, 2  ;;  %v4255_v0 = vrot.slane %v4254_v59, 2  ;;  %v4297_v6 = vadd.f32 %v4296_v61, %v4285_v23 }
 0x2e3   : > { %v4250_v1 = vrot.slane %v4249_v62, 1  ;;  %v4292_v39 = vadd.f32 %v4291_v63, %v4290_v58  ;;  %v4256_v41 = vadd.f32 %v4255_v0, %v4254_v59  ;;  %v4298_v45 = vrot.slane %v4297_v6, 2 }
 0x2e5   : > { %v4293_v8 = vrot.slane %v4292_v39, 1  ;;  %v4257_v12 = vrot.slane %v4256_v41, 1  ;;  %v4299_v40 = vadd.f32 %v4298_v45, %v4297_v6  ;;  %v4251_v43 = vadd.f32 %v4250_v1, %v4249_v62  ;;  %v4439_v62 = vld [vmem:[%s8083_s4] sm:$0x1] }
 0x2e7   : > { %v4258_v44 = vadd.f32 %v4257_v12, %v4256_v41  ;;  %v4300_v13 = vrot.slane %v4299_v40, 1  ;;  %v4294_v14 = vadd.f32 %v4293_v8, %v4292_v39 }
 0x2e9   : > { %v4261_v53 = vcombine.low %v4251_v43, %v4258_v44  ;;  %v4301_v16 = vadd.f32 %v4300_v13, %v4299_v40 }
 0x2eb   : > { %v4268_v17 = vrot.slane %v4261_v53, %v4267_v47  ;;  %v4304_v18 = vcombine.low %v4294_v14, %v4301_v16 }
 0x2ed   : > { %v4275_v21 = vrot.slane %v4268_v17, %v4267_v47  ;;  %v4311_v29 = vrot.slane %v4304_v18, %v4267_v47 }
 0x2ef   : > { %v4277_v57 = vadd.f32 %v4275_v21, %v4244_v20  ;;  %v4318_v32 = vrot.slane %v4311_v29, %v4267_v47 }
 0x2f1   : > { %4282 = vst.msk [vmem:[#allocation3] sm:$0x3] %vm7910_vm0, %v4277_v57  ;;  %v4320_v33 = vadd.f32 %v4318_v32, %v4283_v60 }
 0x2f3   : > { %4321 = vst.msk [vmem:[#allocation4] sm:$0x3] %vm7910_vm0, %v4320_v33 }
 0x2f8   : > { %v4334_v36 = vld [vmem:[#allocation3] sm:$0x3] }
 0x2f9   : > { %v4335_v25 = vmul.f32 0.25, %v4334_v36 }
 0x2fa   : > { %v4336_v26 = vld [vmem:[#allocation4] sm:$0x3] }
 0x2fb   : > { %v4337_v27 = vmul.f32 0.25, %v4336_v26  ;;  %v4338_v38 = vmul.f32 %v4335_v25, %v4335_v25  ;;  %v4351_v2 = vrot.slane %v4335_v25, %v7024_v37  ;;  %v4355_v5 = vrot.slane %v4335_v25, %v7039_v42 }
 0x2fd   : > { %v4339_v46 = vsub.f32 %v4337_v27, %v4338_v38  ;;  %v4358_v9 = vsub.f32 %v8016_v4, %v4351_v2  ;;  %v4359_v10 = vsub.f32 %v4221_v50, %v4355_v5 }
 0x2ff   : > { %v4340_v48 = vmax.f32 %v4339_v46, 0.0 }
 0x301   : > { %v4341_v24 = vadd.f32 1e-05, %v4340_v48 }
 0x303   : > { %6014 = vrsqrt.f32 %v4341_v24 }
 0x310   : > { %v6015_v3 = vpop.eup %6014 }
 0x311   : > { %v4370_v19 = vrot.slane %v6015_v3, %v7039_v42  ;;  %v4366_v11 = vrot.slane %v6015_v3, %v7024_v37 }
 0x313   : > { %v4374_v49 = vmul.f32 %v4370_v19, %v4359_v10  ;;  %v4373_v28 = vmul.f32 %v4366_v11, %v4358_v9 }
 0x315   : > { %v4378_v15 = vmax.f32 %v4374_v49, 0.0  ;;  %v4377_v30 = vmax.f32 %v4373_v28, 0.0 }
 0x317   : > { %v4388_v31 = vsel %vm4234_vm1, %v4378_v15, 0.0  ;;  %v4387_v34 = vsel %vm4234_vm1, %v4377_v30, 0.0 }
 0x318   : > { %v4399_v51 = vrot.slane %v4388_v31, 4  ;;  %v4392_v52 = vrot.slane %v4387_v34, 4 }
 0x31a   : > { %v4400_v22 = vadd.f32 %v4399_v51, %v4388_v31  ;;  %v4393_v4 = vadd.f32 %v4392_v52, %v4387_v34 }
 0x31c   : > { %v4401_v50 = vrot.slane %v4400_v22, 2  ;;  %v4394_v42 = vrot.slane %v4393_v4, 2 }
 0x31e   : > { %v4402_v23 = vadd.f32 %v4401_v50, %v4400_v22  ;;  %v4395_v37 = vadd.f32 %v4394_v42, %v4393_v4 }
 0x320   : > { %v4403_v54 = vrot.slane %v4402_v23, 1  ;;  %v4396_v55 = vrot.slane %v4395_v37, 1 }
 0x322   : > { %v4404_v56 = vadd.f32 %v4403_v54, %v4402_v23  ;;  %v4397_v58 = vadd.f32 %v4396_v55, %v4395_v37 }
 0x324   : > { %v4406_v59 = vmul.f32 0.25, %v4404_v56  ;;  %v4405_v61 = vmul.f32 0.25, %v4397_v58 }
 0x326   : > { %4504 = vmatprep.mubr.f32.mxu0 %v4406_v59 }
 0x327   : > { %4505 = vmatmul.mubr.f32.vlgmr.msra.gmra.mxu0 %v4405_v61 }
 0x3e7   : > { %v5186_v35 = vpop.f32.mrf.mxu0 }
 0x3e9   : > { %v5187_v63 = vpop.f32.mrf.mxu0 }
 0x3ea   : > { %v5188_v0 = vadd.f32 %v5187_v63, %v5186_v35 }
 0x3ec   : > { %v4507_v6 = vadd.f32 %v5188_v0, %v4439_v62 }
 0x3ee   : > { %4511 = vst.msk [vmem:[%s241_s9] sm:$0x1] %vm4510_vm2, %v4507_v6 }
 0x3ef   : > { %6029 = shalt.err (!%p6026_p5)
}
 0x3f0   : > { %s6030_s24 = scalar_lea.hbm %s4523_s13, 16  ;;  %s6034_s27 = scalar_lea.hbm %s8084_s5, 32 }
 0x3f1   : > { %p6031_p6 = scmp.ne.s32.totalorder %s4523_s13, %s6030_s24  ;;  %p6035_p10 = scmp.lt.s32.totalorder %s4523_s13, %s8084_s5 }
 0x3f2   : > { %p6036_p11 = scmp.lt.s32.totalorder %s6034_s27, %s6030_s24 }
 0x3f3   : > { %p6032_p7 = pnand %p6031_p6, %p6167_p4 }
 0x3f4   : > { %p6037_p12 = por %p6036_p11, %p6035_p10 }
 0x3f5   : > { %p6033_p9 = pneg %p6032_p7 }
 0x3f7   : > { %p6038_p13 = pnand %p6037_p12, %p6033_p9 }
 0x3f9   : > { %6041 = shalt.err (!%p6038_p13)
}
 0x3fa   : > { %5189 = dma.vmem_to_hbm [thread:$0]  (%p6167_p4), %s4526_s29, 16, %s4523_s13, %s4513_s14  }
 0x3fb PF: > { %p5195_p0 = scmp.ge.s32.totalorder %s6092_s23, 2  ;;  %s4537_s9 = sand.u32 1, %s6072_s18  }
 0x3fc   : > { %s4538_s11 = scalar_lea.sflag [#allocation6], %s4537_s9 }
 0x3fd   : > { %p5192_p1 = pnand %p5195_p0, %p6174_p8 }
 0x3ff   : > { %p5193_p2 = pneg %p5192_p1 }
 0x401   : > { %6067 = dma.done.wait (%p5193_p2), %s4538_s11, 16  }
 0x402   : > { %6069 = vsyncadd (%p5193_p2), %s4538_s11, 4294967280  ;;  %s18_s23 = sadd.s32 1, %s6092_s23   ;;  %s8089_s18 = smov %s6076_s19 }
 0x403   : > { %p15_p3 = scmp.ge.s32.totalorder %s18_s23, 4   ;;  %s8090_s19 = smov %s6080_s20 }
 0x404   : > { %s8091_s20 = smov %s6180_s6  ;;  %s8092_s21 = smov %s6088_s22 }
 0x405   : > { %s8093_s22 = smov %s8095_s26  ;;  %17 = sbr.rel (!%p15_p3) target bundleno = 4 (0x4), region = 84 }
 0x40a   :  { %4542 = vsyncpa [#allocation6], 1 }
 0x40b   :  { %4544 = vsyncpa [#allocation6 + $0x1], 1 }

</bundles_post_ra>
